<compile_context>
chip_gen: v7x
topology: tpu7x:2x2x1
jax: 0.10.0
libtpu: 0.0.40
codegen_flags: <defaults>
</compile_context>

<pallas_src>
import functools

import jax
import jax.numpy as jnp
from jax import lax
from jax.experimental import pallas as pl
from jax.experimental.pallas import tpu as pltpu

EPS = 1e-5          # nn.BatchNorm2d default eps
LANES = 128         # TPU lane width: pad channels to a multiple of this


def _round_up(v, m):
    return (v + m - 1) // m * m


# ----------------------------------------------------------------------------- kernels
def _emit_conv_stats(y, y_ref, st_ref, ho, wo):
    """Store conv output (f32) and per-block BN partials (sum, centered M2)."""
    m = ho * wo
    s = jnp.sum(y, axis=0, keepdims=True)                      # (1, Cp)
    mu = s * (1.0 / m)
    m2 = jnp.sum(jnp.square(y - mu), axis=0, keepdims=True)    # (1, Cp)
    y_ref[...] = y.reshape(ho, wo, y.shape[-1])
    st_ref[...] = jnp.concatenate([s, m2], axis=0)             # (2, Cp)


def _conv_stats_kernel(*refs, taps, ho, wo, use_proj):
    """conv3x3 (in-kernel im2col, single 9*Cin contraction) + BN partial stats.

    Optionally also the 1x1 stride-s projection conv (reuses the center tap).
    """
    if use_proj:
        x_ref, w_ref, w3_ref, y_ref, st_ref, yp_ref, stp_ref = refs
    else:
        x_ref, w_ref, y_ref, st_ref = refs

    # 9 shifted views of the (spatially pre-padded / parity-repacked) image.
    pats = [x_ref[bh:bh + ho, bw:bw + wo, :] for (bh, bw) in taps]
    p = jnp.concatenate(pats, axis=-1).reshape(ho * wo, -1)     # (M, 9*Cpi) bf16
    y = jnp.dot(p, w_ref[...], preferred_element_type=jnp.float32)
    _emit_conv_stats(y, y_ref, st_ref, ho, wo)

    if use_proj:
        # 1x1 stride-s conv == matmul on the center tap's patch.
        pc = pats[4].reshape(ho * wo, -1)                       # (M, Cpi)
        yp = jnp.dot(pc, w3_ref[...], preferred_element_type=jnp.float32)
        _emit_conv_stats(yp, yp_ref, stp_ref, ho, wo)


def _bn_relu_conv_stats_kernel(y1_ref, s1_ref, b1_ref, w2_ref,
                               y2_ref, st_ref, hp_ref, *, ho, wo, mm_dtype):
    """BN1(affine)+ReLU -> zero-pad in VMEM scratch -> conv3x3 -> BN2 partials."""
    h = jnp.maximum(y1_ref[...] * s1_ref[...] + b1_ref[...], 0.0)   # f32 epilogue
    hp_ref[...] = jnp.zeros_like(hp_ref)                            # halo border
    hp_ref[1:ho + 1, 1:wo + 1, :] = h.astype(mm_dtype)

    pats = [hp_ref[kh:kh + ho, kw:kw + wo, :] for kh in range(3) for kw in range(3)]
    p = jnp.concatenate(pats, axis=-1).reshape(ho * wo, -1)         # (M, 9*Cpo)
    y2 = jnp.dot(p, w2_ref[...], preferred_element_type=jnp.float32)
    _emit_conv_stats(y2, y2_ref, st_ref, ho, wo)


def _bn_add_relu_kernel(*refs, use_proj):
    """BN2(affine) + residual (identity or BN3(proj)) + ReLU."""
    if use_proj:
        y2_ref, yp_ref, s2_ref, b2_ref, sp_ref, bp_ref, o_ref = refs
        res = yp_ref[...] * sp_ref[...] + bp_ref[...]
    else:
        y2_ref, r_ref, s2_ref, b2_ref, o_ref = refs
        res = r_ref[...]
    o_ref[...] = jnp.maximum(y2_ref[...] * s2_ref[...] + b2_ref[...] + res, 0.0)


# ----------------------------------------------------------------------------- helpers
def _pack_w3x3(w_oihw, cpi, cpo):
    """(Cout, Cin, 3, 3) torch layout -> (9*Cpi, Cpo), channel-padded."""
    co, ci = int(w_oihw.shape[0]), int(w_oihw.shape[1])
    wt = jnp.transpose(w_oihw, (2, 3, 1, 0))                  # (3,3,Cin,Cout)
    wt = jnp.pad(wt, ((0, 0), (0, 0), (0, cpi - ci), (0, cpo - co)))
    return wt.reshape(9 * cpi, cpo)


def _pack_w1x1(w_oihw, cpi, cpo):
    co, ci = int(w_oihw.shape[0]), int(w_oihw.shape[1])
    w = jnp.transpose(w_oihw[:, :, 0, 0], (1, 0))             # (Cin, Cout)
    return jnp.pad(w, ((0, cpi - ci), (0, cpo - co)))


def _stats_to_affine(stats, m_blk, gamma, beta, cpo):
    """Combine per-block (sum, centered M2) via Chan's formula -> BN affine."""
    sums, m2s = stats[:, 0, :], stats[:, 1, :]                # (N, Cp)
    total = stats.shape[0] * m_blk
    mean = jnp.sum(sums, axis=0) / total
    bmean = sums / m_blk
    var = (jnp.sum(m2s, axis=0)
           + m_blk * jnp.sum(jnp.square(bmean - mean), axis=0)) / total
    g = jnp.pad(gamma.astype(jnp.float32), (0, cpo - gamma.shape[0]))
    b = jnp.pad(beta.astype(jnp.float32), (0, cpo - beta.shape[0]))
    scale = g * lax.rsqrt(var + EPS)
    shift = b - mean * scale
    return scale.reshape(1, cpo), shift.reshape(1, cpo)


# ----------------------------------------------------------------------------- wrapper
@functools.partial(jax.jit, static_argnames=("same_shape", "mm_dtype"))
def residual_block_forward(x_nchw, params, same_shape=True, mm_dtype=jnp.bfloat16):
    stride = 1 if same_shape else 2
    n, cin, h, w = x_nchw.shape
    cout = params["w1"].shape[0]
    if same_shape:
        assert cin == cout, "identity residual requires Cin == Cout (as in torch)"
    cpi, cpo = _round_up(cin, LANES), _round_up(cout, LANES)
    ho, wo = (h - 1) // stride + 1, (w - 1) // stride + 1
    m_blk = ho * wo

    x = jnp.transpose(x_nchw, (0, 2, 3, 1)).astype(jnp.float32)          # NHWC
    x_cp = jnp.pad(x, ((0, 0), (0, 0), (0, 0), (0, cpi - cin)))          # lane pad

    if stride == 1:
        # spatial pad=1; tap (kh,kw) is the plain slice starting at (kh,kw).
        x_in = jnp.pad(x_cp, ((0, 0), (1, 1), (1, 1), (0, 0))).astype(mm_dtype)
        taps1 = [(kh, kw) for kh in range(3) for kw in range(3)]
        hin, win = h + 2, w + 2
    else:
        # stride 2: space-to-depth parity repack so every tap is a plain slice
        # (no strided in-kernel access, no im2col expansion).
        hh, wh = ho + 1, wo + 1
        x_sp = jnp.pad(x_cp, ((0, 0), (1, 2 * hh - h - 1),
                              (1, 2 * wh - w - 1), (0, 0)))
        x_in = (x_sp.reshape(n, hh, 2, wh, 2, cpi)
                    .transpose(0, 2, 4, 1, 3, 5)
                    .reshape(n, 4 * hh, wh, cpi)
                    .astype(mm_dtype))
        taps1 = [(((kh % 2) * 2 + (kw % 2)) * hh + kh // 2, kw // 2)
                 for kh in range(3) for kw in range(3)]
        hin, win = 4 * hh, wh

    w1p = _pack_w3x3(params["w1"], cpi, cpo).astype(mm_dtype)
    w2p = _pack_w3x3(params["w2"], cpo, cpo).astype(mm_dtype)

    cparams = pltpu.CompilerParams(
        dimension_semantics=("parallel",),          # megacore-shardable on v7x
        vmem_limit_bytes=48 * 1024 * 1024,          # safe on v5e/v6e/v7x (64 MiB phys)
    )

    # Per-image blocks (leading batch dim squeezed); weights/affines broadcast.
    x_spec = pl.BlockSpec((None, hin, win, cpi), lambda i: (i, 0, 0, 0))
    y_spec = pl.BlockSpec((None, ho, wo, cpo), lambda i: (i, 0, 0, 0))
    st_spec = pl.BlockSpec((None, 2, cpo), lambda i: (i, 0, 0))
    vec_spec = pl.BlockSpec((1, cpo), lambda i: (0, 0))
    w1_spec = pl.BlockSpec((9 * cpi, cpo), lambda i: (0, 0))
    w2_spec = pl.BlockSpec((9 * cpo, cpo), lambda i: (0, 0))

    y_shape = jax.ShapeDtypeStruct((n, ho, wo, cpo), jnp.float32)
    st_shape = jax.ShapeDtypeStruct((n, 2, cpo), jnp.float32)

    # ---- pass A: conv1 (+ 1x1 projection) and per-image BN partials ----
    if same_shape:
        y1, st1 = pl.pallas_call(
            functools.partial(_conv_stats_kernel, taps=taps1, ho=ho, wo=wo,
                              use_proj=False),
            grid=(n,),
            in_specs=[x_spec, w1_spec],
            out_specs=(y_spec, st_spec),
            out_shape=(y_shape, st_shape),
            compiler_params=cparams,
        )(x_in, w1p)
    else:
        w3p = _pack_w1x1(params["w3"], cpi, cpo).astype(mm_dtype)
        w3_spec = pl.BlockSpec((cpi, cpo), lambda i: (0, 0))
        y1, st1, yp, stp = pl.pallas_call(
            functools.partial(_conv_stats_kernel, taps=taps1, ho=ho, wo=wo,
                              use_proj=True),
            grid=(n,),
            in_specs=[x_spec, w1_spec, w3_spec],
            out_specs=(y_spec, st_spec, y_spec, st_spec),
            out_shape=(y_shape, st_shape, y_shape, st_shape),
            compiler_params=cparams,
        )(x_in, w1p, w3p)

    s1, b1 = _stats_to_affine(st1, m_blk, params["g1"], params["b1"], cpo)

    # ---- pass B: bn1 + relu + conv2 (fused, h1 never hits HBM) + BN partials ----
    y2, st2 = pl.pallas_call(
        functools.partial(_bn_relu_conv_stats_kernel, ho=ho, wo=wo,
                          mm_dtype=mm_dtype),
        grid=(n,),
        in_specs=[y_spec, vec_spec, vec_spec, w2_spec],
        out_specs=(y_spec, st_spec),
        out_shape=(y_shape, st_shape),
        scratch_shapes=[pltpu.VMEM((ho + 2, wo + 2, cpo), mm_dtype)],
        compiler_params=cparams,
    )(y1, s1, b1, w2p)

    s2, b2 = _stats_to_affine(st2, m_blk, params["g2"], params["b2"], cpo)

    # ---- pass C: bn2 + residual add + relu ----
    if same_shape:
        res_spec = pl.BlockSpec((None, h, w, cpi), lambda i: (i, 0, 0, 0))
        out = pl.pallas_call(
            functools.partial(_bn_add_relu_kernel, use_proj=False),
            grid=(n,),
            in_specs=[y_spec, res_spec, vec_spec, vec_spec],
            out_specs=y_spec,
            out_shape=y_shape,
            compiler_params=cparams,
        )(y2, x_cp, s2, b2)
    else:
        sp, bp = _stats_to_affine(stp, m_blk, params["g3"], params["b3"], cpo)
        out = pl.pallas_call(
            functools.partial(_bn_add_relu_kernel, use_proj=True),
            grid=(n,),
            in_specs=[y_spec, y_spec, vec_spec, vec_spec, vec_spec, vec_spec],
            out_specs=y_spec,
            out_shape=y_shape,
            compiler_params=cparams,
        )(y2, yp, s2, b2, sp, bp)

    # drop channel padding, back to NCHW
    return jnp.transpose(out[..., :cout], (0, 3, 1, 2))
    # TODO(synk): for very large spatial maps, additionally tile rows of each
    # image (with a 1-row halo) instead of one-image-per-block.


# ----------------------------------------------------------------------------- reference (pure JAX)
def residual_block_reference(x, params, same_shape=True):
    def conv(x, w, stride, pad):
        return lax.conv_general_dilated(
            x, w, (stride, stride), [(pad, pad), (pad, pad)],
            dimension_numbers=("NCHW", "OIHW", "NCHW"))

    def bn(x, g, b):
        mean = jnp.mean(x, axis=(0, 2, 3), keepdims=True)
        var = jnp.var(x, axis=(0, 2, 3), keepdims=True)
        return (x - mean) / jnp.sqrt(var + EPS) * g.reshape(1, -1, 1, 1) \
            + b.reshape(1, -1, 1, 1)

    stride = 1 if same_shape else 2
    out = jax.nn.relu(bn(conv(x, params["w1"], stride, 1), params["g1"], params["b1"]))
    out = bn(conv(out, params["w2"], 1, 1), params["g2"], params["b2"])
    res = x if same_shape else bn(conv(x, params["w3"], stride, 0),
                                  params["g3"], params["b3"])
    return jax.nn.relu(out + res)


# ----------------------------------------------------------------------------- param init
def make_params(key, in_channels, out_channels, same_shape):
    ks = jax.random.split(key, 9)
    p = {
        "w1": 0.1 * jax.random.normal(ks[0], (out_channels, in_channels, 3, 3), jnp.float32),
        "g1": 1.0 + 0.1 * jax.random.normal(ks[1], (out_channels,), jnp.float32),
        "b1": 0.1 * jax.random.normal(ks[2], (out_channels,), jnp.float32),
        "w2": 0.1 * jax.random.normal(ks[3], (out_channels, out_channels, 3, 3), jnp.float32),
        "g2": 1.0 + 0.1 * jax.random.normal(ks[4], (out_channels,), jnp.float32),
        "b2": 0.1 * jax.random.normal(ks[5], (out_channels,), jnp.float32),
    }
    if not same_shape:
        p["w3"] = 0.1 * jax.random.normal(ks[6], (out_channels, in_channels, 1, 1), jnp.float32)
        p["g3"] = 1.0 + 0.1 * jax.random.normal(ks[7], (out_channels,), jnp.float32)
        p["b3"] = 0.1 * jax.random.normal(ks[8], (out_channels,), jnp.float32)
    return p


# ----------------------------------------------------------------------------- main
if __name__ == "__main__":
    key = jax.random.PRNGKey(0)
    kx, kp1, kp2 = jax.random.split(key, 3)

    # Tolerances: matmul inputs are bf16 (per perf review) with f32 MXU
    # accumulation and an all-f32 BN/ReLU epilogue; the reference is all-f32.
    ATOL = RTOL = 5e-2

    # case 1: same_shape=True  (stride 1, identity residual), x: (2, 4, 16, 16)
    x = jax.random.normal(kx, (2, 4, 16, 16), jnp.float32)
    params_a = make_params(kp1, in_channels=4, out_channels=4, same_shape=True)
    out_a = jax.block_until_ready(residual_block_forward(x, params_a, same_shape=True))
    ref_a = residual_block_reference(x, params_a, same_shape=True)
    assert out_a.shape == (2, 4, 16, 16)
    assert jnp.allclose(out_a, ref_a, atol=ATOL, rtol=RTOL), "same_shape=True mismatch"

    # case 2: same_shape=False (stride 2, 1x1-conv + BN residual), 4 -> 8 channels
    params_b = make_params(kp2, in_channels=4, out_channels=8, same_shape=False)
    out_b = jax.block_until_ready(residual_block_forward(x, params_b, same_shape=False))
    ref_b = residual_block_reference(x, params_b, same_shape=False)
    assert out_b.shape == (2, 8, 8, 8)
    assert jnp.allclose(out_b, ref_b, atol=ATOL, rtol=RTOL), "same_shape=False mismatch"

    print("KERNEL_OK")
</pallas_src>

<mosaic_0001>
module attributes {stable_mosaic.version = 11 : i64} {
  func.func @_bn_relu_conv_stats_kernel(%arg0: i32, %arg1: memref<1x16x16x128xf32, #tpu.memory_space<vmem>>, %arg2: memref<1x128xf32, #tpu.memory_space<vmem>>, %arg3: memref<1x128xf32, #tpu.memory_space<vmem>>, %arg4: memref<1152x128xbf16, #tpu.memory_space<vmem>>, %arg5: memref<1x16x16x128xf32, #tpu.memory_space<vmem>>, %arg6: memref<1x2x128xf32, #tpu.memory_space<vmem>>, %arg7: memref<18x18x128xbf16, #tpu.memory_space<vmem>>) attributes {dimension_semantics = [#tpu.dimension_semantics<parallel>], iteration_bounds = array<i64: 2>, scalar_prefetch = 0 : i64, scratch_operands = 1 : i64, tpu.core_type = #tpu.core_type<tc>, window_params = [{transform_indices = @transform_0, window_bounds = array<i64: 1, 16, 16, 128>}, {pipeline_mode = #tpu.pipeline_mode<synchronous>, transform_indices = @transform_1, window_bounds = array<i64: 1, 128>}, {pipeline_mode = #tpu.pipeline_mode<synchronous>, transform_indices = @transform_2, window_bounds = array<i64: 1, 128>}, {pipeline_mode = #tpu.pipeline_mode<synchronous>, transform_indices = @transform_3, window_bounds = array<i64: 1152, 128>}, {transform_indices = @transform_4, window_bounds = array<i64: 1, 16, 16, 128>}, {transform_indices = @transform_5, window_bounds = array<i64: 1, 2, 128>}]} {
    %c0 = arith.constant 0 : index
    %c0_0 = arith.constant 0 : index
    %c0_1 = arith.constant 0 : index
    %c0_2 = arith.constant 0 : index
    %0 = vector.load %arg1[%c0, %c0_0, %c0_1, %c0_2] : memref<1x16x16x128xf32, #tpu.memory_space<vmem>>, vector<1x16x16x128xf32>
    %1 = vector.shape_cast %0 : vector<1x16x16x128xf32> to vector<16x16x128xf32>
    %c0_3 = arith.constant 0 : index
    %c0_4 = arith.constant 0 : index
    %2 = vector.load %arg2[%c0_3, %c0_4] : memref<1x128xf32, #tpu.memory_space<vmem>>, vector<1x128xf32>
    %3 = vector.shape_cast %2 : vector<1x128xf32> to vector<1x1x128xf32>
    %4 = vector.broadcast %3 : vector<1x1x128xf32> to vector<16x16x128xf32>
    %5 = arith.mulf %1, %4 : vector<16x16x128xf32>
    %c0_5 = arith.constant 0 : index
    %c0_6 = arith.constant 0 : index
    %6 = vector.load %arg3[%c0_5, %c0_6] : memref<1x128xf32, #tpu.memory_space<vmem>>, vector<1x128xf32>
    %7 = vector.shape_cast %6 : vector<1x128xf32> to vector<1x1x128xf32>
    %8 = vector.broadcast %7 : vector<1x1x128xf32> to vector<16x16x128xf32>
    %9 = arith.addf %5, %8 : vector<16x16x128xf32>
    %cst = arith.constant 0.000000e+00 : f32
    %10 = vector.broadcast %cst : f32 to vector<16x16x128xf32>
    %11 = arith.maximumf %9, %10 : vector<16x16x128xf32>
    %cst_7 = arith.constant 0.000000e+00 : bf16
    %12 = vector.broadcast %cst_7 : bf16 to vector<18x18x128xbf16>
    %c0_8 = arith.constant 0 : index
    %c0_9 = arith.constant 0 : index
    %c0_10 = arith.constant 0 : index
    %13 = vector.load %arg7[%c0_8, %c0_9, %c0_10] : memref<18x18x128xbf16, #tpu.memory_space<vmem>>, vector<18x18x128xbf16>
    tpu.vector_store %arg7[%c0_8, %c0_9, %c0_10], %12 {strides = array<i32>} : memref<18x18x128xbf16, #tpu.memory_space<vmem>>, vector<18x18x128xbf16>,
    %14 = arith.truncf %11 : vector<16x16x128xf32> to vector<16x16x128xbf16>
    %c1 = arith.constant 1 : index
    %c1_11 = arith.constant 1 : index
    %c0_12 = arith.constant 0 : index
    %15 = vector.load %arg7[%c1, %c1_11, %c0_12] : memref<18x18x128xbf16, #tpu.memory_space<vmem>>, vector<16x16x128xbf16>
    tpu.vector_store %arg7[%c1, %c1_11, %c0_12], %14 {strides = array<i32>} : memref<18x18x128xbf16, #tpu.memory_space<vmem>>, vector<16x16x128xbf16>,
    %c0_13 = arith.constant 0 : index
    %c0_14 = arith.constant 0 : index
    %c0_15 = arith.constant 0 : index
    %16 = vector.load %arg7[%c0_13, %c0_14, %c0_15] : memref<18x18x128xbf16, #tpu.memory_space<vmem>>, vector<16x16x128xbf16>
    %c0_16 = arith.constant 0 : index
    %c1_17 = arith.constant 1 : index
    %c0_18 = arith.constant 0 : index
    %17 = vector.load %arg7[%c0_16, %c1_17, %c0_18] : memref<18x18x128xbf16, #tpu.memory_space<vmem>>, vector<16x16x128xbf16>
    %c0_19 = arith.constant 0 : index
    %c2 = arith.constant 2 : index
    %c0_20 = arith.constant 0 : index
    %18 = vector.load %arg7[%c0_19, %c2, %c0_20] : memref<18x18x128xbf16, #tpu.memory_space<vmem>>, vector<16x16x128xbf16>
    %c1_21 = arith.constant 1 : index
    %c0_22 = arith.constant 0 : index
    %c0_23 = arith.constant 0 : index
    %19 = vector.load %arg7[%c1_21, %c0_22, %c0_23] : memref<18x18x128xbf16, #tpu.memory_space<vmem>>, vector<16x16x128xbf16>
    %c1_24 = arith.constant 1 : index
    %c1_25 = arith.constant 1 : index
    %c0_26 = arith.constant 0 : index
    %20 = vector.load %arg7[%c1_24, %c1_25, %c0_26] : memref<18x18x128xbf16, #tpu.memory_space<vmem>>, vector<16x16x128xbf16>
    %c1_27 = arith.constant 1 : index
    %c2_28 = arith.constant 2 : index
    %c0_29 = arith.constant 0 : index
    %21 = vector.load %arg7[%c1_27, %c2_28, %c0_29] : memref<18x18x128xbf16, #tpu.memory_space<vmem>>, vector<16x16x128xbf16>
    %c2_30 = arith.constant 2 : index
    %c0_31 = arith.constant 0 : index
    %c0_32 = arith.constant 0 : index
    %22 = vector.load %arg7[%c2_30, %c0_31, %c0_32] : memref<18x18x128xbf16, #tpu.memory_space<vmem>>, vector<16x16x128xbf16>
    %c2_33 = arith.constant 2 : index
    %c1_34 = arith.constant 1 : index
    %c0_35 = arith.constant 0 : index
    %23 = vector.load %arg7[%c2_33, %c1_34, %c0_35] : memref<18x18x128xbf16, #tpu.memory_space<vmem>>, vector<16x16x128xbf16>
    %c2_36 = arith.constant 2 : index
    %c2_37 = arith.constant 2 : index
    %c0_38 = arith.constant 0 : index
    %24 = vector.load %arg7[%c2_36, %c2_37, %c0_38] : memref<18x18x128xbf16, #tpu.memory_space<vmem>>, vector<16x16x128xbf16>
    %25 = tpu.concatenate %16, %17, %18, %19, %20, %21, %22, %23, %24 in 2 : vector<16x16x128xbf16>, vector<16x16x128xbf16>, vector<16x16x128xbf16>, vector<16x16x128xbf16>, vector<16x16x128xbf16>, vector<16x16x128xbf16>, vector<16x16x128xbf16>, vector<16x16x128xbf16>, vector<16x16x128xbf16> -> vector<16x16x1152xbf16>
    %26 = vector.shape_cast %25 : vector<16x16x1152xbf16> to vector<256x1152xbf16>
    %c0_39 = arith.constant 0 : index
    %c0_40 = arith.constant 0 : index
    %27 = vector.load %arg4[%c0_39, %c0_40] : memref<1152x128xbf16, #tpu.memory_space<vmem>>, vector<1152x128xbf16>
    %cst_41 = arith.constant dense<0.000000e+00> : vector<256x128xf32>
    %28 = tpu.matmul %26, %27, %cst_41 {dimension_numbers = #tpu.dot_dimension_numbers<[1], [0], [0], [1], [0, 0, 1, 1], [], []>} : vector<256x1152xbf16>, vector<1152x128xbf16>, vector<256x128xf32> -> vector<256x128xf32>
    %cst_42 = arith.constant dense<0.000000e+00> : vector<128xf32>
    %29 = vector.multi_reduction <add>, %28, %cst_42 [0] : vector<256x128xf32> to vector<128xf32>
    %30 = vector.shape_cast %29 : vector<128xf32> to vector<1x128xf32>
    %cst_43 = arith.constant 3.906250e-03 : f32
    %31 = vector.broadcast %cst_43 : f32 to vector<1x128xf32>
    %32 = arith.mulf %30, %31 : vector<1x128xf32>
    %33 = vector.broadcast %32 : vector<1x128xf32> to vector<256x128xf32>
    %34 = arith.subf %28, %33 : vector<256x128xf32>
    %35 = arith.mulf %34, %34 : vector<256x128xf32>
    %cst_44 = arith.constant dense<0.000000e+00> : vector<128xf32>
    %36 = vector.multi_reduction <add>, %35, %cst_44 [0] : vector<256x128xf32> to vector<128xf32>
    %37 = vector.shape_cast %36 : vector<128xf32> to vector<1x128xf32>
    %38 = vector.shape_cast %28 : vector<256x128xf32> to vector<16x16x128xf32>
    %c0_45 = arith.constant 0 : index
    %c0_46 = arith.constant 0 : index
    %c0_47 = arith.constant 0 : index
    %c0_48 = arith.constant 0 : index
    %39 = vector.load %arg5[%c0_45, %c0_46, %c0_47, %c0_48] : memref<1x16x16x128xf32, #tpu.memory_space<vmem>>, vector<1x16x16x128xf32>
    %40 = vector.shape_cast %39 : vector<1x16x16x128xf32> to vector<16x16x128xf32>
    %41 = vector.shape_cast %38 : vector<16x16x128xf32> to vector<1x16x16x128xf32>
    tpu.vector_store %arg5[%c0_45, %c0_46, %c0_47, %c0_48], %41 {strides = array<i32>} : memref<1x16x16x128xf32, #tpu.memory_space<vmem>>, vector<1x16x16x128xf32>,
    %42 = tpu.concatenate %30, %37 in 0 : vector<1x128xf32>, vector<1x128xf32> -> vector<2x128xf32>
    %c0_49 = arith.constant 0 : index
    %c0_50 = arith.constant 0 : index
    %c0_51 = arith.constant 0 : index
    %43 = vector.load %arg6[%c0_49, %c0_50, %c0_51] : memref<1x2x128xf32, #tpu.memory_space<vmem>>, vector<1x2x128xf32>
    %44 = vector.shape_cast %43 : vector<1x2x128xf32> to vector<2x128xf32>
    %45 = vector.shape_cast %42 : vector<2x128xf32> to vector<1x2x128xf32>
    tpu.vector_store %arg6[%c0_49, %c0_50, %c0_51], %45 {strides = array<i32>} : memref<1x2x128xf32, #tpu.memory_space<vmem>>, vector<1x2x128xf32>,
    return
  }
  func.func @transform_0(%arg0: i32) -> (i32, i32, i32, i32) {
    %c0_i32 = arith.constant 0 : i32
    %c0_i32_0 = arith.constant 0 : i32
    %c0_i32_1 = arith.constant 0 : i32
    %c0_i32_2 = arith.constant 0 : i32
    return %arg0, %c0_i32, %c0_i32_0, %c0_i32_1 : i32, i32, i32, i32
  }
  func.func @transform_1(%arg0: i32) -> (i32, i32) {
    %c0_i32 = arith.constant 0 : i32
    %c0_i32_0 = arith.constant 0 : i32
    %c0_i32_1 = arith.constant 0 : i32
    return %c0_i32, %c0_i32_0 : i32, i32
  }
  func.func @transform_2(%arg0: i32) -> (i32, i32) {
    %c0_i32 = arith.constant 0 : i32
    %c0_i32_0 = arith.constant 0 : i32
    %c0_i32_1 = arith.constant 0 : i32
    return %c0_i32, %c0_i32_0 : i32, i32
  }
  func.func @transform_3(%arg0: i32) -> (i32, i32) {
    %c0_i32 = arith.constant 0 : i32
    %c0_i32_0 = arith.constant 0 : i32
    %c0_i32_1 = arith.constant 0 : i32
    return %c0_i32, %c0_i32_0 : i32, i32
  }
  func.func @transform_4(%arg0: i32) -> (i32, i32, i32, i32) {
    %c0_i32 = arith.constant 0 : i32
    %c0_i32_0 = arith.constant 0 : i32
    %c0_i32_1 = arith.constant 0 : i32
    %c0_i32_2 = arith.constant 0 : i32
    return %arg0, %c0_i32, %c0_i32_0, %c0_i32_1 : i32, i32, i32, i32
  }
  func.func @transform_5(%arg0: i32) -> (i32, i32, i32) {
    %c0_i32 = arith.constant 0 : i32
    %c0_i32_0 = arith.constant 0 : i32
    %c0_i32_1 = arith.constant 0 : i32
    return %arg0, %c0_i32, %c0_i32_0 : i32, i32, i32
  }
}

module attributes {stable_mosaic.version = 11 : i64} {
  func.func @_conv_stats_kernel(%arg0: i32, %arg1: memref<1x18x18x128xbf16, #tpu.memory_space<vmem>>, %arg2: memref<1152x128xbf16, #tpu.memory_space<vmem>>, %arg3: memref<1x16x16x128xf32, #tpu.memory_space<vmem>>, %arg4: memref<1x2x128xf32, #tpu.memory_space<vmem>>) attributes {dimension_semantics = [#tpu.dimension_semantics<parallel>], iteration_bounds = array<i64: 2>, scalar_prefetch = 0 : i64, scratch_operands = 0 : i64, tpu.core_type = #tpu.core_type<tc>, window_params = [{transform_indices = @transform_0, window_bounds = array<i64: 1, 18, 18, 128>}, {pipeline_mode = #tpu.pipeline_mode<synchronous>, transform_indices = @transform_1, window_bounds = array<i64: 1152, 128>}, {transform_indices = @transform_2, window_bounds = array<i64: 1, 16, 16, 128>}, {transform_indices = @transform_3, window_bounds = array<i64: 1, 2, 128>}]} {
    %c0 = arith.constant 0 : index
    %c0_0 = arith.constant 0 : index
    %c0_1 = arith.constant 0 : index
    %c0_2 = arith.constant 0 : index
    %0 = vector.load %arg1[%c0, %c0_0, %c0_1, %c0_2] : memref<1x18x18x128xbf16, #tpu.memory_space<vmem>>, vector<1x16x16x128xbf16>
    %1 = vector.shape_cast %0 : vector<1x16x16x128xbf16> to vector<16x16x128xbf16>
    %c0_3 = arith.constant 0 : index
    %c0_4 = arith.constant 0 : index
    %c1 = arith.constant 1 : index
    %c0_5 = arith.constant 0 : index
    %2 = vector.load %arg1[%c0_3, %c0_4, %c1, %c0_5] : memref<1x18x18x128xbf16, #tpu.memory_space<vmem>>, vector<1x16x16x128xbf16>
    %3 = vector.shape_cast %2 : vector<1x16x16x128xbf16> to vector<16x16x128xbf16>
    %c0_6 = arith.constant 0 : index
    %c0_7 = arith.constant 0 : index
    %c2 = arith.constant 2 : index
    %c0_8 = arith.constant 0 : index
    %4 = vector.load %arg1[%c0_6, %c0_7, %c2, %c0_8] : memref<1x18x18x128xbf16, #tpu.memory_space<vmem>>, vector<1x16x16x128xbf16>
    %5 = vector.shape_cast %4 : vector<1x16x16x128xbf16> to vector<16x16x128xbf16>
    %c0_9 = arith.constant 0 : index
    %c1_10 = arith.constant 1 : index
    %c0_11 = arith.constant 0 : index
    %c0_12 = arith.constant 0 : index
    %6 = vector.load %arg1[%c0_9, %c1_10, %c0_11, %c0_12] : memref<1x18x18x128xbf16, #tpu.memory_space<vmem>>, vector<1x16x16x128xbf16>
    %7 = vector.shape_cast %6 : vector<1x16x16x128xbf16> to vector<16x16x128xbf16>
    %c0_13 = arith.constant 0 : index
    %c1_14 = arith.constant 1 : index
    %c1_15 = arith.constant 1 : index
    %c0_16 = arith.constant 0 : index
    %8 = vector.load %arg1[%c0_13, %c1_14, %c1_15, %c0_16] : memref<1x18x18x128xbf16, #tpu.memory_space<vmem>>, vector<1x16x16x128xbf16>
    %9 = vector.shape_cast %8 : vector<1x16x16x128xbf16> to vector<16x16x128xbf16>
    %c0_17 = arith.constant 0 : index
    %c1_18 = arith.constant 1 : index
    %c2_19 = arith.constant 2 : index
    %c0_20 = arith.constant 0 : index
    %10 = vector.load %arg1[%c0_17, %c1_18, %c2_19, %c0_20] : memref<1x18x18x128xbf16, #tpu.memory_space<vmem>>, vector<1x16x16x128xbf16>
    %11 = vector.shape_cast %10 : vector<1x16x16x128xbf16> to vector<16x16x128xbf16>
    %c0_21 = arith.constant 0 : index
    %c2_22 = arith.constant 2 : index
    %c0_23 = arith.constant 0 : index
    %c0_24 = arith.constant 0 : index
    %12 = vector.load %arg1[%c0_21, %c2_22, %c0_23, %c0_24] : memref<1x18x18x128xbf16, #tpu.memory_space<vmem>>, vector<1x16x16x128xbf16>
    %13 = vector.shape_cast %12 : vector<1x16x16x128xbf16> to vector<16x16x128xbf16>
    %c0_25 = arith.constant 0 : index
    %c2_26 = arith.constant 2 : index
    %c1_27 = arith.constant 1 : index
    %c0_28 = arith.constant 0 : index
    %14 = vector.load %arg1[%c0_25, %c2_26, %c1_27, %c0_28] : memref<1x18x18x128xbf16, #tpu.memory_space<vmem>>, vector<1x16x16x128xbf16>
    %15 = vector.shape_cast %14 : vector<1x16x16x128xbf16> to vector<16x16x128xbf16>
    %c0_29 = arith.constant 0 : index
    %c2_30 = arith.constant 2 : index
    %c2_31 = arith.constant 2 : index
    %c0_32 = arith.constant 0 : index
    %16 = vector.load %arg1[%c0_29, %c2_30, %c2_31, %c0_32] : memref<1x18x18x128xbf16, #tpu.memory_space<vmem>>, vector<1x16x16x128xbf16>
    %17 = vector.shape_cast %16 : vector<1x16x16x128xbf16> to vector<16x16x128xbf16>
    %18 = tpu.concatenate %1, %3, %5, %7, %9, %11, %13, %15, %17 in 2 : vector<16x16x128xbf16>, vector<16x16x128xbf16>, vector<16x16x128xbf16>, vector<16x16x128xbf16>, vector<16x16x128xbf16>, vector<16x16x128xbf16>, vector<16x16x128xbf16>, vector<16x16x128xbf16>, vector<16x16x128xbf16> -> vector<16x16x1152xbf16>
    %19 = vector.shape_cast %18 : vector<16x16x1152xbf16> to vector<256x1152xbf16>
    %c0_33 = arith.constant 0 : index
    %c0_34 = arith.constant 0 : index
    %20 = vector.load %arg2[%c0_33, %c0_34] : memref<1152x128xbf16, #tpu.memory_space<vmem>>, vector<1152x128xbf16>
    %cst = arith.constant dense<0.000000e+00> : vector<256x128xf32>
    %21 = tpu.matmul %19, %20, %cst {dimension_numbers = #tpu.dot_dimension_numbers<[1], [0], [0], [1], [0, 0, 1, 1], [], []>} : vector<256x1152xbf16>, vector<1152x128xbf16>, vector<256x128xf32> -> vector<256x128xf32>
    %cst_35 = arith.constant dense<0.000000e+00> : vector<128xf32>
    %22 = vector.multi_reduction <add>, %21, %cst_35 [0] : vector<256x128xf32> to vector<128xf32>
    %23 = vector.shape_cast %22 : vector<128xf32> to vector<1x128xf32>
    %cst_36 = arith.constant 3.906250e-03 : f32
    %24 = vector.broadcast %cst_36 : f32 to vector<1x128xf32>
    %25 = arith.mulf %23, %24 : vector<1x128xf32>
    %26 = vector.broadcast %25 : vector<1x128xf32> to vector<256x128xf32>
    %27 = arith.subf %21, %26 : vector<256x128xf32>
    %28 = arith.mulf %27, %27 : vector<256x128xf32>
    %cst_37 = arith.constant dense<0.000000e+00> : vector<128xf32>
    %29 = vector.multi_reduction <add>, %28, %cst_37 [0] : vector<256x128xf32> to vector<128xf32>
    %30 = vector.shape_cast %29 : vector<128xf32> to vector<1x128xf32>
    %31 = vector.shape_cast %21 : vector<256x128xf32> to vector<16x16x128xf32>
    %c0_38 = arith.constant 0 : index
    %c0_39 = arith.constant 0 : index
    %c0_40 = arith.constant 0 : index
    %c0_41 = arith.constant 0 : index
    %32 = vector.load %arg3[%c0_38, %c0_39, %c0_40, %c0_41] : memref<1x16x16x128xf32, #tpu.memory_space<vmem>>, vector<1x16x16x128xf32>
    %33 = vector.shape_cast %32 : vector<1x16x16x128xf32> to vector<16x16x128xf32>
    %34 = vector.shape_cast %31 : vector<16x16x128xf32> to vector<1x16x16x128xf32>
    tpu.vector_store %arg3[%c0_38, %c0_39, %c0_40, %c0_41], %34 {strides = array<i32>} : memref<1x16x16x128xf32, #tpu.memory_space<vmem>>, vector<1x16x16x128xf32>,
    %35 = tpu.concatenate %23, %30 in 0 : vector<1x128xf32>, vector<1x128xf32> -> vector<2x128xf32>
    %c0_42 = arith.constant 0 : index
    %c0_43 = arith.constant 0 : index
    %c0_44 = arith.constant 0 : index
    %36 = vector.load %arg4[%c0_42, %c0_43, %c0_44] : memref<1x2x128xf32, #tpu.memory_space<vmem>>, vector<1x2x128xf32>
    %37 = vector.shape_cast %36 : vector<1x2x128xf32> to vector<2x128xf32>
    %38 = vector.shape_cast %35 : vector<2x128xf32> to vector<1x2x128xf32>
    tpu.vector_store %arg4[%c0_42, %c0_43, %c0_44], %38 {strides = array<i32>} : memref<1x2x128xf32, #tpu.memory_space<vmem>>, vector<1x2x128xf32>,
    return
  }
  func.func @transform_0(%arg0: i32) -> (i32, i32, i32, i32) {
    %c0_i32 = arith.constant 0 : i32
    %c0_i32_0 = arith.constant 0 : i32
    %c0_i32_1 = arith.constant 0 : i32
    %c0_i32_2 = arith.constant 0 : i32
    return %arg0, %c0_i32, %c0_i32_0, %c0_i32_1 : i32, i32, i32, i32
  }
  func.func @transform_1(%arg0: i32) -> (i32, i32) {
    %c0_i32 = arith.constant 0 : i32
    %c0_i32_0 = arith.constant 0 : i32
    %c0_i32_1 = arith.constant 0 : i32
    return %c0_i32, %c0_i32_0 : i32, i32
  }
  func.func @transform_2(%arg0: i32) -> (i32, i32, i32, i32) {
    %c0_i32 = arith.constant 0 : i32
    %c0_i32_0 = arith.constant 0 : i32
    %c0_i32_1 = arith.constant 0 : i32
    %c0_i32_2 = arith.constant 0 : i32
    return %arg0, %c0_i32, %c0_i32_0, %c0_i32_1 : i32, i32, i32, i32
  }
  func.func @transform_3(%arg0: i32) -> (i32, i32, i32) {
    %c0_i32 = arith.constant 0 : i32
    %c0_i32_0 = arith.constant 0 : i32
    %c0_i32_1 = arith.constant 0 : i32
    return %arg0, %c0_i32, %c0_i32_0 : i32, i32, i32
  }
}

module attributes {stable_mosaic.version = 11 : i64} {
  func.func @_bn_add_relu_kernel(%arg0: i32, %arg1: memref<1x16x16x128xf32, #tpu.memory_space<vmem>>, %arg2: memref<1x16x16x128xf32, #tpu.memory_space<vmem>>, %arg3: memref<1x128xf32, #tpu.memory_space<vmem>>, %arg4: memref<1x128xf32, #tpu.memory_space<vmem>>, %arg5: memref<1x16x16x128xf32, #tpu.memory_space<vmem>>) attributes {dimension_semantics = [#tpu.dimension_semantics<parallel>], iteration_bounds = array<i64: 2>, scalar_prefetch = 0 : i64, scratch_operands = 0 : i64, tpu.core_type = #tpu.core_type<tc>, window_params = [{transform_indices = @transform_0, window_bounds = array<i64: 1, 16, 16, 128>}, {transform_indices = @transform_1, window_bounds = array<i64: 1, 16, 16, 128>}, {pipeline_mode = #tpu.pipeline_mode<synchronous>, transform_indices = @transform_2, window_bounds = array<i64: 1, 128>}, {pipeline_mode = #tpu.pipeline_mode<synchronous>, transform_indices = @transform_3, window_bounds = array<i64: 1, 128>}, {transform_indices = @transform_4, window_bounds = array<i64: 1, 16, 16, 128>}]} {
    %c0 = arith.constant 0 : index
    %c0_0 = arith.constant 0 : index
    %c0_1 = arith.constant 0 : index
    %c0_2 = arith.constant 0 : index
    %0 = vector.load %arg2[%c0, %c0_0, %c0_1, %c0_2] : memref<1x16x16x128xf32, #tpu.memory_space<vmem>>, vector<1x16x16x128xf32>
    %1 = vector.shape_cast %0 : vector<1x16x16x128xf32> to vector<16x16x128xf32>
    %c0_3 = arith.constant 0 : index
    %c0_4 = arith.constant 0 : index
    %c0_5 = arith.constant 0 : index
    %c0_6 = arith.constant 0 : index
    %2 = vector.load %arg1[%c0_3, %c0_4, %c0_5, %c0_6] : memref<1x16x16x128xf32, #tpu.memory_space<vmem>>, vector<1x16x16x128xf32>
    %3 = vector.shape_cast %2 : vector<1x16x16x128xf32> to vector<16x16x128xf32>
    %c0_7 = arith.constant 0 : index
    %c0_8 = arith.constant 0 : index
    %4 = vector.load %arg3[%c0_7, %c0_8] : memref<1x128xf32, #tpu.memory_space<vmem>>, vector<1x128xf32>
    %5 = vector.shape_cast %4 : vector<1x128xf32> to vector<1x1x128xf32>
    %6 = vector.broadcast %5 : vector<1x1x128xf32> to vector<16x16x128xf32>
    %7 = arith.mulf %3, %6 : vector<16x16x128xf32>
    %c0_9 = arith.constant 0 : index
    %c0_10 = arith.constant 0 : index
    %8 = vector.load %arg4[%c0_9, %c0_10] : memref<1x128xf32, #tpu.memory_space<vmem>>, vector<1x128xf32>
    %9 = vector.shape_cast %8 : vector<1x128xf32> to vector<1x1x128xf32>
    %10 = vector.broadcast %9 : vector<1x1x128xf32> to vector<16x16x128xf32>
    %11 = arith.addf %7, %10 : vector<16x16x128xf32>
    %12 = arith.addf %11, %1 : vector<16x16x128xf32>
    %cst = arith.constant 0.000000e+00 : f32
    %13 = vector.broadcast %cst : f32 to vector<16x16x128xf32>
    %14 = arith.maximumf %12, %13 : vector<16x16x128xf32>
    %c0_11 = arith.constant 0 : index
    %c0_12 = arith.constant 0 : index
    %c0_13 = arith.constant 0 : index
    %c0_14 = arith.constant 0 : index
    %15 = vector.load %arg5[%c0_11, %c0_12, %c0_13, %c0_14] : memref<1x16x16x128xf32, #tpu.memory_space<vmem>>, vector<1x16x16x128xf32>
    %16 = vector.shape_cast %15 : vector<1x16x16x128xf32> to vector<16x16x128xf32>
    %17 = vector.shape_cast %14 : vector<16x16x128xf32> to vector<1x16x16x128xf32>
    tpu.vector_store %arg5[%c0_11, %c0_12, %c0_13, %c0_14], %17 {strides = array<i32>} : memref<1x16x16x128xf32, #tpu.memory_space<vmem>>, vector<1x16x16x128xf32>,
    return
  }
  func.func @transform_0(%arg0: i32) -> (i32, i32, i32, i32) {
    %c0_i32 = arith.constant 0 : i32
    %c0_i32_0 = arith.constant 0 : i32
    %c0_i32_1 = arith.constant 0 : i32
    %c0_i32_2 = arith.constant 0 : i32
    return %arg0, %c0_i32, %c0_i32_0, %c0_i32_1 : i32, i32, i32, i32
  }
  func.func @transform_1(%arg0: i32) -> (i32, i32, i32, i32) {
    %c0_i32 = arith.constant 0 : i32
    %c0_i32_0 = arith.constant 0 : i32
    %c0_i32_1 = arith.constant 0 : i32
    %c0_i32_2 = arith.constant 0 : i32
    return %arg0, %c0_i32, %c0_i32_0, %c0_i32_1 : i32, i32, i32, i32
  }
  func.func @transform_2(%arg0: i32) -> (i32, i32) {
    %c0_i32 = arith.constant 0 : i32
    %c0_i32_0 = arith.constant 0 : i32
    %c0_i32_1 = arith.constant 0 : i32
    return %c0_i32, %c0_i32_0 : i32, i32
  }
  func.func @transform_3(%arg0: i32) -> (i32, i32) {
    %c0_i32 = arith.constant 0 : i32
    %c0_i32_0 = arith.constant 0 : i32
    %c0_i32_1 = arith.constant 0 : i32
    return %c0_i32, %c0_i32_0 : i32, i32
  }
  func.func @transform_4(%arg0: i32) -> (i32, i32, i32, i32) {
    %c0_i32 = arith.constant 0 : i32
    %c0_i32_0 = arith.constant 0 : i32
    %c0_i32_1 = arith.constant 0 : i32
    %c0_i32_2 = arith.constant 0 : i32
    return %arg0, %c0_i32, %c0_i32_0, %c0_i32_1 : i32, i32, i32, i32
  }
}

</mosaic_0001>

<bundles_post_ra>
// kernel: residual_block_forward.5
= control target key start
LH: loop header
LB: loop body
LE: loop exit
PB: predicated region body
PF: predicated region fallthrough
CT: control target
= control target key end

     0   :  { %s582_s15 = smov 0   ;;  %s783_s0 = inlined_call_operand.vmem [shape: f32[2,16,16,128], index: 0, kind: input, shape index: {}]   ;;  %s784_s1 = inlined_call_operand.vmem [shape: f32[2,16,16,128], index: 1, kind: input, shape index: {}]   ;;  %s785_s2 = inlined_call_operand.vmem [shape: f32[1,128], index: 2, kind: input, shape index: {}]   ;;  %s786_s3 = inlined_call_operand.vmem [shape: f32[1,128], index: 3, kind: input, shape index: {}]   ;;  %s787_s4 = inlined_call_operand.vmem [shape: f32[2,16,16,128], index: 4, kind: output, shape index: {}]  }
   0x1 LB: > { %s523_s16 = sadd.s32 4294967295, %s555_s15   ;;  %p527_p0 = scmp.ge.s32.totalorder %s555_s15, 1  ;;  %s555_s15 = sphi %s582_s15, %s14_s15  }
   0x2   : > { %p172_p1 = scmp.lt.s32.totalorder %s555_s15, 3 }
   0x4   : > { %p173_p2 = pnand %p527_p0, %p172_p1 }
   0x5   : > { %p203_p3 = scmp.lt.s32.totalorder (!%p173_p2), %s523_s16, 1  ;;  %v595_v0 = vld [vmem:[%s785_s2] ss:$0 sm:$0xff] (!%p173_p2) }
   0x6   : > { %176 = sbr.rel (%p173_p2) target bundleno = 55 (0x37), region = 36  ;;  %v613_v2 = vld [vmem:[%s786_s3] ss:$0 sm:$0xff] (!%p173_p2) }
   0xd   : > { %s789_s16 = smov (!%p203_p3, %s523_s16), 1 }
   0xe   : > { %s590_s17 = sshll.u32 %s789_s16, 8 }
   0xf   : > { %s601_s22 = scalar_lea.vmem %s783_s0, %s590_s17  ;;  %s607_s25 = scalar_lea.vmem %s784_s1, %s590_s17 }
  0x10   : > { %v250_v1 = vld [vmem:[%s601_s22] sm:$0xff]  ;;  %v251_v4 = vld [vmem:[%s601_s22 + $0x8] sm:$0xff]  ;;  %v252_v5 = vld [vmem:[%s601_s22 + $0x10] sm:$0xff]  ;;  %s643_s30 = scalar_lea.vmem %s787_s4, %s590_s17 }
  0x11   : > { %v289_v3 = vmul.f32 %v595_v0, %v250_v1  ;;  %v218_v6 = vld [vmem:[%s607_s25] sm:$0xff]  ;;  %v219_v7 = vld [vmem:[%s607_s25 + $0x8] sm:$0xff]  ;;  %v290_v8 = vmul.f32 %v595_v0, %v251_v4  ;;  %v291_v9 = vmul.f32 %v595_v0, %v252_v5  ;;  %v253_v10 = vld [vmem:[%s601_s22 + $0x18] sm:$0xff] }
  0x12   : > { %v220_v12 = vld [vmem:[%s607_s25 + $0x10] sm:$0xff]  ;;  %v292_v13 = vmul.f32 %v595_v0, %v253_v10  ;;  %v254_v14 = vld [vmem:[%s601_s22 + $0x20] sm:$0xff]  ;;  %v255_v15 = vld [vmem:[%s601_s22 + $0x28] sm:$0xff] }
  0x13   : > { %v328_v11 = vadd.f32 %v613_v2, %v289_v3  ;;  %v329_v16 = vadd.f32 %v613_v2, %v290_v8  ;;  %v330_v17 = vadd.f32 %v613_v2, %v291_v9  ;;  %v221_v18 = vld [vmem:[%s607_s25 + $0x18] sm:$0xff]  ;;  %v293_v19 = vmul.f32 %v595_v0, %v254_v14  ;;  %v256_v21 = vld [vmem:[%s601_s22 + $0x30] sm:$0xff]  ;;  %v222_v24 = vld [vmem:[%s607_s25 + $0x20] sm:$0xff] }
  0x14   : > { %v294_v20 = vmul.f32 %v595_v0, %v255_v15  ;;  %v331_v23 = vadd.f32 %v613_v2, %v292_v13  ;;  %v223_v25 = vld [vmem:[%s607_s25 + $0x28] sm:$0xff]  ;;  %v295_v26 = vmul.f32 %v595_v0, %v256_v21  ;;  %v257_v27 = vld [vmem:[%s601_s22 + $0x38] sm:$0xff]  ;;  %v224_v32 = vld [vmem:[%s607_s25 + $0x30] sm:$0xff] }
  0x15   : > { %v360_v22 = vadd.f32 %v328_v11, %v218_v6  ;;  %v361_v28 = vadd.f32 %v329_v16, %v219_v7  ;;  %v362_v29 = vadd.f32 %v330_v17, %v220_v12  ;;  %v332_v30 = vadd.f32 %v613_v2, %v293_v19  ;;  %v258_v33 = vld [vmem:[%s601_s22 + $0x40] sm:$0xff]  ;;  %v259_v38 = vld [vmem:[%s601_s22 + $0x48] sm:$0xff]  ;;  %v260_v39 = vld [vmem:[%s601_s22 + $0x50] sm:$0xff] }
  0x16   : > { %v333_v31 = vadd.f32 %v613_v2, %v294_v20  ;;  %v363_v35 = vadd.f32 %v331_v23, %v221_v18  ;;  %v334_v36 = vadd.f32 %v613_v2, %v295_v26  ;;  %v296_v37 = vmul.f32 %v595_v0, %v257_v27  ;;  %v225_v44 = vld [vmem:[%s607_s25 + $0x38] sm:$0xff]  ;;  %v262_v50 = vld [vmem:[%s601_s22 + $0x60] sm:$0xff]  ;;  %v263_v51 = vld [vmem:[%s601_s22 + $0x68] sm:$0xff] }
  0x17   : > { %v392_v34 = vmax.f32 %v360_v22, 0.0  ;;  %v393_v40 = vmax.f32 %v361_v28, 0.0  ;;  %v394_v41 = vmax.f32 %v362_v29, 0.0  ;;  %v364_v42 = vadd.f32 %v332_v30, %v222_v24  ;;  %v261_v45 = vld [vmem:[%s601_s22 + $0x58] sm:$0xff]  ;;  %v226_v54 = vld [vmem:[%s607_s25 + $0x40] sm:$0xff]  ;;  %v264_v57 = vld [vmem:[%s601_s22 + $0x70] sm:$0xff] }
  0x18   : > { %v365_v43 = vadd.f32 %v333_v31, %v223_v25  ;;  %v395_v46 = vmax.f32 %v363_v35, 0.0  ;;  %v366_v47 = vadd.f32 %v334_v36, %v224_v32  ;;  %v335_v48 = vadd.f32 %v613_v2, %v296_v37  ;;  %v227_v61 = vld [vmem:[%s607_s25 + $0x48] sm:$0xff]  ;;  %v228_v62 = vld [vmem:[%s607_s25 + $0x50] sm:$0xff]  ;;  %v229_v4 = vld [vmem:[%s607_s25 + $0x58] sm:$0xff] }
  0x19   : > { %424 = vst [vmem:[%s643_s30] sm:$0xff] %v392_v34  ;;  %v297_v49 = vmul.f32 %v595_v0, %v258_v33  ;;  %425 = vst [vmem:[%s643_s30 + $0x8] sm:$0xff] %v393_v40  ;;  %v396_v52 = vmax.f32 %v364_v42, 0.0  ;;  %v298_v55 = vmul.f32 %v595_v0, %v259_v38  ;;  %v299_v56 = vmul.f32 %v595_v0, %v260_v39  ;;  %v265_v7 = vld [vmem:[%s601_s22 + $0x78] sm:$0xff]  ;;  %v230_v11 = vld [vmem:[%s607_s25 + $0x60] sm:$0xff] }
  0x1a   : > { %426 = vst [vmem:[%s643_s30 + $0x10] sm:$0xff] %v394_v41  ;;  %v397_v53 = vmax.f32 %v365_v43, 0.0  ;;  %427 = vst [vmem:[%s643_s30 + $0x18] sm:$0xff] %v395_v46  ;;  %v398_v58 = vmax.f32 %v366_v47, 0.0  ;;  %v367_v59 = vadd.f32 %v335_v48, %v225_v44  ;;  %v300_v63 = vmul.f32 %v595_v0, %v261_v45  ;;  %v231_v12 = vld [vmem:[%s607_s25 + $0x68] sm:$0xff]  ;;  %v232_v18 = vld [vmem:[%s607_s25 + $0x70] sm:$0xff] }
  0x1b   : > { %v336_v60 = vadd.f32 %v613_v2, %v297_v49  ;;  %428 = vst [vmem:[%s643_s30 + $0x20] sm:$0xff] %v396_v52  ;;  %v337_v1 = vadd.f32 %v613_v2, %v298_v55  ;;  %v338_v3 = vadd.f32 %v613_v2, %v299_v56  ;;  %v301_v5 = vmul.f32 %v595_v0, %v262_v50  ;;  %v266_v19 = vld [vmem:[%s601_s22 + $0x80] sm:$0xff]  ;;  %v267_v24 = vld [vmem:[%s601_s22 + $0x88] sm:$0xff]  ;;  %v268_v25 = vld [vmem:[%s601_s22 + $0x90] sm:$0xff] }
  0x1c   : > { %429 = vst [vmem:[%s643_s30 + $0x28] sm:$0xff] %v397_v53  ;;  %v302_v6 = vmul.f32 %v595_v0, %v263_v51  ;;  %430 = vst [vmem:[%s643_s30 + $0x30] sm:$0xff] %v398_v58  ;;  %v399_v8 = vmax.f32 %v367_v59, 0.0  ;;  %v339_v10 = vadd.f32 %v613_v2, %v300_v63  ;;  %v303_v13 = vmul.f32 %v595_v0, %v264_v57  ;;  %v233_v30 = vld [vmem:[%s607_s25 + $0x78] sm:$0xff]  ;;  %v270_v36 = vld [vmem:[%s601_s22 + $0xa0] sm:$0xff] }
  0x1d   : > { %v368_v9 = vadd.f32 %v336_v60, %v226_v54  ;;  %v369_v14 = vadd.f32 %v337_v1, %v227_v61  ;;  %v370_v15 = vadd.f32 %v338_v3, %v228_v62  ;;  %v340_v16 = vadd.f32 %v613_v2, %v301_v5  ;;  %v269_v31 = vld [vmem:[%s601_s22 + $0x98] sm:$0xff]  ;;  %v271_v37 = vld [vmem:[%s601_s22 + $0xa8] sm:$0xff]  ;;  %v234_v40 = vld [vmem:[%s607_s25 + $0x80] sm:$0xff] }
  0x1e   : > { %v341_v17 = vadd.f32 %v613_v2, %v302_v6  ;;  %431 = vst [vmem:[%s643_s30 + $0x38] sm:$0xff] %v399_v8  ;;  %v371_v21 = vadd.f32 %v339_v10, %v229_v4  ;;  %v342_v22 = vadd.f32 %v613_v2, %v303_v13  ;;  %v304_v23 = vmul.f32 %v595_v0, %v265_v7  ;;  %v272_v43 = vld [vmem:[%s601_s22 + $0xb0] sm:$0xff]  ;;  %v235_v47 = vld [vmem:[%s607_s25 + $0x88] sm:$0xff]  ;;  %v237_v52 = vld [vmem:[%s607_s25 + $0x98] sm:$0xff] }
  0x1f   : > { %v400_v20 = vmax.f32 %v368_v9, 0.0  ;;  %v401_v26 = vmax.f32 %v369_v14, 0.0  ;;  %v402_v27 = vmax.f32 %v370_v15, 0.0  ;;  %v372_v28 = vadd.f32 %v340_v16, %v230_v11  ;;  %v236_v48 = vld [vmem:[%s607_s25 + $0x90] sm:$0xff]  ;;  %v273_v55 = vld [vmem:[%s601_s22 + $0xb8] sm:$0xff]  ;;  %v238_v59 = vld [vmem:[%s607_s25 + $0xa0] sm:$0xff] }
  0x20   : > { %v373_v29 = vadd.f32 %v341_v17, %v231_v12  ;;  %v403_v32 = vmax.f32 %v371_v21, 0.0  ;;  %v374_v33 = vadd.f32 %v342_v22, %v232_v18  ;;  %v343_v34 = vadd.f32 %v613_v2, %v304_v23  ;;  %v239_v60 = vld [vmem:[%s607_s25 + $0xa8] sm:$0xff]  ;;  %v240_v4 = vld [vmem:[%s607_s25 + $0xb0] sm:$0xff]  ;;  %v274_v5 = vld [vmem:[%s601_s22 + $0xc0] sm:$0xff] }
  0x21   : > { %432 = vst [vmem:[%s643_s30 + $0x40] sm:$0xff] %v400_v20  ;;  %v305_v35 = vmul.f32 %v595_v0, %v266_v19  ;;  %433 = vst [vmem:[%s643_s30 + $0x48] sm:$0xff] %v401_v26  ;;  %v404_v38 = vmax.f32 %v372_v28, 0.0  ;;  %v306_v41 = vmul.f32 %v595_v0, %v267_v24  ;;  %v307_v42 = vmul.f32 %v595_v0, %v268_v25  ;;  %v275_v10 = vld [vmem:[%s601_s22 + $0xc8] sm:$0xff]  ;;  %v276_v11 = vld [vmem:[%s601_s22 + $0xd0] sm:$0xff] }
  0x22   : > { %434 = vst [vmem:[%s643_s30 + $0x50] sm:$0xff] %v402_v27  ;;  %v405_v39 = vmax.f32 %v373_v29, 0.0  ;;  %435 = vst [vmem:[%s643_s30 + $0x58] sm:$0xff] %v403_v32  ;;  %v406_v44 = vmax.f32 %v374_v33, 0.0  ;;  %v375_v45 = vadd.f32 %v343_v34, %v233_v30  ;;  %v308_v49 = vmul.f32 %v595_v0, %v269_v31  ;;  %v241_v16 = vld [vmem:[%s607_s25 + $0xb8] sm:$0xff]  ;;  %v278_v22 = vld [vmem:[%s601_s22 + $0xe0] sm:$0xff] }
  0x23   : > { %v344_v46 = vadd.f32 %v613_v2, %v305_v35  ;;  %436 = vst [vmem:[%s643_s30 + $0x60] sm:$0xff] %v404_v38  ;;  %v345_v50 = vadd.f32 %v613_v2, %v306_v41  ;;  %v346_v51 = vadd.f32 %v613_v2, %v307_v42  ;;  %v309_v53 = vmul.f32 %v595_v0, %v270_v36  ;;  %v277_v17 = vld [vmem:[%s601_s22 + $0xd8] sm:$0xff]  ;;  %v279_v23 = vld [vmem:[%s601_s22 + $0xe8] sm:$0xff]  ;;  %v242_v26 = vld [vmem:[%s607_s25 + $0xc0] sm:$0xff] }
  0x24   : > { %437 = vst [vmem:[%s643_s30 + $0x68] sm:$0xff] %v405_v39  ;;  %v310_v54 = vmul.f32 %v595_v0, %v271_v37  ;;  %438 = vst [vmem:[%s643_s30 + $0x70] sm:$0xff] %v406_v44  ;;  %v407_v56 = vmax.f32 %v375_v45, 0.0  ;;  %v347_v58 = vadd.f32 %v613_v2, %v308_v49  ;;  %v311_v61 = vmul.f32 %v595_v0, %v272_v43  ;;  %v280_v29 = vld [vmem:[%s601_s22 + $0xf0] sm:$0xff]  ;;  %v243_v33 = vld [vmem:[%s607_s25 + $0xc8] sm:$0xff] }
  0x25   : > { %v376_v57 = vadd.f32 %v344_v46, %v234_v40  ;;  %v377_v62 = vadd.f32 %v345_v50, %v235_v47  ;;  %v378_v63 = vadd.f32 %v346_v51, %v236_v48  ;;  %v348_v1 = vadd.f32 %v613_v2, %v309_v53  ;;  %v244_v34 = vld [vmem:[%s607_s25 + $0xd0] sm:$0xff]  ;;  %v245_v38 = vld [vmem:[%s607_s25 + $0xd8] sm:$0xff]  ;;  %v246_v45 = vld [vmem:[%s607_s25 + $0xe0] sm:$0xff] }
  0x26   : > { %v349_v3 = vadd.f32 %v613_v2, %v310_v54  ;;  %439 = vst [vmem:[%s643_s30 + $0x78] sm:$0xff] %v407_v56  ;;  %v379_v7 = vadd.f32 %v347_v58, %v237_v52  ;;  %v350_v8 = vadd.f32 %v613_v2, %v311_v61  ;;  %v312_v9 = vmul.f32 %v595_v0, %v273_v55  ;;  %v281_v41 = vld [vmem:[%s601_s22 + $0xf8] sm:$0xff]  ;;  %v247_v46 = vld [vmem:[%s607_s25 + $0xe8] sm:$0xff]  ;;  %v248_v52 = vld [vmem:[%s607_s25 + $0xf0] sm:$0xff] }
  0x27   : > { %v408_v6 = vmax.f32 %v376_v57, 0.0  ;;  %v409_v12 = vmax.f32 %v377_v62, 0.0  ;;  %v410_v13 = vmax.f32 %v378_v63, 0.0  ;;  %v380_v14 = vadd.f32 %v348_v1, %v238_v59  ;;  %v249_v61 = vld [vmem:[%s607_s25 + $0xf8] sm:$0xff] }
  0x28   : > { %v381_v15 = vadd.f32 %v349_v3, %v239_v60  ;;  %v411_v18 = vmax.f32 %v379_v7, 0.0  ;;  %v382_v19 = vadd.f32 %v350_v8, %v240_v4  ;;  %v351_v20 = vadd.f32 %v613_v2, %v312_v9 }
  0x29   : > { %440 = vst [vmem:[%s643_s30 + $0x80] sm:$0xff] %v408_v6  ;;  %v313_v21 = vmul.f32 %v595_v0, %v274_v5  ;;  %441 = vst [vmem:[%s643_s30 + $0x88] sm:$0xff] %v409_v12  ;;  %v412_v24 = vmax.f32 %v380_v14, 0.0  ;;  %v314_v27 = vmul.f32 %v595_v0, %v275_v10  ;;  %v315_v28 = vmul.f32 %v595_v0, %v276_v11 }
  0x2a   : > { %442 = vst [vmem:[%s643_s30 + $0x90] sm:$0xff] %v410_v13  ;;  %v413_v25 = vmax.f32 %v381_v15, 0.0  ;;  %443 = vst [vmem:[%s643_s30 + $0x98] sm:$0xff] %v411_v18  ;;  %v414_v30 = vmax.f32 %v382_v19, 0.0  ;;  %v383_v31 = vadd.f32 %v351_v20, %v241_v16  ;;  %v316_v35 = vmul.f32 %v595_v0, %v277_v17 }
  0x2b   : > { %v352_v32 = vadd.f32 %v613_v2, %v313_v21  ;;  %444 = vst [vmem:[%s643_s30 + $0xa0] sm:$0xff] %v412_v24  ;;  %v353_v36 = vadd.f32 %v613_v2, %v314_v27  ;;  %v354_v37 = vadd.f32 %v613_v2, %v315_v28  ;;  %v317_v39 = vmul.f32 %v595_v0, %v278_v22 }
  0x2c   : > { %445 = vst [vmem:[%s643_s30 + $0xa8] sm:$0xff] %v413_v25  ;;  %v318_v40 = vmul.f32 %v595_v0, %v279_v23  ;;  %446 = vst [vmem:[%s643_s30 + $0xb0] sm:$0xff] %v414_v30  ;;  %v415_v42 = vmax.f32 %v383_v31, 0.0  ;;  %v355_v44 = vadd.f32 %v613_v2, %v316_v35  ;;  %v319_v47 = vmul.f32 %v595_v0, %v280_v29 }
  0x2d   : > { %v384_v43 = vadd.f32 %v352_v32, %v242_v26  ;;  %v385_v48 = vadd.f32 %v353_v36, %v243_v33  ;;  %v386_v49 = vadd.f32 %v354_v37, %v244_v34  ;;  %v356_v50 = vadd.f32 %v613_v2, %v317_v39 }
  0x2e   : > { %v357_v51 = vadd.f32 %v613_v2, %v318_v40  ;;  %447 = vst [vmem:[%s643_s30 + $0xb8] sm:$0xff] %v415_v42  ;;  %v387_v54 = vadd.f32 %v355_v44, %v245_v38  ;;  %v358_v55 = vadd.f32 %v613_v2, %v319_v47  ;;  %v320_v56 = vmul.f32 %v595_v0, %v281_v41 }
  0x2f   : > { %v416_v53 = vmax.f32 %v384_v43, 0.0  ;;  %v417_v57 = vmax.f32 %v385_v48, 0.0  ;;  %v418_v58 = vmax.f32 %v386_v49, 0.0  ;;  %v388_v59 = vadd.f32 %v356_v50, %v246_v45 }
  0x30   : > { %v389_v60 = vadd.f32 %v357_v51, %v247_v46  ;;  %v419_v62 = vmax.f32 %v387_v54, 0.0  ;;  %v390_v63 = vadd.f32 %v358_v55, %v248_v52  ;;  %v359_v1 = vadd.f32 %v613_v2, %v320_v56 }
  0x31   : > { %448 = vst [vmem:[%s643_s30 + $0xc0] sm:$0xff] %v416_v53  ;;  %449 = vst [vmem:[%s643_s30 + $0xc8] sm:$0xff] %v417_v57  ;;  %v420_v3 = vmax.f32 %v388_v59, 0.0 }
  0x32   : > { %450 = vst [vmem:[%s643_s30 + $0xd0] sm:$0xff] %v418_v58  ;;  %v421_v4 = vmax.f32 %v389_v60, 0.0  ;;  %451 = vst [vmem:[%s643_s30 + $0xd8] sm:$0xff] %v419_v62  ;;  %v422_v0 = vmax.f32 %v390_v63, 0.0  ;;  %v391_v5 = vadd.f32 %v359_v1, %v249_v61 }
  0x33   : > { %452 = vst [vmem:[%s643_s30 + $0xe0] sm:$0xff] %v420_v3 }
  0x34   : > { %453 = vst [vmem:[%s643_s30 + $0xe8] sm:$0xff] %v421_v4  ;;  %454 = vst [vmem:[%s643_s30 + $0xf0] sm:$0xff] %v422_v0  ;;  %v423_v6 = vmax.f32 %v391_v5, 0.0 }
  0x36   : > { %455 = vst [vmem:[%s643_s30 + $0xf8] sm:$0xff] %v423_v6 }
  0x37 PF: > { %s14_s15 = sadd.s32 1, %s555_s15  }
  0x38   : > { %p11_p4 = scmp.ge.s32.totalorder %s14_s15, 4  }
  0x3a   :  { %13 = sbr.rel (!%p11_p4) target bundleno = 1 (0x1), region = 69 }

// kernel: residual_block_forward.3
= control target key start
LH: loop header
LB: loop body
LE: loop exit
PB: predicated region body
PF: predicated region fallthrough
CT: control target
= control target key end

     0   :  { %s4565_s12 = smov 0   ;;  %s6146_s0 = inlined_call_operand.vmem [shape: bf16[2,18,18,128], index: 0, kind: input, shape index: {}]   ;;  %s6147_s1 = inlined_call_operand.vmem [shape: bf16[1152,128], index: 1, kind: input, shape index: {}]   ;;  %s6148_s2 = inlined_call_operand.vmem [shape: f32[2,16,16,128], index: 2, kind: output, shape index: {0}]   ;;  %s6149_s3 = inlined_call_operand.vmem [shape: f32[2,2,128], index: 3, kind: output, shape index: {1}]  }
   0x1 LB: > { %s3412_s13 = sadd.s32 4294967295, %s4543_s12   ;;  %p3416_p0 = scmp.ge.s32.totalorder %s4543_s12, 1  ;;  %s4543_s12 = sphi %s4565_s12, %s14_s12  }
   0x2   : > { %p140_p1 = scmp.lt.s32.totalorder %s4543_s12, 3 }
   0x4   : > { %p141_p2 = pnand %p3416_p0, %p140_p1 }
   0x5   : > { %v4313_v0 = vld [vmem:[%s6147_s1 + $0x40] sm:$0xff] (!%p141_p2)   ;;  %p168_p3 = scmp.lt.s32.totalorder (!%p141_p2), %s3412_s13, 1  ;;  %v4315_v2 = vld [vmem:[%s6147_s1 + $0x48] sm:$0xff] (!%p141_p2)   ;;  %v4317_v4 = vld [vmem:[%s6147_s1 + $0x50] sm:$0xff] (!%p141_p2)   ;;  %vm521_vm0 = vsmask.f32 (!%p141_p2), 7424 }
   0x6   : > { %144 = sbr.rel (%p141_p2) target bundleno = 635 (0x27b), region = 28  ;;  %v4314_v1 = vld [vmem:[%s6147_s1] sm:$0xff] (!%p141_p2)   ;;  %3768 = vmatprep.subr.bf16.mxu0 (!%p141_p2), %v4313_v0  ;;  %4288 = vmatprep.subr.bf16.mxu1 (!%p141_p2), %v4313_v0  ;;  %v4316_v3 = vld [vmem:[%s6147_s1 + $0x8] sm:$0xff] (!%p141_p2)   ;;  %v4318_v5 = vld [vmem:[%s6147_s1 + $0x10] sm:$0xff] (!%p141_p2)   ;;  %vm778_vm1 = vcmask (!%p141_p2), 1046528   ;;  %vm3323_vm2 = vcmask (!%p141_p2), 1040384  }
   0x7   : > { %3769 = vmatpush3.bf16.msra.mxu0 (!%p141_p2), %v4314_v1  ;;  %4296 = vmatpush3.bf16.msra.mxu1 (!%p141_p2), %v4314_v1  ;;  %v4319_v6 = vld [vmem:[%s6147_s1 + $0x58] sm:$0xff] (!%p141_p2)   ;;  %v4321_v8 = vld [vmem:[%s6147_s1 + $0x60] sm:$0xff] (!%p141_p2)   ;;  %v4323_v10 = vld [vmem:[%s6147_s1 + $0x68] sm:$0xff] (!%p141_p2)  }
   0x8   : > { %3770 = vmatprep.subr.bf16.mxu0 (!%p141_p2), %v4315_v2  ;;  %4289 = vmatprep.subr.bf16.mxu1 (!%p141_p2), %v4315_v2  ;;  %v4320_v7 = vld [vmem:[%s6147_s1 + $0x18] sm:$0xff] (!%p141_p2)   ;;  %v4322_v9 = vld [vmem:[%s6147_s1 + $0x20] sm:$0xff] (!%p141_p2)   ;;  %v4324_v17 = vld [vmem:[%s6147_s1 + $0x28] sm:$0xff] (!%p141_p2)  }
   0x9   : > { %v4325_v21 = vld [vmem:[%s6147_s1 + $0x70] sm:$0xff] (!%p141_p2)   ;;  %v4327_v31 = vld [vmem:[%s6147_s1 + $0x78] sm:$0xff] (!%p141_p2)   ;;  %v4333_v37 = vld [vmem:[%s6147_s1 + $0xc0] sm:$0xff] (!%p141_p2)  }
   0xa   : > { %v4326_v26 = vld [vmem:[%s6147_s1 + $0x30] sm:$0xff] (!%p141_p2)   ;;  %v4328_v34 = vld [vmem:[%s6147_s1 + $0x38] sm:$0xff] (!%p141_p2)   ;;  %v4334_v40 = vld [vmem:[%s6147_s1 + $0x140] sm:$0xff] (!%p141_p2)  }
   0xb   : > { %3771 = vmatpush3.bf16.msra.mxu0 (!%p141_p2), %v4316_v3  ;;  %4297 = vmatpush3.bf16.msra.mxu1 (!%p141_p2), %v4316_v3  ;;  %v4335_v46 = vld [vmem:[%s6147_s1 + $0x80] sm:$0xff] (!%p141_p2)   ;;  %v4337_v57 = vld [vmem:[%s6147_s1 + $0xc8] sm:$0xff] (!%p141_p2)   ;;  %v4343_v2 = vld [vmem:[%s6147_s1 + $0xd0] sm:$0xff] (!%p141_p2)  }
   0xc   : > { %3772 = vmatprep.subr.bf16.mxu0 (!%p141_p2), %v4317_v4  ;;  %4290 = vmatprep.subr.bf16.mxu1 (!%p141_p2), %v4317_v4  ;;  %v4336_v47 = vld [vmem:[%s6147_s1 + $0x100] sm:$0xff] (!%p141_p2)   ;;  %v4338_v59 = vld [vmem:[%s6147_s1 + $0x88] sm:$0xff] (!%p141_p2)  }
   0xd   : > { %s6151_s13 = smov (!%p168_p3, %s3412_s13), 1  ;;  %v4346_v63 = vld [vmem:[%s6147_s1 + $0x148] sm:$0xff]  }
   0xe   : > { %s4304_s28 = smul.u32 216, %s6151_s13  ;;  %v4348_v3 = vld [vmem:[%s6147_s1 + $0x108] sm:$0xff]   ;;  %s3420_s20 = sshll.u32 %s6151_s13, 1 }
   0xf   : > { %3773 = vmatpush3.bf16.msra.mxu0 %v4318_v5  ;;  %4298 = vmatpush3.bf16.msra.mxu1 %v4318_v5  ;;  %s181_s23 = scalar_lea.vmem %s6149_s3, %s3420_s20 }
  0x10   : > { %3774 = vmatprep.subr.bf16.mxu0 %v4319_v6  ;;  %4291 = vmatprep.subr.bf16.mxu1 %v4319_v6  ;;  %s4606_s8 = scalar_lea.vmem %s6146_s0, %s4304_s28 }
  0x11   : > { %v183_v11 = vld [vmem:[%s4606_s8] sm:$0xf]  ;;  %v4616_v12 = vld [vmem:[%s4606_s8 + $0x4] sm:$0xf]  ;;  %v207_v15 = vld [vmem:[%s4606_s8 + $0x90] sm:$0xf] }
  0x12   : > { %v4619_v13 = vcombine.low %v183_v11, %v4616_v12  ;;  %v4622_v14 = vld [vmem:[%s4606_s8 + $0x8] ss:$0 sps:$4 sm:$0x11]   ;;  %v208_v16 = vld [vmem:[%s4606_s8 + $0x94] sm:$0xf] }
  0x13   : > { %3775 = vmatpush3.bf16.msra.mxu0 %v4320_v7  ;;  %4299 = vmatpush3.bf16.msra.mxu1 %v4320_v7  ;;  %v530_v20 = vshll.u32 %v4622_v14, 16  ;;  %v3561_v22 = vcombine.low %v207_v15, %v208_v16  ;;  %v4332_v23 = vld [vmem:[%s4606_s8 + $0x98] ss:$0 sps:$4 sm:$0x11]   ;;  %v185_v38 = vld [vmem:[%s4606_s8 + $0xc] sm:$0xf] }
  0x14   : > { %3776 = vmatprep.subr.bf16.mxu0 %v4321_v8  ;;  %4292 = vmatprep.subr.bf16.mxu1 %v4321_v8  ;;  %v523_v18 = vshrl.u32 %v4619_v13, 16  ;;  %v525_v19 = vshll.u32 %v4619_v13, 16  ;;  %v674_v29 = vshll.u32 %v4332_v23, 16  ;;  %v4651_v39 = vld [vmem:[%s4606_s8 + $0x10] sm:$0xf] }
  0x15   : > { %v532_v25 = vrot.slane %v530_v20, 1  ;;  %v667_v27 = vshrl.u32 %v3561_v22, 16  ;;  %v669_v28 = vshll.u32 %v3561_v22, 16  ;;  %v3550_v41 = vcombine.low %v185_v38, %v4651_v39  ;;  %v4658_v42 = vld [vmem:[%s4606_s8 + $0x14] ss:$0 sps:$4 sm:$0x11]  }
  0x16   : > { %v527_v24 = vrot.slane %v525_v19, 1  ;;  %v676_v33 = vrot.slane %v674_v29, 1  ;;  %v209_v44 = vld [vmem:[%s4606_s8 + $0x9c] sm:$0xf]  ;;  %v210_v45 = vld [vmem:[%s4606_s8 + $0xa0] sm:$0xf] }
  0x17   : > { %3777 = vmatpush3.bf16.msra.mxu0 %v4322_v9  ;;  %4300 = vmatpush3.bf16.msra.mxu1 %v4322_v9  ;;  %v671_v32 = vrot.slane %v669_v28, 1  ;;  %v535_v48 = vshrl.u32 %v3550_v41, 16  ;;  %v537_v49 = vshll.u32 %v3550_v41, 16  ;;  %v542_v50 = vshll.u32 %v4658_v42, 16  ;;  %v187_v4 = vld [vmem:[%s4606_s8 + $0x18] sm:$0xf] }
  0x18   : > { %3778 = vmatprep.subr.bf16.mxu0 %v4323_v10  ;;  %4293 = vmatprep.subr.bf16.mxu1 %v4323_v10  ;;  %v528_v30 = vor.u32 %v527_v24, %v523_v18  ;;  %v3562_v51 = vcombine.low %v209_v44, %v210_v45  ;;  %v4342_v52 = vld [vmem:[%s4606_s8 + $0xa4] ss:$0 sps:$4 sm:$0x11]   ;;  %v4690_v5 = vld [vmem:[%s4606_s8 + $0x1c] sm:$0xf]  ;;  %v4344_v7 = vld [vmem:[%s6147_s1 + $0x90] sm:$0xff]  }
  0x19   : > { %v672_v36 = vor.u32 %v671_v32, %v667_v27  ;;  %v539_v53 = vrot.slane %v537_v49, 1  ;;  %v544_v54 = vrot.slane %v542_v50, 1  ;;  %v686_v58 = vshll.u32 %v4342_v52, 16  ;;  %v4698_v9 = vld [vmem:[%s4606_s8 + $0x20] ss:$0 sps:$4 sm:$0x11]  }
  0x1a   : > { %v533_v35 = vsel %vm521_vm0, %v528_v30, %v532_v25  ;;  %v679_v55 = vshrl.u32 %v3562_v51, 16  ;;  %v681_v56 = vshll.u32 %v3562_v51, 16  ;;  %v3551_v8 = vcombine.low %v187_v4, %v4690_v5  ;;  %v4345_v10 = vld [vmem:[%s6147_s1 + $0xd8] sm:$0xff]   ;;  %v211_v11 = vld [vmem:[%s4606_s8 + $0xa8] sm:$0xf]  ;;  %v4353_v29 = vld [vmem:[%s6147_s1 + $0xe0] sm:$0xff]  }
  0x1b   : > { %3779 = vmatpush3.bf16.msra.mxu0 %v4324_v17  ;;  %4301 = vmatpush3.bf16.msra.mxu1 %v4324_v17  ;;  %v677_v43 = vsel %vm521_vm0, %v672_v36, %v676_v33  ;;  %v540_v60 = vor.u32 %v539_v53, %v535_v48  ;;  %v688_v62 = vrot.slane %v686_v58, 1  ;;  %v554_v17 = vshll.u32 %v4698_v9, 16  ;;  %v4352_v19 = vld [vmem:[%s4606_s8 + $0xb0] ss:$0 sps:$4 sm:$0x11]   ;;  %v4347_v25 = vld [vmem:[%s6147_s1 + $0x98] sm:$0xff]  }
  0x1c   : > { %3780 = vmatprep.subr.bf16.mxu0 %v4325_v21  ;;  %4294 = vmatprep.subr.bf16.mxu1 %v4325_v21  ;;  %v683_v61 = vrot.slane %v681_v56, 1  ;;  %v547_v15 = vshrl.u32 %v3551_v8, 16  ;;  %v549_v16 = vshll.u32 %v3551_v8, 16  ;;  %v698_v24 = vshll.u32 %v4352_v19, 16  ;;  %v189_v30 = vld [vmem:[%s4606_s8 + $0x24] sm:$0xf] }
  0x1d   : > { %2379 = vmatprep.mubr.bf16.mxu0 %v533_v35  ;;  %2475 = vmatprep.mubr.bf16.mxu1 %v677_v43  ;;  %v545_v0 = vsel %vm521_vm0, %v540_v60, %v544_v54  ;;  %v556_v21 = vrot.slane %v554_v17, 1  ;;  %v4723_v36 = vld [vmem:[%s4606_s8 + $0x2c] ss:$0 sps:$4 sm:$0x11]   ;;  %v213_v38 = vld [vmem:[%s4606_s8 + $0xb4] sm:$0xf] }
  0x1e   : > { %v684_v1 = vor.u32 %v683_v61, %v679_v55  ;;  %v551_v20 = vrot.slane %v549_v16, 1  ;;  %v700_v28 = vrot.slane %v698_v24, 1  ;;  %v566_v45 = vshll.u32 %v4723_v36, 16  ;;  %v4356_v48 = vld [vmem:[%s6147_s1 + $0xa8] sm:$0xff]   ;;  %v4362_v52 = vld [vmem:[%s6147_s1 + $0x150] sm:$0xff]   ;;  %v4366_v17 = vld [vmem:[%s6147_s1 + $0xb8] sm:$0xff]  }
  0x1f   : > { %3781 = vmatpush3.bf16.msra.mxu0 %v4326_v26  ;;  %4302 = vmatpush3.bf16.msra.mxu1 %v4326_v26  ;;  %v231_v16 = vld [vmem:[%s4606_s8] sm:$0xe]  ;;  %v4375_v24 = vld [vmem:[%s6147_s1 + $0x118] sm:$0xff]  }
  0x20   : > { %3782 = vmatprep.subr.bf16.mxu0 %v4327_v31  ;;  %4295 = vmatprep.subr.bf16.mxu1 %v4327_v31  ;;  %v689_v6 = vsel %vm521_vm0, %v684_v1, %v688_v62  ;;  %v552_v26 = vor.u32 %v551_v20, %v547_v15  ;;  %v4715_v31 = vld [vmem:[%s4606_s8 + $0x28] sm:$0xf]  ;;  %v568_v50 = vrot.slane %v566_v45, 1  ;;  %v191_v62 = vld [vmem:[%s4606_s8 + $0x30] sm:$0xf]  ;;  %v4372_v20 = vld [vmem:[%s6147_s1 + $0x1c0] sm:$0xff]  }
  0x21   : > { %v3552_v35 = vcombine.low %v189_v30, %v4715_v31  ;;  %v4796_v30 = vld [vmem:[%s4606_s8 + $0x44] ss:$0 sps:$4 sm:$0x11]   ;;  %v4387_v45 = vld [vmem:[%s6147_s1 + $0x1c8] sm:$0xff]  }
  0x22   : > { %v557_v32 = vsel %vm521_vm0, %v552_v26, %v556_v21  ;;  %v4790_v26 = vld [vmem:[%s4606_s8 + $0x40] sm:$0xf] }
  0x23   : > { %3783 = vmatpush3.bf16.msra.mxu0 %v4328_v34  ;;  %4303 = vmatpush3.bf16.msra.mxu1 %v4328_v34  ;;  %v4354_v34 = vld [vmem:[%s6147_s1 + $0xa0] sm:$0xff]   ;;  %v559_v43 = vshrl.u32 %v3552_v35, 16  ;;  %v561_v44 = vshll.u32 %v3552_v35, 16 }
  0x24   : > { %3880 = vmatprep.subr.bf16.mxu1 %v4333_v37  ;;  %3992 = vmatprep.subr.bf16.mxu0 %v4334_v40  ;;  %v4355_v37 = vld [vmem:[%s6147_s1 + $0xe8] sm:$0xff]   ;;  %v214_v40 = vld [vmem:[%s4606_s8 + $0xb8] sm:$0xf] }
  0x25   : > { %v563_v49 = vrot.slane %v561_v44, 1  ;;  %v195_v44 = vld [vmem:[%s4606_s8 + $0x48] sm:$0xf] }
  0x26   : > { %2380 = vmatmul.mubr.bf16.vlgmr.msra.gmra.mrb[0].mxu0 %v4619_v13  ;;  %2476 = vmatmul.mubr.bf16.vlgmr.msra.gmra.mrb[0].mxu1 %v3561_v22  ;;  %v212_v13 = vld [vmem:[%s4606_s8 + $0xac] sm:$0xf] }
  0x27   : > { %3881 = vmatpush3.bf16.msra.mxu1 %v4335_v46  ;;  %3993 = vmatpush3.bf16.msra.mxu0 %v4336_v47  ;;  %v3563_v18 = vcombine.low %v211_v11, %v212_v13  ;;  %v4360_v46 = vld [vmem:[%s4606_s8 + $0xbc] ss:$0 sps:$4 sm:$0x11]   ;;  %v3564_v47 = vcombine.low %v213_v38, %v214_v40  ;;  %v564_v55 = vor.u32 %v563_v49, %v559_v43 }
  0x28   : > { %3882 = vmatprep.subr.bf16.mxu1 %v4337_v57  ;;  %2387 = vmatprep.mubr.bf16.mxu0 %v545_v0  ;;  %v4361_v57 = vld [vmem:[%s6147_s1 + $0xf0] sm:$0xff]  }
  0x29   : > { %3994 = vmatprep.subr.bf16.mxu0 %v4346_v63  ;;  %2483 = vmatprep.mubr.bf16.mxu1 %v689_v6  ;;  %v691_v22 = vshrl.u32 %v3563_v18, 16  ;;  %v693_v23 = vshll.u32 %v3563_v18, 16  ;;  %v703_v53 = vshrl.u32 %v3564_v47, 16  ;;  %v705_v54 = vshll.u32 %v3564_v47, 16  ;;  %v4748_v63 = vld [vmem:[%s4606_s8 + $0x34] sm:$0xf] }
  0x2a   : > { %v569_v60 = vsel %vm521_vm0, %v564_v55, %v568_v50  ;;  %v4363_v0 = vld [vmem:[%s6147_s1 + $0xb0] sm:$0xff]   ;;  %v3553_v1 = vcombine.low %v191_v62, %v4748_v63  ;;  %v4365_v6 = vld [vmem:[%s6147_s1 + $0xf8] sm:$0xff]  }
  0x2b   : > { %3883 = vmatpush3.bf16.msra.mxu1 %v4338_v59  ;;  %3995 = vmatpush3.bf16.msra.mxu0 %v4348_v3  ;;  %v695_v27 = vrot.slane %v693_v23, 1  ;;  %v707_v58 = vrot.slane %v705_v54, 1  ;;  %v4364_v59 = vld [vmem:[%s6147_s1 + $0x110] sm:$0xff]   ;;  %v780_v3 = vrot.slane %v4622_v14, 1  ;;  %v3581_v14 = vcombine.low %v231_v16, %v4616_v12  ;;  %v4374_v12 = vld [vmem:[%s6147_s1 + $0x158] sm:$0xff]   ;;  %v4373_v23 = vld [vmem:[%s6147_s1 + $0x180] sm:$0xff]  }
  0x2c   : > { %3884 = vmatprep.subr.bf16.mxu1 %v4343_v2  ;;  %3996 = vmatprep.subr.bf16.mxu0 %v4362_v52  ;;  %v4755_v2 = vld [vmem:[%s4606_s8 + $0x38] ss:$0 sps:$4 sm:$0x11]   ;;  %v573_v11 = vshll.u32 %v3553_v1, 16 }
  0x2d   : > { %v696_v33 = vor.u32 %v695_v27, %v691_v22  ;;  %v708_v61 = vor.u32 %v707_v58, %v703_v53  ;;  %v578_v13 = vshll.u32 %v4755_v2, 16  ;;  %v779_v21 = vrot.slane %v3581_v14, 1  ;;  %v4826_v53 = vld [vmem:[%s4606_s8 + $0x28] sm:$0xf]  ;;  %v233_v58 = vld [vmem:[%s4606_s8 + $0x18] sm:$0xe] }
  0x2e   : > { %2388 = vmatmul.mubr.bf16.gmra.mrb[4].mxu0 %v3550_v41  ;;  %2484 = vmatmul.mubr.bf16.gmra.mrb[4].mxu1 %v3562_v51  ;;  %v710_v51 = vshll.u32 %v4360_v46, 16  ;;  %v786_v14 = vrot.slane %v4698_v9, 1 }
  0x2f   : > { %3885 = vmatpush3.bf16.msra.mxu1 %v4344_v7  ;;  %2395 = vmatprep.mubr.bf16.mxu0 %v557_v32  ;;  %v701_v41 = vsel %vm521_vm0, %v696_v33, %v700_v28  ;;  %v3421_v7 = vld [vmem:[%s4606_s8 + $0xc] sm:$0xf]  ;;  %v580_v19 = vrot.slane %v578_v13, 1  ;;  %v781_v28 = vsel %vm778_vm1, %v779_v21, %v780_v3  ;;  %v3423_v32 = vld [vmem:[%s4606_s8 + $0x18] sm:$0xf]  ;;  %v4386_v33 = vld [vmem:[%s6147_s1 + $0x160] sm:$0xff]   ;;  %v3583_v3 = vcombine.low %v233_v58, %v4690_v5 }
  0x30   : > { %3886 = vmatprep.subr.bf16.mxu1 %v4345_v10  ;;  %2491 = vmatprep.mubr.bf16.mxu1 %v701_v41  ;;  %v712_v56 = vrot.slane %v710_v51, 1  ;;  %v571_v10 = vshrl.u32 %v3553_v1, 16  ;;  %v590_v41 = vshll.u32 %v4796_v30, 16  ;;  %v4823_v51 = vld [vmem:[%s4606_s8 + $0x50] ss:$0 sps:$4 sm:$0x11]  }
  0x31   : > { %3997 = vmatpush3.bf16.msra.mxu0 %v4364_v59  ;;  %v4389_v59 = vld [vmem:[%s6147_s1 + $0x188] sm:$0xff]   ;;  %v785_v16 = vrot.slane %v3583_v3, 1  ;;  %v4909_v58 = vld [vmem:[%s4606_s8 + $0x74] ss:$0 sps:$4 sm:$0x11]  }
  0x32   : > { %v713_v4 = vsel %vm521_vm0, %v708_v61, %v712_v56  ;;  %3998 = vmatprep.subr.bf16.mxu0 %v4374_v12  ;;  %v592_v49 = vrot.slane %v590_v41, 1  ;;  %v4395_v13 = vld [vmem:[%s6147_s1 + $0x168] sm:$0xff]   ;;  %v234_v12 = vld [vmem:[%s4606_s8 + $0x24] sm:$0xe]  ;;  %v638_v3 = vshll.u32 %v4909_v58, 16 }
  0x33   : > { %3887 = vmatpush3.bf16.msra.mxu1 %v4347_v25  ;;  %v193_v25 = vld [vmem:[%s4606_s8 + $0x3c] sm:$0xf] }
  0x34   : > { %3888 = vmatprep.subr.bf16.mxu1 %v4353_v29  ;;  %v3554_v29 = vcombine.low %v193_v25, %v4790_v26  ;;  %v787_v25 = vsel %vm778_vm1, %v785_v16, %v786_v14  ;;  %v3431_v16 = vld [vmem:[%s4606_s8 + $0x48] sm:$0xf]  ;;  %v236_v14 = vld [vmem:[%s4606_s8 + $0x3c] sm:$0xe] }
  0x35   : > { %3999 = vmatpush3.bf16.msra.mxu0 %v4375_v24 }
  0x36   : > { %2396 = vmatmul.mubr.bf16.gmra.mrb[8].mxu0 %v3551_v8  ;;  %2492 = vmatmul.mubr.bf16.gmra.mrb[8].mxu1 %v3563_v18  ;;  %v4764_v8 = vld [vmem:[%s4606_s8 + $0x10] sm:$0xf]  ;;  %v575_v18 = vrot.slane %v573_v11, 1  ;;  %v583_v38 = vshrl.u32 %v3554_v29, 16  ;;  %v585_v40 = vshll.u32 %v3554_v29, 16 }
  0x37   : > { %3889 = vmatpush3.bf16.msra.mxu1 %v4354_v34  ;;  %2403 = vmatprep.mubr.bf16.mxu0 %v569_v60  ;;  %v4768_v15 = vcombine.low %v3421_v7, %v4764_v8  ;;  %v4803_v34 = vld [vmem:[%s4606_s8 + $0x1c] sm:$0xf]  ;;  %v4844_v7 = vld [vmem:[%s4606_s8 + $0x58] sm:$0xf] }
  0x38   : > { %3890 = vmatprep.subr.bf16.mxu1 %v4355_v37  ;;  %2499 = vmatprep.mubr.bf16.mxu1 %v713_v4  ;;  %v576_v22 = vor.u32 %v575_v18, %v571_v10  ;;  %v783_v37 = vrot.slane %v4658_v42, 1  ;;  %v4809_v43 = vcombine.low %v3423_v32, %v4803_v34  ;;  %v4817_v42 = vld [vmem:[%s4606_s8 + $0x4c] sm:$0xf]  ;;  %v4848_v11 = vld [vmem:[%s4606_s8 + $0x5c] ss:$0 sps:$4 sm:$0x11]  }
  0x39   : > { %4000 = vmatprep.subr.bf16.mxu0 %v4386_v33  ;;  %v3555_v50 = vcombine.low %v195_v44, %v4817_v42  ;;  %v4858_v18 = vld [vmem:[%s4606_s8 + $0x34] sm:$0xf]  ;;  %v614_v21 = vshll.u32 %v4848_v11, 16 }
  0x3a   : > { %v581_v27 = vsel %vm521_vm0, %v576_v22, %v580_v19  ;;  %v4396_v22 = vld [vmem:[%s6147_s1 + $0x128] sm:$0xff]   ;;  %v4402_v32 = vld [vmem:[%s6147_s1 + $0x1d0] sm:$0xff]  }
  0x3b   : > { %3891 = vmatpush3.bf16.msra.mxu1 %v4356_v48  ;;  %v587_v48 = vrot.slane %v585_v40, 1  ;;  %v595_v55 = vshrl.u32 %v3555_v50, 16  ;;  %v597_v56 = vshll.u32 %v3555_v50, 16  ;;  %v616_v24 = vrot.slane %v614_v21, 1  ;;  %v4934_v21 = vld [vmem:[%s4606_s8 + $0x4c] sm:$0xf] }
  0x3c   : > { %3892 = vmatprep.subr.bf16.mxu1 %v4361_v57  ;;  %v602_v57 = vshll.u32 %v4823_v51, 16  ;;  %v789_v40 = vrot.slane %v4723_v36, 1  ;;  %v4409_v36 = vld [vmem:[%s6147_s1 + $0x170] sm:$0xff]  }
  0x3d   : > { %v588_v54 = vor.u32 %v587_v48, %v583_v38  ;;  %v4893_v48 = vld [vmem:[%s4606_s8 + $0x40] sm:$0xf] }
  0x3e   : > { %2404 = vmatmul.mubr.bf16.gmra.mrb[12].mxu0 %v3552_v35  ;;  %2500 = vmatmul.mubr.bf16.gmra.mrb[12].mxu1 %v3564_v47  ;;  %v232_v35 = vld [vmem:[%s4606_s8 + $0xc] sm:$0xe]  ;;  %v3425_v47 = vld [vmem:[%s4606_s8 + $0x24] sm:$0xf] }
  0x3f   : > { %3893 = vmatpush3.bf16.msra.mxu1 %v4363_v0  ;;  %2540 = vmatprep.mubr.bf16.mxu1 %v4768_v15  ;;  %v3582_v46 = vcombine.low %v232_v35, %v4651_v39  ;;  %v4388_v39 = vld [vmem:[%s6147_s1 + $0x120] sm:$0xff]   ;;  %v4838_v61 = vcombine.low %v3425_v47, %v4826_v53  ;;  %v593_v62 = vsel %vm521_vm0, %v588_v54, %v592_v49  ;;  %v599_v0 = vrot.slane %v597_v56, 1  ;;  %v4881_v35 = vld [vmem:[%s4606_s8 + $0x68] ss:$0 sps:$4 sm:$0x11]  }
  0x40   : > { %3894 = vmatprep.subr.bf16.mxu1 %v4365_v6  ;;  %2411 = vmatprep.mubr.bf16.mxu0 %v581_v27  ;;  %v197_v6 = vld [vmem:[%s4606_s8 + $0x54] sm:$0xf]  ;;  %v3429_v47 = vld [vmem:[%s4606_s8 + $0x3c] sm:$0xf]  ;;  %v235_v49 = vld [vmem:[%s4606_s8 + $0x30] sm:$0xe] }
  0x41   : > { %v782_v52 = vrot.slane %v3582_v46, 1  ;;  %4001 = vmatpush3.bf16.msra.mxu0 %v4388_v39  ;;  %v600_v4 = vor.u32 %v599_v0, %v595_v55  ;;  %v3556_v10 = vcombine.low %v197_v6, %v4844_v7  ;;  %v626_v46 = vshll.u32 %v4881_v35, 16  ;;  %v201_v39 = vld [vmem:[%s4606_s8 + $0x6c] sm:$0xf]  ;;  %v4902_v54 = vld [vmem:[%s4606_s8 + $0x70] sm:$0xf] }
  0x42   : > { %4002 = vmatprep.subr.bf16.mxu0 %v4395_v13  ;;  %v3585_v56 = vcombine.low %v235_v49, %v4748_v63 }
  0x43   : > { %3895 = vmatpush3.bf16.msra.mxu1 %v4366_v17  ;;  %v784_v60 = vsel %vm778_vm1, %v782_v52, %v783_v37  ;;  %v3427_v17 = vld [vmem:[%s4606_s8 + $0x30] sm:$0xf]  ;;  %v607_v19 = vshrl.u32 %v3556_v10, 16  ;;  %v628_v52 = vrot.slane %v626_v46, 1  ;;  %v4969_v46 = vld [vmem:[%s4606_s8 + $0x58] sm:$0xf] }
  0x44   : > { %4104 = vmatprep.subr.bf16.mxu1 %v4372_v20  ;;  %v609_v20 = vshll.u32 %v3556_v10, 16  ;;  %v4868_v27 = vcombine.low %v3427_v17, %v4858_v18  ;;  %v4403_v37 = vld [vmem:[%s6147_s1 + $0x190] sm:$0xff]   ;;  %v791_v6 = vrot.slane %v3585_v56, 1 }
  0x45   : > { %4003 = vmatpush3.bf16.msra.mxu0 %v4396_v22  ;;  %v3586_v22 = vcombine.low %v236_v14, %v4790_v26 }
  0x46   : > { %2412 = vmatmul.mubr.bf16.gmra.mrb[16].mxu0 %v3553_v1  ;;  %2541 = vmatmul.mubr.bf16.vlgmr.msra.gmra.mrb[16].mxu1 %v781_v28  ;;  %v604_v1 = vrot.slane %v602_v57, 1  ;;  %v611_v9 = vrot.slane %v609_v20, 1  ;;  %v199_v28 = vld [vmem:[%s4606_s8 + $0x60] sm:$0xf]  ;;  %v4906_v57 = vcombine.low %v201_v39, %v4902_v54  ;;  %v640_v20 = vrot.slane %v638_v3, 1 }
  0x47   : > { %4105 = vmatpush3.bf16.msra.mxu1 %v4373_v23  ;;  %2548 = vmatprep.mubr.bf16.mxu1 %v4809_v43  ;;  %v3584_v23 = vcombine.low %v234_v12, %v4715_v31  ;;  %v4429_v39 = vld [vmem:[%s6147_s1 + $0x1e0] sm:$0xff]  }
  0x48   : > { %4106 = vmatprep.subr.bf16.mxu1 %v4387_v45  ;;  %2419 = vmatprep.mubr.bf16.mxu0 %v593_v62  ;;  %v605_v5 = vsel %vm521_vm0, %v600_v4, %v604_v1  ;;  %v612_v33 = vor.u32 %v611_v9, %v607_v19  ;;  %v792_v62 = vrot.slane %v4755_v2, 1  ;;  %v631_v1 = vshrl.u32 %v4906_v57, 16  ;;  %v4410_v4 = vld [vmem:[%s6147_s1 + $0x130] sm:$0xff]   ;;  %v4925_v2 = vld [vmem:[%s4606_s8 + $0x7c] sm:$0xf] }
  0x49   : > { %v788_v38 = vrot.slane %v3584_v23, 1  ;;  %4004 = vmatprep.subr.bf16.mxu0 %v4409_v36  ;;  %v633_v63 = vshll.u32 %v4906_v57, 16  ;;  %v4416_v23 = vld [vmem:[%s6147_s1 + $0x1d8] sm:$0xff]   ;;  %v237_v36 = vld [vmem:[%s4606_s8 + $0x48] sm:$0xe] }
  0x4a   : > { %v617_v41 = vsel %vm521_vm0, %v612_v33, %v616_v24  ;;  %4005 = vmatpush3.bf16.msra.mxu0 %v4410_v4  ;;  %v793_v9 = vsel %vm778_vm1, %v791_v6, %v792_v62  ;;  %v4946_v24 = vcombine.low %v3431_v16, %v4934_v21  ;;  %v4990_v62 = vld [vmem:[%s6147_s1 + $0x200] sm:$0xff]   ;;  %v798_v4 = vrot.slane %v4823_v51, 1 }
  0x4b   : > { %4107 = vmatpush3.bf16.msra.mxu1 %v4389_v59  ;;  %v790_v59 = vsel %vm778_vm1, %v788_v38, %v789_v40  ;;  %v635_v13 = vrot.slane %v633_v63, 1  ;;  %v4418_v38 = vld [vmem:[%s6147_s1 + $0x178] sm:$0xff]   ;;  %v3435_v6 = vld [vmem:[%s4606_s8 + $0x60] sm:$0xf]  ;;  %v5005_v51 = vld [vmem:[%s4606_s8 + $0x64] sm:$0xf] }
  0x4c   : > { %4108 = vmatprep.subr.bf16.mxu1 %v4402_v32  ;;  %v4419_v40 = vld [vmem:[%s6147_s1 + $0x138] sm:$0xff]   ;;  %4006 = vmatprep.subr.bf16.mxu0 %v4418_v38 }
  0x4d   : > { %v636_v19 = vor.u32 %v635_v13, %v631_v1 }
  0x4e   : > { %2420 = vmatmul.mubr.bf16.gmra.mrb[20].mxu0 %v3554_v29  ;;  %2549 = vmatmul.mubr.bf16.gmra.mrb[20].mxu1 %v784_v60  ;;  %v4872_v29 = vld [vmem:[%s4606_s8 + $0x64] sm:$0xf]  ;;  %v4913_v60 = vcombine.low %v3429_v47, %v4893_v48 }
  0x4f   : > { %2556 = vmatprep.mubr.bf16.mxu1 %v4838_v61  ;;  %2427 = vmatprep.mubr.bf16.mxu0 %v605_v5  ;;  %v4878_v31 = vcombine.low %v199_v28, %v4872_v29  ;;  %v203_v5 = vld [vmem:[%s4606_s8 + $0x78] sm:$0xf]  ;;  %v641_v32 = vsel %vm521_vm0, %v636_v19, %v640_v20  ;;  %v238_v19 = vld [vmem:[%s4606_s8 + $0x54] sm:$0xe] }
  0x50   : > { %4109 = vmatpush3.bf16.msra.mxu1 %v4403_v37  ;;  %v4931_v17 = vcombine.low %v203_v5, %v4925_v2  ;;  %v4417_v37 = vld [vmem:[%s6147_s1 + $0x198] sm:$0xff]   ;;  %4007 = vmatpush3.bf16.msra.mxu0 %v4419_v40  ;;  %v4431_v5 = vld [vmem:[%s6147_s1 + $0x1a0] sm:$0xff]  }
  0x51   : > { %v619_v44 = vshrl.u32 %v4878_v31, 16  ;;  %v621_v45 = vshll.u32 %v4878_v31, 16  ;;  %4110 = vmatprep.subr.bf16.mxu1 %v4416_v23  ;;  %4240 = vmatprep.subr.bf16.mxu0 %v4990_v62  ;;  %v3470_v40 = vld [vmem:[%s4606_s8 + $0x18] sm:$0xe] }
  0x52   : > { %v645_v12 = vshll.u32 %v4931_v17, 16  ;;  %v643_v28 = vshrl.u32 %v4931_v17, 16 }
  0x54   : > { %v647_v26 = vrot.slane %v645_v12, 1  ;;  %4111 = vmatpush3.bf16.msra.mxu1 %v4417_v37  ;;  %v5011_v12 = vcombine.low %v3435_v6, %v5005_v51  ;;  %v239_v37 = vld [vmem:[%s4606_s8 + $0x60] sm:$0xe] }
  0x55   : > { %4112 = vmatprep.subr.bf16.mxu1 %v4429_v39 }
  0x56   : > { %2428 = vmatmul.mubr.bf16.gmra.mrb[24].mxu0 %v3555_v50  ;;  %2557 = vmatmul.mubr.bf16.gmra.mrb[24].mxu1 %v787_v25  ;;  %v623_v50 = vrot.slane %v621_v45, 1  ;;  %v795_v25 = vrot.slane %v4796_v30, 1  ;;  %v794_v30 = vrot.slane %v3586_v22, 1  ;;  %v3433_v45 = vld [vmem:[%s4606_s8 + $0x54] sm:$0xf]  ;;  %v3588_v22 = vcombine.low %v238_v19, %v4844_v7 }
  0x57   : > { %2435 = vmatprep.mubr.bf16.mxu0 %v617_v41  ;;  %2564 = vmatprep.mubr.bf16.mxu1 %v4868_v27  ;;  %v205_v41 = vld [vmem:[%s4606_s8 + $0x84] sm:$0xf]  ;;  %v4984_v56 = vcombine.low %v3433_v45, %v4969_v46  ;;  %v3589_v45 = vcombine.low %v239_v37, %v4872_v29  ;;  %v804_v29 = vrot.slane %v4881_v35, 1 }
  0x58   : > { %v624_v55 = vor.u32 %v623_v50, %v619_v44  ;;  %v4964_v44 = vld [vmem:[%s4606_s8 + $0x88] sm:$0xf]  ;;  %v4976_v50 = vld [vmem:[%s4606_s8 + $0x8c] ss:$0 sps:$4 sm:$0x11]   ;;  %4113 = vmatpush3.bf16.msra.mxu1 %v4431_v5  ;;  %v800_v7 = vrot.slane %v3588_v22, 1 }
  0x59   : > { %v4972_v47 = vcombine.low %v205_v41, %v4964_v44  ;;  %v662_v3 = vshll.u32 %v4976_v50, 16  ;;  %v803_v39 = vrot.slane %v3589_v45, 1  ;;  %v4453_v5 = vld [vmem:[%s6147_s1 + $0x1b0] sm:$0xff]   ;;  %v4438_v22 = vld [vmem:[%s4606_s8 + $0x2c] ss:$0 sps:$4 sm:$0x11]  }
  0x5a   : > { %v629_v0 = vsel %vm521_vm0, %v624_v55, %v628_v52  ;;  %v796_v55 = vsel %vm778_vm1, %v794_v30, %v795_v25  ;;  %v4440_v25 = vld [vmem:[%s6147_s1 + $0x1e8] sm:$0xff]  }
  0x5b   : > { %v657_v52 = vshll.u32 %v4972_v47, 16  ;;  %v655_v1 = vshrl.u32 %v4972_v47, 16  ;;  %v664_v14 = vrot.slane %v662_v3, 1  ;;  %4114 = vmatprep.subr.bf16.mxu1 %v4440_v25  ;;  %v4442_v30 = vld [vmem:[%s6147_s1 + $0x1a8] sm:$0xff]   ;;  %v3471_v3 = vld [vmem:[%s4606_s8 + $0x24] sm:$0xe] }
  0x5c   : > { %4115 = vmatpush3.bf16.msra.mxu1 %v4442_v30  ;;  %v1014_v25 = vshll.u32 %v4838_v61, 16  ;;  %v3472_v30 = vld [vmem:[%s4606_s8 + $0x30] sm:$0xe] }
  0x5d   : > { %v659_v63 = vrot.slane %v657_v52, 1  ;;  %v3630_v52 = vcombine.low %v3470_v40, %v4803_v34  ;;  %v3439_v34 = vld [vmem:[%s4606_s8 + $0x78] sm:$0xf] }
  0x5e   : > { %2436 = vmatmul.mubr.bf16.gmra.mrb[28].mxu0 %v3556_v10  ;;  %2565 = vmatmul.mubr.bf16.gmra.mrb[28].mxu1 %v790_v59  ;;  %v4937_v10 = vld [vmem:[%s4606_s8 + $0x80] ss:$0 sps:$4 sm:$0x11]   ;;  %v3587_v59 = vcombine.low %v237_v36, %v4817_v42  ;;  %v3469_v42 = vld [vmem:[%s4606_s8 + $0xc] sm:$0xe] }
  0x5f   : > { %2443 = vmatprep.mubr.bf16.mxu0 %v629_v0  ;;  %2572 = vmatprep.mubr.bf16.mxu1 %v4913_v60  ;;  %v650_v33 = vshll.u32 %v4937_v10, 16  ;;  %v660_v16 = vor.u32 %v659_v63, %v655_v1  ;;  %v1002_v1 = vshll.u32 %v4809_v43, 16  ;;  %v5050_v63 = vld [vmem:[%s4606_s8 + $0x7c] sm:$0xf] }
  0x60   : > { %v797_v13 = vrot.slane %v3587_v59, 1  ;;  %v4445_v40 = vld [vmem:[%s4606_s8 + $0x38] ss:$0 sps:$4 sm:$0x11]  }
  0x61   : > { %v652_v49 = vrot.slane %v650_v33, 1  ;;  %v665_v23 = vsel %vm521_vm0, %v660_v16, %v664_v14  ;;  %v1000_v14 = vshrl.u32 %v4809_v43, 16  ;;  %v1004_v19 = vrot.slane %v1002_v1, 1  ;;  %v5073_v43 = vld [vmem:[%s4606_s8 + $0x88] sm:$0xf] }
  0x62   : > { %v799_v20 = vsel %vm778_vm1, %v797_v13, %v798_v4  ;;  %v1246_v4 = vrot.slane %v3630_v52, 1  ;;  %v5057_v13 = vcombine.low %v3439_v34, %v5050_v63  ;;  %v1019_v52 = vshll.u32 %v4438_v22, 16  ;;  %v242_v1 = vld [vmem:[%s4606_s8 + $0x84] sm:$0xe]  ;;  %v5108_v34 = vld [vmem:[%s4606_s8 + $0x94] sm:$0xf] }
  0x66   : > { %2444 = vmatmul.mubr.bf16.gmra.mrb[32].mxu0 %v4878_v31  ;;  %2573 = vmatmul.mubr.bf16.gmra.mrb[32].mxu1 %v793_v9  ;;  %v648_v31 = vor.u32 %v647_v26, %v643_v28  ;;  %v4427_v9 = vld [vmem:[%s4606_s8 + $0x14] ss:$0 sps:$4 sm:$0x11]   ;;  %v990_v28 = vshll.u32 %v4768_v15, 16  ;;  %v5024_v26 = vld [vmem:[%s4606_s8 + $0x70] sm:$0xf] }
  0x67   : > { %2451 = vmatprep.mubr.bf16.mxu0 %v641_v32  ;;  %2580 = vmatprep.mubr.bf16.mxu1 %v4946_v24  ;;  %v3437_v32 = vld [vmem:[%s4606_s8 + $0x6c] sm:$0xf]  ;;  %v1244_v38 = vrot.slane %v4427_v9, 1  ;;  %v995_v41 = vshll.u32 %v4427_v9, 16 }
  0x68   : > { %v653_v0 = vsel %vm521_vm0, %v648_v31, %v652_v49  ;;  %v5036_v49 = vcombine.low %v3437_v32, %v5024_v26 }
  0x69   : > { %v997_v59 = vrot.slane %v995_v41, 1  ;;  %v4464_v41 = vld [vmem:[%s6147_s1 + $0x1b8] sm:$0xff]  }
  0x6e   : > { %2452 = vmatmul.mubr.bf16.gmra.mrb[36].mxu0 %v4906_v57  ;;  %2581 = vmatmul.mubr.bf16.gmra.mrb[36].mxu1 %v796_v55  ;;  %v3629_v57 = vcombine.low %v3469_v42, %v4764_v8  ;;  %v801_v8 = vrot.slane %v4848_v11, 1  ;;  %v988_v11 = vshrl.u32 %v4768_v15, 16  ;;  %v4434_v15 = vld [vmem:[%s4606_s8 + $0x20] ss:$0 sps:$4 sm:$0x11]   ;;  %v805_v42 = vsel %vm778_vm1, %v803_v39, %v804_v29 }
  0x6f   : > { %2459 = vmatprep.mubr.bf16.mxu0 %v653_v0  ;;  %2588 = vmatprep.mubr.bf16.mxu1 %v4984_v56  ;;  %v4451_v0 = vld [vmem:[%s6147_s1 + $0x1f0] sm:$0xff]   ;;  %v1247_v35 = vrot.slane %v4434_v15, 1  ;;  %v810_v29 = vrot.slane %v4937_v10, 1  ;;  %v3592_v10 = vcombine.low %v242_v1, %v4964_v44 }
  0x70   : > { %v1243_v33 = vrot.slane %v3629_v57, 1  ;;  %v802_v31 = vsel %vm778_vm1, %v800_v7, %v801_v8  ;;  %4116 = vmatprep.subr.bf16.mxu1 %v4451_v0  ;;  %v1007_v57 = vshll.u32 %v4434_v15, 16  ;;  %v1005_v8 = vor.u32 %v1004_v19, %v1000_v14  ;;  %v241_v7 = vld [vmem:[%s4606_s8 + $0x78] sm:$0xe]  ;;  %v3443_v0 = vld [vmem:[%s4606_s8 + $0x90] sm:$0xf] }
  0x71   : > { %4117 = vmatpush3.bf16.msra.mxu1 %v4453_v5  ;;  %v1248_v9 = vsel %vm778_vm1, %v1246_v4, %v1247_v35  ;;  %v3473_v4 = vld [vmem:[%s4606_s8 + $0x3c] sm:$0xe]  ;;  %v5116_v5 = vcombine.low %v3443_v0, %v5108_v34  ;;  %v1031_v14 = vshll.u32 %v4445_v40, 16  ;;  %v4449_v19 = vld [vmem:[%s4606_s8 + $0x44] ss:$0 sps:$4 sm:$0x11]  }
  0x72   : > { %v1245_v36 = vsel %vm778_vm1, %v1243_v33, %v1244_v38  ;;  %v1009_v32 = vrot.slane %v1007_v57, 1  ;;  %v4462_v33 = vld [vmem:[%s6147_s1 + $0x1f8] sm:$0xff]   ;;  %v1250_v38 = vrot.slane %v4438_v22, 1  ;;  %v4472_v57 = vld [vmem:[%s6147_s1 + $0x220] sm:$0xff]   ;;  %v813_v22 = vrot.slane %v4976_v50, 1  ;;  %v4479_v50 = vld [vmem:[%s6147_s1 + $0x228] sm:$0xff]  }
  0x73   : > { %4118 = vmatprep.subr.bf16.mxu1 %v4462_v33  ;;  %v4493_v0 = vld [vmem:[%s6147_s1 + $0x238] sm:$0xff]  }
  0x75   : > { %4119 = vmatpush3.bf16.msra.mxu1 %v4464_v41  ;;  %v4456_v41 = vld [vmem:[%s4606_s8 + $0x50] ss:$0 sps:$4 sm:$0x11]  }
  0x76   : > { %2460 = vmatmul.mubr.bf16.gmra.mrb[40].mxu0 %v4931_v17  ;;  %2589 = vmatmul.mubr.bf16.gmra.mrb[40].mxu1 %v799_v20  ;;  %v992_v17 = vrot.slane %v990_v28, 1  ;;  %v3631_v20 = vcombine.low %v3471_v3, %v4826_v53  ;;  %v807_v28 = vrot.slane %v4909_v58, 1  ;;  %v1253_v3 = vrot.slane %v4445_v40, 1 }
  0x77   : > { %2467 = vmatprep.mubr.bf16.mxu0 %v665_v23  ;;  %2596 = vmatprep.mubr.bf16.mxu1 %v5011_v12  ;;  %v4441_v23 = vld [vmem:[%s6147_s1 + $0x208] sm:$0xff]   ;;  %v1043_v40 = vshll.u32 %v4449_v19, 16 }
  0x78   : > { %v993_v55 = vor.u32 %v992_v17, %v988_v11  ;;  %v1249_v37 = vrot.slane %v3631_v20, 1  ;;  %v1012_v11 = vshrl.u32 %v4838_v61, 16  ;;  %v3591_v17 = vcombine.low %v241_v7, %v4925_v2  ;;  %v4463_v2 = vld [vmem:[%s6147_s1 + $0x218] sm:$0xff]  }
  0x79   : > { %v3632_v61 = vcombine.low %v3472_v30, %v4858_v18  ;;  %v3633_v20 = vcombine.low %v3473_v4, %v4893_v48 }
  0x7a   : > { %v998_v6 = vsel %vm521_vm0, %v993_v55, %v997_v59  ;;  %v1251_v15 = vsel %vm778_vm1, %v1249_v37, %v1250_v38  ;;  %v809_v39 = vrot.slane %v3591_v17, 1  ;;  %v1026_v55 = vshll.u32 %v4868_v27, 16  ;;  %v4529_v37 = vld [vmem:[%s4606_s8 + $0x94] sm:$0xf] }
  0x7b   : > { %v1021_v59 = vrot.slane %v1019_v52, 1  ;;  %v4530_v52 = vld [vmem:[%s4606_s8 + $0x98] ss:$0 sps:$4 sm:$0x11]  }
  0x7c   : > { %v811_v35 = vsel %vm778_vm1, %v809_v39, %v810_v29  ;;  %v5154_v39 = vld [vmem:[%s4606_s8 + $0xac] sm:$0xf] }
  0x7e   : > { %2468 = vmatmul.mubr.bf16.gmra.mrb[44].mxu0 %v4972_v47  ;;  %2597 = vmatmul.mubr.bf16.gmra.mrb[44].mxu1 %v802_v31  ;;  %v240_v47 = vld [vmem:[%s4606_s8 + $0x6c] sm:$0xe]  ;;  %v1010_v31 = vsel %vm521_vm0, %v1005_v8, %v1009_v32  ;;  %v1256_v8 = vrot.slane %v4449_v19, 1  ;;  %v3474_v32 = vld [vmem:[%s4606_s8 + $0x48] sm:$0xe] }
  0x7f   : > { %2604 = vmatprep.mubr.bf16.mxu1 %v5036_v49  ;;  %2701 = vmatprep.mubr.bf16.mxu0 %v1245_v36  ;;  %v3590_v16 = vcombine.low %v240_v47, %v4902_v54  ;;  %v3441_v54 = vld [vmem:[%s4606_s8 + $0x84] sm:$0xf]  ;;  %v1016_v36 = vrot.slane %v1014_v25, 1  ;;  %v1252_v47 = vrot.slane %v3632_v61, 1  ;;  %v1038_v25 = vshll.u32 %v4913_v60, 16 }
  0x80   : > { %v5088_v58 = vcombine.low %v3441_v54, %v5073_v43  ;;  %v1033_v54 = vrot.slane %v1031_v14, 1  ;;  %v816_v61 = vrot.slane %v4530_v52, 1  ;;  %v4460_v19 = vld [vmem:[%s4606_s8 + $0x5c] ss:$0 sps:$4 sm:$0x11]  }
  0x81   : > { %v806_v53 = vrot.slane %v3590_v16, 1  ;;  %v1017_v18 = vor.u32 %v1016_v36, %v1012_v11  ;;  %v1028_v16 = vrot.slane %v1026_v55, 1  ;;  %v1254_v44 = vsel %vm778_vm1, %v1252_v47, %v1253_v3 }
  0x82   : > { %v1036_v11 = vshrl.u32 %v4913_v60, 16  ;;  %v1040_v17 = vrot.slane %v1038_v25, 1  ;;  %v1050_v60 = vshll.u32 %v4946_v24, 16  ;;  %v1259_v55 = vrot.slane %v4456_v41, 1 }
  0x83   : > { %v808_v45 = vsel %vm778_vm1, %v806_v53, %v807_v28  ;;  %v243_v53 = vld [vmem:[%s4606_s8 + $0x90] sm:$0xe]  ;;  %v1255_v28 = vrot.slane %v3633_v20, 1  ;;  %v1048_v3 = vshrl.u32 %v4946_v24, 16  ;;  %v3476_v24 = vld [vmem:[%s4606_s8 + $0x60] sm:$0xe] }
  0x84   : > { %v3593_v38 = vcombine.low %v243_v53, %v4529_v37  ;;  %v4532_v20 = vld [vmem:[%s4606_s8 + $0xa4] ss:$0 sps:$4 sm:$0x11]   ;;  %v1262_v53 = vrot.slane %v4460_v19, 1 }
  0x86   : > { %2605 = vmatmul.mubr.bf16.gmra.mrb[48].mxu1 %v805_v42  ;;  %2702 = vmatmul.mubr.bf16.vlgmr.msra.gmra.mrb[48].mxu0 %v998_v6  ;;  %v1024_v42 = vshrl.u32 %v4868_v27, 16  ;;  %v1022_v6 = vsel %vm521_vm0, %v1017_v18, %v1021_v59  ;;  %v812_v27 = vrot.slane %v3592_v10, 1  ;;  %v815_v36 = vrot.slane %v3593_v38, 1  ;;  %v244_v18 = vld [vmem:[%s4606_s8 + $0x9c] sm:$0xe] }
  0x87   : > { %4241 = vmatpush3.bf16.msra.mxu0 %v4990_v62  ;;  %2612 = vmatprep.mubr.bf16.mxu1 %v5057_v13  ;;  %v4452_v62 = vld [vmem:[%s6147_s1 + $0x210] sm:$0xff]   ;;  %v1067_v38 = vshll.u32 %v4460_v19, 16 }
  0x88   : > { %2709 = vmatprep.mubr.bf16.mxu0 %v1248_v9  ;;  %4242 = vmatprep.subr.bf16.mxu0 %v4441_v23  ;;  %v5127_v9 = vld [vmem:[%s4606_s8 + $0xa0] sm:$0xf]  ;;  %v1029_v48 = vor.u32 %v1028_v16, %v1024_v42  ;;  %v814_v7 = vsel %vm778_vm1, %v812_v27, %v813_v22  ;;  %v3475_v59 = vld [vmem:[%s4606_s8 + $0x54] sm:$0xe]  ;;  %v817_v1 = vsel %vm778_vm1, %v815_v36, %v816_v61  ;;  %v1052_v42 = vrot.slane %v1050_v60, 1 }
  0x89   : > { %v3635_v16 = vcombine.low %v3475_v59, %v4969_v46  ;;  %v3449_v27 = vld [vmem:[%s4606_s8 + $0xb4] sm:$0xf]  ;;  %v5176_v22 = vld [vmem:[%s4606_s8 + $0xb8] sm:$0xf]  ;;  %v1069_v60 = vrot.slane %v1067_v38, 1  ;;  %v1072_v59 = vshrl.u32 %v5011_v12, 16 }
  0x8a   : > { %v1034_v30 = vsel %vm521_vm0, %v1029_v48, %v1033_v54  ;;  %v1053_v25 = vor.u32 %v1052_v42, %v1048_v3  ;;  %v4534_v36 = vld [vmem:[%s4606_s8 + $0xb0] ss:$0 sps:$4 sm:$0x11]   ;;  %v3487_v3 = vld [vmem:[%s4606_s8 + $0x24] sm:$0xf] }
  0x8b   : > { %4243 = vmatpush3.bf16.msra.mxu0 %v4441_v23  ;;  %v3445_v23 = vld [vmem:[%s4606_s8 + $0x9c] sm:$0xf]  ;;  %v1261_v54 = vrot.slane %v3635_v16, 1  ;;  %v822_v52 = vrot.slane %v4534_v36, 1 }
  0x8c   : > { %4244 = vmatprep.subr.bf16.mxu0 %v4452_v62  ;;  %v5138_v33 = vcombine.low %v3445_v23, %v5127_v9  ;;  %v245_v23 = vld [vmem:[%s4606_s8 + $0xa8] sm:$0xe]  ;;  %v4469_v16 = vld [vmem:[%s4606_s8 + $0x74] ss:$0 sps:$4 sm:$0x11]  }
  0x8e   : > { %2613 = vmatmul.mubr.bf16.gmra.mrb[52].mxu1 %v808_v45  ;;  %2710 = vmatmul.mubr.bf16.gmra.mrb[52].mxu0 %v1010_v31  ;;  %v3634_v45 = vcombine.low %v3474_v32, %v4934_v21  ;;  %v1257_v31 = vsel %vm778_vm1, %v1255_v28, %v1256_v8  ;;  %v3447_v21 = vld [vmem:[%s4606_s8 + $0xa8] sm:$0xf]  ;;  %v3485_v28 = vld [vmem:[%s4606_s8 + $0x18] sm:$0xf]  ;;  %v5182_v8 = vld [vmem:[%s4606_s8 + $0x1c] sm:$0xf]  ;;  %v3636_v32 = vcombine.low %v3476_v24, %v5005_v51 }
  0x8f   : > { %2620 = vmatprep.mubr.bf16.mxu1 %v5088_v58  ;;  %2717 = vmatprep.mubr.bf16.mxu0 %v1251_v15  ;;  %v1041_v15 = vor.u32 %v1040_v17, %v1036_v11  ;;  %v5163_v47 = vcombine.low %v3447_v21, %v5154_v39  ;;  %v1060_v11 = vshrl.u32 %v4984_v56, 16  ;;  %v1263_v51 = vsel %vm778_vm1, %v1261_v54, %v1262_v53 }
  0x90   : > { %4245 = vmatpush3.bf16.msra.mxu0 %v4452_v62  ;;  %v4486_v62 = vld [vmem:[%s6147_s1 + $0x230] sm:$0xff]   ;;  %v1258_v29 = vrot.slane %v3634_v45, 1  ;;  %v5196_v45 = vcombine.low %v3485_v28, %v5182_v8 }
  0x91   : > { %4246 = vmatprep.subr.bf16.mxu0 %v4463_v2 }
  0x92   : > { %v1260_v14 = vsel %vm778_vm1, %v1258_v29, %v1259_v55  ;;  %v1264_v29 = vrot.slane %v3636_v32, 1  ;;  %v4471_v55 = vld [vmem:[%s4606_s8 + $0x20] ss:$0 sps:$4 sm:$0x11]   ;;  %v1268_v32 = vrot.slane %v4469_v16, 1 }
  0x93   : > { %v1708_v36 = vrot.slane %v4471_v55, 1 }
  0x94   : > { %4247 = vmatpush3.bf16.msra.mxu0 %v4463_v2  ;;  %v1045_v2 = vrot.slane %v1043_v40, 1  ;;  %v1074_v40 = vshll.u32 %v5011_v12, 16  ;;  %v1459_v12 = vshll.u32 %v4471_v55, 16 }
  0x95   : > { %4248 = vmatprep.subr.bf16.mxu0 %v4472_v57 }
  0x96   : > { %2621 = vmatmul.mubr.bf16.gmra.mrb[56].mxu1 %v811_v35  ;;  %2718 = vmatmul.mubr.bf16.gmra.mrb[56].mxu0 %v1022_v6  ;;  %v1046_v4 = vsel %vm521_vm0, %v1041_v15, %v1045_v2  ;;  %v4531_v35 = vld [vmem:[%s4606_s8 + $0xa0] sm:$0xf]  ;;  %v1055_v6 = vshll.u32 %v4456_v41, 16  ;;  %v4467_v41 = vld [vmem:[%s4606_s8 + $0x68] ss:$0 sps:$4 sm:$0x11]  }
  0x97   : > { %2628 = vmatprep.mubr.bf16.mxu1 %v5116_v5  ;;  %2725 = vmatprep.mubr.bf16.mxu0 %v1254_v44  ;;  %v3594_v10 = vcombine.low %v244_v18, %v4531_v35  ;;  %v819_v44 = vrot.slane %v4532_v20, 1  ;;  %v5202_v15 = vld [vmem:[%s4606_s8 + $0xc4] sm:$0xf]  ;;  %v246_v2 = vld [vmem:[%s4606_s8 + $0xb4] sm:$0xe]  ;;  %v1265_v18 = vrot.slane %v4467_v41, 1 }
  0x98   : > { %4249 = vmatpush3.bf16.msra.mxu0 %v4472_v57  ;;  %v1062_v57 = vshll.u32 %v4984_v56, 16  ;;  %v1057_v48 = vrot.slane %v1055_v6, 1  ;;  %v3451_v56 = vld [vmem:[%s4606_s8 + $0xc0] sm:$0xf]  ;;  %v1079_v6 = vshll.u32 %v4467_v41, 16  ;;  %v1452_v20 = vshrl.u32 %v5196_v45, 16 }
  0x99   : > { %4250 = vmatprep.subr.bf16.mxu0 %v4479_v50  ;;  %v818_v46 = vrot.slane %v3594_v10, 1  ;;  %v3488_v10 = vld [vmem:[%s4606_s8 + $0x28] sm:$0xf]  ;;  %v1266_v24 = vsel %vm778_vm1, %v1264_v29, %v1265_v18  ;;  %v5235_v41 = vld [vmem:[%s4606_s8 + $0x34] sm:$0xf] }
  0x9a   : > { %v1064_v17 = vrot.slane %v1062_v57, 1  ;;  %v5217_v57 = vcombine.low %v3451_v56, %v5202_v15  ;;  %v1081_v53 = vrot.slane %v1079_v6, 1  ;;  %v1091_v56 = vshll.u32 %v4469_v16, 16 }
  0x9c   : > { %4251 = vmatpush3.bf16.msra.mxu0 %v4479_v50  ;;  %v5186_v50 = vcombine.low %v3449_v27, %v5176_v22  ;;  %v1065_v21 = vor.u32 %v1064_v17, %v1060_v11  ;;  %v5221_v27 = vcombine.low %v3487_v3, %v3488_v10  ;;  %v3489_v17 = vld [vmem:[%s4606_s8 + $0x30] sm:$0xf] }
  0x9d   : > { %4252 = vmatprep.subr.bf16.mxu0 %v4486_v62 }
  0x9e   : > { %2629 = vmatmul.mubr.bf16.gmra.mrb[60].mxu1 %v814_v7  ;;  %2726 = vmatmul.mubr.bf16.gmra.mrb[60].mxu0 %v1034_v30  ;;  %v4533_v7 = vld [vmem:[%s4606_s8 + $0xac] sm:$0xf]  ;;  %v1058_v30 = vsel %vm521_vm0, %v1053_v25, %v1057_v48  ;;  %v1070_v19 = vsel %vm521_vm0, %v1065_v21, %v1069_v60  ;;  %v4536_v25 = vld [vmem:[%s4606_s8 + $0xbc] ss:$0 sps:$4 sm:$0x11]   ;;  %v1466_v11 = vshll.u32 %v5221_v27, 16 }
  0x9f   : > { %2636 = vmatprep.mubr.bf16.mxu1 %v5138_v33  ;;  %2733 = vmatprep.mubr.bf16.mxu0 %v1257_v31  ;;  %v3595_v37 = vcombine.low %v245_v23, %v4533_v7  ;;  %v3477_v31 = vld [vmem:[%s4606_s8 + $0x6c] sm:$0xe]  ;;  %v3478_v23 = vld [vmem:[%s4606_s8 + $0x78] sm:$0xe]  ;;  %v825_v48 = vrot.slane %v4536_v25, 1  ;;  %v1461_v7 = vrot.slane %v1459_v12, 1 }
  0xa0   : > { %4253 = vmatpush3.bf16.msra.mxu0 %v4486_v62  ;;  %v820_v62 = vsel %vm778_vm1, %v818_v46, %v819_v44  ;;  %v3637_v42 = vcombine.low %v3477_v31, %v5024_v26  ;;  %v1086_v26 = vshll.u32 %v5036_v49, 16  ;;  %v3638_v38 = vcombine.low %v3478_v23, %v5050_v63 }
  0xa1   : > { %4254 = vmatprep.subr.bf16.mxu0 %v4493_v0  ;;  %v821_v61 = vrot.slane %v3595_v37, 1  ;;  %v3533_v37 = vld [vmem:[%s4606_s8 + $0x18] sm:$0xe]  ;;  %v1464_v21 = vshrl.u32 %v5221_v27, 16  ;;  %v1096_v23 = vshrl.u32 %v5057_v13, 16 }
  0xa2   : > { %v1267_v28 = vrot.slane %v3637_v42, 1  ;;  %v3677_v31 = vcombine.low %v3533_v37, %v5182_v8  ;;  %v1088_v60 = vrot.slane %v1086_v26, 1  ;;  %v5245_v8 = vcombine.low %v3489_v17, %v5235_v41  ;;  %v5261_v26 = vld [vmem:[%s4606_s8 + $0x40] sm:$0xf] }
  0xa3   : > { %v1093_v42 = vrot.slane %v1091_v56, 1  ;;  %v1270_v6 = vrot.slane %v3638_v38, 1 }
  0xa4   : > { %4255 = vmatpush3.bf16.msra.mxu0 %v4493_v0  ;;  %v1076_v0 = vrot.slane %v1074_v40, 1  ;;  %v1269_v63 = vsel %vm778_vm1, %v1267_v28, %v1268_v32  ;;  %v1707_v29 = vrot.slane %v3677_v31, 1  ;;  %v4476_v28 = vld [vmem:[%s4606_s8 + $0x8c] ss:$0 sps:$4 sm:$0x11]   ;;  %v1476_v32 = vshrl.u32 %v5245_v8, 16 }
  0xa5   : > { %v1115_v56 = vshll.u32 %v4476_v28, 16 }
  0xa6   : > { %2637 = vmatmul.mubr.bf16.gmra.mrb[64].mxu1 %v817_v1  ;;  %2734 = vmatmul.mubr.bf16.gmra.mrb[64].mxu0 %v1046_v4  ;;  %v1454_v1 = vshll.u32 %v5196_v45, 16  ;;  %v4535_v4 = vld [vmem:[%s4606_s8 + $0xb8] sm:$0xf]  ;;  %v1077_v54 = vor.u32 %v1076_v0, %v1072_v59  ;;  %v1468_v0 = vrot.slane %v1466_v11, 1  ;;  %v5248_v55 = vsel %vm778_vm1, %v1707_v29, %v1708_v36 }
  0xa7   : > { %2644 = vmatprep.mubr.bf16.mxu1 %v5163_v47  ;;  %2741 = vmatprep.mubr.bf16.mxu0 %v1260_v14  ;;  %v3596_v35 = vcombine.low %v246_v2, %v4535_v4  ;;  %v823_v14 = vsel %vm778_vm1, %v821_v61, %v822_v52  ;;  %v3534_v52 = vld [vmem:[%s4606_s8 + $0x24] sm:$0xe]  ;;  %v4473_v2 = vld [vmem:[%s4606_s8 + $0x80] ss:$0 sps:$4 sm:$0x11]   ;;  %v1098_v4 = vshll.u32 %v5057_v13, 16 }
  0xa8   : > { %v1456_v44 = vrot.slane %v1454_v1, 1  ;;  %v1082_v61 = vsel %vm521_vm0, %v1077_v54, %v1081_v53  ;;  %v3678_v18 = vcombine.low %v3534_v52, %v3488_v10  ;;  %v1271_v16 = vrot.slane %v4473_v2, 1  ;;  %v5278_v36 = vld [vmem:[%s4606_s8 + $0x44] ss:$0 sps:$4 sm:$0x11]  }
  0xa9   : > { %v824_v46 = vrot.slane %v3596_v35, 1  ;;  %v3479_v35 = vld [vmem:[%s4606_s8 + $0x84] sm:$0xe]  ;;  %v1103_v25 = vshll.u32 %v4473_v2, 16 }
  0xaa   : > { %v1710_v3 = vrot.slane %v3678_v18, 1  ;;  %v1272_v53 = vsel %vm778_vm1, %v1270_v6, %v1271_v16  ;;  %v4480_v18 = vld [vmem:[%s4606_s8 + $0x98] ss:$0 sps:$4 sm:$0x11]  }
  0xab   : > { %v826_v40 = vsel %vm778_vm1, %v824_v46, %v825_v48  ;;  %v1100_v46 = vrot.slane %v1098_v4, 1  ;;  %v3639_v48 = vcombine.low %v3479_v35, %v5073_v43  ;;  %v1110_v43 = vshll.u32 %v5088_v58, 16 }
  0xac   : > { %v1105_v11 = vrot.slane %v1103_v25, 1  ;;  %v1117_v35 = vrot.slane %v1115_v56, 1 }
  0xad   : > { %v1273_v17 = vrot.slane %v3639_v48, 1 }
  0xae   : > { %2645 = vmatmul.mubr.bf16.gmra.mrb[68].mxu1 %v820_v62  ;;  %2742 = vmatmul.mubr.bf16.gmra.mrb[68].mxu0 %v1058_v30  ;;  %v1457_v62 = vor.u32 %v1456_v44, %v1452_v20  ;;  %v4475_v30 = vld [vmem:[%s4606_s8 + $0x2c] ss:$0 sps:$4 sm:$0x11]   ;;  %v1478_v20 = vshll.u32 %v5245_v8, 16  ;;  %v3491_v44 = vld [vmem:[%s4606_s8 + $0x3c] sm:$0xf] }
  0xaf   : > { %2652 = vmatprep.mubr.bf16.mxu1 %v5186_v50  ;;  %2749 = vmatprep.mubr.bf16.mxu0 %v1263_v51  ;;  %v1084_v51 = vshrl.u32 %v5036_v49, 16  ;;  %v1711_v59 = vrot.slane %v4475_v30, 1  ;;  %v1471_v1 = vshll.u32 %v4475_v30, 16  ;;  %v5272_v13 = vcombine.low %v3491_v44, %v5261_v26  ;;  %v5305_v44 = vld [vmem:[%s4606_s8 + $0x58] sm:$0xf] }
  0xb0   : > { %v1462_v49 = vsel %vm521_vm0, %v1457_v62, %v1461_v7  ;;  %v1480_v37 = vrot.slane %v1478_v20, 1  ;;  %v3480_v62 = vld [vmem:[%s4606_s8 + $0x90] sm:$0xe]  ;;  %v1101_v30 = vor.u32 %v1100_v46, %v1096_v23  ;;  %v3495_v20 = vld [vmem:[%s4606_s8 + $0x54] sm:$0xf]  ;;  %v1120_v23 = vshrl.u32 %v5116_v5, 16 }
  0xb1   : > { %v1089_v10 = vor.u32 %v1088_v60, %v1084_v51  ;;  %v1473_v12 = vrot.slane %v1471_v1, 1  ;;  %v1490_v52 = vshll.u32 %v5272_v13, 16  ;;  %v1108_v60 = vshrl.u32 %v5088_v58, 16 }
  0xb2   : > { %v1481_v51 = vor.u32 %v1480_v37, %v1476_v32  ;;  %v3640_v2 = vcombine.low %v3480_v62, %v5108_v34  ;;  %v1495_v1 = vshll.u32 %v5278_v36, 16  ;;  %v1122_v34 = vshll.u32 %v5116_v5, 16 }
  0xb3   : > { %v1094_v54 = vsel %vm521_vm0, %v1089_v10, %v1093_v42  ;;  %v1277_v42 = vrot.slane %v4480_v18, 1  ;;  %v1127_v46 = vshll.u32 %v4480_v18, 16  ;;  %v5316_v5 = vcombine.low %v3495_v20, %v5305_v44  ;;  %v5349_v20 = vld [vmem:[%s4606_s8 + $0x70] sm:$0xf] }
  0xb4   : > { %v1276_v10 = vrot.slane %v3640_v2, 1  ;;  %v1497_v16 = vrot.slane %v1495_v1, 1  ;;  %v1134_v62 = vshll.u32 %v5138_v33, 16  ;;  %v3483_v1 = vld [vmem:[%s4606_s8 + $0xb4] sm:$0xe] }
  0xb6   : > { %2653 = vmatmul.mubr.bf16.gmra.mrb[72].mxu1 %v823_v14  ;;  %2750 = vmatmul.mubr.bf16.gmra.mrb[72].mxu0 %v1070_v19  ;;  %v5253_v14 = vsel %vm778_vm1, %v1710_v3, %v1711_v59  ;;  %v1469_v19 = vor.u32 %v1468_v0, %v1464_v21  ;;  %v1106_v21 = vsel %vm521_vm0, %v1101_v30, %v1105_v11  ;;  %v1488_v59 = vshrl.u32 %v5272_v13, 16  ;;  %v3481_v3 = vld [vmem:[%s4606_s8 + $0x9c] sm:$0xe] }
  0xb7   : > { %2660 = vmatprep.mubr.bf16.mxu1 %v5217_v57  ;;  %2757 = vmatprep.mubr.bf16.mxu0 %v1266_v24  ;;  %v5256_v24 = vld [vmem:[%s4606_s8 + $0x38] ss:$0 sps:$4 sm:$0x11]   ;;  %v1492_v0 = vrot.slane %v1490_v52, 1  ;;  %v3641_v25 = vcombine.low %v3481_v3, %v5127_v9  ;;  %v3497_v52 = vld [vmem:[%s4606_s8 + $0x60] sm:$0xf] }
  0xb8   : > { %v1474_v7 = vsel %vm521_vm0, %v1469_v19, %v1473_v12  ;;  %v1483_v38 = vshll.u32 %v5256_v24, 16  ;;  %v5300_v19 = vld [vmem:[%s4606_s8 + $0x50] ss:$0 sps:$4 sm:$0x11]   ;;  %v1136_v2 = vrot.slane %v1134_v62, 1 }
  0xb9   : > { %v1493_v6 = vor.u32 %v1492_v0, %v1488_v59  ;;  %v1507_v37 = vshll.u32 %v5300_v19, 16  ;;  %v1279_v30 = vrot.slane %v3641_v25, 1  ;;  %v4487_v59 = vld [vmem:[%s4606_s8 + $0xb0] ss:$0 sps:$4 sm:$0x11]  }
  0xba   : > { %v1485_v31 = vrot.slane %v1483_v38, 1  ;;  %v3482_v38 = vld [vmem:[%s4606_s8 + $0xa8] sm:$0xe] }
  0xbb   : > { %v1498_v32 = vsel %vm521_vm0, %v1493_v6, %v1497_v16 }
  0xbe   : > { %2661 = vmatmul.mubr.bf16.gmra.mrb[76].mxu1 %v826_v40  ;;  %2758 = vmatmul.mubr.bf16.gmra.mrb[76].mxu0 %v1082_v61  ;;  %v1274_v40 = vrot.slane %v4476_v28, 1  ;;  %v3493_v61 = vld [vmem:[%s4606_s8 + $0x48] sm:$0xf] }
  0xbf   : > { %2765 = vmatprep.mubr.bf16.mxu0 %v1269_v63  ;;  %2862 = vmatprep.mubr.bf16.mxu1 %v1462_v49  ;;  %v5283_v63 = vld [vmem:[%s4606_s8 + $0x4c] sm:$0xf]  ;;  %v1486_v49 = vsel %vm521_vm0, %v1481_v51, %v1485_v31  ;;  %v1509_v51 = vrot.slane %v1507_v37, 1  ;;  %v1514_v31 = vshll.u32 %v5316_v5, 16 }
  0xc0   : > { %v1275_v29 = vsel %vm778_vm1, %v1273_v17, %v1274_v40  ;;  %v5294_v58 = vcombine.low %v3493_v61, %v5283_v63  ;;  %v5322_v17 = vld [vmem:[%s4606_s8 + $0x5c] ss:$0 sps:$4 sm:$0x11]   ;;  %v5327_v61 = vld [vmem:[%s4606_s8 + $0x64] sm:$0xf] }
  0xc1   : > { %v1516_v0 = vrot.slane %v1514_v31, 1  ;;  %v3501_v31 = vld [vmem:[%s4606_s8 + $0x78] sm:$0xf] }
  0xc2   : > { %v1502_v12 = vshll.u32 %v5294_v58, 16  ;;  %v1500_v28 = vshrl.u32 %v5294_v58, 16 }
  0xc6   : > { %2766 = vmatmul.mubr.bf16.gmra.mrb[80].mxu0 %v1094_v54  ;;  %2863 = vmatmul.mubr.bf16.vlgmr.msra.gmra.mrb[80].mxu1 %v5196_v45  ;;  %v1112_v45 = vrot.slane %v1110_v43, 1  ;;  %v1278_v54 = vsel %vm778_vm1, %v1276_v10, %v1277_v42  ;;  %v1129_v43 = vrot.slane %v1127_v46, 1  ;;  %v1283_v42 = vrot.slane %v4487_v59, 1 }
  0xc7   : > { %2773 = vmatprep.mubr.bf16.mxu0 %v1272_v53  ;;  %2870 = vmatprep.mubr.bf16.mxu1 %v1474_v7  ;;  %v4483_v53 = vld [vmem:[%s4606_s8 + $0xa4] ss:$0 sps:$4 sm:$0x11]   ;;  %v1504_v7 = vrot.slane %v1502_v12, 1  ;;  %v3499_v12 = vld [vmem:[%s4606_s8 + $0x6c] sm:$0xf] }
  0xc8   : > { %v1113_v4 = vor.u32 %v1112_v45, %v1108_v60  ;;  %v1280_v11 = vrot.slane %v4483_v53, 1  ;;  %v1132_v45 = vshrl.u32 %v5138_v33, 16  ;;  %v1146_v33 = vshll.u32 %v5163_v47, 16 }
  0xc9   : > { %v1505_v40 = vor.u32 %v1504_v7, %v1500_v28  ;;  %v1151_v46 = vshll.u32 %v4487_v59, 16 }
  0xca   : > { %v1118_v48 = vsel %vm521_vm0, %v1113_v4, %v1117_v35  ;;  %v1281_v56 = vsel %vm778_vm1, %v1279_v30, %v1280_v11  ;;  %v5344_v4 = vld [vmem:[%s4606_s8 + $0x68] ss:$0 sps:$4 sm:$0x11]   ;;  %v3484_v11 = vld [vmem:[%s4606_s8 + $0xc0] sm:$0xe] }
  0xcb   : > { %v1510_v18 = vsel %vm521_vm0, %v1505_v40, %v1509_v51  ;;  %v1531_v28 = vshll.u32 %v5344_v4, 16  ;;  %v5366_v40 = vld [vmem:[%s4606_s8 + $0x74] ss:$0 sps:$4 sm:$0x11]  }
  0xcd   : > { %v1533_v30 = vrot.slane %v1531_v28, 1 }
  0xce   : > { %2774 = vmatmul.mubr.bf16.gmra.mrb[84].mxu0 %v1106_v21  ;;  %2871 = vmatmul.mubr.bf16.gmra.mrb[84].mxu1 %v5221_v27  ;;  %v1124_v27 = vrot.slane %v1122_v34, 1  ;;  %v1139_v21 = vshll.u32 %v4483_v53, 16  ;;  %v1137_v34 = vor.u32 %v1136_v2, %v1132_v45  ;;  %v3644_v45 = vcombine.low %v3484_v11, %v5202_v15 }
  0xcf   : > { %2781 = vmatprep.mubr.bf16.mxu0 %v1275_v29  ;;  %2878 = vmatprep.mubr.bf16.mxu1 %v1486_v49  ;;  %v5334_v29 = vcombine.low %v3497_v52, %v5327_v61  ;;  %v1512_v49 = vshrl.u32 %v5316_v5, 16  ;;  %v5371_v52 = vld [vmem:[%s4606_s8 + $0x7c] sm:$0xf] }
  0xd0   : > { %v1125_v9 = vor.u32 %v1124_v27, %v1120_v23  ;;  %v1141_v3 = vrot.slane %v1139_v21, 1  ;;  %v3643_v23 = vcombine.low %v3483_v1, %v5176_v22  ;;  %v1148_v27 = vrot.slane %v1146_v33, 1 }
  0xd1   : > { %v1526_v35 = vshll.u32 %v5334_v29, 16  ;;  %v1517_v6 = vor.u32 %v1516_v0, %v1512_v49  ;;  %v5360_v22 = vcombine.low %v3499_v12, %v5349_v20  ;;  %v1543_v0 = vshll.u32 %v5366_v40, 16 }
  0xd2   : > { %v1130_v60 = vsel %vm521_vm0, %v1125_v9, %v1129_v43  ;;  %v1142_v25 = vsel %vm521_vm0, %v1137_v34, %v1141_v3  ;;  %v1285_v9 = vrot.slane %v3643_v23, 1  ;;  %v1170_v33 = vshll.u32 %v5217_v57, 16 }
  0xd3   : > { %v1528_v53 = vrot.slane %v1526_v35, 1  ;;  %v1538_v51 = vshll.u32 %v5360_v22, 16  ;;  %v1536_v59 = vshrl.u32 %v5360_v22, 16  ;;  %v1288_v1 = vrot.slane %v3644_v45, 1 }
  0xd4   : > { %v1545_v35 = vrot.slane %v1543_v0, 1 }
  0xd5   : > { %v1540_v49 = vrot.slane %v1538_v51, 1 }
  0xd6   : > { %2782 = vmatmul.mubr.bf16.gmra.mrb[88].mxu0 %v1118_v48  ;;  %2879 = vmatmul.mubr.bf16.gmra.mrb[88].mxu1 %v5245_v8  ;;  %v3642_v8 = vcombine.low %v3482_v38, %v5154_v39  ;;  %v1519_v39 = vshll.u32 %v5322_v17, 16  ;;  %v4490_v48 = vld [vmem:[%s4606_s8 + $0xbc] ss:$0 sps:$4 sm:$0x11]   ;;  %v1153_v38 = vrot.slane %v1151_v46, 1 }
  0xd7   : > { %2789 = vmatprep.mubr.bf16.mxu0 %v1278_v54  ;;  %2886 = vmatprep.mubr.bf16.mxu1 %v1498_v32  ;;  %v1524_v54 = vshrl.u32 %v5334_v29, 16  ;;  %v1286_v43 = vrot.slane %v4490_v48, 1  ;;  %v1541_v3 = vor.u32 %v1540_v49, %v1536_v59 }
  0xd8   : > { %v1282_v10 = vrot.slane %v3642_v8, 1  ;;  %v1521_v16 = vrot.slane %v1519_v39, 1  ;;  %v1156_v8 = vshrl.u32 %v5186_v50, 16 }
  0xd9   : > { %v1529_v62 = vor.u32 %v1528_v53, %v1524_v54  ;;  %v1287_v2 = vsel %vm778_vm1, %v1285_v9, %v1286_v43 }
  0xda   : > { %v1284_v32 = vsel %vm778_vm1, %v1282_v10, %v1283_v42  ;;  %v1522_v7 = vsel %vm521_vm0, %v1517_v6, %v1521_v16  ;;  %v5387_v10 = vld [vmem:[%s4606_s8 + $0x80] ss:$0 sps:$4 sm:$0x11]   ;;  %v3503_v6 = vld [vmem:[%s4606_s8 + $0x84] sm:$0xf] }
  0xdb   : > { %v1534_v21 = vsel %vm521_vm0, %v1529_v62, %v1533_v30  ;;  %v5392_v16 = vld [vmem:[%s4606_s8 + $0x88] sm:$0xf]  ;;  %v1555_v54 = vshll.u32 %v5387_v10, 16  ;;  %v3505_v62 = vld [vmem:[%s4606_s8 + $0x90] sm:$0xf] }
  0xdc   : > { %v5401_v53 = vcombine.low %v3503_v6, %v5392_v16  ;;  %v5411_v30 = vld [vmem:[%s4606_s8 + $0x94] sm:$0xf] }
  0xdd   : > { %v5423_v49 = vcombine.low %v3505_v62, %v5411_v30 }
  0xde   : > { %2790 = vmatmul.mubr.bf16.gmra.mrb[92].mxu0 %v1130_v60  ;;  %2887 = vmatmul.mubr.bf16.gmra.mrb[92].mxu1 %v5272_v13  ;;  %v1144_v13 = vshrl.u32 %v5163_v47, 16  ;;  %v1158_v47 = vshll.u32 %v5186_v50, 16  ;;  %v1163_v60 = vshll.u32 %v4490_v48, 16  ;;  %v5382_v50 = vcombine.low %v3501_v31, %v5371_v52 }
  0xdf   : > { %2797 = vmatprep.mubr.bf16.mxu0 %v1281_v56  ;;  %2894 = vmatprep.mubr.bf16.mxu1 %v1510_v18  ;;  %v4494_v18 = vld [vmem:[%s4606_s8 + $0xc8] ss:$0 sps:$4 sm:$0x11]   ;;  %v1574_v6 = vshll.u32 %v5423_v49, 16 }
  0xe0   : > { %v1149_v37 = vor.u32 %v1148_v27, %v1144_v13  ;;  %v1165_v39 = vrot.slane %v1163_v60, 1  ;;  %v1289_v34 = vrot.slane %v4494_v18, 1  ;;  %v1550_v42 = vshll.u32 %v5382_v50, 16 }
  0xe1   : > { %v1172_v13 = vrot.slane %v1170_v33, 1  ;;  %v1175_v27 = vshll.u32 %v4494_v18, 16  ;;  %v1548_v46 = vshrl.u32 %v5382_v50, 16  ;;  %v1714_v33 = vrot.slane %v5256_v24, 1 }
  0xe2   : > { %v1154_v56 = vsel %vm521_vm0, %v1149_v37, %v1153_v38  ;;  %v1290_v23 = vsel %vm778_vm1, %v1288_v1, %v1289_v34  ;;  %v1552_v48 = vrot.slane %v1550_v42, 1  ;;  %v5406_v37 = vld [vmem:[%s4606_s8 + $0x8c] ss:$0 sps:$4 sm:$0x11]   ;;  %v1562_v38 = vshll.u32 %v5401_v53, 16 }
  0xe3   : > { %v1177_v28 = vrot.slane %v1175_v27, 1  ;;  %v3536_v1 = vld [vmem:[%s4606_s8 + $0x3c] sm:$0xe]  ;;  %v3537_v34 = vld [vmem:[%s4606_s8 + $0x48] sm:$0xe] }
  0xe4   : > { %v1564_v59 = vrot.slane %v1562_v38, 1  ;;  %v5435_v42 = vld [vmem:[%s4606_s8 + $0x98] ss:$0 sps:$4 sm:$0x11]   ;;  %v1576_v38 = vrot.slane %v1574_v6, 1 }
  0xe6   : > { %2798 = vmatmul.mubr.bf16.gmra.mrb[96].mxu0 %v1142_v25  ;;  %2895 = vmatmul.mubr.bf16.gmra.mrb[96].mxu1 %v5294_v58  ;;  %v1160_v58 = vrot.slane %v1158_v47, 1  ;;  %v1546_v25 = vsel %vm521_vm0, %v1541_v3, %v1545_v35  ;;  %v1557_v47 = vrot.slane %v1555_v54, 1 }
  0xe7   : > { %2805 = vmatprep.mubr.bf16.mxu0 %v1284_v32  ;;  %2902 = vmatprep.mubr.bf16.mxu1 %v1522_v7  ;;  %v3535_v32 = vld [vmem:[%s4606_s8 + $0x30] sm:$0xe]  ;;  %v1553_v7 = vor.u32 %v1552_v48, %v1548_v46  ;;  %v3680_v46 = vcombine.low %v3536_v1, %v5261_v26 }
  0xe8   : > { %v1161_v15 = vor.u32 %v1160_v58, %v1156_v8 }
  0xe9   : > { %v1558_v18 = vsel %vm521_vm0, %v1553_v7, %v1557_v47 }
  0xea   : > { %v1166_v12 = vsel %vm521_vm0, %v1161_v15, %v1165_v39 }
  0xee   : > { %2806 = vmatmul.mubr.bf16.gmra.mrb[100].mxu0 %v1154_v56  ;;  %2903 = vmatmul.mubr.bf16.gmra.mrb[100].mxu1 %v5316_v5  ;;  %v1168_v5 = vshrl.u32 %v5217_v57, 16  ;;  %v1560_v56 = vshrl.u32 %v5401_v53, 16 }
  0xef   : > { %2813 = vmatprep.mubr.bf16.mxu0 %v1287_v2  ;;  %2910 = vmatprep.mubr.bf16.mxu1 %v1534_v21 }
  0xf0   : > { %v1173_v57 = vor.u32 %v1172_v13, %v1168_v5  ;;  %v1565_v3 = vor.u32 %v1564_v59, %v1560_v56  ;;  %v5440_v13 = vld [vmem:[%s4606_s8 + $0xa0] sm:$0xf]  ;;  %v5471_v59 = vld [vmem:[%s4606_s8 + $0xac] sm:$0xf] }
  0xf2   : > { %v1178_v45 = vsel %vm521_vm0, %v1173_v57, %v1177_v28  ;;  %v1572_v57 = vshrl.u32 %v5423_v49, 16  ;;  %v3681_v28 = vcombine.low %v3537_v34, %v5283_v63  ;;  %v1716_v63 = vrot.slane %v3680_v46, 1 }
  0xf6   : > { %2814 = vmatmul.mubr.bf16.gmra.mrb[104].mxu0 %v1166_v12  ;;  %2911 = vmatmul.mubr.bf16.gmra.mrb[104].mxu1 %v5334_v29  ;;  %v3679_v29 = vcombine.low %v3535_v32, %v5235_v41  ;;  %v1567_v41 = vshll.u32 %v5406_v37, 16 }
  0xf7   : > { %2821 = vmatprep.mubr.bf16.mxu0 %v1290_v23  ;;  %2918 = vmatprep.mubr.bf16.mxu1 %v1546_v25  ;;  %v3507_v23 = vld [vmem:[%s4606_s8 + $0x9c] sm:$0xf] }
  0xf8   : > { %v1713_v39 = vrot.slane %v3679_v29, 1  ;;  %v1569_v35 = vrot.slane %v1567_v41, 1  ;;  %v5453_v26 = vcombine.low %v3507_v23, %v5440_v13  ;;  %v1720_v29 = vrot.slane %v5300_v19, 1 }
  0xf9   : > { %v3784_v9 = vpop.f32.mrb[0].mxu0  ;;  %v3856_v43 = vpop.f32.mrb[0].mxu1 }
  0xfa   : > { %v3785_v11 = vpop.f32.mrb[1].mxu0  ;;  %v3857_v51 = vpop.f32.mrb[1].mxu1  ;;  %v1715_v24 = vsel %vm778_vm1, %v1713_v39, %v1714_v33  ;;  %v1570_v47 = vsel %vm521_vm0, %v1565_v3, %v1569_v35 }
  0xfb   : > { %v5414_v31 = vadd.f32 %v3785_v11, %v3784_v9  ;;  %v5416_v8 = vadd.f32 %v3857_v51, %v3856_v43  ;;  %v3787_v58 = vpop.f32.mrb[2].mxu0  ;;  %v3859_v60 = vpop.f32.mrb[2].mxu1  ;;  %v1579_v9 = vshll.u32 %v5435_v42, 16  ;;  %v1717_v11 = vrot.slane %v5278_v36, 1 }
  0xfc   : > { %v3788_v2 = vpop.f32.mrb[3].mxu0  ;;  %v3860_v21 = vpop.f32.mrb[3].mxu1  ;;  %v1719_v51 = vrot.slane %v3681_v28, 1  ;;  %v1726_v28 = vrot.slane %v5344_v4, 1 }
  0xfd   : > { %v5425_v0 = vadd.f32 %v3788_v2, %v3787_v58  ;;  %v5427_v15 = vadd.f32 %v3860_v21, %v3859_v60  ;;  %v3538_v58 = vld [vmem:[%s4606_s8 + $0x54] sm:$0xe]  ;;  %v3539_v60 = vld [vmem:[%s4606_s8 + $0x60] sm:$0xe]  ;;  %v1581_v56 = vrot.slane %v1579_v9, 1  ;;  %v1718_v39 = vsel %vm778_vm1, %v1716_v63, %v1717_v11 }
  0xfe   : > { %2822 = vmatmul.mubr.bf16.gmra.mrb[108].mxu0 %v1178_v45  ;;  %2919 = vmatmul.mubr.bf16.gmra.mrb[108].mxu1 %v5360_v22  ;;  %v1577_v45 = vor.u32 %v1576_v38, %v1572_v57  ;;  %v5466_v2 = vld [vmem:[%s4606_s8 + $0xa4] ss:$0 sps:$4 sm:$0x11]   ;;  %v3682_v33 = vcombine.low %v3538_v58, %v5305_v44  ;;  %v3683_v19 = vcombine.low %v3539_v60, %v5327_v61  ;;  %v5497_v9 = vld [vmem:[%s4606_s8 + $0xb0] ss:$0 sps:$4 sm:$0x11]  }
  0xff   : > { %2926 = vmatprep.mubr.bf16.mxu1 %v1558_v18  ;;  %4256 = vmatprep.mubr.bf16.mxu0 %v5248_v55  ;;  %v1721_v6 = vsel %vm778_vm1, %v1719_v51, %v1720_v29  ;;  %v1591_v44 = vshll.u32 %v5466_v2, 16  ;;  %v3511_v51 = vld [vmem:[%s4606_s8 + $0xb4] sm:$0xf]  ;;  %v5502_v29 = vld [vmem:[%s4606_s8 + $0xb8] sm:$0xf] }
 0x100   : > { %v1725_v57 = vrot.slane %v3683_v19, 1 }
 0x101   : > { %v3790_v12 = vpop.f32.mrb[4].mxu0  ;;  %v3862_v5 = vpop.f32.mrb[4].mxu1  ;;  %v1593_v38 = vrot.slane %v1591_v44, 1 }
 0x102   : > { %v3791_v22 = vpop.f32.mrb[5].mxu0  ;;  %v3863_v27 = vpop.f32.mrb[5].mxu1  ;;  %v1727_v4 = vsel %vm778_vm1, %v1725_v57, %v1726_v28 }
 0x103   : > { %v5444_v55 = vadd.f32 %v3791_v22, %v3790_v12  ;;  %v5446_v25 = vadd.f32 %v3863_v27, %v3862_v5  ;;  %v3793_v48 = vpop.f32.mrb[6].mxu0  ;;  %v3865_v54 = vpop.f32.mrb[6].mxu1  ;;  %v1584_v12 = vshrl.u32 %v5453_v26, 16  ;;  %v1582_v22 = vsel %vm521_vm0, %v1577_v45, %v1581_v56 }
 0x104   : > { %v3794_v32 = vpop.f32.mrb[7].mxu0  ;;  %v3866_v7 = vpop.f32.mrb[7].mxu1 }
 0x105   : > { %v5455_v43 = vadd.f32 %v3794_v32, %v3793_v48  ;;  %v5457_v62 = vadd.f32 %v3866_v7, %v3865_v54  ;;  %v1722_v48 = vrot.slane %v3682_v33, 1  ;;  %v1723_v54 = vrot.slane %v5322_v17, 1  ;;  %v3540_v32 = vld [vmem:[%s4606_s8 + $0x6c] sm:$0xe]  ;;  %v3541_v7 = vld [vmem:[%s4606_s8 + $0x78] sm:$0xe] }
 0x106   : > { %2927 = vmatmul.mubr.bf16.gmra.mrb[112].mxu1 %v5382_v50  ;;  %4257 = vmatmul.mubr.bf16.vlgmr.msra.gmra.mrb[112].mxu0 %v5253_v14  ;;  %v1586_v50 = vshll.u32 %v5453_v26, 16  ;;  %v3509_v14 = vld [vmem:[%s4606_s8 + $0xa8] sm:$0xf]  ;;  %v3684_v45 = vcombine.low %v3540_v32, %v5349_v20  ;;  %v5516_v20 = vcombine.low %v3511_v51, %v5502_v29  ;;  %v3513_v32 = vld [vmem:[%s4606_s8 + $0xc0] sm:$0xf] }
 0x107   : > { %2934 = vmatprep.mubr.bf16.mxu1 %v1570_v47  ;;  %4260 = vmatprep.mubr.bf16.mxu0 %v1715_v24  ;;  %v5485_v61 = vcombine.low %v3509_v14, %v5471_v59  ;;  %v1724_v60 = vsel %vm778_vm1, %v1722_v48, %v1723_v54  ;;  %v5528_v54 = vld [vmem:[%s4606_s8 + $0xbc] ss:$0 sps:$4 sm:$0x11]  }
 0x108   : > { %v1588_v27 = vrot.slane %v1586_v50, 1  ;;  %v1610_v57 = vshll.u32 %v5516_v20, 16 }
 0x109   : > { %v3796_v21 = vpop.f32.mrb[8].mxu0  ;;  %v3868_v18 = vpop.f32.mrb[8].mxu1  ;;  %v1598_v63 = vshll.u32 %v5485_v61, 16  ;;  %v1596_v14 = vshrl.u32 %v5485_v61, 16 }
 0x10a   : > { %v3797_v41 = vpop.f32.mrb[9].mxu0  ;;  %v3869_v36 = vpop.f32.mrb[9].mxu1  ;;  %v1589_v47 = vor.u32 %v1588_v27, %v1584_v12  ;;  %v1729_v12 = vrot.slane %v5366_v40, 1  ;;  %v3543_v27 = vld [vmem:[%s4606_s8 + $0x90] sm:$0xe] }
 0x10b   : > { %v5476_v1 = vadd.f32 %v3797_v41, %v3796_v21  ;;  %v5478_v34 = vadd.f32 %v3869_v36, %v3868_v18  ;;  %v3799_v3 = vpop.f32.mrb[10].mxu0  ;;  %v3871_v35 = vpop.f32.mrb[10].mxu1  ;;  %v3685_v41 = vcombine.low %v3541_v7, %v5371_v52  ;;  %v1600_v19 = vrot.slane %v1598_v63, 1  ;;  %v5533_v7 = vld [vmem:[%s4606_s8 + $0xc4] sm:$0xf] }
 0x10c   : > { %v3800_v5 = vpop.f32.mrb[11].mxu0  ;;  %v3872_v23 = vpop.f32.mrb[11].mxu1  ;;  %v1594_v33 = vsel %vm521_vm0, %v1589_v47, %v1593_v38  ;;  %v1728_v52 = vrot.slane %v3684_v45, 1 }
 0x10d   : > { %v5487_v24 = vadd.f32 %v3800_v5, %v3799_v3  ;;  %v5489_v46 = vadd.f32 %v3872_v23, %v3871_v35  ;;  %v1603_v3 = vshll.u32 %v5497_v9, 16  ;;  %v1731_v5 = vrot.slane %v3685_v41, 1 }
 0x10e   : > { %2935 = vmatmul.mubr.bf16.gmra.mrb[116].mxu1 %v5401_v53  ;;  %4261 = vmatmul.mubr.bf16.gmra.mrb[116].mxu0 %v1718_v39  ;;  %v1732_v23 = vrot.slane %v5387_v10, 1  ;;  %v1601_v44 = vor.u32 %v1600_v19, %v1596_v14  ;;  %v1730_v38 = vsel %vm778_vm1, %v1728_v52, %v1729_v12  ;;  %v3687_v10 = vcombine.low %v3543_v27, %v5411_v30  ;;  %v3545_v12 = vld [vmem:[%s4606_s8 + $0xa8] sm:$0xe] }
 0x10f   : > { %2942 = vmatprep.mubr.bf16.mxu1 %v1582_v22  ;;  %4264 = vmatprep.mubr.bf16.mxu0 %v1721_v6  ;;  %v3542_v22 = vld [vmem:[%s4606_s8 + $0x84] sm:$0xe]  ;;  %v1605_v48 = vrot.slane %v1603_v3, 1  ;;  %v5545_v30 = vcombine.low %v3513_v32, %v5533_v7  ;;  %v1738_v3 = vrot.slane %v5435_v42, 1 }
 0x110   : > { %v3686_v63 = vcombine.low %v3542_v22, %v5392_v16  ;;  %v1615_v16 = vshll.u32 %v5528_v54, 16  ;;  %v1737_v19 = vrot.slane %v3687_v10, 1  ;;  %v5561_v22 = vld [vmem:[%s4606_s8 + $0xc8] ss:$0 sps:$4 sm:$0x11]   ;;  %v3689_v10 = vcombine.low %v3545_v12, %v5471_v59 }
 0x111   : > { %v3802_v53 = vpop.f32.mrb[12].mxu0  ;;  %v3874_v11 = vpop.f32.mrb[12].mxu1 }
 0x112   : > { %v3803_v58 = vpop.f32.mrb[13].mxu0  ;;  %v3875_v17 = vpop.f32.mrb[13].mxu1 }
 0x113   : > { %v5507_v56 = vadd.f32 %v3803_v58, %v3802_v53  ;;  %v5509_v50 = vadd.f32 %v3875_v17, %v3874_v11  ;;  %v3805_v21 = vpop.f32.mrb[14].mxu0  ;;  %v3877_v18 = vpop.f32.mrb[14].mxu1  ;;  %v1733_v17 = vsel %vm778_vm1, %v1731_v5, %v1732_v23  ;;  %v1617_v23 = vrot.slane %v1615_v16, 1 }
 0x114   : > { %v3806_v36 = vpop.f32.mrb[15].mxu0  ;;  %v3878_v39 = vpop.f32.mrb[15].mxu1 }
 0x115   : > { %v5518_v35 = vadd.f32 %v3806_v36, %v3805_v21  ;;  %v5520_v6 = vadd.f32 %v3878_v39, %v3877_v18  ;;  %v1606_v21 = vsel %vm521_vm0, %v1601_v44, %v1605_v48  ;;  %v1612_v18 = vrot.slane %v1610_v57, 1  ;;  %v3515_v48 = vld [vmem:[%s4606_s8 + $0xcc] sm:$0xf] }
 0x116   : > { %2943 = vmatmul.mubr.bf16.gmra.mrb[120].mxu1 %v5423_v49  ;;  %4265 = vmatmul.mubr.bf16.gmra.mrb[120].mxu0 %v1724_v60  ;;  %v1608_v60 = vshrl.u32 %v5516_v20, 16  ;;  %v1734_v39 = vrot.slane %v3686_v63, 1  ;;  %v1620_v63 = vshrl.u32 %v5545_v30, 16 }
 0x117   : > { %2950 = vmatprep.mubr.bf16.mxu1 %v1594_v33  ;;  %4268 = vmatprep.mubr.bf16.mxu0 %v1727_v4  ;;  %v1735_v33 = vrot.slane %v5406_v37, 1  ;;  %v5566_v37 = vld [vmem:[%s4606_s8 + $0xd0] sm:$0xf] }
 0x118   : > { %v1613_v5 = vor.u32 %v1612_v18, %v1608_v60  ;;  %v1627_v60 = vshll.u32 %v5561_v22, 16  ;;  %v1741_v18 = vrot.slane %v5466_v2, 1 }
 0x119   : > { %v3808_v49 = vpop.f32.mrb[16].mxu0  ;;  %v3896_v28 = vpop.f32.mrb[16].mxu1 }
 0x11a   : > { %v3809_v47 = vpop.f32.mrb[17].mxu0  ;;  %v3897_v40 = vpop.f32.mrb[17].mxu1 }
 0x11b   : > { %v5538_v53 = vadd.f32 %v3809_v47, %v3808_v49  ;;  %v3898_v11 = vadd.f32 %v3897_v40, %v3896_v28  ;;  %v3811_v51 = vpop.f32.mrb[18].mxu0  ;;  %v3899_v58 = vpop.f32.mrb[18].mxu1  ;;  %v1739_v49 = vsel %vm778_vm1, %v1737_v19, %v1738_v3  ;;  %v1629_v3 = vrot.slane %v1627_v60, 1 }
 0x11c   : > { %v3812_v4 = vpop.f32.mrb[19].mxu0  ;;  %v3900_v45 = vpop.f32.mrb[19].mxu1 }
 0x11d   : > { %v5548_v14 = vadd.f32 %v3898_v11, %v5414_v31  ;;  %v5550_v41 = vadd.f32 %v3812_v4, %v3811_v51  ;;  %v3901_v36 = vadd.f32 %v3900_v45, %v3899_v58  ;;  %v3544_v31 = vld [vmem:[%s4606_s8 + $0x9c] sm:$0xe]  ;;  %v1618_v58 = vsel %vm521_vm0, %v1613_v5, %v1617_v23 }
 0x11e   : > { %2951 = vmatmul.mubr.bf16.gmra.mrb[124].mxu1 %v5453_v26  ;;  %4269 = vmatmul.mubr.bf16.gmra.mrb[124].mxu0 %v1730_v38  ;;  %v1622_v26 = vshll.u32 %v5545_v30, 16  ;;  %v3688_v28 = vcombine.low %v3544_v31, %v5440_v13  ;;  %v5578_v13 = vcombine.low %v3515_v48, %v5566_v37  ;;  %v5594_v31 = vld [vmem:[%s4606_s8 + $0xd4] ss:$0 sps:$4 sm:$0x11]  }
 0x11f   : > { %v5556_v52 = vadd.f32 %v3901_v36, %v5425_v0  ;;  %2958 = vmatprep.mubr.bf16.mxu1 %v1606_v21  ;;  %4272 = vmatprep.mubr.bf16.mxu0 %v1733_v17  ;;  %v1736_v0 = vsel %vm778_vm1, %v1734_v39, %v1735_v33  ;;  %v1743_v36 = vrot.slane %v3689_v10, 1  ;;  %v1744_v39 = vrot.slane %v5497_v9, 1  ;;  %v3547_v33 = vld [vmem:[%s4606_s8 + $0xc0] sm:$0xe] }
 0x120   : > { %v1624_v17 = vrot.slane %v1622_v26, 1  ;;  %v1740_v59 = vrot.slane %v3688_v28, 1 }
 0x121   : > { %v3814_v27 = vpop.f32.mrb[20].mxu0  ;;  %v3902_v44 = vpop.f32.mrb[20].mxu1 }
 0x122   : > { %v3815_v57 = vpop.f32.mrb[21].mxu0  ;;  %v3903_v42 = vpop.f32.mrb[21].mxu1  ;;  %v1625_v19 = vor.u32 %v1624_v17, %v1620_v63 }
 0x123   : > { %v5571_v32 = vadd.f32 %v3815_v57, %v3814_v27  ;;  %v3904_v47 = vadd.f32 %v3903_v42, %v3902_v44  ;;  %v3817_v40 = vpop.f32.mrb[22].mxu0  ;;  %v3905_v38 = vpop.f32.mrb[22].mxu1  ;;  %v1745_v57 = vsel %vm778_vm1, %v1743_v36, %v1744_v39  ;;  %v3691_v42 = vcombine.low %v3547_v33, %v5533_v7 }
 0x124   : > { %v3818_v11 = vpop.f32.mrb[23].mxu0  ;;  %v3906_v51 = vpop.f32.mrb[23].mxu1  ;;  %v1630_v28 = vsel %vm521_vm0, %v1625_v19, %v1629_v3 }
 0x125   : > { %v5581_v4 = vadd.f32 %v3904_v47, %v5444_v55  ;;  %v5583_v45 = vadd.f32 %v3818_v11, %v3817_v40  ;;  %v3907_v21 = vadd.f32 %v3906_v51, %v3905_v38  ;;  %v3546_v55 = vld [vmem:[%s4606_s8 + $0xb4] sm:$0xe]  ;;  %v1632_v47 = vshrl.u32 %v5578_v13, 16 }
 0x126   : > { %2959 = vmatmul.mubr.bf16.gmra.mrb[128].mxu1 %v5485_v61  ;;  %4273 = vmatmul.mubr.bf16.gmra.mrb[128].mxu0 %v1736_v0  ;;  %v1634_v61 = vshll.u32 %v5578_v13, 16  ;;  %v3690_v26 = vcombine.low %v3546_v55, %v5502_v29  ;;  %v1639_v38 = vshll.u32 %v5594_v31, 16  ;;  %v1747_v51 = vrot.slane %v5528_v54, 1 }
 0x127   : > { %v5588_v16 = vadd.f32 %v3907_v21, %v5455_v43  ;;  %2966 = vmatprep.mubr.bf16.mxu1 %v1618_v58  ;;  %4276 = vmatprep.mubr.bf16.mxu0 %v1739_v49  ;;  %v1742_v43 = vsel %vm778_vm1, %v1740_v59, %v1741_v18  ;;  %v1749_v60 = vrot.slane %v3691_v42, 1  ;;  %v3548_v21 = vld [vmem:[%s4606_s8 + $0xcc] sm:$0xe]  ;;  %s3767_s8 = sshll.u32 %s6151_s13, 8 }
 0x128   : > { %v1636_v40 = vrot.slane %v1634_v61, 1  ;;  %v1746_v11 = vrot.slane %v3690_v26, 1  ;;  %v1641_v17 = vrot.slane %v1639_v38, 1  ;;  %v3692_v3 = vcombine.low %v3548_v21, %v5566_v37  ;;  %s5866_s19 = scalar_lea.vmem %s6148_s2, %s3767_s8 }
 0x129   : > { %v3820_v12 = vpop.f32.mrb[24].mxu0  ;;  %v3908_v5 = vpop.f32.mrb[24].mxu1  ;;  %v1753_v26 = vrot.slane %v5594_v31, 1 }
 0x12a   : > { %v3821_v23 = vpop.f32.mrb[25].mxu0  ;;  %v3909_v2 = vpop.f32.mrb[25].mxu1  ;;  %v1637_v58 = vor.u32 %v1636_v40, %v1632_v47  ;;  %v1748_v19 = vsel %vm778_vm1, %v1746_v11, %v1747_v51  ;;  %v1752_v37 = vrot.slane %v3692_v3, 1 }
 0x12b   : > { %v5599_v27 = vadd.f32 %v3821_v23, %v3820_v12  ;;  %v3910_v44 = vadd.f32 %v3909_v2, %v3908_v5  ;;  %v3823_v9 = vpop.f32.mrb[26].mxu0  ;;  %v3911_v48 = vpop.f32.mrb[26].mxu1 }
 0x12c   : > { %v3824_v0 = vpop.f32.mrb[27].mxu0  ;;  %v3912_v49 = vpop.f32.mrb[27].mxu1  ;;  %v1642_v12 = vsel %vm521_vm0, %v1637_v58, %v1641_v17 }
 0x12d   : > { %v5607_v29 = vadd.f32 %v3910_v44, %v5476_v1  ;;  %v5609_v63 = vadd.f32 %v3824_v0, %v3823_v9  ;;  %v3913_v10 = vadd.f32 %v3912_v49, %v3911_v48  ;;  %v1750_v1 = vrot.slane %v5561_v22, 1 }
 0x12e   : > { %2967 = vmatmul.mubr.bf16.gmra.mrb[132].mxu1 %v5516_v20  ;;  %4277 = vmatmul.mubr.bf16.gmra.mrb[132].mxu0 %v1742_v43 }
 0x12f   : > { %v5613_v7 = vadd.f32 %v3913_v10, %v5487_v24  ;;  %2974 = vmatprep.mubr.bf16.mxu1 %v1630_v28  ;;  %4280 = vmatprep.mubr.bf16.mxu0 %v1745_v57  ;;  %v1751_v22 = vsel %vm778_vm1, %v1749_v60, %v1750_v1 }
 0x131   : > { %v3826_v59 = vpop.f32.mrb[28].mxu0  ;;  %v3914_v18 = vpop.f32.mrb[28].mxu1 }
 0x132   : > { %v3827_v36 = vpop.f32.mrb[29].mxu0  ;;  %v3915_v39 = vpop.f32.mrb[29].mxu1 }
 0x133   : > { %v5618_v20 = vadd.f32 %v3827_v36, %v3826_v59  ;;  %v3916_v55 = vadd.f32 %v3915_v39, %v3914_v18  ;;  %v3829_v24 = vpop.f32.mrb[30].mxu0  ;;  %v3917_v33 = vpop.f32.mrb[30].mxu1 }
 0x134   : > { %v3830_v54 = vpop.f32.mrb[31].mxu0  ;;  %v3918_v61 = vpop.f32.mrb[31].mxu1 }
 0x135   : > { %v5625_v5 = vadd.f32 %v3916_v55, %v5507_v56  ;;  %v5627_v23 = vadd.f32 %v3830_v54, %v3829_v24  ;;  %v3919_v2 = vadd.f32 %v3918_v61, %v3917_v33 }
 0x136   : > { %2975 = vmatmul.mubr.bf16.gmra.mrb[136].mxu1 %v5545_v30  ;;  %4281 = vmatmul.mubr.bf16.gmra.mrb[136].mxu0 %v1748_v19  ;;  %v1754_v30 = vsel %vm778_vm1, %v1752_v37, %v1753_v26 }
 0x137   : > { %v5631_v43 = vadd.f32 %v3919_v2, %v5518_v35  ;;  %2982 = vmatprep.mubr.bf16.mxu1 %v1642_v12  ;;  %4284 = vmatprep.mubr.bf16.mxu0 %v1751_v22 }
 0x139   : > { %v3832_v44 = vpop.f32.mrb[32].mxu0  ;;  %v3920_v9 = vpop.f32.mrb[32].mxu1 }
 0x13a   : > { %v3833_v48 = vpop.f32.mrb[33].mxu0  ;;  %v3921_v57 = vpop.f32.mrb[33].mxu1 }
 0x13b   : > { %v5634_v56 = vadd.f32 %v3833_v48, %v3832_v44  ;;  %v3922_v42 = vadd.f32 %v3921_v57, %v3920_v9  ;;  %v3835_v0 = vpop.f32.mrb[34].mxu0  ;;  %v3923_v49 = vpop.f32.mrb[34].mxu1 }
 0x13c   : > { %v3836_v28 = vpop.f32.mrb[35].mxu0  ;;  %v3924_v47 = vpop.f32.mrb[35].mxu1 }
 0x13d   : > { %v5638_v35 = vadd.f32 %v3922_v42, %v5538_v53  ;;  %v3837_v40 = vadd.f32 %v3836_v28, %v3835_v0  ;;  %v3925_v38 = vadd.f32 %v3924_v47, %v3923_v49 }
 0x13e   : > { %2983 = vmatmul.mubr.bf16.gmra.mrb[140].mxu1 %v5578_v13  ;;  %4285 = vmatmul.mubr.bf16.gmra.mrb[140].mxu0 %v1754_v30 }
 0x13f   : > { %v5642_v31 = vadd.f32 %v3925_v38, %v5550_v41 }
 0x141   : > { %v3838_v10 = vpop.f32.mrb[36].mxu0  ;;  %v3926_v11 = vpop.f32.mrb[36].mxu1 }
 0x142   : > { %v3839_v51 = vpop.f32.mrb[37].mxu0  ;;  %v3927_v58 = vpop.f32.mrb[37].mxu1 }
 0x143   : > { %v5644_v17 = vadd.f32 %v3839_v51, %v3838_v10  ;;  %v3928_v60 = vadd.f32 %v3927_v58, %v3926_v11  ;;  %v3841_v1 = vpop.f32.mrb[38].mxu0  ;;  %v3929_v21 = vpop.f32.mrb[38].mxu1 }
 0x144   : > { %v3842_v59 = vpop.f32.mrb[39].mxu0  ;;  %v3930_v53 = vpop.f32.mrb[39].mxu1 }
 0x145   : > { %v5647_v18 = vadd.f32 %v3928_v60, %v5571_v32  ;;  %v3843_v36 = vadd.f32 %v3842_v59, %v3841_v1  ;;  %v3931_v13 = vadd.f32 %v3930_v53, %v3929_v21 }
 0x147   : > { %v5650_v39 = vadd.f32 %v3931_v13, %v5583_v45 }
 0x149   : > { %v3844_v41 = vpop.f32.mrb[40].mxu0  ;;  %v3932_v55 = vpop.f32.mrb[40].mxu1 }
 0x14a   : > { %v3845_v24 = vpop.f32.mrb[41].mxu0  ;;  %v3933_v33 = vpop.f32.mrb[41].mxu1 }
 0x14b   : > { %v5652_v19 = vadd.f32 %v3845_v24, %v3844_v41  ;;  %v3934_v3 = vadd.f32 %v3933_v33, %v3932_v55  ;;  %v3847_v54 = vpop.f32.mrb[42].mxu0  ;;  %v3935_v61 = vpop.f32.mrb[42].mxu1 }
 0x14c   : > { %v3848_v12 = vpop.f32.mrb[43].mxu0  ;;  %v3936_v22 = vpop.f32.mrb[43].mxu1 }
 0x14d   : > { %v5655_v2 = vadd.f32 %v3934_v3, %v5599_v27  ;;  %v5657_v32 = vadd.f32 %v3848_v12, %v3847_v54  ;;  %v3937_v37 = vadd.f32 %v3936_v22, %v3935_v61 }
 0x14f   : > { %v5660_v45 = vadd.f32 %v3937_v37, %v5609_v63 }
 0x151   : > { %v3850_v26 = vpop.f32.mrb[44].mxu0  ;;  %v3938_v44 = vpop.f32.mrb[44].mxu1 }
 0x152   : > { %v3851_v9 = vpop.f32.mrb[45].mxu0  ;;  %v3939_v48 = vpop.f32.mrb[45].mxu1 }
 0x153   : > { %v5662_v57 = vadd.f32 %v3851_v9, %v3850_v26  ;;  %v3940_v42 = vadd.f32 %v3939_v48, %v3938_v44  ;;  %v3853_v0 = vpop.f32.mrb[46].mxu0  ;;  %v3941_v49 = vpop.f32.mrb[46].mxu1 }
 0x154   : > { %v3854_v30 = vpop.f32.mrb[47].mxu0  ;;  %v3942_v28 = vpop.f32.mrb[47].mxu1 }
 0x155   : > { %v5665_v27 = vadd.f32 %v3940_v42, %v5618_v20  ;;  %v5667_v47 = vadd.f32 %v3854_v30, %v3853_v0  ;;  %v3943_v38 = vadd.f32 %v3942_v28, %v3941_v49 }
 0x157   : > { %v5670_v63 = vadd.f32 %v3943_v38, %v5627_v23 }
 0x159   : > { %v3944_v10 = vpop.f32.mrb[48].mxu1  ;;  %v4008_v11 = vpop.f32.mrb[48].mxu0 }
 0x15a   : > { %v3945_v51 = vpop.f32.mrb[49].mxu1  ;;  %v4009_v58 = vpop.f32.mrb[49].mxu0 }
 0x15b   : > { %v3946_v60 = vadd.f32 %v3945_v51, %v3944_v10  ;;  %v4010_v1 = vadd.f32 %v4009_v58, %v4008_v11  ;;  %v3947_v21 = vpop.f32.mrb[50].mxu1  ;;  %v4011_v59 = vpop.f32.mrb[50].mxu0 }
 0x15c   : > { %v3948_v53 = vpop.f32.mrb[51].mxu1  ;;  %v4012_v13 = vpop.f32.mrb[51].mxu0 }
 0x15d   : > { %v5673_v41 = vadd.f32 %v3946_v60, %v5634_v56  ;;  %v5676_v20 = vadd.f32 %v4010_v1, %v5548_v14  ;;  %v3949_v55 = vadd.f32 %v3948_v53, %v3947_v21  ;;  %v4013_v24 = vadd.f32 %v4012_v13, %v4011_v59 }
 0x15f   : > { %v5678_v23 = vadd.f32 %v3949_v55, %v3837_v40  ;;  %v5681_v33 = vadd.f32 %v4013_v24, %v5556_v52 }
 0x161   : > { %v3950_v3 = vpop.f32.mrb[52].mxu1  ;;  %v4014_v54 = vpop.f32.mrb[52].mxu0 }
 0x162   : > { %v3951_v61 = vpop.f32.mrb[53].mxu1  ;;  %v4015_v12 = vpop.f32.mrb[53].mxu0 }
 0x163   : > { %v3952_v22 = vadd.f32 %v3951_v61, %v3950_v3  ;;  %v4016_v37 = vadd.f32 %v4015_v12, %v4014_v54  ;;  %v3953_v26 = vpop.f32.mrb[54].mxu1  ;;  %v4017_v44 = vpop.f32.mrb[54].mxu0 }
 0x164   : > { %v3954_v56 = vpop.f32.mrb[55].mxu1  ;;  %v4018_v9 = vpop.f32.mrb[55].mxu0 }
 0x165   : > { %v5684_v14 = vadd.f32 %v3952_v22, %v5644_v17  ;;  %v5687_v48 = vadd.f32 %v4016_v37, %v5581_v4  ;;  %v3955_v40 = vadd.f32 %v3954_v56, %v3953_v26  ;;  %v4019_v42 = vadd.f32 %v4018_v9, %v4017_v44 }
 0x167   : > { %v5689_v52 = vadd.f32 %v3955_v40, %v3843_v36  ;;  %v5692_v0 = vadd.f32 %v4019_v42, %v5588_v16 }
 0x169   : > { %v3956_v49 = vpop.f32.mrb[56].mxu1  ;;  %v4020_v30 = vpop.f32.mrb[56].mxu0 }
 0x16a   : > { %v3957_v28 = vpop.f32.mrb[57].mxu1  ;;  %v4021_v38 = vpop.f32.mrb[57].mxu0 }
 0x16b   : > { %v3958_v10 = vadd.f32 %v3957_v28, %v3956_v49  ;;  %v4022_v11 = vadd.f32 %v4021_v38, %v4020_v30  ;;  %v3959_v51 = vpop.f32.mrb[58].mxu1  ;;  %v4023_v58 = vpop.f32.mrb[58].mxu0 }
 0x16c   : > { %v3960_v17 = vpop.f32.mrb[59].mxu1  ;;  %v4024_v60 = vpop.f32.mrb[59].mxu0 }
 0x16d   : > { %v5695_v4 = vadd.f32 %v3958_v10, %v5652_v19  ;;  %v5698_v1 = vadd.f32 %v4022_v11, %v5607_v29  ;;  %v3961_v36 = vadd.f32 %v3960_v17, %v3959_v51  ;;  %v4025_v21 = vadd.f32 %v4024_v60, %v4023_v58 }
 0x16f   : > { %v5701_v16 = vadd.f32 %v3961_v36, %v5657_v32  ;;  %v5704_v59 = vadd.f32 %v4025_v21, %v5613_v7 }
 0x171   : > { %v3962_v53 = vpop.f32.mrb[60].mxu1  ;;  %v4026_v13 = vpop.f32.mrb[60].mxu0 }
 0x172   : > { %v3963_v55 = vpop.f32.mrb[61].mxu1  ;;  %v4027_v24 = vpop.f32.mrb[61].mxu0 }
 0x173   : > { %v3964_v3 = vadd.f32 %v3963_v55, %v3962_v53  ;;  %v4028_v54 = vadd.f32 %v4027_v24, %v4026_v13  ;;  %v3965_v61 = vpop.f32.mrb[62].mxu1  ;;  %v4029_v19 = vpop.f32.mrb[62].mxu0 }
 0x174   : > { %v3966_v12 = vpop.f32.mrb[63].mxu1  ;;  %v4030_v22 = vpop.f32.mrb[63].mxu0 }
 0x175   : > { %v5707_v29 = vadd.f32 %v3964_v3, %v5662_v57  ;;  %v5710_v37 = vadd.f32 %v4028_v54, %v5625_v5  ;;  %v3967_v32 = vadd.f32 %v3966_v12, %v3965_v61  ;;  %v4031_v26 = vadd.f32 %v4030_v22, %v4029_v19 }
 0x177   : > { %v5713_v7 = vadd.f32 %v3967_v32, %v5667_v47  ;;  %v5716_v44 = vadd.f32 %v4031_v26, %v5631_v43 }
 0x179   : > { %v3968_v56 = vpop.f32.mrb[64].mxu1  ;;  %v4032_v9 = vpop.f32.mrb[64].mxu0 }
 0x17a   : > { %v3969_v40 = vpop.f32.mrb[65].mxu1  ;;  %v4033_v42 = vpop.f32.mrb[65].mxu0 }
 0x17b   : > { %v3970_v49 = vadd.f32 %v3969_v40, %v3968_v56  ;;  %v4034_v30 = vadd.f32 %v4033_v42, %v4032_v9  ;;  %v3971_v28 = vpop.f32.mrb[66].mxu1  ;;  %v4035_v57 = vpop.f32.mrb[66].mxu0 }
 0x17c   : > { %v3972_v38 = vpop.f32.mrb[67].mxu1  ;;  %v4036_v10 = vpop.f32.mrb[67].mxu0 }
 0x17d   : > { %v5719_v5 = vadd.f32 %v3970_v49, %v5416_v8  ;;  %v5722_v11 = vadd.f32 %v4034_v30, %v5638_v35  ;;  %v3973_v47 = vadd.f32 %v3972_v38, %v3971_v28  ;;  %v4037_v51 = vadd.f32 %v4036_v10, %v4035_v57 }
 0x17f   : > { %v5725_v43 = vadd.f32 %v3973_v47, %v5427_v15  ;;  %v5728_v58 = vadd.f32 %v4037_v51, %v5642_v31 }
 0x181   : > { %v3974_v17 = vpop.f32.mrb[68].mxu1  ;;  %v4038_v60 = vpop.f32.mrb[68].mxu0 }
 0x182   : > { %v3975_v36 = vpop.f32.mrb[69].mxu1  ;;  %v4039_v21 = vpop.f32.mrb[69].mxu0 }
 0x183   : > { %v3976_v53 = vadd.f32 %v3975_v36, %v3974_v17  ;;  %v4040_v13 = vadd.f32 %v4039_v21, %v4038_v60  ;;  %v3977_v55 = vpop.f32.mrb[70].mxu1  ;;  %v4041_v8 = vpop.f32.mrb[70].mxu0 }
 0x184   : > { %v3978_v24 = vpop.f32.mrb[71].mxu1  ;;  %v4042_v3 = vpop.f32.mrb[71].mxu0 }
 0x185   : > { %v5731_v35 = vadd.f32 %v3976_v53, %v5446_v25  ;;  %v5734_v54 = vadd.f32 %v4040_v13, %v5647_v18  ;;  %v3979_v15 = vadd.f32 %v3978_v24, %v3977_v55  ;;  %v4043_v61 = vadd.f32 %v4042_v3, %v4041_v8 }
 0x187   : > { %v5737_v31 = vadd.f32 %v3979_v15, %v5457_v62  ;;  %v5740_v19 = vadd.f32 %v4043_v61, %v5650_v39 }
 0x189   : > { %v3980_v12 = vpop.f32.mrb[72].mxu1  ;;  %v4044_v22 = vpop.f32.mrb[72].mxu0 }
 0x18a   : > { %v3981_v32 = vpop.f32.mrb[73].mxu1  ;;  %v4045_v26 = vpop.f32.mrb[73].mxu0 }
 0x18b   : > { %v3982_v56 = vadd.f32 %v3981_v32, %v3980_v12  ;;  %v4046_v9 = vadd.f32 %v4045_v26, %v4044_v22  ;;  %v3983_v40 = vpop.f32.mrb[74].mxu1  ;;  %v4047_v25 = vpop.f32.mrb[74].mxu0 }
 0x18c   : > { %v3984_v42 = vpop.f32.mrb[75].mxu1  ;;  %v4048_v49 = vpop.f32.mrb[75].mxu0 }
 0x18d   : > { %v5743_v18 = vadd.f32 %v3982_v56, %v5478_v34  ;;  %v5746_v30 = vadd.f32 %v4046_v9, %v5655_v2  ;;  %v3985_v62 = vadd.f32 %v3984_v42, %v3983_v40  ;;  %v4049_v28 = vadd.f32 %v4048_v49, %v4047_v25 }
 0x18f   : > { %v5749_v39 = vadd.f32 %v3985_v62, %v5489_v46  ;;  %v5752_v57 = vadd.f32 %v4049_v28, %v5660_v45 }
 0x191   : > { %v3986_v38 = vpop.f32.mrb[76].mxu1  ;;  %v4050_v10 = vpop.f32.mrb[76].mxu0 }
 0x192   : > { %v3987_v47 = vpop.f32.mrb[77].mxu1  ;;  %v4051_v51 = vpop.f32.mrb[77].mxu0 }
 0x193   : > { %v3988_v17 = vadd.f32 %v3987_v47, %v3986_v38  ;;  %v4052_v60 = vadd.f32 %v4051_v51, %v4050_v10  ;;  %v3989_v36 = vpop.f32.mrb[78].mxu1  ;;  %v4053_v34 = vpop.f32.mrb[78].mxu0 }
 0x194   : > { %v3990_v21 = vpop.f32.mrb[79].mxu1  ;;  %v4054_v53 = vpop.f32.mrb[79].mxu0 }
 0x195   : > { %v5755_v2 = vadd.f32 %v3988_v17, %v5509_v50  ;;  %v5758_v13 = vadd.f32 %v4052_v60, %v5665_v27  ;;  %v3991_v46 = vadd.f32 %v3990_v21, %v3989_v36  ;;  %v4055_v55 = vadd.f32 %v4054_v53, %v4053_v34 }
 0x197   : > { %v5761_v45 = vadd.f32 %v3991_v46, %v5520_v6  ;;  %v5764_v8 = vadd.f32 %v4055_v55, %v5670_v63 }
 0x199   : > { %v4056_v24 = vpop.f32.mrb[80].mxu0  ;;  %v4120_v3 = vpop.f32.mrb[80].mxu1 }
 0x19a   : > { %v4057_v15 = vpop.f32.mrb[81].mxu0  ;;  %v4121_v61 = vpop.f32.mrb[81].mxu1 }
 0x19b   : > { %v4058_v12 = vadd.f32 %v4057_v15, %v4056_v24  ;;  %v4122_v22 = vadd.f32 %v4121_v61, %v4120_v3  ;;  %v4059_v32 = vpop.f32.mrb[82].mxu0  ;;  %v4123_v50 = vpop.f32.mrb[82].mxu1 }
 0x19c   : > { %v4060_v26 = vpop.f32.mrb[83].mxu0  ;;  %v4124_v56 = vpop.f32.mrb[83].mxu1 }
 0x19d   : > { %v5767_v27 = vadd.f32 %v4058_v12, %v5673_v41  ;;  %v4061_v9 = vadd.f32 %v4060_v26, %v4059_v32  ;;  %v4125_v40 = vadd.f32 %v4124_v56, %v4123_v50  ;;  %v5770_v6 = vadd.f32 %v4122_v22, %v5676_v20 }
 0x19f   : > { %v5773_v63 = vadd.f32 %v4061_v9, %v5678_v23  ;;  %v5776_v25 = vadd.f32 %v4125_v40, %v5681_v33 }
 0x1a1   : > { %v4062_v42 = vpop.f32.mrb[84].mxu0  ;;  %v4126_v49 = vpop.f32.mrb[84].mxu1 }
 0x1a2   : > { %v4063_v62 = vpop.f32.mrb[85].mxu0  ;;  %v4127_v28 = vpop.f32.mrb[85].mxu1 }
 0x1a3   : > { %v4064_v38 = vadd.f32 %v4063_v62, %v4062_v42  ;;  %v4128_v10 = vadd.f32 %v4127_v28, %v4126_v49  ;;  %v4065_v47 = vpop.f32.mrb[86].mxu0  ;;  %v4129_v41 = vpop.f32.mrb[86].mxu1 }
 0x1a4   : > { %v4066_v51 = vpop.f32.mrb[87].mxu0  ;;  %v4130_v17 = vpop.f32.mrb[87].mxu1 }
 0x1a5   : > { %v5779_v60 = vadd.f32 %v4064_v38, %v5684_v14  ;;  %v4067_v20 = vadd.f32 %v4066_v51, %v4065_v47  ;;  %v4131_v36 = vadd.f32 %v4130_v17, %v4129_v41  ;;  %v5782_v23 = vadd.f32 %v4128_v10, %v5687_v48 }
 0x1a7   : > { %v5785_v33 = vadd.f32 %v4067_v20, %v5689_v52  ;;  %v5788_v34 = vadd.f32 %v4131_v36, %v5692_v0 }
 0x1a9   : > { %v4068_v21 = vpop.f32.mrb[88].mxu0  ;;  %v4132_v53 = vpop.f32.mrb[88].mxu1 }
 0x1aa   : > { %v4069_v46 = vpop.f32.mrb[89].mxu0  ;;  %v4133_v55 = vpop.f32.mrb[89].mxu1 }
 0x1ab   : > { %v4070_v24 = vadd.f32 %v4069_v46, %v4068_v21  ;;  %v4134_v3 = vadd.f32 %v4133_v55, %v4132_v53  ;;  %v4071_v15 = vpop.f32.mrb[90].mxu0  ;;  %v4135_v14 = vpop.f32.mrb[90].mxu1 }
 0x1ac   : > { %v4072_v61 = vpop.f32.mrb[91].mxu0  ;;  %v4136_v12 = vpop.f32.mrb[91].mxu1 }
 0x1ad   : > { %v5791_v22 = vadd.f32 %v4070_v24, %v5695_v4  ;;  %v4073_v48 = vadd.f32 %v4072_v61, %v4071_v15  ;;  %v4137_v32 = vadd.f32 %v4136_v12, %v4135_v14  ;;  %v5794_v52 = vadd.f32 %v4134_v3, %v5698_v1 }
 0x1af   : > { %v5797_v0 = vadd.f32 %v4073_v48, %v5701_v16  ;;  %v5800_v50 = vadd.f32 %v4137_v32, %v5704_v59 }
 0x1b1   : > { %v4074_v26 = vpop.f32.mrb[92].mxu0  ;;  %v4138_v56 = vpop.f32.mrb[92].mxu1 }
 0x1b2   : > { %v4075_v9 = vpop.f32.mrb[93].mxu0  ;;  %v4139_v40 = vpop.f32.mrb[93].mxu1 }
 0x1b3   : > { %v4076_v42 = vadd.f32 %v4075_v9, %v4074_v26  ;;  %v4140_v49 = vadd.f32 %v4139_v40, %v4138_v56  ;;  %v4077_v62 = vpop.f32.mrb[94].mxu0  ;;  %v4141_v4 = vpop.f32.mrb[94].mxu1 }
 0x1b4   : > { %v4078_v28 = vpop.f32.mrb[95].mxu0  ;;  %v4142_v38 = vpop.f32.mrb[95].mxu1 }
 0x1b5   : > { %v5803_v10 = vadd.f32 %v4076_v42, %v5707_v29  ;;  %v4079_v1 = vadd.f32 %v4078_v28, %v4077_v62  ;;  %v4143_v47 = vadd.f32 %v4142_v38, %v4141_v4  ;;  %v5806_v16 = vadd.f32 %v4140_v49, %v5710_v37 }
 0x1b7   : > { %v5809_v59 = vadd.f32 %v4079_v1, %v5713_v7  ;;  %v5812_v41 = vadd.f32 %v4143_v47, %v5716_v44 }
 0x1b9   : > { %v4080_v51 = vpop.f32.mrb[96].mxu0  ;;  %v4144_v17 = vpop.f32.mrb[96].mxu1 }
 0x1ba   : > { %v4081_v20 = vpop.f32.mrb[97].mxu0  ;;  %v4145_v36 = vpop.f32.mrb[97].mxu1 }
 0x1bb   : > { %v4082_v21 = vadd.f32 %v4081_v20, %v4080_v51  ;;  %v4146_v53 = vadd.f32 %v4145_v36, %v4144_v17  ;;  %v4083_v46 = vpop.f32.mrb[98].mxu0  ;;  %v4147_v29 = vpop.f32.mrb[98].mxu1 }
 0x1bc   : > { %v4084_v55 = vpop.f32.mrb[99].mxu0  ;;  %v4148_v24 = vpop.f32.mrb[99].mxu1 }
 0x1bd   : > { %v5815_v3 = vadd.f32 %v4082_v21, %v5719_v5  ;;  %v4085_v37 = vadd.f32 %v4084_v55, %v4083_v46  ;;  %v4149_v15 = vadd.f32 %v4148_v24, %v4147_v29  ;;  %v5818_v7 = vadd.f32 %v4146_v53, %v5722_v11 }
 0x1bf   : > { %v5821_v44 = vadd.f32 %v4085_v37, %v5725_v43  ;;  %v5824_v14 = vadd.f32 %v4149_v15, %v5728_v58 }
 0x1c1   : > { %v4086_v61 = vpop.f32.mrb[100].mxu0  ;;  %v4150_v12 = vpop.f32.mrb[100].mxu1 }
 0x1c2   : > { %v4087_v48 = vpop.f32.mrb[101].mxu0  ;;  %v4151_v32 = vpop.f32.mrb[101].mxu1 }
 0x1c3   : > { %v4088_v26 = vadd.f32 %v4087_v48, %v4086_v61  ;;  %v4152_v56 = vadd.f32 %v4151_v32, %v4150_v12  ;;  %v4089_v9 = vpop.f32.mrb[102].mxu0  ;;  %v4153_v5 = vpop.f32.mrb[102].mxu1 }
 0x1c4   : > { %v4090_v40 = vpop.f32.mrb[103].mxu0  ;;  %v4154_v42 = vpop.f32.mrb[103].mxu1 }
 0x1c5   : > { %v5827_v49 = vadd.f32 %v4088_v26, %v5731_v35  ;;  %v4091_v11 = vadd.f32 %v4090_v40, %v4089_v9  ;;  %v4155_v62 = vadd.f32 %v4154_v42, %v4153_v5  ;;  %v5830_v43 = vadd.f32 %v4152_v56, %v5734_v54 }
 0x1c7   : > { %v5833_v58 = vadd.f32 %v4091_v11, %v5737_v31  ;;  %v5836_v4 = vadd.f32 %v4155_v62, %v5740_v19 }
 0x1c9   : > { %v4092_v28 = vpop.f32.mrb[104].mxu0  ;;  %v4156_v38 = vpop.f32.mrb[104].mxu1 }
 0x1ca   : > { %v4093_v1 = vpop.f32.mrb[105].mxu0  ;;  %v4157_v47 = vpop.f32.mrb[105].mxu1 }
 0x1cb   : > { %v4094_v51 = vadd.f32 %v4093_v1, %v4092_v28  ;;  %v4158_v17 = vadd.f32 %v4157_v47, %v4156_v38  ;;  %v4095_v20 = vpop.f32.mrb[106].mxu0  ;;  %v4159_v35 = vpop.f32.mrb[106].mxu1 }
 0x1cc   : > { %v4096_v36 = vpop.f32.mrb[107].mxu0  ;;  %v4160_v21 = vpop.f32.mrb[107].mxu1 }
 0x1cd   : > { %v5839_v53 = vadd.f32 %v4094_v51, %v5743_v18  ;;  %v4097_v54 = vadd.f32 %v4096_v36, %v4095_v20  ;;  %v4161_v46 = vadd.f32 %v4160_v21, %v4159_v35  ;;  %v5842_v31 = vadd.f32 %v4158_v17, %v5746_v30 }
 0x1cf   : > { %v5845_v19 = vadd.f32 %v4097_v54, %v5749_v39  ;;  %v5848_v29 = vadd.f32 %v4161_v46, %v5752_v57 }
 0x1d1   : > { %v4098_v55 = vpop.f32.mrb[108].mxu0  ;;  %v4162_v24 = vpop.f32.mrb[108].mxu1 }
 0x1d2   : > { %v4099_v37 = vpop.f32.mrb[109].mxu0  ;;  %v4163_v15 = vpop.f32.mrb[109].mxu1 }
 0x1d3   : > { %v4100_v61 = vadd.f32 %v4099_v37, %v4098_v55  ;;  %v4164_v12 = vadd.f32 %v4163_v15, %v4162_v24  ;;  %v4101_v18 = vpop.f32.mrb[110].mxu0  ;;  %v4165_v48 = vpop.f32.mrb[110].mxu1 }
 0x1d4   : > { %v4102_v32 = vpop.f32.mrb[111].mxu0  ;;  %v4166_v26 = vpop.f32.mrb[111].mxu1 }
 0x1d5   : > { %v5851_v30 = vadd.f32 %v4100_v61, %v5755_v2  ;;  %v4103_v56 = vadd.f32 %v4102_v32, %v4101_v18  ;;  %v4167_v39 = vadd.f32 %v4166_v26, %v4165_v48  ;;  %v5854_v9 = vadd.f32 %v4164_v12, %v5758_v13 }
 0x1d7   : > { %v5858_v57 = vadd.f32 %v4103_v56, %v5761_v45  ;;  %v5861_v5 = vadd.f32 %v4167_v39, %v5764_v8 }
 0x1d9   : > { %v4168_v40 = vpop.f32.mrb[112].mxu1  ;;  %v4258_v2 = vpop.f32.mrb[112].mxu0 }
 0x1da   : > { %v5869_v13 = vadd.f32 %v4258_v2, %v5782_v23  ;;  %v4169_v42 = vpop.f32.mrb[113].mxu1  ;;  %v3025_v45 = vpop.f32.mrb[113].mxu0 }
 0x1db   : > { %v4170_v11 = vadd.f32 %v4169_v42, %v4168_v40  ;;  %v5872_v8 = vadd.f32 %v3025_v45, %v5770_v6  ;;  %v4171_v62 = vpop.f32.mrb[114].mxu1  ;;  %v4259_v28 = vpop.f32.mrb[114].mxu0 }
 0x1dc   : > { %3293 = vst [vmem:[%s5866_s19 + $0x10] sm:$0xff] %v5869_v13  ;;  %v5877_v38 = vadd.f32 %v4259_v28, %v5788_v34  ;;  %v4172_v1 = vpop.f32.mrb[115].mxu1  ;;  %v3028_v47 = vpop.f32.mrb[115].mxu0 }
 0x1dd   : > { %3291 = vst [vmem:[%s5866_s19] sm:$0xff] %v5872_v8  ;;  %v4173_v23 = vadd.f32 %v4172_v1, %v4171_v62  ;;  %v5882_v51 = vadd.f32 %v3028_v47, %v5776_v25  ;;  %v5885_v17 = vadd.f32 %v4170_v11, %v5767_v27 }
 0x1de   : > { %3294 = vst [vmem:[%s5866_s19 + $0x18] sm:$0xff] %v5877_v38 }
 0x1df   : > { %v3152_v6 = vadd.f32 %v5882_v51, %v5872_v8  ;;  %3292 = vst [vmem:[%s5866_s19 + $0x8] sm:$0xff] %v5882_v51  ;;  %v5894_v34 = vadd.f32 %v4173_v23, %v5773_v63 }
 0x1e1   : > { %v3153_v20 = vadd.f32 %v3152_v6, %v5869_v13  ;;  %v4174_v35 = vpop.f32.mrb[116].mxu1  ;;  %v4262_v25 = vpop.f32.mrb[116].mxu0 }
 0x1e2   : > { %v5898_v36 = vadd.f32 %v4262_v25, %v5806_v16  ;;  %v4175_v27 = vpop.f32.mrb[117].mxu1  ;;  %v3041_v21 = vpop.f32.mrb[117].mxu0 }
 0x1e3   : > { %v4176_v54 = vadd.f32 %v4175_v27, %v4174_v35  ;;  %v5901_v46 = vadd.f32 %v3041_v21, %v5794_v52  ;;  %v3154_v55 = vadd.f32 %v3153_v20, %v5877_v38  ;;  %v4177_v63 = vpop.f32.mrb[118].mxu1  ;;  %v4263_v24 = vpop.f32.mrb[118].mxu0 }
 0x1e4   : > { %3297 = vst [vmem:[%s5866_s19 + $0x30] sm:$0xff] %v5898_v36  ;;  %v5907_v37 = vadd.f32 %v4263_v24, %v5812_v41  ;;  %v4178_v15 = vpop.f32.mrb[119].mxu1  ;;  %v3044_v16 = vpop.f32.mrb[119].mxu0 }
 0x1e5   : > { %v3155_v61 = vadd.f32 %v3154_v55, %v5901_v46  ;;  %3295 = vst [vmem:[%s5866_s19 + $0x20] sm:$0xff] %v5901_v46  ;;  %v4179_v12 = vadd.f32 %v4178_v15, %v4177_v63  ;;  %v5913_v18 = vadd.f32 %v3044_v16, %v5800_v50  ;;  %v2937_v52 = vadd.f32 %v4176_v54, %v5779_v60 }
 0x1e6   : > { %3298 = vst [vmem:[%s5866_s19 + $0x38] sm:$0xff] %v5907_v37 }
 0x1e7   : > { %v3156_v48 = vadd.f32 %v3155_v61, %v5913_v18  ;;  %3296 = vst [vmem:[%s5866_s19 + $0x28] sm:$0xff] %v5913_v18  ;;  %v2940_v41 = vadd.f32 %v4179_v12, %v5785_v33 }
 0x1e9   : > { %v3157_v32 = vadd.f32 %v3156_v48, %v5898_v36  ;;  %v4180_v26 = vpop.f32.mrb[120].mxu1  ;;  %v4266_v56 = vpop.f32.mrb[120].mxu0 }
 0x1ea   : > { %v5924_v39 = vadd.f32 %v4266_v56, %v5830_v43  ;;  %v4181_v50 = vpop.f32.mrb[121].mxu1  ;;  %v3057_v60 = vpop.f32.mrb[121].mxu0 }
 0x1eb   : > { %v4182_v40 = vadd.f32 %v4181_v50, %v4180_v26  ;;  %v5927_v2 = vadd.f32 %v3057_v60, %v5818_v7  ;;  %v3158_v42 = vadd.f32 %v3157_v32, %v5907_v37  ;;  %v4183_v45 = vpop.f32.mrb[122].mxu1  ;;  %v4267_v33 = vpop.f32.mrb[122].mxu0 }
 0x1ec   : > { %3301 = vst [vmem:[%s5866_s19 + $0x50] sm:$0xff] %v5924_v39  ;;  %v5933_v11 = vadd.f32 %v4267_v33, %v5836_v4  ;;  %v4184_v62 = vpop.f32.mrb[123].mxu1  ;;  %v3060_v43 = vpop.f32.mrb[123].mxu0 }
 0x1ed   : > { %v3159_v28 = vadd.f32 %v3158_v42, %v5927_v2  ;;  %3299 = vst [vmem:[%s5866_s19 + $0x40] sm:$0xff] %v5927_v2  ;;  %v4185_v1 = vadd.f32 %v4184_v62, %v4183_v45  ;;  %v5939_v47 = vadd.f32 %v3060_v43, %v5824_v14  ;;  %v2945_v7 = vadd.f32 %v4182_v40, %v5791_v22 }
 0x1ee   : > { %3302 = vst [vmem:[%s5866_s19 + $0x58] sm:$0xff] %v5933_v11 }
 0x1ef   : > { %v3160_v23 = vadd.f32 %v3159_v28, %v5939_v47  ;;  %3300 = vst [vmem:[%s5866_s19 + $0x48] sm:$0xff] %v5939_v47  ;;  %v5948_v4 = vadd.f32 %v4185_v1, %v5797_v0 }
 0x1f1   : > { %v3161_v6 = vadd.f32 %v3160_v23, %v5924_v39  ;;  %v4186_v20 = vpop.f32.mrb[124].mxu1  ;;  %v4270_v35 = vpop.f32.mrb[124].mxu0 }
 0x1f2   : > { %v5952_v14 = vadd.f32 %v4270_v35, %v5854_v9  ;;  %v4187_v25 = vpop.f32.mrb[125].mxu1  ;;  %v3073_v22 = vpop.f32.mrb[125].mxu0 }
 0x1f3   : > { %v4188_v27 = vadd.f32 %v4187_v25, %v4186_v20  ;;  %v5955_v21 = vadd.f32 %v3073_v22, %v5842_v31  ;;  %v3162_v54 = vadd.f32 %v3161_v6, %v5933_v11  ;;  %v4189_v0 = vpop.f32.mrb[126].mxu1  ;;  %v4271_v55 = vpop.f32.mrb[126].mxu0 }
 0x1f4   : > { %3305 = vst [vmem:[%s5866_s19 + $0x70] sm:$0xff] %v5952_v14  ;;  %v5961_v63 = vadd.f32 %v4271_v55, %v5861_v5  ;;  %v4190_v24 = vpop.f32.mrb[127].mxu1  ;;  %v3076_v9 = vpop.f32.mrb[127].mxu0 }
 0x1f5   : > { %v3163_v15 = vadd.f32 %v3162_v54, %v5955_v21  ;;  %3303 = vst [vmem:[%s5866_s19 + $0x60] sm:$0xff] %v5955_v21  ;;  %v4191_v16 = vadd.f32 %v4190_v24, %v4189_v0  ;;  %v5967_v61 = vadd.f32 %v3076_v9, %v5848_v29  ;;  %v2953_v31 = vadd.f32 %v4188_v27, %v5803_v10 }
 0x1f6   : > { %3306 = vst [vmem:[%s5866_s19 + $0x78] sm:$0xff] %v5961_v63 }
 0x1f7   : > { %v3164_v12 = vadd.f32 %v3163_v15, %v5967_v61  ;;  %3304 = vst [vmem:[%s5866_s19 + $0x68] sm:$0xff] %v5967_v61  ;;  %v2956_v5 = vadd.f32 %v4191_v16, %v5809_v59 }
 0x1f9   : > { %v3165_v48 = vadd.f32 %v3164_v12, %v5952_v14  ;;  %v4192_v32 = vpop.f32.mrb[128].mxu1  ;;  %v4274_v26 = vpop.f32.mrb[128].mxu0 }
 0x1fa   : > { %v5977_v56 = vadd.f32 %v4274_v26, %v2937_v52  ;;  %v4193_v29 = vpop.f32.mrb[129].mxu1  ;;  %v3089_v50 = vpop.f32.mrb[129].mxu0 }
 0x1fb   : > { %v4194_v10 = vadd.f32 %v4193_v29, %v4192_v32  ;;  %v5980_v60 = vadd.f32 %v3089_v50, %v5885_v17  ;;  %v3166_v40 = vadd.f32 %v3165_v48, %v5961_v63  ;;  %v4195_v42 = vpop.f32.mrb[130].mxu1  ;;  %v4275_v45 = vpop.f32.mrb[130].mxu0 }
 0x1fc   : > { %3309 = vst [vmem:[%s5866_s19 + $0x90] sm:$0xff] %v5977_v56  ;;  %v5985_v59 = vadd.f32 %v4275_v45, %v2940_v41  ;;  %v4196_v33 = vpop.f32.mrb[131].mxu1  ;;  %v3092_v62 = vpop.f32.mrb[131].mxu0 }
 0x1fd   : > { %v3167_v52 = vadd.f32 %v3166_v40, %v5980_v60  ;;  %3307 = vst [vmem:[%s5866_s19 + $0x80] sm:$0xff] %v5980_v60  ;;  %v4197_v43 = vadd.f32 %v4196_v33, %v4195_v42  ;;  %v5991_v28 = vadd.f32 %v3092_v62, %v5894_v34  ;;  %v2961_v17 = vadd.f32 %v4194_v10, %v5815_v3 }
 0x1fe   : > { %3310 = vst [vmem:[%s5866_s19 + $0x98] sm:$0xff] %v5985_v59 }
 0x1ff   : > { %v3168_v1 = vadd.f32 %v3167_v52, %v5991_v28  ;;  %3308 = vst [vmem:[%s5866_s19 + $0x88] sm:$0xff] %v5991_v28  ;;  %v2964_v41 = vadd.f32 %v4197_v43, %v5821_v44 }
 0x201   : > { %v3169_v23 = vadd.f32 %v3168_v1, %v5977_v56  ;;  %v4198_v6 = vpop.f32.mrb[132].mxu1  ;;  %v4278_v20 = vpop.f32.mrb[132].mxu0 }
 0x202   : > { %v6001_v35 = vadd.f32 %v4278_v20, %v2953_v31  ;;  %v4199_v34 = vpop.f32.mrb[133].mxu1  ;;  %v3105_v25 = vpop.f32.mrb[133].mxu0 }
 0x203   : > { %v4200_v3 = vadd.f32 %v4199_v34, %v4198_v6  ;;  %v6003_v22 = vadd.f32 %v3105_v25, %v2945_v7  ;;  %v3170_v27 = vadd.f32 %v3169_v23, %v5985_v59  ;;  %v4201_v54 = vpop.f32.mrb[134].mxu1  ;;  %v4279_v0 = vpop.f32.mrb[134].mxu0 }
 0x204   : > { %3313 = vst [vmem:[%s5866_s19 + $0xb0] sm:$0xff] %v6001_v35  ;;  %v6008_v44 = vadd.f32 %v4279_v0, %v2956_v5  ;;  %v4202_v55 = vpop.f32.mrb[135].mxu1  ;;  %v3108_v24 = vpop.f32.mrb[135].mxu0 }
 0x205   : > { %v3171_v9 = vadd.f32 %v3170_v27, %v6003_v22  ;;  %3311 = vst [vmem:[%s5866_s19 + $0xa0] sm:$0xff] %v6003_v22  ;;  %v4203_v15 = vadd.f32 %v4202_v55, %v4201_v54  ;;  %v6014_v16 = vadd.f32 %v3108_v24, %v5948_v4  ;;  %v2969_v7 = vadd.f32 %v4200_v3, %v5827_v49 }
 0x206   : > { %3314 = vst [vmem:[%s5866_s19 + $0xb8] sm:$0xff] %v6008_v44 }
 0x207   : > { %v3172_v31 = vadd.f32 %v3171_v9, %v6014_v16  ;;  %3312 = vst [vmem:[%s5866_s19 + $0xa8] sm:$0xff] %v6014_v16  ;;  %v2972_v12 = vadd.f32 %v4203_v15, %v5833_v58 }
 0x209   : > { %v3173_v5 = vadd.f32 %v3172_v31, %v6001_v35  ;;  %v4204_v48 = vpop.f32.mrb[136].mxu1  ;;  %v4282_v32 = vpop.f32.mrb[136].mxu0 }
 0x20a   : > { %v6024_v26 = vadd.f32 %v4282_v32, %v2969_v7  ;;  %v4205_v4 = vpop.f32.mrb[137].mxu1  ;;  %v3121_v29 = vpop.f32.mrb[137].mxu0 }
 0x20b   : > { %v4206_v49 = vadd.f32 %v4205_v4, %v4204_v48  ;;  %v6026_v50 = vadd.f32 %v3121_v29, %v2961_v17  ;;  %v3174_v10 = vadd.f32 %v3173_v5, %v6008_v44  ;;  %v4207_v40 = vpop.f32.mrb[138].mxu1  ;;  %v4283_v42 = vpop.f32.mrb[138].mxu0 }
 0x20c   : > { %3317 = vst [vmem:[%s5866_s19 + $0xd0] sm:$0xff] %v6024_v26  ;;  %v6031_v58 = vadd.f32 %v4283_v42, %v2972_v12  ;;  %v4208_v45 = vpop.f32.mrb[139].mxu1  ;;  %v3124_v33 = vpop.f32.mrb[139].mxu0 }
 0x20d   : > { %v3175_v62 = vadd.f32 %v3174_v10, %v6026_v50  ;;  %3315 = vst [vmem:[%s5866_s19 + $0xc0] sm:$0xff] %v6026_v50  ;;  %v4209_v52 = vadd.f32 %v4208_v45, %v4207_v40  ;;  %v6036_v43 = vadd.f32 %v3124_v33, %v2964_v41  ;;  %v2977_v17 = vadd.f32 %v4206_v49, %v5839_v53 }
 0x20e   : > { %3318 = vst [vmem:[%s5866_s19 + $0xd8] sm:$0xff] %v6031_v58 }
 0x20f   : > { %v3176_v1 = vadd.f32 %v3175_v62, %v6036_v43  ;;  %3316 = vst [vmem:[%s5866_s19 + $0xc8] sm:$0xff] %v6036_v43  ;;  %v2980_v23 = vadd.f32 %v4209_v52, %v5845_v19 }
 0x211   : > { %v3177_v6 = vadd.f32 %v3176_v1, %v6024_v26  ;;  %v4210_v20 = vpop.f32.mrb[140].mxu1  ;;  %v4286_v34 = vpop.f32.mrb[140].mxu0 }
 0x212   : > { %v4211_v25 = vpop.f32.mrb[141].mxu1  ;;  %v3137_v3 = vpop.f32.mrb[141].mxu0 }
 0x213   : > { %v4212_v41 = vadd.f32 %v4211_v25, %v4210_v20  ;;  %v6046_v27 = vadd.f32 %v3137_v3, %v2977_v17  ;;  %v3178_v53 = vadd.f32 %v3177_v6, %v6031_v58  ;;  %v4213_v54 = vpop.f32.mrb[142].mxu1  ;;  %v4287_v0 = vpop.f32.mrb[142].mxu0 }
 0x214   : > { %v4214_v55 = vpop.f32.mrb[143].mxu1  ;;  %v3140_v24 = vpop.f32.mrb[143].mxu0 }
 0x215   : > { %v2985_v19 = vadd.f32 %v4212_v41, %v5851_v30  ;;  %v3179_v9 = vadd.f32 %v3178_v53, %v6046_v27  ;;  %3319 = vst [vmem:[%s5866_s19 + $0xe0] sm:$0xff] %v6046_v27  ;;  %v4215_v15 = vadd.f32 %v4214_v55, %v4213_v54  ;;  %v6053_v7 = vadd.f32 %v3140_v24, %v2980_v23 }
 0x217   : > { %v6055_v31 = vadd.f32 %v4286_v34, %v2985_v19  ;;  %v2988_v12 = vadd.f32 %v4215_v15, %v5858_v57  ;;  %v3180_v5 = vadd.f32 %v3179_v9, %v6053_v7  ;;  %3320 = vst [vmem:[%s5866_s19 + $0xe8] sm:$0xff] %v6053_v7 }
 0x219   : > { %3321 = vst [vmem:[%s5866_s19 + $0xf0] sm:$0xff] %v6055_v31  ;;  %v6063_v48 = vadd.f32 %v4287_v0, %v2988_v12  ;;  %v3181_v30 = vadd.f32 %v3180_v5, %v6055_v31 }
 0x21b   : > { %3322 = vst [vmem:[%s5866_s19 + $0xf8] sm:$0xff] %v6063_v48  ;;  %v3182_v32 = vadd.f32 %v3181_v30, %v6063_v48 }
 0x21d   : > { %v3183_v4 = vrot.slane %v3182_v32, 4 }
 0x21f   : > { %v3184_v29 = vadd.f32 %v3183_v4, %v3182_v32 }
 0x221   : > { %v3185_v49 = vrot.slane %v3184_v29, 2 }
 0x223   : > { %v3186_v10 = vadd.f32 %v3185_v49, %v3184_v29 }
 0x225   : > { %v3187_v40 = vrot.slane %v3186_v10, 1 }
 0x227   : > { %v6069_v57 = vadd.f32 %v3187_v40, %v3186_v10 }
 0x229   : > { %v6072_v42 = vmul.f32 0.00390625, %v6069_v57 }
 0x22b   : > { %v3190_v45 = vsub.f32 %v5872_v8, %v6072_v42  ;;  %v3191_v33 = vsub.f32 %v5882_v51, %v6072_v42  ;;  %v3192_v62 = vsub.f32 %v5869_v13, %v6072_v42  ;;  %v3193_v1 = vsub.f32 %v5877_v38, %v6072_v42 }
 0x22c   : > { %v3194_v23 = vsub.f32 %v5901_v46, %v6072_v42  ;;  %v3195_v34 = vsub.f32 %v5913_v18, %v6072_v42  ;;  %v3196_v51 = vsub.f32 %v5898_v36, %v6072_v42  ;;  %v3197_v41 = vsub.f32 %v5907_v37, %v6072_v42 }
 0x22d   : > { %v3222_v52 = vmul.f32 %v3190_v45, %v3190_v45  ;;  %v3223_v17 = vmul.f32 %v3191_v33, %v3191_v33  ;;  %v3224_v6 = vmul.f32 %v3192_v62, %v3192_v62  ;;  %v3225_v8 = vmul.f32 %v3193_v1, %v3193_v1 }
 0x22e   : > { %v3226_v3 = vmul.f32 %v3194_v23, %v3194_v23  ;;  %v3227_v53 = vmul.f32 %v3195_v34, %v3195_v34  ;;  %v3198_v46 = vsub.f32 %v5927_v2, %v6072_v42  ;;  %v3228_v54 = vmul.f32 %v3196_v51, %v3196_v51 }
 0x22f   : > { %v3254_v20 = vadd.f32 %v3223_v17, %v3222_v52  ;;  %v3199_v18 = vsub.f32 %v5939_v47, %v6072_v42  ;;  %v3229_v55 = vmul.f32 %v3197_v41, %v3197_v41  ;;  %v3200_v36 = vsub.f32 %v5924_v39, %v6072_v42 }
 0x230   : > { %v3230_v19 = vmul.f32 %v3198_v46, %v3198_v46  ;;  %v3201_v37 = vsub.f32 %v5933_v11, %v6072_v42  ;;  %v3202_v2 = vsub.f32 %v5955_v21, %v6072_v42  ;;  %v3203_v47 = vsub.f32 %v5967_v61, %v6072_v42 }
 0x231   : > { %v3255_v25 = vadd.f32 %v3254_v20, %v3224_v6  ;;  %v3231_v15 = vmul.f32 %v3199_v18, %v3199_v18  ;;  %v3232_v5 = vmul.f32 %v3200_v36, %v3200_v36  ;;  %v3204_v39 = vsub.f32 %v5952_v14, %v6072_v42 }
 0x232   : > { %v3233_v32 = vmul.f32 %v3201_v37, %v3201_v37  ;;  %v3234_v29 = vmul.f32 %v3202_v2, %v3202_v2  ;;  %v3205_v11 = vsub.f32 %v5961_v63, %v6072_v42  ;;  %v3235_v10 = vmul.f32 %v3203_v47, %v3203_v47 }
 0x233   : > { %v3256_v13 = vadd.f32 %v3255_v25, %v3225_v8  ;;  %v3206_v21 = vsub.f32 %v5980_v60, %v6072_v42  ;;  %v3236_v45 = vmul.f32 %v3204_v39, %v3204_v39  ;;  %v3207_v61 = vsub.f32 %v5991_v28, %v6072_v42 }
 0x234   : > { %v3237_v62 = vmul.f32 %v3205_v11, %v3205_v11  ;;  %v3208_v14 = vsub.f32 %v5977_v56, %v6072_v42  ;;  %v3209_v63 = vsub.f32 %v5985_v59, %v6072_v42  ;;  %v3210_v60 = vsub.f32 %v6003_v22, %v6072_v42 }
 0x235   : > { %v3257_v38 = vadd.f32 %v3256_v13, %v3226_v3  ;;  %v3238_v17 = vmul.f32 %v3206_v21, %v3206_v21  ;;  %v3239_v23 = vmul.f32 %v3207_v61, %v3207_v61  ;;  %v3211_v28 = vsub.f32 %v6014_v16, %v6072_v42 }
 0x236   : > { %v3240_v20 = vmul.f32 %v3208_v14, %v3208_v14  ;;  %v3241_v8 = vmul.f32 %v3209_v63, %v3209_v63  ;;  %v3212_v56 = vsub.f32 %v6001_v35, %v6072_v42  ;;  %v3242_v51 = vmul.f32 %v3210_v60, %v3210_v60 }
 0x237   : > { %v3258_v0 = vadd.f32 %v3257_v38, %v3227_v53  ;;  %v3213_v59 = vsub.f32 %v6008_v44, %v6072_v42  ;;  %v3243_v13 = vmul.f32 %v3211_v28, %v3211_v28  ;;  %v3214_v22 = vsub.f32 %v6026_v50, %v6072_v42 }
 0x238   : > { %v3244_v53 = vmul.f32 %v3212_v56, %v3212_v56  ;;  %v3215_v16 = vsub.f32 %v6036_v43, %v6072_v42  ;;  %v3216_v35 = vsub.f32 %v6024_v26, %v6072_v42  ;;  %v3217_v44 = vsub.f32 %v6031_v58, %v6072_v42 }
 0x239   : > { %v3259_v24 = vadd.f32 %v3258_v0, %v3228_v54  ;;  %v3245_v46 = vmul.f32 %v3213_v59, %v3213_v59  ;;  %v3246_v0 = vmul.f32 %v3214_v22, %v3214_v22  ;;  %v3218_v50 = vsub.f32 %v6046_v27, %v6072_v42 }
 0x23a   : > { %v3248_v36 = vmul.f32 %v3216_v35, %v3216_v35  ;;  %v3219_v43 = vsub.f32 %v6053_v7, %v6072_v42  ;;  %v3220_v26 = vsub.f32 %v6055_v31, %v6072_v42  ;;  %v3221_v58 = vsub.f32 %v6063_v48, %v6072_v42 }
 0x23b   : > { %v3260_v9 = vadd.f32 %v3259_v24, %v3229_v55  ;;  %v3247_v55 = vmul.f32 %v3215_v16, %v3215_v16 }
 0x23c   : > { %v3251_v2 = vmul.f32 %v3219_v43, %v3219_v43  ;;  %v3253_v47 = vmul.f32 %v3221_v58, %v3221_v58 }
 0x23d   : > { %v3261_v12 = vadd.f32 %v3260_v9, %v3230_v19  ;;  %v3249_v9 = vmul.f32 %v3217_v44, %v3217_v44 }
 0x23f   : > { %v3262_v30 = vadd.f32 %v3261_v12, %v3231_v15  ;;  %v3250_v15 = vmul.f32 %v3218_v50, %v3218_v50 }
 0x241   : > { %v3263_v4 = vadd.f32 %v3262_v30, %v3232_v5  ;;  %v3252_v30 = vmul.f32 %v3220_v26, %v3220_v26 }
 0x243   : > { %v3264_v49 = vadd.f32 %v3263_v4, %v3233_v32 }
 0x245   : > { %v3265_v40 = vadd.f32 %v3264_v49, %v3234_v29 }
 0x247   : > { %v3266_v33 = vadd.f32 %v3265_v40, %v3235_v10 }
 0x249   : > { %v3267_v52 = vadd.f32 %v3266_v33, %v3236_v45 }
 0x24b   : > { %v3268_v1 = vadd.f32 %v3267_v52, %v3237_v62 }
 0x24d   : > { %v3269_v6 = vadd.f32 %v3268_v1, %v3238_v17 }
 0x24f   : > { %v3270_v34 = vadd.f32 %v3269_v6, %v3239_v23 }
 0x251   : > { %v3271_v25 = vadd.f32 %v3270_v34, %v3240_v20 }
 0x253   : > { %v3272_v3 = vadd.f32 %v3271_v25, %v3241_v8 }
 0x255   : > { %v3273_v41 = vadd.f32 %v3272_v3, %v3242_v51 }
 0x257   : > { %v3274_v38 = vadd.f32 %v3273_v41, %v3243_v13 }
 0x259   : > { %v3275_v54 = vadd.f32 %v3274_v38, %v3244_v53 }
 0x25b   : > { %v3276_v18 = vadd.f32 %v3275_v54, %v3245_v46 }
 0x25d   : > { %v3277_v24 = vadd.f32 %v3276_v18, %v3246_v0 }
 0x25f   : > { %v3278_v19 = vadd.f32 %v3277_v24, %v3247_v55 }
 0x261   : > { %v3279_v37 = vadd.f32 %v3278_v19, %v3248_v36 }
 0x263   : > { %v3280_v12 = vadd.f32 %v3279_v37, %v3249_v9 }
 0x265   : > { %v3281_v5 = vadd.f32 %v3280_v12, %v3250_v15 }
 0x267   : > { %v3282_v27 = vadd.f32 %v3281_v5, %v3251_v2 }
 0x269   : > { %v3283_v32 = vadd.f32 %v3282_v27, %v3252_v30 }
 0x26b   : > { %v3284_v4 = vadd.f32 %v3283_v32, %v3253_v47 }
 0x26d   : > { %v3285_v39 = vrot.slane %v3284_v4, 4 }
 0x26f   : > { %v3286_v7 = vadd.f32 %v3285_v39, %v3284_v4 }
 0x271   : > { %v3287_v29 = vrot.slane %v3286_v7, 2 }
 0x273   : > { %v3288_v49 = vadd.f32 %v3287_v29, %v3286_v7 }
 0x275   : > { %v3289_v11 = vrot.slane %v3288_v49, 1 }
 0x277   : > { %v3290_v31 = vadd.f32 %v3289_v11, %v3288_v49 }
 0x279   : > { %v3324_v48 = vsel %vm3323_vm2, %v6069_v57, %v3290_v31 }
 0x27a   : > { %3325 = vst [vmem:[%s181_s23] sm:$0x3] %v3324_v48 }
 0x27b PF: > { %s14_s12 = sadd.s32 1, %s4543_s12  }
 0x27c   : > { %p11_p4 = scmp.ge.s32.totalorder %s14_s12, 4  }
 0x27e   :  { %13 = sbr.rel (!%p11_p4) target bundleno = 1 (0x1), region = 72 }

// kernel: residual_block_forward.4
= control target key start
LH: loop header
LB: loop body
LE: loop exit
PB: predicated region body
PF: predicated region fallthrough
CT: control target
= control target key end

     0   :  { %s5304_s18 = smov 0   ;;  %s6953_s0 = inlined_call_operand.vmem [shape: f32[2,16,16,128], index: 0, kind: input, shape index: {}]   ;;  %s6954_s1 = inlined_call_operand.vmem [shape: f32[1,128], index: 1, kind: input, shape index: {}]   ;;  %s6955_s2 = inlined_call_operand.vmem [shape: f32[1,128], index: 2, kind: input, shape index: {}]   ;;  %s6956_s3 = inlined_call_operand.vmem [shape: bf16[1152,128], index: 3, kind: input, shape index: {}]   ;;  %s6957_s4 = inlined_call_operand.vmem [shape: f32[2,16,16,128], index: 4, kind: output, shape index: {0}]   ;;  %s6958_s5 = inlined_call_operand.vmem [shape: f32[2,2,128], index: 5, kind: output, shape index: {1}]  }
   0x1 LB: > { %s4198_s19 = sadd.s32 4294967295, %s5271_s18   ;;  %p4202_p0 = scmp.ge.s32.totalorder %s5271_s18, 1  ;;  %s5271_s18 = sphi %s5304_s18, %s16_s18  }
   0x2   : > { %p190_p1 = scmp.lt.s32.totalorder %s5271_s18, 3 }
   0x4   : > { %p191_p2 = pnand %p4202_p0, %p190_p1 }
   0x5   : > { %v5039_v0 = vld [vmem:[%s6956_s3 + $0x40] sm:$0xff] (!%p191_p2)   ;;  %v5273_v2 = vmov (!%p191_p2), 0   ;;  %v5041_v3 = vld [vmem:[%s6956_s3 + $0x48] sm:$0xff] (!%p191_p2)   ;;  %p222_p3 = scmp.lt.s32.totalorder (!%p191_p2), %s4198_s19, 1  ;;  %v5043_v5 = vld [vmem:[%s6956_s3 + $0x50] sm:$0xff] (!%p191_p2)   ;;  %vm853_vm1 = vcmask (!%p191_p2), 1043456  }
   0x6   : > { %194 = sbr.rel (%p191_p2) target bundleno = 677 (0x2a5), region = 36  ;;  %v5040_v1 = vld [vmem:[%s6956_s3] sm:$0xff] (!%p191_p2)   ;;  %379 = vst [vmem:[#allocation2] sm:$0xf] (!%p191_p2), %v5273_v2  ;;  %380 = vst [vmem:[#allocation2 + $0x4] sm:$0xf] (!%p191_p2), %v5273_v2  ;;  %4494 = vmatprep.subr.bf16.mxu0 (!%p191_p2), %v5039_v0  ;;  %5014 = vmatprep.subr.bf16.mxu1 (!%p191_p2), %v5039_v0 }
   0x7   : > { %381 = vst [vmem:[#allocation2 + $0x8] sm:$0x1] (!%p191_p2), %v5273_v2  ;;  %382 = vst [vmem:[#allocation2 + $0xc] sm:$0xf] (!%p191_p2), %v5273_v2  ;;  %4495 = vmatpush3.bf16.msra.mxu0 (!%p191_p2), %v5040_v1  ;;  %5022 = vmatpush3.bf16.msra.mxu1 (!%p191_p2), %v5040_v1  ;;  %v5042_v4 = vld [vmem:[%s6956_s3 + $0x8] sm:$0xff] (!%p191_p2)   ;;  %v5044_v6 = vld [vmem:[%s6956_s3 + $0x10] sm:$0xff] (!%p191_p2)  }
   0x8   : > { %383 = vst [vmem:[#allocation2 + $0x10] sm:$0xf] (!%p191_p2), %v5273_v2  ;;  %384 = vst [vmem:[#allocation2 + $0x14] sm:$0x1] (!%p191_p2), %v5273_v2  ;;  %4496 = vmatprep.subr.bf16.mxu0 (!%p191_p2), %v5041_v3  ;;  %5015 = vmatprep.subr.bf16.mxu1 (!%p191_p2), %v5041_v3  ;;  %v5045_v7 = vld [vmem:[%s6956_s3 + $0x58] sm:$0xff] (!%p191_p2)   ;;  %v5047_v9 = vld [vmem:[%s6956_s3 + $0x60] sm:$0xff] (!%p191_p2)  }
   0x9   : > { %385 = vst [vmem:[#allocation2 + $0x18] sm:$0xf] (!%p191_p2), %v5273_v2  ;;  %386 = vst [vmem:[#allocation2 + $0x1c] sm:$0xf] (!%p191_p2), %v5273_v2  ;;  %v5046_v8 = vld [vmem:[%s6956_s3 + $0x18] sm:$0xff] (!%p191_p2)   ;;  %v5048_v10 = vld [vmem:[%s6956_s3 + $0x20] sm:$0xff] (!%p191_p2)  }
   0xa   : > { %387 = vst [vmem:[#allocation2 + $0x20] sm:$0x1] (!%p191_p2), %v5273_v2  ;;  %388 = vst [vmem:[#allocation2 + $0x24] sm:$0xf] (!%p191_p2), %v5273_v2  ;;  %v5049_v11 = vld [vmem:[%s6956_s3 + $0x68] sm:$0xff] (!%p191_p2)   ;;  %v5051_v24 = vld [vmem:[%s6956_s3 + $0x70] sm:$0xff] (!%p191_p2)  }
   0xb   : > { %389 = vst [vmem:[#allocation2 + $0x28] sm:$0xf] (!%p191_p2), %v5273_v2  ;;  %390 = vst [vmem:[#allocation2 + $0x2c] sm:$0x1] (!%p191_p2), %v5273_v2  ;;  %4497 = vmatpush3.bf16.msra.mxu0 (!%p191_p2), %v5042_v4  ;;  %5023 = vmatpush3.bf16.msra.mxu1 (!%p191_p2), %v5042_v4  ;;  %v5371_v18 = vld [vmem:[%s6954_s1] ss:$0 sm:$0xff] (!%p191_p2) }
   0xc   : > { %391 = vst [vmem:[#allocation2 + $0x30] sm:$0xf] (!%p191_p2), %v5273_v2  ;;  %392 = vst [vmem:[#allocation2 + $0x34] sm:$0xf] (!%p191_p2), %v5273_v2  ;;  %4498 = vmatprep.subr.bf16.mxu0 (!%p191_p2), %v5043_v5  ;;  %5016 = vmatprep.subr.bf16.mxu1 (!%p191_p2), %v5043_v5  ;;  %v5050_v19 = vld [vmem:[%s6956_s3 + $0x28] sm:$0xff] (!%p191_p2)   ;;  %v5052_v31 = vld [vmem:[%s6956_s3 + $0x30] sm:$0xff] (!%p191_p2)  }
   0xd   : > { %393 = vst [vmem:[#allocation2 + $0x38] sm:$0x1] %v5273_v2  ;;  %394 = vst [vmem:[#allocation2 + $0x3c] sm:$0xf] %v5273_v2  ;;  %s6966_s19 = smov (!%p222_p3, %s4198_s19), 1  ;;  %v5053_v33 = vld [vmem:[%s6956_s3 + $0x78] sm:$0xff]  }
   0xe   : > { %395 = vst [vmem:[#allocation2 + $0x40] sm:$0xf] %v5273_v2  ;;  %396 = vst [vmem:[#allocation2 + $0x44] sm:$0x1] %v5273_v2  ;;  %s4460_s11 = sshll.u32 %s6966_s19, 8  ;;  %vm860_vm2 = vcmask 1040384  }
   0xf   : > { %397 = vst [vmem:[#allocation2 + $0x48] sm:$0xf] %v5273_v2  ;;  %398 = vst [vmem:[#allocation2 + $0x4c] sm:$0xf] %v5273_v2  ;;  %4499 = vmatpush3.bf16.msra.mxu0 %v5044_v6  ;;  %5024 = vmatpush3.bf16.msra.mxu1 %v5044_v6  ;;  %s5354_s20 = scalar_lea.vmem %s6953_s0, %s4460_s11  ;;  %v970_v12 = vld [vmem:[#allocation2] sm:$0xf]  ;;  %s6660_s28 = scalar_lea.vmem %s6957_s4, %s4460_s11 }
  0x10   : > { %399 = vst [vmem:[#allocation2 + $0x50] sm:$0x1] %v5273_v2  ;;  %400 = vst [vmem:[#allocation2 + $0x54] sm:$0xf] %v5273_v2  ;;  %4500 = vmatprep.subr.bf16.mxu0 %v5045_v7  ;;  %5017 = vmatprep.subr.bf16.mxu1 %v5045_v7  ;;  %v5359_v13 = vld [vmem:[#allocation2 + $0x4] sm:$0xf] }
  0x11   : > { %401 = vst [vmem:[#allocation2 + $0x58] sm:$0xf] %v5273_v2  ;;  %402 = vst [vmem:[#allocation2 + $0x5c] sm:$0x1] %v5273_v2  ;;  %v5362_v14 = vcombine.low %v970_v12, %v5359_v13  ;;  %v259_v16 = vld [vmem:[%s5354_s20 + $0xb0] sm:$0xff]  ;;  %v260_v17 = vld [vmem:[%s5354_s20 + $0xb8] sm:$0xff] }
  0x12   : > { %403 = vst [vmem:[#allocation2 + $0x60] sm:$0xf] %v5273_v2  ;;  %404 = vst [vmem:[#allocation2 + $0x64] sm:$0xf] %v5273_v2  ;;  %v5382_v23 = vld [vmem:[%s6955_s2] ss:$0 sm:$0xff]  ;;  %v298_v25 = vmul.f32 %v5371_v18, %v259_v16  ;;  %v299_v26 = vmul.f32 %v5371_v18, %v260_v17 }
  0x13   : > { %405 = vst [vmem:[#allocation2 + $0x68] sm:$0x1] %v5273_v2  ;;  %406 = vst [vmem:[#allocation2 + $0x6c] sm:$0xf] %v5273_v2  ;;  %4501 = vmatpush3.bf16.msra.mxu0 %v5046_v8  ;;  %5025 = vmatpush3.bf16.msra.mxu1 %v5046_v8  ;;  %v1309_v20 = vshrl.u32 %v5362_v14, 16  ;;  %v1311_v21 = vshll.u32 %v5362_v14, 16 }
  0x14   : > { %407 = vst [vmem:[#allocation2 + $0x70] sm:$0xf] %v5273_v2  ;;  %408 = vst [vmem:[#allocation2 + $0x74] sm:$0x1] %v5273_v2  ;;  %4502 = vmatprep.subr.bf16.mxu0 %v5047_v9  ;;  %5018 = vmatprep.subr.bf16.mxu1 %v5047_v9  ;;  %vm1307_vm0 = vsmask.f32 7424  ;;  %v337_v29 = vadd.f32 %v5382_v23, %v298_v25  ;;  %v338_v30 = vadd.f32 %v5382_v23, %v299_v26 }
  0x15   : > { %409 = vst [vmem:[#allocation2 + $0x78] sm:$0xf] %v5273_v2  ;;  %410 = vst [vmem:[#allocation2 + $0x7c] sm:$0xf] %v5273_v2  ;;  %v1313_v27 = vrot.slane %v1311_v21, 1  ;;  %v5054_v36 = vld [vmem:[%s6956_s3 + $0x38] sm:$0xff]  }
  0x16   : > { %411 = vst [vmem:[#allocation2 + $0x80] sm:$0x1] %v5273_v2  ;;  %412 = vst [vmem:[#allocation2 + $0x84] sm:$0xf] %v5273_v2  ;;  %v369_v34 = vmax.f32 %v337_v29, 0.0  ;;  %v370_v35 = vmax.f32 %v338_v30, 0.0 }
  0x17   : > { %413 = vst [vmem:[#allocation2 + $0x88] sm:$0xf] %v5273_v2  ;;  %414 = vst [vmem:[#allocation2 + $0x8c] sm:$0x1] %v5273_v2  ;;  %4503 = vmatpush3.bf16.msra.mxu0 %v5048_v10  ;;  %5026 = vmatpush3.bf16.msra.mxu1 %v5048_v10  ;;  %v1314_v32 = vor.u32 %v1313_v27, %v1309_v20  ;;  %vm529_vm3 = vsmask.f32 256 }
  0x18   : > { %415 = vst [vmem:[#allocation2 + $0x90] sm:$0xf] %v5273_v2  ;;  %416 = vst [vmem:[#allocation2 + $0x94] sm:$0xf] %v5273_v2  ;;  %4504 = vmatprep.subr.bf16.mxu0 %v5049_v11  ;;  %5019 = vmatprep.subr.bf16.mxu1 %v5049_v11  ;;  %v4484_v38 = vpack.c.bf16 %v369_v34, %v369_v34  ;;  %v4485_v39 = vpack.c.bf16 %v370_v35, %v370_v35  ;;  %vm530_vm4 = vsmask.f32 4368 }
  0x19   : > { %417 = vst [vmem:[#allocation2 + $0x98] sm:$0x1] %v5273_v2  ;;  %418 = vst [vmem:[#allocation2 + $0x9c] sm:$0xf] %v5273_v2  ;;  %v237_v40 = vld [vmem:[%s5354_s20] sm:$0xff]  ;;  %v238_v41 = vld [vmem:[%s5354_s20 + $0x8] sm:$0xff] }
  0x1a   : > { %419 = vst [vmem:[#allocation2 + $0xa0] sm:$0xf] %v5273_v2  ;;  %420 = vst [vmem:[#allocation2 + $0xa4] sm:$0x1] %v5273_v2  ;;  %vm854_vm5 = vsmask.f32 7938  ;;  %v276_v44 = vmul.f32 %v5371_v18, %v237_v40  ;;  %v277_v45 = vmul.f32 %v5371_v18, %v238_v41 }
  0x1b   : > { %421 = vst [vmem:[#allocation2 + $0xa8] sm:$0xf] %v5273_v2  ;;  %422 = vst [vmem:[#allocation2 + $0xac] sm:$0xf] %v5273_v2  ;;  %4505 = vmatpush3.bf16.msra.mxu0 %v5050_v19  ;;  %5027 = vmatpush3.bf16.msra.mxu1 %v5050_v19  ;;  %v5059_v42 = vld [vmem:[%s6956_s3 + $0xc0] sm:$0xff]   ;;  %v720_v46 = vshrl.u32 %v4484_v38, 16 }
  0x1c   : > { %423 = vst [vmem:[#allocation2 + $0xb0] sm:$0x1] %v5273_v2  ;;  %424 = vst [vmem:[#allocation2 + $0xb4] sm:$0xf] %v5273_v2  ;;  %4506 = vmatprep.subr.bf16.mxu0 %v5051_v24  ;;  %5020 = vmatprep.subr.bf16.mxu1 %v5051_v24  ;;  %v5060_v43 = vld [vmem:[%s6956_s3 + $0x140] sm:$0xff]   ;;  %v723_v47 = vshll.u32 %v4484_v38, 16  ;;  %v315_v52 = vadd.f32 %v5382_v23, %v276_v44  ;;  %v316_v53 = vadd.f32 %v5382_v23, %v277_v45 }
  0x1d   : > { %425 = vst [vmem:[#allocation2 + $0xb8] sm:$0xf] %v5273_v2  ;;  %426 = vst [vmem:[#allocation2 + $0xbc] sm:$0x1] %v5273_v2  ;;  %v728_v48 = vshrl.u32 %v4485_v39, 16  ;;  %v731_v49 = vshll.u32 %v4485_v39, 16 }
  0x1e   : > { %427 = vst [vmem:[#allocation2 + $0xc0] sm:$0xf] %v5273_v2  ;;  %428 = vst [vmem:[#allocation2 + $0xc4] sm:$0xf] %v5273_v2  ;;  %v722_v54 = vrot.slane %v720_v46, 7  ;;  %v261_v57 = vld [vmem:[%s5354_s20 + $0xc0] sm:$0xff] }
  0x1f   : > { %429 = vst [vmem:[#allocation2 + $0xc8] sm:$0x1] %v5273_v2  ;;  %430 = vst [vmem:[#allocation2 + $0xcc] sm:$0xf] %v5273_v2  ;;  %4507 = vmatpush3.bf16.msra.mxu0 %v5052_v31  ;;  %5028 = vmatpush3.bf16.msra.mxu1 %v5052_v31  ;;  %v935_v51 = vld [vmem:[#allocation2 + $0x90] sm:$0xf]  ;;  %v300_v0 = vmul.f32 %v5371_v18, %v261_v57 }
  0x20   : > { %431 = vst [vmem:[#allocation2 + $0xd0] sm:$0xf] %v5273_v2  ;;  %432 = vst [vmem:[#allocation2 + $0xd4] sm:$0x1] %v5273_v2  ;;  %4508 = vmatprep.subr.bf16.mxu0 %v5053_v33  ;;  %5021 = vmatprep.subr.bf16.mxu1 %v5053_v33  ;;  %v730_v55 = vrot.slane %v728_v48, 7  ;;  %v262_v58 = vld [vmem:[%s5354_s20 + $0xc8] sm:$0xff]  ;;  %v725_v2 = vor.u32 %v723_v47, %v722_v54 }
  0x21   : > { %v5364_v15 = vld [vmem:[#allocation2 + $0x8] ss:$0 sps:$4 sm:$0x11]   ;;  %vm5413_vm6 = vmor %vm529_vm3, %vm530_vm4  ;;  %v939_v60 = vld [vmem:[#allocation2 + $0x98] sm:$0x1]  ;;  %v347_v62 = vmax.f32 %v315_v52, 0.0  ;;  %v301_v1 = vmul.f32 %v5371_v18, %v262_v58  ;;  %v339_v8 = vadd.f32 %v5382_v23, %v300_v0 }
  0x22   : > { %v1316_v22 = vshll.u32 %v5364_v15, 16  ;;  %vm5421_vm7 = vmand %vm853_vm1, %vm854_vm5  ;;  %v5062_v61 = vld [vmem:[%s6956_s3 + $0x100] sm:$0xff]   ;;  %v348_v63 = vmax.f32 %v316_v53, 0.0  ;;  %v726_v3 = vrot.slane %v722_v54, 4  ;;  %v733_v4 = vor.u32 %v731_v49, %v730_v55  ;;  %v239_v16 = vld [vmem:[%s5354_s20 + $0x10] sm:$0xff]  ;;  %s4207_s11 = sshll.u32 %s6966_s19, 1 }
  0x23   : > { %4509 = vmatpush3.bf16.msra.mxu0 %v5054_v36  ;;  %5029 = vmatpush3.bf16.msra.mxu1 %v5054_v36  ;;  %vm5429_vm8 = vmand %vm860_vm2, %vm529_vm3  ;;  %v735_v5 = vrot.slane %v730_v55, 4  ;;  %v4462_v6 = vpack.c.bf16 %v347_v62, %v347_v62  ;;  %v340_v9 = vadd.f32 %v5382_v23, %v301_v1  ;;  %v936_v11 = vsel %vm5421_vm7, %v725_v2, %v935_v51  ;;  %v240_v17 = vld [vmem:[%s5354_s20 + $0x18] sm:$0xff]  ;;  %v862_v24 = vld [vmem:[#allocation2 + $0x14] sm:$0x1]  ;;  %s235_s6 = scalar_lea.vmem %s6958_s5, %s4207_s11 }
  0x24   : > { %v1318_v28 = vrot.slane %v1316_v22, 1  ;;  %4606 = vmatprep.subr.bf16.mxu1 %v5059_v42  ;;  %4718 = vmatprep.subr.bf16.mxu0 %v5060_v43  ;;  %v4463_v7 = vpack.c.bf16 %v348_v63, %v348_v63  ;;  %v734_v10 = vsel %vm5413_vm6, %v726_v3, %v733_v4  ;;  %937 = vst [vmem:[#allocation2 + $0x90] sm:$0xf] %v936_v11  ;;  %v371_v25 = vmax.f32 %v339_v8, 0.0  ;;  %v5074_v31 = vld [vmem:[%s6956_s3 + $0x148] sm:$0xff]   ;;  %v263_v49 = vld [vmem:[%s5354_s20 + $0xd0] sm:$0xff] }
  0x25   : > { %v940_v12 = vsel %vm5429_vm8, %v735_v5, %v939_v60  ;;  %938 = vst [vmem:[#allocation2 + $0x94] sm:$0xf] %v734_v10  ;;  %v533_v19 = vshrl.u32 %v4462_v6, 16  ;;  %v536_v20 = vshll.u32 %v4462_v6, 16  ;;  %v372_v26 = vmax.f32 %v340_v9, 0.0  ;;  %v5076_v40 = vld [vmem:[%s6956_s3 + $0x108] sm:$0xff]  }
  0x26   : > { %v1319_v37 = vsel %vm1307_vm0, %v1314_v32, %v1318_v28  ;;  %941 = vst [vmem:[#allocation2 + $0x98] sm:$0x1] %v940_v12  ;;  %v541_v21 = vshrl.u32 %v4463_v7, 16  ;;  %v544_v22 = vshll.u32 %v4463_v7, 16  ;;  %v278_v27 = vmul.f32 %v5371_v18, %v239_v16  ;;  %v264_v51 = vld [vmem:[%s5354_s20 + $0xd8] sm:$0xff] }
  0x27   : > { %3165 = vmatprep.mubr.bf16.mxu0 %v1319_v37  ;;  %v279_v28 = vmul.f32 %v5371_v18, %v240_v17  ;;  %v535_v29 = vrot.slane %v533_v19, 7  ;;  %v4486_v32 = vpack.c.bf16 %v371_v25, %v371_v25  ;;  %v4487_v33 = vpack.c.bf16 %v372_v26, %v372_v26  ;;  %v942_v63 = vld [vmem:[#allocation2 + $0x9c] sm:$0xf]  ;;  %v946_v0 = vld [vmem:[#allocation2 + $0xa4] sm:$0x1] }
  0x28   : > { %3166 = vmatmul.mubr.bf16.vlgmr.msra.gmra.mrb[0].mxu0 %v5362_v14  ;;  %v856_v14 = vld [vmem:[#allocation2 + $0xc] sm:$0xf]  ;;  %v543_v30 = vrot.slane %v541_v21, 7  ;;  %v317_v34 = vadd.f32 %v5382_v23, %v278_v27  ;;  %v302_v54 = vmul.f32 %v5371_v18, %v263_v49  ;;  %v303_v55 = vmul.f32 %v5371_v18, %v264_v51 }
  0x29   : > { %4719 = vmatpush3.bf16.msra.mxu0 %v5062_v61  ;;  %v318_v35 = vadd.f32 %v5382_v23, %v279_v28  ;;  %v538_v36 = vor.u32 %v536_v20, %v535_v29  ;;  %v539_v37 = vrot.slane %v535_v29, 4  ;;  %v737_v41 = vshrl.u32 %v4486_v32, 16  ;;  %v241_v20 = vld [vmem:[%s5354_s20 + $0x20] sm:$0xff]  ;;  %v242_v21 = vld [vmem:[%s5354_s20 + $0x28] sm:$0xff] }
  0x2a   : > { %v546_v38 = vor.u32 %v544_v22, %v543_v30  ;;  %v548_v39 = vrot.slane %v543_v30, 4  ;;  %4720 = vmatprep.subr.bf16.mxu0 %v5074_v31  ;;  %v740_v42 = vshll.u32 %v4486_v32, 16  ;;  %v745_v43 = vshrl.u32 %v4487_v33, 16  ;;  %v5061_v22 = vld [vmem:[%s6956_s3 + $0x80] sm:$0xff]   ;;  %v5065_v30 = vld [vmem:[%s6956_s3 + $0xc8] sm:$0xff]  }
  0x2b   : > { %v748_v44 = vshll.u32 %v4487_v33, 16  ;;  %v857_v46 = vsel %vm5421_vm7, %v538_v36, %v856_v14  ;;  %v349_v48 = vmax.f32 %v317_v34, 0.0  ;;  %v994_v52 = vld [vmem:[#allocation2 + $0x90] sm:$0xf]  ;;  %v739_v60 = vrot.slane %v737_v41, 7 }
  0x2c   : > { %v547_v45 = vsel %vm5413_vm6, %v539_v37, %v546_v38  ;;  %v863_v47 = vsel %vm5429_vm8, %v548_v39, %v862_v24  ;;  %v995_v53 = vld [vmem:[#allocation2 + $0x94] sm:$0xf]  ;;  %858 = vst [vmem:[#allocation2 + $0xc] sm:$0xf] %v857_v46  ;;  %v747_v61 = vrot.slane %v745_v43, 7  ;;  %v350_v62 = vmax.f32 %v318_v35, 0.0 }
  0x2d   : > { %4721 = vmatpush3.bf16.msra.mxu0 %v5076_v40  ;;  %859 = vst [vmem:[#allocation2 + $0x10] sm:$0xf] %v547_v45  ;;  %864 = vst [vmem:[#allocation2 + $0x14] sm:$0x1] %v863_v47  ;;  %v4254_v57 = vcombine.low %v994_v52, %v995_v53  ;;  %v4464_v1 = vpack.c.bf16 %v349_v48, %v349_v48  ;;  %v341_v2 = vadd.f32 %v5382_v23, %v302_v54  ;;  %v865_v31 = vld [vmem:[#allocation2 + $0x18] sm:$0xf] }
  0x2e   : > { %v5058_v58 = vld [vmem:[#allocation2 + $0x98] ss:$0 sps:$4 sm:$0x11]   ;;  %v342_v3 = vadd.f32 %v5382_v23, %v303_v55  ;;  %v742_v7 = vor.u32 %v740_v42, %v739_v60  ;;  %v743_v8 = vrot.slane %v739_v60, 4  ;;  %v750_v9 = vor.u32 %v748_v44, %v747_v61  ;;  %v869_v39 = vld [vmem:[#allocation2 + $0x20] sm:$0x1] }
  0x2f   : > { %v1453_v4 = vshrl.u32 %v4254_v57, 16  ;;  %v1455_v5 = vshll.u32 %v4254_v57, 16  ;;  %v1460_v6 = vshll.u32 %v5058_v58, 16  ;;  %v752_v10 = vrot.slane %v747_v61, 4  ;;  %v5066_v55 = vld [vmem:[%s6956_s3 + $0x88] sm:$0xff]   ;;  %v265_v61 = vld [vmem:[%s5354_s20 + $0xe0] sm:$0xff] }
  0x30   : > { %v4465_v11 = vpack.c.bf16 %v350_v62, %v350_v62  ;;  %v943_v17 = vsel %vm5421_vm7, %v742_v7, %v942_v63  ;;  %v550_v19 = vshrl.u32 %v4464_v1, 16  ;;  %v751_v14 = vsel %vm5413_vm6, %v743_v8, %v750_v9  ;;  %v949_v9 = vld [vmem:[#allocation2 + $0xa8] sm:$0xf] }
  0x31   : > { %v1457_v12 = vrot.slane %v1455_v5, 1  ;;  %v1462_v16 = vrot.slane %v1460_v6, 1  ;;  %944 = vst [vmem:[#allocation2 + $0x9c] sm:$0xf] %v943_v17  ;;  %v947_v24 = vsel %vm5429_vm8, %v752_v10, %v946_v0  ;;  %v553_v25 = vshll.u32 %v4464_v1, 16  ;;  %v5070_v6 = vld [vmem:[%s6956_s3 + $0x90] sm:$0xff]  }
  0x32   : > { %v558_v26 = vshrl.u32 %v4465_v11, 16  ;;  %945 = vst [vmem:[#allocation2 + $0xa0] sm:$0xf] %v751_v14  ;;  %948 = vst [vmem:[#allocation2 + $0xa4] sm:$0x1] %v947_v24  ;;  %v280_v32 = vmul.f32 %v5371_v18, %v241_v20  ;;  %v281_v33 = vmul.f32 %v5371_v18, %v242_v21  ;;  %v552_v36 = vrot.slane %v550_v19, 7 }
  0x33   : > { %v1458_v27 = vor.u32 %v1457_v12, %v1453_v4  ;;  %v972_v28 = vld [vmem:[#allocation2 + $0xc] sm:$0xf]  ;;  %v561_v38 = vshll.u32 %v4465_v11, 16  ;;  %v373_v41 = vmax.f32 %v341_v2, 0.0  ;;  %v374_v42 = vmax.f32 %v342_v3, 0.0  ;;  %v5088_v21 = vld [vmem:[%s6956_s3 + $0x150] sm:$0xff]  }
  0x34   : > { %v5482_v29 = vld [vmem:[#allocation2 + $0x10] sm:$0xf]  ;;  %v5492_v35 = vld [vmem:[#allocation2 + $0x14] ss:$0 sps:$4 sm:$0x11]   ;;  %v560_v37 = vrot.slane %v558_v26, 7  ;;  %v319_v43 = vadd.f32 %v5382_v23, %v280_v32  ;;  %v555_v47 = vor.u32 %v553_v25, %v552_v36  ;;  %v320_v10 = vadd.f32 %v5382_v23, %v281_v33  ;;  %4722 = vmatprep.subr.bf16.mxu0 %v5088_v21 }
  0x35   : > { %v5490_v34 = vcombine.low %v972_v28, %v5482_v29  ;;  %v1463_v40 = vsel %vm1307_vm0, %v1458_v27, %v1462_v16  ;;  %v1328_v46 = vshll.u32 %v5492_v35, 16  ;;  %v556_v48 = vrot.slane %v552_v36, 4  ;;  %v266_v3 = vld [vmem:[%s5354_s20 + $0xe8] sm:$0xff]  ;;  %v953_v17 = vld [vmem:[#allocation2 + $0xb0] sm:$0x1]  ;;  %v5075_v32 = vld [vmem:[%s6956_s3 + $0x98] sm:$0xff]  }
  0x36   : > { %3261 = vmatprep.mubr.bf16.mxu1 %v1463_v40  ;;  %v563_v49 = vor.u32 %v561_v38, %v560_v37  ;;  %v565_v51 = vrot.slane %v560_v37, 4  ;;  %v4488_v52 = vpack.c.bf16 %v373_v41, %v373_v41  ;;  %v866_v58 = vsel %vm5421_vm7, %v555_v47, %v865_v31 }
  0x37   : > { %v1321_v44 = vshrl.u32 %v5490_v34, 16  ;;  %v1323_v45 = vshll.u32 %v5490_v34, 16  ;;  %3262 = vmatmul.mubr.bf16.vlgmr.msra.gmra.mrb[0].mxu1 %v4254_v57  ;;  %v1330_v54 = vrot.slane %v1328_v46, 1  ;;  %v4489_v60 = vpack.c.bf16 %v374_v42, %v374_v42  ;;  %v5069_v57 = vld [vmem:[%s6956_s3 + $0xd0] sm:$0xff]   ;;  %867 = vst [vmem:[#allocation2 + $0x18] sm:$0xf] %v866_v58 }
  0x38   : > { %4607 = vmatpush3.bf16.msra.mxu1 %v5061_v22  ;;  %v996_v62 = vld [vmem:[#allocation2 + $0x9c] sm:$0xf]  ;;  %v564_v63 = vsel %vm5413_vm6, %v556_v48, %v563_v49  ;;  %v870_v0 = vsel %vm5429_vm8, %v565_v51, %v869_v39  ;;  %v754_v1 = vshrl.u32 %v4488_v52, 16  ;;  %v757_v2 = vshll.u32 %v4488_v52, 16  ;;  %v5079_v42 = vld [vmem:[%s6956_s3 + $0xe0] sm:$0xff]  }
  0x39   : > { %v1325_v53 = vrot.slane %v1323_v45, 1  ;;  %4608 = vmatprep.subr.bf16.mxu1 %v5065_v30  ;;  %v997_v5 = vld [vmem:[#allocation2 + $0xa0] sm:$0xf]  ;;  %868 = vst [vmem:[#allocation2 + $0x1c] sm:$0xf] %v564_v63  ;;  %v762_v7 = vshrl.u32 %v4489_v60, 16  ;;  %v304_v20 = vmul.f32 %v5371_v18, %v265_v61  ;;  %v305_v25 = vmul.f32 %v5371_v18, %v266_v3 }
  0x3a   : > { %871 = vst [vmem:[#allocation2 + $0x20] sm:$0x1] %v870_v0  ;;  %v765_v8 = vshll.u32 %v4489_v60, 16  ;;  %v5517_v11 = vcombine.low %v996_v62, %v997_v5  ;;  %v5068_v12 = vld [vmem:[#allocation2 + $0xa4] ss:$0 sps:$4 sm:$0x11]  }
  0x3b   : > { %v1326_v4 = vor.u32 %v1325_v53, %v1321_v44  ;;  %v756_v16 = vrot.slane %v754_v1, 7  ;;  %v351_v19 = vmax.f32 %v319_v43, 0.0  ;;  %v764_v14 = vrot.slane %v762_v7, 7  ;;  %v5073_v30 = vld [vmem:[%s6956_s3 + $0xd8] sm:$0xff]   ;;  %v5090_v61 = vld [vmem:[%s6956_s3 + $0x110] sm:$0xff]   ;;  %v5080_v63 = vld [vmem:[%s6956_s3 + $0xa0] sm:$0xff]  }
  0x3c   : > { %4609 = vmatpush3.bf16.msra.mxu1 %v5066_v55  ;;  %v352_v24 = vmax.f32 %v320_v10, 0.0  ;;  %v1465_v26 = vshrl.u32 %v5517_v11, 16  ;;  %v1467_v27 = vshll.u32 %v5517_v11, 16  ;;  %v1472_v28 = vshll.u32 %v5068_v12, 16  ;;  %v243_v62 = vld [vmem:[%s5354_s20 + $0x30] sm:$0xff]  ;;  %4723 = vmatpush3.bf16.msra.mxu0 %v5090_v61 }
  0x3d   : > { %v1331_v22 = vsel %vm1307_vm0, %v1326_v4, %v1330_v54  ;;  %4610 = vmatprep.subr.bf16.mxu1 %v5069_v57  ;;  %v759_v31 = vor.u32 %v757_v2, %v756_v16  ;;  %v760_v33 = vrot.slane %v756_v16, 4  ;;  %v767_v36 = vor.u32 %v765_v8, %v764_v14  ;;  %v872_v1 = vld [vmem:[#allocation2 + $0x24] sm:$0xf]  ;;  %v876_v8 = vld [vmem:[#allocation2 + $0x2c] sm:$0x1] }
  0x3e   : > { %3173 = vmatprep.mubr.bf16.mxu0 %v1331_v22  ;;  %v769_v37 = vrot.slane %v764_v14, 4  ;;  %v4466_v38 = vpack.c.bf16 %v351_v19, %v351_v19  ;;  %v1469_v39 = vrot.slane %v1467_v27, 1  ;;  %v1474_v40 = vrot.slane %v1472_v28, 1 }
  0x3f   : > { %3174 = vmatmul.mubr.bf16.gmra.mrb[4].mxu0 %v5490_v34  ;;  %v950_v41 = vsel %vm5421_vm7, %v759_v31, %v949_v9  ;;  %v4467_v43 = vpack.c.bf16 %v352_v24, %v352_v24  ;;  %v974_v34 = vld [vmem:[#allocation2 + $0x18] sm:$0xf]  ;;  %v768_v44 = vsel %vm5413_vm6, %v760_v33, %v767_v36  ;;  %v343_v53 = vadd.f32 %v5382_v23, %v304_v20 }
  0x40   : > { %4611 = vmatpush3.bf16.msra.mxu1 %v5070_v6  ;;  %951 = vst [vmem:[#allocation2 + $0xa8] sm:$0xf] %v950_v41  ;;  %v954_v45 = vsel %vm5429_vm8, %v769_v37, %v953_v17  ;;  %v567_v46 = vshrl.u32 %v4466_v38, 16  ;;  %v570_v47 = vshll.u32 %v4466_v38, 16  ;;  %v1470_v48 = vor.u32 %v1469_v39, %v1465_v26  ;;  %v5543_v49 = vld [vmem:[#allocation2 + $0x1c] sm:$0xf] }
  0x41   : > { %4612 = vmatprep.subr.bf16.mxu1 %v5073_v30  ;;  %952 = vst [vmem:[#allocation2 + $0xac] sm:$0xf] %v768_v44  ;;  %955 = vst [vmem:[#allocation2 + $0xb0] sm:$0x1] %v954_v45  ;;  %v575_v51 = vshrl.u32 %v4467_v43, 16  ;;  %v578_v52 = vshll.u32 %v4467_v43, 16  ;;  %v5547_v54 = vcombine.low %v974_v34, %v5543_v49  ;;  %v344_v60 = vadd.f32 %v5382_v23, %v305_v25 }
  0x42   : > { %v5549_v55 = vld [vmem:[#allocation2 + $0x20] ss:$0 sps:$4 sm:$0x11]   ;;  %v569_v58 = vrot.slane %v567_v46, 7  ;;  %v1475_v57 = vsel %vm1307_vm0, %v1470_v48, %v1474_v40  ;;  %v375_v2 = vmax.f32 %v343_v53, 0.0  ;;  %v282_v3 = vmul.f32 %v5371_v18, %v243_v62  ;;  %v244_v9 = vld [vmem:[%s5354_s20 + $0x38] sm:$0xff] }
  0x43   : > { %v577_v0 = vrot.slane %v575_v51, 7  ;;  %3269 = vmatprep.mubr.bf16.mxu1 %v1475_v57  ;;  %v1333_v4 = vshrl.u32 %v5547_v54, 16  ;;  %v1335_v5 = vshll.u32 %v5547_v54, 16  ;;  %v1340_v6 = vshll.u32 %v5549_v55, 16  ;;  %v5083_v17 = vld [vmem:[%s6956_s3 + $0xe8] sm:$0xff]   ;;  %v5087_v41 = vld [vmem:[%s6956_s3 + $0xf0] sm:$0xff]  }
  0x44   : > { %4613 = vmatpush3.bf16.msra.mxu1 %v5075_v32  ;;  %v572_v7 = vor.u32 %v570_v47, %v569_v58  ;;  %v573_v10 = vrot.slane %v569_v58, 4  ;;  %v376_v19 = vmax.f32 %v344_v60, 0.0  ;;  %v4490_v14 = vpack.c.bf16 %v375_v2, %v375_v2  ;;  %v5084_v26 = vld [vmem:[%s6956_s3 + $0xa8] sm:$0xff]   ;;  %v956_v44 = vld [vmem:[#allocation2 + $0xb4] sm:$0xf]  ;;  %v5093_v2 = vld [vmem:[%s6956_s3 + $0xf8] sm:$0xff]  }
  0x45   : > { %3270 = vmatmul.mubr.bf16.gmra.mrb[4].mxu1 %v5517_v11  ;;  %4614 = vmatprep.subr.bf16.mxu1 %v5079_v42  ;;  %v580_v12 = vor.u32 %v578_v52, %v577_v0  ;;  %v582_v16 = vrot.slane %v577_v0, 4  ;;  %v1337_v20 = vrot.slane %v1335_v5, 1  ;;  %v1342_v21 = vrot.slane %v1340_v6, 1  ;;  %v960_v45 = vld [vmem:[#allocation2 + $0xbc] sm:$0x1]  ;;  %v5089_v60 = vld [vmem:[%s6956_s3 + $0xb0] sm:$0xff]  }
  0x46   : > { %v873_v22 = vsel %vm5421_vm7, %v572_v7, %v872_v1  ;;  %v4491_v27 = vpack.c.bf16 %v376_v19, %v376_v19  ;;  %v283_v28 = vmul.f32 %v5371_v18, %v244_v9  ;;  %v771_v32 = vshrl.u32 %v4490_v14, 16 }
  0x47   : > { %v998_v24 = vld [vmem:[#allocation2 + $0xa8] sm:$0xf]  ;;  %v581_v11 = vsel %vm5413_vm6, %v573_v10, %v580_v12  ;;  %874 = vst [vmem:[#allocation2 + $0x24] sm:$0xf] %v873_v22  ;;  %v877_v25 = vsel %vm5429_vm8, %v582_v16, %v876_v8  ;;  %v1338_v30 = vor.u32 %v1337_v20, %v1333_v4  ;;  %v774_v33 = vshll.u32 %v4490_v14, 16  ;;  %v5094_v22 = vld [vmem:[%s6956_s3 + $0xb8] sm:$0xff]  }
  0x48   : > { %v999_v31 = vld [vmem:[#allocation2 + $0xac] sm:$0xf]  ;;  %4615 = vmatpush3.bf16.msra.mxu1 %v5080_v63  ;;  %875 = vst [vmem:[#allocation2 + $0x28] sm:$0xf] %v581_v11  ;;  %878 = vst [vmem:[#allocation2 + $0x2c] sm:$0x1] %v877_v25  ;;  %v321_v36 = vadd.f32 %v5382_v23, %v282_v3  ;;  %v322_v42 = vadd.f32 %v5382_v23, %v283_v28 }
  0x49   : > { %v5580_v37 = vcombine.low %v998_v24, %v999_v31  ;;  %v5078_v38 = vld [vmem:[#allocation2 + $0xb0] ss:$0 sps:$4 sm:$0x11]   ;;  %4616 = vmatprep.subr.bf16.mxu1 %v5083_v17  ;;  %v779_v39 = vshrl.u32 %v4491_v27, 16  ;;  %v782_v40 = vshll.u32 %v4491_v27, 16  ;;  %v1343_v43 = vsel %vm1307_vm0, %v1338_v30, %v1342_v21  ;;  %v5097_v11 = vld [vmem:[%s6956_s3 + $0x1c0] sm:$0xff]  }
  0x4a   : > { %v773_v34 = vrot.slane %v771_v32, 7  ;;  %v353_v46 = vmax.f32 %v321_v36, 0.0  ;;  %3181 = vmatprep.mubr.bf16.mxu0 %v1343_v43  ;;  %v1484_v51 = vshll.u32 %v5078_v38, 16  ;;  %v354_v61 = vmax.f32 %v322_v42, 0.0  ;;  %v879_v12 = vld [vmem:[#allocation2 + $0x30] sm:$0xf] }
  0x4b   : > { %v1477_v47 = vshrl.u32 %v5580_v37, 16  ;;  %v1479_v48 = vshll.u32 %v5580_v37, 16  ;;  %v781_v52 = vrot.slane %v779_v39, 7  ;;  %3182 = vmatmul.mubr.bf16.gmra.mrb[8].mxu0 %v5547_v54  ;;  %v1018_v16 = vld [vmem:[#allocation2] sm:$0xe]  ;;  %vm1564_vm9 = vcmask 1046528  }
  0x4c   : > { %4617 = vmatpush3.bf16.msra.mxu1 %v5084_v26  ;;  %v776_v53 = vor.u32 %v774_v33, %v773_v34  ;;  %v777_v58 = vrot.slane %v773_v34, 4  ;;  %v4468_v62 = vpack.c.bf16 %v353_v46, %v353_v46  ;;  %v1486_v63 = vrot.slane %v1484_v51, 1  ;;  %v245_v25 = vld [vmem:[%s5354_s20 + $0x40] sm:$0xff]  ;;  %v246_v26 = vld [vmem:[%s5354_s20 + $0x48] sm:$0xff]  ;;  %v883_v32 = vld [vmem:[#allocation2 + $0x38] sm:$0x1] }
  0x4d   : > { %v1481_v57 = vrot.slane %v1479_v48, 1  ;;  %v784_v0 = vor.u32 %v782_v40, %v781_v52  ;;  %v786_v1 = vrot.slane %v781_v52, 4  ;;  %4618 = vmatprep.subr.bf16.mxu1 %v5087_v41  ;;  %v4469_v4 = vpack.c.bf16 %v354_v61, %v354_v61  ;;  %v5102_v33 = vld [vmem:[%s6956_s3 + $0x158] sm:$0xff]  }
  0x4e   : > { %v976_v3 = vld [vmem:[#allocation2 + $0x24] sm:$0xf]  ;;  %v957_v54 = vsel %vm5421_vm7, %v776_v53, %v956_v44  ;;  %v584_v5 = vshrl.u32 %v4468_v62, 16  ;;  %v587_v6 = vshll.u32 %v4468_v62, 16  ;;  %v1566_v36 = vrot.slane %v5364_v15, 1  ;;  %v5103_v41 = vld [vmem:[%s6956_s3 + $0x118] sm:$0xff]   ;;  %4724 = vmatprep.subr.bf16.mxu0 %v5102_v33 }
  0x4f   : > { %v1482_v7 = vor.u32 %v1481_v57, %v1477_v47  ;;  %v5598_v8 = vld [vmem:[#allocation2 + $0x28] sm:$0xf]  ;;  %v785_v9 = vsel %vm5413_vm6, %v777_v58, %v784_v0  ;;  %958 = vst [vmem:[#allocation2 + $0xb4] sm:$0xf] %v957_v54  ;;  %v961_v10 = vsel %vm5429_vm8, %v786_v1, %v960_v45  ;;  %v592_v21 = vshrl.u32 %v4469_v4, 16  ;;  %4725 = vmatpush3.bf16.msra.mxu0 %v5103_v41  ;;  %v247_v0 = vld [vmem:[%s5354_s20 + $0x50] sm:$0xff] }
  0x50   : > { %v4245_v17 = vcombine.low %v976_v3, %v5598_v8  ;;  %v5605_v19 = vld [vmem:[#allocation2 + $0x2c] ss:$0 sps:$4 sm:$0x11]   ;;  %959 = vst [vmem:[#allocation2 + $0xb8] sm:$0xf] %v785_v9  ;;  %4619 = vmatpush3.bf16.msra.mxu1 %v5089_v60  ;;  %v586_v20 = vrot.slane %v584_v5, 7  ;;  %v4274_v40 = vcombine.low %v1018_v16, %v5359_v13  ;;  %v284_v44 = vmul.f32 %v5371_v18, %v245_v25 }
  0x51   : > { %962 = vst [vmem:[#allocation2 + $0xbc] sm:$0x1] %v961_v10  ;;  %v1487_v14 = vsel %vm1307_vm0, %v1482_v7, %v1486_v63  ;;  %v595_v24 = vshll.u32 %v4469_v4, 16  ;;  %4620 = vmatprep.subr.bf16.mxu1 %v5093_v2  ;;  %v1352_v30 = vshll.u32 %v5605_v19, 16  ;;  %v594_v39 = vrot.slane %v592_v21, 7  ;;  %v248_v1 = vld [vmem:[%s5354_s20 + $0x58] sm:$0xff] }
  0x52   : > { %3277 = vmatprep.mubr.bf16.mxu1 %v1487_v14  ;;  %v1345_v27 = vshrl.u32 %v4245_v17, 16  ;;  %v1347_v28 = vshll.u32 %v4245_v17, 16  ;;  %v589_v31 = vor.u32 %v587_v6, %v586_v20  ;;  %v590_v38 = vrot.slane %v586_v20, 4  ;;  %v5111_v6 = vld [vmem:[%s6956_s3 + $0x160] sm:$0xff]   ;;  %v1034_v7 = vld [vmem:[#allocation2 + $0xc] sm:$0xf] }
  0x53   : > { %3278 = vmatmul.mubr.bf16.gmra.mrb[8].mxu1 %v5580_v37  ;;  %v1354_v43 = vrot.slane %v1352_v30, 1  ;;  %v597_v15 = vor.u32 %v595_v24, %v594_v39  ;;  %v599_v45 = vrot.slane %v594_v39, 4  ;;  %v1565_v37 = vrot.slane %v4274_v40, 1  ;;  %v5645_v9 = vld [vmem:[#allocation2 + $0x10] sm:$0xf]  ;;  %4726 = vmatprep.subr.bf16.mxu0 %v5111_v6  ;;  %v5099_v6 = vld [vmem:[%s6956_s3 + $0x180] sm:$0xff]  }
  0x54   : > { %v1349_v42 = vrot.slane %v1347_v28, 1  ;;  %v880_v34 = vsel %vm5421_vm7, %v589_v31, %v879_v12  ;;  %4621 = vmatpush3.bf16.msra.mxu1 %v5094_v22  ;;  %v285_v13 = vmul.f32 %v5371_v18, %v246_v26  ;;  %v323_v48 = vadd.f32 %v5382_v23, %v284_v44  ;;  %v5647_v12 = vld [vmem:[#allocation2 + $0xc] sm:$0xe]  ;;  %v886_v26 = vld [vmem:[#allocation2 + $0x3c] sm:$0xf] }
  0x55   : > { %881 = vst [vmem:[#allocation2 + $0x30] sm:$0xf] %v880_v34  ;;  %4830 = vmatprep.subr.bf16.mxu1 %v5097_v11  ;;  %v598_v52 = vsel %vm5413_vm6, %v590_v38, %v597_v15  ;;  %v884_v53 = vsel %vm5429_vm8, %v599_v45, %v883_v32  ;;  %v5636_v58 = vsel %vm1564_vm9, %v1565_v37, %v1566_v36  ;;  %v890_v31 = vld [vmem:[#allocation2 + $0x44] sm:$0x1]  ;;  %v1036_v44 = vld [vmem:[#allocation2 + $0x18] sm:$0xf] }
  0x56   : > { %v1350_v46 = vor.u32 %v1349_v42, %v1345_v27  ;;  %v1000_v47 = vld [vmem:[#allocation2 + $0xb4] sm:$0xf]  ;;  %v324_v60 = vadd.f32 %v5382_v23, %v285_v13  ;;  %882 = vst [vmem:[#allocation2 + $0x34] sm:$0xf] %v598_v52  ;;  %885 = vst [vmem:[#allocation2 + $0x38] sm:$0x1] %v884_v53  ;;  %v286_v16 = vmul.f32 %v5371_v18, %v247_v0 }
  0x57   : > { %v1001_v51 = vld [vmem:[#allocation2 + $0xb8] sm:$0xf]  ;;  %v355_v63 = vmax.f32 %v323_v48, 0.0  ;;  %v287_v20 = vmul.f32 %v5371_v18, %v248_v1  ;;  %v5114_v18 = vld [vmem:[%s6956_s3 + $0x120] sm:$0xff]   ;;  %v5659_v36 = vcombine.low %v1034_v7, %v5645_v9  ;;  %v4275_v39 = vcombine.low %v5647_v12, %v5482_v29  ;;  %v5667_v15 = vld [vmem:[#allocation2 + $0x1c] sm:$0xf] }
  0x58   : > { %v1355_v61 = vsel %vm1307_vm0, %v1350_v46, %v1354_v43  ;;  %v4257_v62 = vcombine.low %v1000_v47, %v1001_v51  ;;  %v5086_v57 = vld [vmem:[#allocation2 + $0xbc] ss:$0 sps:$4 sm:$0x11]   ;;  %v356_v2 = vmax.f32 %v324_v60, 0.0  ;;  %v325_v27 = vadd.f32 %v5382_v23, %v286_v16  ;;  %4727 = vmatpush3.bf16.msra.mxu0 %v5114_v18  ;;  %v1020_v12 = vld [vmem:[#allocation2 + $0x18] sm:$0xe] }
  0x59   : > { %3189 = vmatprep.mubr.bf16.mxu0 %v1355_v61  ;;  %v1496_v4 = vshll.u32 %v5086_v57, 16  ;;  %v4470_v5 = vpack.c.bf16 %v355_v63, %v355_v63  ;;  %v326_v32 = vadd.f32 %v5382_v23, %v287_v20  ;;  %v249_v57 = vld [vmem:[%s5354_s20 + $0x60] sm:$0xff]  ;;  %v1569_v7 = vrot.slane %v5492_v35, 1  ;;  %v5123_v35 = vld [vmem:[%s6956_s3 + $0x168] sm:$0xff]   ;;  %v251_v18 = vld [vmem:[%s5354_s20 + $0x70] sm:$0xff] }
  0x5a   : > { %3190 = vmatmul.mubr.bf16.gmra.mrb[12].mxu0 %v4245_v17  ;;  %v1489_v3 = vshrl.u32 %v4257_v62, 16  ;;  %v1491_v54 = vshll.u32 %v4257_v62, 16  ;;  %v4471_v10 = vpack.c.bf16 %v356_v2, %v356_v2  ;;  %v357_v40 = vmax.f32 %v325_v27, 0.0  ;;  %v5689_v16 = vld [vmem:[%s6954_s1] ss:$0 sm:$0xff]  ;;  %4728 = vmatprep.subr.bf16.mxu0 %v5123_v35 }
  0x5b   : > { %v1498_v17 = vrot.slane %v1496_v4, 1  ;;  %v601_v14 = vshrl.u32 %v4470_v5, 16  ;;  %v604_v24 = vshll.u32 %v4470_v5, 16  ;;  %v358_v13 = vmax.f32 %v326_v32, 0.0  ;;  %v5697_v27 = vld [vmem:[#allocation2 + $0x28] sm:$0xf] }
  0x5c   : > { %v1493_v21 = vrot.slane %v1491_v54, 1  ;;  %v978_v22 = vld [vmem:[#allocation2 + $0x30] sm:$0xf]  ;;  %v609_v11 = vshrl.u32 %v4471_v10, 16  ;;  %v612_v25 = vshll.u32 %v4471_v10, 16  ;;  %v4472_v29 = vpack.c.bf16 %v357_v40, %v357_v40 }
  0x5d   : > { %v603_v30 = vrot.slane %v601_v14, 7  ;;  %v5656_v33 = vld [vmem:[#allocation2 + $0x34] sm:$0xf]  ;;  %v5665_v43 = vld [vmem:[#allocation2 + $0x38] ss:$0 sps:$4 sm:$0x11]   ;;  %v4473_v60 = vpack.c.bf16 %v358_v13, %v358_v13  ;;  %v5680_v2 = vcombine.low %v1036_v44, %v5667_v15  ;;  %v288_v20 = vmul.f32 %v5689_v16, %v249_v57 }
  0x5e   : > { %v1494_v28 = vor.u32 %v1493_v21, %v1489_v3  ;;  %v611_v38 = vrot.slane %v609_v11, 7  ;;  %v4246_v42 = vcombine.low %v978_v22, %v5656_v33  ;;  %v1364_v48 = vshll.u32 %v5665_v43, 16  ;;  %v893_v10 = vld [vmem:[#allocation2 + $0x48] sm:$0xf]  ;;  %v897_v11 = vld [vmem:[#allocation2 + $0x50] sm:$0x1] }
  0x5f   : > { %v606_v23 = vor.u32 %v604_v24, %v603_v30  ;;  %v607_v34 = vrot.slane %v603_v30, 4  ;;  %v618_v61 = vshrl.u32 %v4472_v29, 16  ;;  %v621_v1 = vshll.u32 %v4472_v29, 16  ;;  %v5705_v30 = vld [vmem:[%s6955_s2] ss:$0 sm:$0xff] }
  0x60   : > { %v1499_v41 = vsel %vm1307_vm0, %v1494_v28, %v1498_v17  ;;  %v614_v45 = vor.u32 %v612_v25, %v611_v38  ;;  %v616_v37 = vrot.slane %v611_v38, 4  ;;  %v1357_v46 = vshrl.u32 %v4246_v42, 16  ;;  %v5112_v28 = vld [vmem:[%s6956_s3 + $0x1c8] sm:$0xff]  }
  0x61   : > { %3285 = vmatprep.mubr.bf16.mxu1 %v1499_v41  ;;  %v1359_v47 = vshll.u32 %v4246_v42, 16  ;;  %v887_v51 = vsel %vm5421_vm7, %v606_v23, %v886_v26  ;;  %v1366_v0 = vrot.slane %v1364_v48, 1  ;;  %v620_v3 = vrot.slane %v618_v61, 7  ;;  %v1038_v26 = vld [vmem:[#allocation2 + $0x24] sm:$0xf]  ;;  %v5124_v23 = vld [vmem:[%s6956_s3 + $0x128] sm:$0xff]  }
  0x62   : > { %3286 = vmatmul.mubr.bf16.gmra.mrb[12].mxu1 %v4257_v62  ;;  %v615_v52 = vsel %vm5413_vm6, %v607_v34, %v614_v45  ;;  %888 = vst [vmem:[#allocation2 + $0x3c] sm:$0xf] %v887_v51  ;;  %v891_v53 = vsel %vm5429_vm8, %v616_v37, %v890_v31  ;;  %v250_v62 = vld [vmem:[%s5354_s20 + $0x68] sm:$0xff]  ;;  %v626_v54 = vshrl.u32 %v4473_v60, 16  ;;  %v629_v4 = vshll.u32 %v4473_v60, 16  ;;  %v252_v37 = vld [vmem:[%s5354_s20 + $0x78] sm:$0xff]  ;;  %4729 = vmatpush3.bf16.msra.mxu0 %v5124_v23 }
  0x63   : > { %3326 = vmatprep.mubr.bf16.mxu1 %v5659_v36  ;;  %v1361_v63 = vrot.slane %v1359_v47, 1  ;;  %889 = vst [vmem:[#allocation2 + $0x40] sm:$0xf] %v615_v52  ;;  %892 = vst [vmem:[#allocation2 + $0x44] sm:$0x1] %v891_v53  ;;  %v289_v21 = vmul.f32 %v5689_v16, %v250_v62  ;;  %v1568_v17 = vrot.slane %v4275_v39, 1  ;;  %v623_v22 = vor.u32 %v621_v1, %v620_v3 }
  0x64   : > { %v624_v14 = vrot.slane %v620_v3, 4  ;;  %v628_v24 = vrot.slane %v626_v54, 7  ;;  %v327_v31 = vadd.f32 %v5705_v30, %v288_v20  ;;  %v4276_v41 = vcombine.low %v1020_v12, %v5543_v49  ;;  %v1040_v52 = vld [vmem:[#allocation2 + $0x30] sm:$0xf]  ;;  %v900_v12 = vld [vmem:[#allocation2 + $0x54] sm:$0xf] }
  0x65   : > { %v1362_v5 = vor.u32 %v1361_v63, %v1357_v46  ;;  %v328_v32 = vadd.f32 %v5705_v30, %v289_v21  ;;  %v894_v40 = vsel %vm5421_vm7, %v623_v22, %v893_v10  ;;  %v1570_v49 = vsel %vm1564_vm9, %v1568_v17, %v1569_v7  ;;  %v5127_v60 = vld [vmem:[%s6956_s3 + $0x1d0] sm:$0xff]  }
  0x66   : > { %v631_v38 = vor.u32 %v629_v4, %v628_v24  ;;  %v633_v39 = vrot.slane %v628_v24, 4  ;;  %895 = vst [vmem:[#allocation2 + $0x48] sm:$0xf] %v894_v40  ;;  %v359_v44 = vmax.f32 %v327_v31, 0.0  ;;  %v290_v53 = vmul.f32 %v5689_v16, %v251_v18  ;;  %v5742_v63 = vld [vmem:[#allocation2 + $0x34] sm:$0xf] }
  0x67   : > { %v1367_v25 = vsel %vm1307_vm0, %v1362_v5, %v1366_v0  ;;  %v360_v45 = vmax.f32 %v328_v32, 0.0  ;;  %v5739_v61 = vcombine.low %v1038_v26, %v5697_v27  ;;  %v1571_v57 = vrot.slane %v4276_v41, 1  ;;  %v1021_v5 = vld [vmem:[#allocation2 + $0x24] sm:$0xe]  ;;  %v5129_v20 = vld [vmem:[%s6956_s3 + $0x190] sm:$0xff]  }
  0x68   : > { %3197 = vmatprep.mubr.bf16.mxu0 %v1367_v25  ;;  %v632_v29 = vsel %vm5413_vm6, %v624_v14, %v631_v38  ;;  %v4474_v48 = vpack.c.bf16 %v359_v44, %v359_v44  ;;  %v1572_v62 = vrot.slane %v5549_v55, 1  ;;  %v291_v0 = vmul.f32 %v5689_v16, %v252_v37  ;;  %v904_v14 = vld [vmem:[#allocation2 + $0x5c] sm:$0x1]  ;;  %v5136_v32 = vld [vmem:[%s6956_s3 + $0x130] sm:$0xff]   ;;  %v253_v41 = vld [vmem:[%s5354_s20 + $0x80] sm:$0xff] }
  0x69   : > { %3198 = vmatmul.mubr.bf16.gmra.mrb[16].mxu0 %v4246_v42  ;;  %v980_v34 = vld [vmem:[#allocation2 + $0x3c] sm:$0xf]  ;;  %v898_v42 = vsel %vm5429_vm8, %v633_v39, %v897_v11  ;;  %896 = vst [vmem:[#allocation2 + $0x4c] sm:$0xf] %v632_v29  ;;  %v4475_v51 = vpack.c.bf16 %v360_v45, %v360_v45  ;;  %v1575_v55 = vrot.slane %v5605_v19, 1  ;;  %v329_v24 = vadd.f32 %v5705_v30, %v290_v53  ;;  %v5134_v11 = vld [vmem:[%s6956_s3 + $0x170] sm:$0xff]  }
  0x6a   : > { %3327 = vmatmul.mubr.bf16.vlgmr.msra.gmra.mrb[16].mxu1 %v5636_v58  ;;  %v5718_v13 = vld [vmem:[#allocation2 + $0x40] sm:$0xf]  ;;  %v5115_v58 = vld [vmem:[%s6956_s3 + $0x188] sm:$0xff]   ;;  %v5732_v47 = vld [vmem:[#allocation2 + $0x44] ss:$0 sps:$4 sm:$0x11]   ;;  %v1573_v25 = vsel %vm1564_vm9, %v1571_v57, %v1572_v62  ;;  %v330_v31 = vadd.f32 %v5705_v30, %v291_v0  ;;  %4730 = vmatprep.subr.bf16.mxu0 %v5134_v11  ;;  %v4277_v45 = vcombine.low %v1021_v5, %v5598_v8 }
  0x6b   : > { %4831 = vmatpush3.bf16.msra.mxu1 %v5099_v6  ;;  %3334 = vmatprep.mubr.bf16.mxu1 %v5680_v2  ;;  %v5730_v46 = vcombine.low %v980_v34, %v5718_v13  ;;  %899 = vst [vmem:[#allocation2 + $0x50] sm:$0x1] %v898_v42  ;;  %v1376_v54 = vshll.u32 %v5732_v47, 16  ;;  %v635_v4 = vshrl.u32 %v4474_v48, 16  ;;  %v638_v6 = vshll.u32 %v4474_v48, 16  ;;  %v254_v53 = vld [vmem:[%s5354_s20 + $0x88] sm:$0xff] }
  0x6c   : > { %4832 = vmatprep.subr.bf16.mxu1 %v5112_v28  ;;  %v643_v7 = vshrl.u32 %v4475_v51, 16  ;;  %v646_v10 = vshll.u32 %v4475_v51, 16  ;;  %v5758_v28 = vcombine.low %v1040_v52, %v5742_v63  ;;  %v361_v40 = vmax.f32 %v329_v24, 0.0  ;;  %4731 = vmatpush3.bf16.msra.mxu0 %v5136_v32  ;;  %v5143_v11 = vld [vmem:[%s6956_s3 + $0x198] sm:$0xff]   ;;  %v5795_v32 = vld [vmem:[#allocation2 + $0x40] sm:$0xf] }
  0x6d   : > { %v1369_v1 = vshrl.u32 %v5730_v46, 16  ;;  %v1371_v3 = vshll.u32 %v5730_v46, 16  ;;  %v1378_v17 = vrot.slane %v1376_v54, 1  ;;  %v637_v22 = vrot.slane %v635_v4, 7  ;;  %v982_v35 = vld [vmem:[#allocation2 + $0x48] sm:$0xf] }
  0x6e   : > { %v645_v26 = vrot.slane %v643_v7, 7  ;;  %v362_v37 = vmax.f32 %v330_v31, 0.0  ;;  %v4476_v48 = vpack.c.bf16 %v361_v40, %v361_v40 }
  0x6f   : > { %4833 = vmatpush3.bf16.msra.mxu1 %v5115_v58  ;;  %v1373_v21 = vrot.slane %v1371_v3, 1  ;;  %v640_v38 = vor.u32 %v638_v6, %v637_v22  ;;  %v641_v39 = vrot.slane %v637_v22, 4  ;;  %v1574_v3 = vrot.slane %v4277_v45, 1  ;;  %v907_v6 = vld [vmem:[#allocation2 + $0x60] sm:$0xf]  ;;  %v5141_v22 = vld [vmem:[%s6956_s3 + $0x1d8] sm:$0xff]  }
  0x70   : > { %4834 = vmatprep.subr.bf16.mxu1 %v5127_v60  ;;  %v5765_v23 = vld [vmem:[#allocation2 + $0x4c] sm:$0xf]  ;;  %v648_v34 = vor.u32 %v646_v10, %v645_v26  ;;  %v650_v44 = vrot.slane %v645_v26, 4  ;;  %v4477_v52 = vpack.c.bf16 %v362_v37, %v362_v37  ;;  %v292_v60 = vmul.f32 %v5689_v16, %v253_v41 }
  0x71   : > { %v1374_v18 = vor.u32 %v1373_v21, %v1369_v1  ;;  %v901_v58 = vsel %vm5421_vm7, %v640_v38, %v900_v12  ;;  %v652_v1 = vshrl.u32 %v4476_v48, 16  ;;  %v655_v54 = vshll.u32 %v4476_v48, 16  ;;  %v1042_v21 = vld [vmem:[#allocation2 + $0x3c] sm:$0xf] }
  0x72   : > { %3335 = vmatmul.mubr.bf16.gmra.mrb[20].mxu1 %v1570_v49  ;;  %v5771_v49 = vcombine.low %v982_v35, %v5765_v23  ;;  %v5773_v42 = vld [vmem:[#allocation2 + $0x50] ss:$0 sps:$4 sm:$0x11]   ;;  %v649_v51 = vsel %vm5413_vm6, %v641_v39, %v648_v34  ;;  %902 = vst [vmem:[#allocation2 + $0x54] sm:$0xf] %v901_v58  ;;  %v905_v8 = vsel %vm5429_vm8, %v650_v44, %v904_v14  ;;  %v660_v4 = vshrl.u32 %v4477_v52, 16 }
  0x73   : > { %3342 = vmatprep.mubr.bf16.mxu1 %v5739_v61  ;;  %4835 = vmatpush3.bf16.msra.mxu1 %v5129_v20  ;;  %v1379_v29 = vsel %vm1307_vm0, %v1374_v18, %v1378_v17  ;;  %v1388_v0 = vshll.u32 %v5773_v42, 16  ;;  %903 = vst [vmem:[#allocation2 + $0x58] sm:$0xf] %v649_v51  ;;  %906 = vst [vmem:[#allocation2 + $0x5c] sm:$0x1] %v905_v8  ;;  %v663_v5 = vshll.u32 %v4477_v52, 16 }
  0x74   : > { %3205 = vmatprep.mubr.bf16.mxu0 %v1379_v29  ;;  %v1381_v57 = vshrl.u32 %v5771_v49, 16  ;;  %v1383_v62 = vshll.u32 %v5771_v49, 16  ;;  %v654_v12 = vrot.slane %v652_v1, 7  ;;  %v911_v20 = vld [vmem:[#allocation2 + $0x68] sm:$0x1]  ;;  %v293_v17 = vmul.f32 %v5689_v16, %v254_v53  ;;  %4836 = vmatprep.subr.bf16.mxu1 %v5141_v22  ;;  %v255_v34 = vld [vmem:[%s5354_s20 + $0x90] sm:$0xff] }
  0x75   : > { %3206 = vmatmul.mubr.bf16.gmra.mrb[20].mxu0 %v5730_v46  ;;  %v1390_v10 = vrot.slane %v1388_v0, 1  ;;  %v1022_v46 = vld [vmem:[#allocation2 + $0x30] sm:$0xe]  ;;  %v662_v14 = vrot.slane %v660_v4, 7  ;;  %v331_v24 = vadd.f32 %v5705_v30, %v292_v60  ;;  %v1576_v45 = vsel %vm1564_vm9, %v1574_v3, %v1575_v55  ;;  %v256_v58 = vld [vmem:[%s5354_s20 + $0x98] sm:$0xff] }
  0x76   : > { %v1385_v7 = vrot.slane %v1383_v62, 1  ;;  %v657_v26 = vor.u32 %v655_v54, %v654_v12  ;;  %v658_v31 = vrot.slane %v654_v12, 4  ;;  %v332_v18 = vadd.f32 %v5705_v30, %v293_v17  ;;  %v5146_v48 = vld [vmem:[%s6956_s3 + $0x178] sm:$0xff]  }
  0x77   : > { %v665_v38 = vor.u32 %v663_v5, %v662_v14  ;;  %v667_v39 = vrot.slane %v662_v14, 4  ;;  %v4278_v40 = vcombine.low %v1022_v46, %v5656_v33  ;;  %v363_v41 = vmax.f32 %v331_v24, 0.0  ;;  %4837 = vmatpush3.bf16.msra.mxu1 %v5143_v11  ;;  %4732 = vmatprep.subr.bf16.mxu0 %v5146_v48  ;;  %v1044_v14 = vld [vmem:[#allocation2 + $0x48] sm:$0xf]  ;;  %v1023_v24 = vld [vmem:[#allocation2 + $0x3c] sm:$0xe] }
  0x78   : > { %v1386_v35 = vor.u32 %v1385_v7, %v1381_v57  ;;  %v908_v37 = vsel %vm5421_vm7, %v657_v26, %v907_v6  ;;  %v364_v29 = vmax.f32 %v332_v18, 0.0  ;;  %v5818_v55 = vcombine.low %v1042_v21, %v5795_v32  ;;  %v914_v7 = vld [vmem:[#allocation2 + $0x6c] sm:$0xf]  ;;  %v257_v48 = vld [vmem:[%s5354_s20 + $0xa0] sm:$0xff] }
  0x79   : > { %v666_v51 = vsel %vm5413_vm6, %v658_v31, %v665_v38  ;;  %909 = vst [vmem:[#allocation2 + $0x60] sm:$0xf] %v908_v37  ;;  %v912_v19 = vsel %vm5429_vm8, %v667_v39, %v911_v20  ;;  %v4478_v8 = vpack.c.bf16 %v363_v41, %v363_v41  ;;  %v1578_v60 = vrot.slane %v5665_v43, 1  ;;  %v918_v20 = vld [vmem:[#allocation2 + $0x74] sm:$0x1] }
  0x7a   : > { %3343 = vmatmul.mubr.bf16.gmra.mrb[24].mxu1 %v1573_v25  ;;  %v1391_v44 = vsel %vm1307_vm0, %v1386_v35, %v1390_v10  ;;  %v984_v25 = vld [vmem:[#allocation2 + $0x54] sm:$0xf]  ;;  %v5811_v33 = vld [vmem:[#allocation2 + $0x58] sm:$0xf]  ;;  %910 = vst [vmem:[#allocation2 + $0x64] sm:$0xf] %v666_v51  ;;  %v4479_v57 = vpack.c.bf16 %v364_v29, %v364_v29  ;;  %v294_v62 = vmul.f32 %v5689_v16, %v255_v34 }
  0x7b   : > { %3350 = vmatprep.mubr.bf16.mxu1 %v5758_v28  ;;  %3213 = vmatprep.mubr.bf16.mxu0 %v1391_v44  ;;  %v5822_v52 = vcombine.low %v984_v25, %v5811_v33  ;;  %v5824_v53 = vld [vmem:[#allocation2 + $0x5c] ss:$0 sps:$4 sm:$0x11]   ;;  %913 = vst [vmem:[#allocation2 + $0x68] sm:$0x1] %v912_v19  ;;  %v1577_v0 = vrot.slane %v4278_v40, 1  ;;  %v295_v54 = vmul.f32 %v5689_v16, %v256_v58 }
  0x7c   : > { %v669_v1 = vshrl.u32 %v4478_v8, 16  ;;  %v672_v3 = vshll.u32 %v4478_v8, 16  ;;  %v1400_v6 = vshll.u32 %v5824_v53, 16  ;;  %v677_v43 = vshrl.u32 %v4479_v57, 16  ;;  %v5154_v35 = vld [vmem:[%s6956_s3 + $0x1e0] sm:$0xff]  }
  0x7d   : > { %3214 = vmatmul.mubr.bf16.gmra.mrb[24].mxu0 %v5771_v49  ;;  %v5147_v49 = vld [vmem:[%s6956_s3 + $0x138] sm:$0xff]   ;;  %v1393_v4 = vshrl.u32 %v5822_v52, 16  ;;  %v1395_v5 = vshll.u32 %v5822_v52, 16  ;;  %v680_v12 = vshll.u32 %v4479_v57, 16  ;;  %v333_v21 = vadd.f32 %v5705_v30, %v294_v62  ;;  %v5841_v34 = vld [vmem:[#allocation2 + $0x4c] sm:$0xf]  ;;  %4838 = vmatprep.subr.bf16.mxu1 %v5154_v35 }
  0x7e   : > { %v671_v10 = vrot.slane %v669_v1, 7  ;;  %4733 = vmatpush3.bf16.msra.mxu0 %v5147_v49  ;;  %v1402_v17 = vrot.slane %v1400_v6, 1  ;;  %v679_v22 = vrot.slane %v677_v43, 7  ;;  %v334_v11 = vadd.f32 %v5705_v30, %v295_v54  ;;  %v5853_v51 = vld [vmem:[%s6956_s3 + $0x200] sm:$0xff]   ;;  %v258_v62 = vld [vmem:[%s5354_s20 + $0xa8] sm:$0xff] }
  0x7f   : > { %v1397_v46 = vrot.slane %v1395_v5, 1  ;;  %v365_v18 = vmax.f32 %v333_v21, 0.0  ;;  %v4279_v29 = vcombine.low %v1023_v24, %v5718_v13  ;;  %v5868_v1 = vcombine.low %v1044_v14, %v5841_v34  ;;  %4966 = vmatprep.subr.bf16.mxu0 %v5853_v51 }
  0x80   : > { %v674_v26 = vor.u32 %v672_v3, %v671_v10  ;;  %v675_v31 = vrot.slane %v671_v10, 4  ;;  %v986_v39 = vld [vmem:[#allocation2 + $0x60] sm:$0xf]  ;;  %v682_v40 = vor.u32 %v680_v12, %v679_v22  ;;  %v684_v41 = vrot.slane %v679_v22, 4 }
  0x81   : > { %v1398_v38 = vor.u32 %v1397_v46, %v1393_v4  ;;  %v366_v44 = vmax.f32 %v334_v11, 0.0  ;;  %v5843_v25 = vld [vmem:[#allocation2 + $0x64] sm:$0xf]  ;;  %v4480_v58 = vpack.c.bf16 %v365_v18, %v365_v18  ;;  %v1581_v43 = vrot.slane %v5732_v47, 1  ;;  %v925_v22 = vld [vmem:[#allocation2 + $0x80] sm:$0x1] }
  0x82   : > { %3351 = vmatmul.mubr.bf16.gmra.mrb[28].mxu1 %v1576_v45  ;;  %v1579_v45 = vsel %vm1564_vm9, %v1577_v0, %v1578_v60  ;;  %v915_v37 = vsel %vm5421_vm7, %v674_v26, %v914_v7  ;;  %v4250_v8 = vcombine.low %v986_v39, %v5843_v25  ;;  %v5857_v57 = vld [vmem:[#allocation2 + $0x68] ss:$0 sps:$4 sm:$0x11]   ;;  %v683_v60 = vsel %vm5413_vm6, %v675_v31, %v682_v40  ;;  %v5157_v0 = vld [vmem:[%s6956_s3 + $0x1a0] sm:$0xff]   ;;  %v1046_v47 = vld [vmem:[#allocation2 + $0x54] sm:$0xf] }
  0x83   : > { %3358 = vmatprep.mubr.bf16.mxu1 %v5818_v55  ;;  %v1403_v19 = vsel %vm1307_vm0, %v1398_v38, %v1402_v17  ;;  %916 = vst [vmem:[#allocation2 + $0x6c] sm:$0xf] %v915_v37  ;;  %v919_v13 = vsel %vm5429_vm8, %v684_v41, %v918_v20  ;;  %917 = vst [vmem:[#allocation2 + $0x70] sm:$0xf] %v683_v60  ;;  %v4481_v3 = vpack.c.bf16 %v366_v44, %v366_v44  ;;  %v921_v17 = vld [vmem:[#allocation2 + $0x78] sm:$0xf] }
  0x84   : > { %3221 = vmatprep.mubr.bf16.mxu0 %v1403_v19  ;;  %920 = vst [vmem:[#allocation2 + $0x74] sm:$0x1] %v919_v13  ;;  %v686_v54 = vshrl.u32 %v4480_v58, 16  ;;  %v689_v49 = vshll.u32 %v4480_v58, 16  ;;  %v1405_v4 = vshrl.u32 %v4250_v8, 16  ;;  %v1407_v5 = vshll.u32 %v4250_v8, 16  ;;  %4839 = vmatpush3.bf16.msra.mxu1 %v5157_v0 }
  0x85   : > { %3222 = vmatmul.mubr.bf16.gmra.mrb[28].mxu0 %v5822_v52  ;;  %v1412_v6 = vshll.u32 %v5857_v57, 16  ;;  %v1580_v7 = vrot.slane %v4279_v29, 1  ;;  %v694_v12 = vshrl.u32 %v4481_v3, 16  ;;  %v697_v20 = vshll.u32 %v4481_v3, 16  ;;  %v5877_v26 = vld [vmem:[#allocation2 + $0x58] sm:$0xf] }
  0x86   : > { %v688_v10 = vrot.slane %v686_v54, 7  ;;  %v1409_v21 = vrot.slane %v1407_v5, 1  ;;  %v296_v14 = vmul.f32 %v5689_v16, %v257_v48  ;;  %v297_v52 = vmul.f32 %v5689_v16, %v258_v62  ;;  %v1024_v18 = vld [vmem:[#allocation2 + $0x48] sm:$0xe] }
  0x87   : > { %v1414_v46 = vrot.slane %v1412_v6, 1  ;;  %v696_v35 = vrot.slane %v694_v12, 7  ;;  %v5165_v40 = vld [vmem:[%s6956_s3 + $0x1e8] sm:$0xff]   ;;  %v1582_v44 = vsel %vm1564_vm9, %v1580_v7, %v1581_v43  ;;  %v5891_v19 = vcombine.low %v1046_v47, %v5877_v26  ;;  %v1025_v47 = vld [vmem:[#allocation2 + $0x54] sm:$0xe] }
  0x88   : > { %v691_v24 = vor.u32 %v689_v49, %v688_v10  ;;  %v692_v11 = vrot.slane %v688_v10, 4  ;;  %v1410_v31 = vor.u32 %v1409_v21, %v1405_v4  ;;  %v335_v38 = vadd.f32 %v5705_v30, %v296_v14  ;;  %4840 = vmatprep.subr.bf16.mxu1 %v5165_v40 }
  0x89   : > { %v336_v39 = vadd.f32 %v5705_v30, %v297_v52  ;;  %v701_v37 = vrot.slane %v696_v35, 4  ;;  %v4280_v49 = vcombine.low %v1024_v18, %v5765_v23  ;;  %v1584_v10 = vrot.slane %v5773_v42, 1  ;;  %v932_v52 = vld [vmem:[#allocation2 + $0x8c] sm:$0x1]  ;;  %v5907_v42 = vld [vmem:[#allocation2 + $0x64] sm:$0xf] }
  0x8a   : > { %3359 = vmatmul.mubr.bf16.gmra.mrb[32].mxu1 %v1579_v45  ;;  %v988_v41 = vld [vmem:[#allocation2 + $0x6c] sm:$0xf]  ;;  %v699_v45 = vor.u32 %v697_v20, %v696_v35  ;;  %v922_v29 = vsel %vm5421_vm7, %v691_v24, %v921_v17  ;;  %v1415_v58 = vsel %vm1307_vm0, %v1410_v31, %v1414_v46  ;;  %v5888_v48 = vld [vmem:[#allocation2 + $0x70] sm:$0xf]  ;;  %v367_v60 = vmax.f32 %v335_v38, 0.0 }
  0x8b   : > { %3366 = vmatprep.mubr.bf16.mxu1 %v5868_v1  ;;  %923 = vst [vmem:[#allocation2 + $0x78] sm:$0xf] %v922_v29  ;;  %v368_v13 = vmax.f32 %v336_v39, 0.0  ;;  %3229 = vmatprep.mubr.bf16.mxu0 %v1415_v58  ;;  %v4251_v62 = vcombine.low %v988_v41, %v5888_v48  ;;  %v5894_v0 = vld [vmem:[#allocation2 + $0x74] ss:$0 sps:$4 sm:$0x11]   ;;  %v926_v54 = vsel %vm5429_vm8, %v701_v37, %v925_v22 }
  0x8c   : > { %v700_v3 = vsel %vm5413_vm6, %v692_v11, %v699_v45  ;;  %927 = vst [vmem:[#allocation2 + $0x80] sm:$0x1] %v926_v54  ;;  %v4482_v4 = vpack.c.bf16 %v367_v60, %v367_v60  ;;  %v1424_v7 = vshll.u32 %v5894_v0, 16  ;;  %v1048_v17 = vld [vmem:[#allocation2 + $0x60] sm:$0xf]  ;;  %v1583_v23 = vrot.slane %v4280_v49, 1 }
  0x8d   : > { %3230 = vmatmul.mubr.bf16.gmra.mrb[32].mxu0 %v4250_v8  ;;  %924 = vst [vmem:[#allocation2 + $0x7c] sm:$0xf] %v700_v3  ;;  %v4483_v5 = vpack.c.bf16 %v368_v13, %v368_v13  ;;  %v1417_v6 = vshrl.u32 %v4251_v62, 16  ;;  %v1419_v43 = vshll.u32 %v4251_v62, 16  ;;  %v928_v8 = vld [vmem:[#allocation2 + $0x84] sm:$0xf]  ;;  %v5914_v29 = vcombine.low %v1048_v17, %v5907_v42 }
  0x8e   : > { %v703_v12 = vshrl.u32 %v4482_v4, 16  ;;  %v706_v20 = vshll.u32 %v4482_v4, 16  ;;  %v1426_v14 = vrot.slane %v1424_v7, 1  ;;  %v5168_v24 = vld [vmem:[%s6956_s3 + $0x1a8] sm:$0xff]   ;;  %v1585_v37 = vsel %vm1564_vm9, %v1583_v23, %v1584_v10  ;;  %v5176_v60 = vld [vmem:[%s6956_s3 + $0x1f0] sm:$0xff]  }
  0x8f   : > { %v711_v21 = vshrl.u32 %v4483_v5, 16  ;;  %v714_v46 = vshll.u32 %v4483_v5, 16  ;;  %v1421_v22 = vrot.slane %v1419_v43, 1  ;;  %4841 = vmatpush3.bf16.msra.mxu1 %v5168_v24  ;;  %v4281_v58 = vcombine.low %v1025_v47, %v5811_v33  ;;  %v1026_v10 = vld [vmem:[#allocation2 + $0x60] sm:$0xe] }
  0x90   : > { %v705_v11 = vrot.slane %v703_v12, 7  ;;  %4842 = vmatprep.subr.bf16.mxu1 %v5176_v60  ;;  %v1587_v7 = vrot.slane %v5824_v53, 1  ;;  %v5187_v53 = vld [vmem:[%s6956_s3 + $0x1f8] sm:$0xff]  }
  0x91   : > { %v713_v35 = vrot.slane %v711_v21, 7  ;;  %v1422_v31 = vor.u32 %v1421_v22, %v1417_v6  ;;  %v1586_v43 = vrot.slane %v4281_v58, 1  ;;  %v1050_v21 = vld [vmem:[#allocation2 + $0x6c] sm:$0xf]  ;;  %v4282_v22 = vcombine.low %v1026_v10, %v5843_v25 }
  0x92   : > { %3367 = vmatmul.mubr.bf16.gmra.mrb[36].mxu1 %v1582_v44  ;;  %v990_v18 = vld [vmem:[#allocation2 + $0x78] sm:$0xf]  ;;  %v708_v38 = vor.u32 %v706_v20, %v705_v11  ;;  %v709_v39 = vrot.slane %v705_v11, 4  ;;  %v1027_v58 = vld [vmem:[#allocation2 + $0x6c] sm:$0xe]  ;;  %v1774_v10 = vshrl.u32 %v5659_v36, 16 }
  0x93   : > { %3374 = vmatprep.mubr.bf16.mxu1 %v5891_v19  ;;  %v716_v40 = vor.u32 %v714_v46, %v713_v35  ;;  %v718_v41 = vrot.slane %v713_v35, 4  ;;  %v1427_v44 = vsel %vm1307_vm0, %v1422_v31, %v1426_v14  ;;  %v5921_v3 = vld [vmem:[#allocation2 + $0x80] ss:$0 sps:$4 sm:$0x11]   ;;  %v5932_v46 = vld [vmem:[#allocation2 + $0x70] sm:$0xf]  ;;  %v1588_v23 = vsel %vm1564_vm9, %v1586_v43, %v1587_v7 }
  0x94   : > { %v5910_v45 = vld [vmem:[#allocation2 + $0x7c] sm:$0xf]  ;;  %3237 = vmatprep.mubr.bf16.mxu0 %v1427_v44  ;;  %v929_v49 = vsel %vm5421_vm7, %v708_v38, %v928_v8  ;;  %v1436_v6 = vshll.u32 %v5921_v3, 16  ;;  %v5179_v14 = vld [vmem:[%s6956_s3 + $0x1b0] sm:$0xff]   ;;  %v5940_v8 = vcombine.low %v1050_v21, %v5932_v46  ;;  %v1589_v38 = vrot.slane %v4282_v22, 1 }
  0x95   : > { %v4252_v13 = vcombine.low %v990_v18, %v5910_v45  ;;  %v717_v54 = vsel %vm5413_vm6, %v709_v39, %v716_v40  ;;  %v933_v4 = vsel %vm5429_vm8, %v718_v41, %v932_v52  ;;  %3238 = vmatmul.mubr.bf16.gmra.mrb[36].mxu0 %v4251_v62  ;;  %930 = vst [vmem:[#allocation2 + $0x84] sm:$0xf] %v929_v49  ;;  %v1082_v62 = vld [vmem:[#allocation2 + $0xc] sm:$0xe]  ;;  %v1776_v18 = vshll.u32 %v5659_v36, 16 }
  0x96   : > { %931 = vst [vmem:[#allocation2 + $0x88] sm:$0xf] %v717_v54  ;;  %934 = vst [vmem:[#allocation2 + $0x8c] sm:$0x1] %v933_v4  ;;  %v1438_v20 = vrot.slane %v1436_v6, 1  ;;  %4843 = vmatpush3.bf16.msra.mxu1 %v5179_v14  ;;  %v4322_v25 = vcombine.low %v1082_v62, %v5645_v9  ;;  %v1590_v9 = vrot.slane %v5857_v57, 1  ;;  %v4283_v7 = vcombine.low %v1027_v58, %v5888_v48 }
  0x97   : > { %v1429_v33 = vshrl.u32 %v4252_v13, 16  ;;  %v1431_v5 = vshll.u32 %v4252_v13, 16  ;;  %v5151_v31 = vld [vmem:[#allocation2 + $0x14] ss:$0 sps:$4 sm:$0x11]   ;;  %4844 = vmatprep.subr.bf16.mxu1 %v5187_v53  ;;  %v1788_v57 = vshll.u32 %v5680_v2, 16 }
  0x98   : > { %v1052_v39 = vld [vmem:[#allocation2 + $0x78] sm:$0xf]  ;;  %v5953_v40 = vld [vmem:[#allocation2 + $0x7c] sm:$0xf]  ;;  %v2029_v49 = vrot.slane %v4322_v25, 1  ;;  %v2030_v4 = vrot.slane %v5151_v31, 1  ;;  %v1591_v6 = vsel %vm1564_vm9, %v1589_v38, %v1590_v9 }
  0x99   : > { %v1433_v12 = vrot.slane %v1431_v5, 1  ;;  %v5960_v43 = vcombine.low %v1052_v39, %v5953_v40  ;;  %v1084_v22 = vld [vmem:[#allocation2 + $0x24] sm:$0xe]  ;;  %v1592_v36 = vrot.slane %v4283_v7, 1  ;;  %v1790_v9 = vrot.slane %v1788_v57, 1 }
  0x9a   : > { %3375 = vmatmul.mubr.bf16.gmra.mrb[40].mxu1 %v1585_v37  ;;  %v2031_v62 = vsel %vm1564_vm9, %v2029_v49, %v2030_v4  ;;  %v5162_v38 = vld [vmem:[#allocation2 + $0x2c] ss:$0 sps:$4 sm:$0x11]   ;;  %v1800_v58 = vshll.u32 %v5739_v61, 16  ;;  %v1056_v7 = vld [vmem:[#allocation2 + $0x90] sm:$0xf] }
  0x9b   : > { %3382 = vmatprep.mubr.bf16.mxu1 %v5914_v29  ;;  %v1434_v17 = vor.u32 %v1433_v12, %v1429_v33  ;;  %v1083_v33 = vld [vmem:[#allocation2 + $0x18] sm:$0xe]  ;;  %v1778_v12 = vrot.slane %v1776_v18, 1  ;;  %v2036_v4 = vrot.slane %v5162_v38, 1  ;;  %v1798_v57 = vshrl.u32 %v5739_v61, 16 }
  0x9c   : > { %v992_v24 = vld [vmem:[#allocation2 + $0x84] sm:$0xf]  ;;  %v1870_v59 = vshrl.u32 %v5940_v8, 16 }
  0x9d   : > { %v1439_v52 = vsel %vm1307_vm0, %v1434_v17, %v1438_v20  ;;  %v5946_v11 = vld [vmem:[#allocation2 + $0x88] sm:$0xf]  ;;  %v5950_v47 = vld [vmem:[#allocation2 + $0x8c] ss:$0 sps:$4 sm:$0x11]   ;;  %v4323_v20 = vcombine.low %v1083_v33, %v5667_v15  ;;  %v5190_v15 = vld [vmem:[%s6956_s3 + $0x1b8] sm:$0xff]  }
  0x9e   : > { %3245 = vmatprep.mubr.bf16.mxu0 %v1439_v52  ;;  %v4253_v35 = vcombine.low %v992_v24, %v5946_v11  ;;  %v1448_v37 = vshll.u32 %v5950_v47, 16  ;;  %v5158_v17 = vld [vmem:[#allocation2 + $0x20] ss:$0 sps:$4 sm:$0x11]   ;;  %v1054_v53 = vld [vmem:[#allocation2 + $0x84] sm:$0xf]  ;;  %v1779_v52 = vor.u32 %v1778_v12, %v1774_v10  ;;  %4845 = vmatpush3.bf16.msra.mxu1 %v5190_v15 }
  0x9f   : > { %3246 = vmatmul.mubr.bf16.gmra.mrb[40].mxu0 %v4252_v13  ;;  %v1781_v13 = vshll.u32 %v5151_v31, 16  ;;  %v5970_v48 = vld [vmem:[#allocation2 + $0x88] sm:$0xf]  ;;  %v1028_v24 = vld [vmem:[#allocation2 + $0x78] sm:$0xe]  ;;  %v2032_v25 = vrot.slane %v4323_v20, 1 }
  0xa0   : > { %v1441_v41 = vshrl.u32 %v4253_v35, 16  ;;  %v1443_v44 = vshll.u32 %v4253_v35, 16  ;;  %v1450_v54 = vrot.slane %v1448_v37, 1  ;;  %v2033_v31 = vrot.slane %v5158_v17, 1  ;;  %v5177_v33 = vld [vmem:[%s6956_s3 + $0x210] sm:$0xff]   ;;  %v5188_v15 = vld [vmem:[%s6956_s3 + $0x218] sm:$0xff]  }
  0xa1   : > { %v1783_v14 = vrot.slane %v1781_v13, 1  ;;  %v1793_v18 = vshll.u32 %v5158_v17, 16  ;;  %v5978_v39 = vcombine.low %v1054_v53, %v5970_v48  ;;  %v1786_v37 = vshrl.u32 %v5680_v2, 16  ;;  %v267_v13 = vld [vmem:[%s5354_s20 + $0xf0] sm:$0xff]  ;;  %v1029_v12 = vld [vmem:[#allocation2 + $0x84] sm:$0xe] }
  0xa2   : > { %3383 = vmatmul.mubr.bf16.gmra.mrb[44].mxu1 %v1588_v23  ;;  %v1445_v60 = vrot.slane %v1443_v44, 1  ;;  %v1593_v23 = vrot.slane %v5894_v0, 1  ;;  %v4324_v0 = vcombine.low %v1084_v22, %v5697_v27  ;;  %v5166_v27 = vld [vmem:[%s6956_s3 + $0x208] sm:$0xff]   ;;  %v1596_v2 = vrot.slane %v5921_v3, 1  ;;  %v5995_v10 = vld [vmem:[#allocation2 + $0x94] sm:$0xf] }
  0xa3   : > { %3390 = vmatprep.mubr.bf16.mxu1 %v5940_v8  ;;  %v1784_v44 = vsel %vm1307_vm0, %v1779_v52, %v1783_v14  ;;  %v1802_v20 = vrot.slane %v1800_v58, 1  ;;  %v306_v3 = vmul.f32 %v5689_v16, %v267_v13  ;;  %v6002_v22 = vcombine.low %v1056_v7, %v5995_v10 }
  0xa4   : > { %v1446_v5 = vor.u32 %v1445_v60, %v1441_v41  ;;  %v4284_v41 = vcombine.low %v1028_v24, %v5910_v45  ;;  %v2034_v60 = vsel %vm1564_vm9, %v2032_v25, %v2033_v31  ;;  %v2035_v49 = vrot.slane %v4324_v0, 1 }
  0xa5   : > { %v345_v52 = vadd.f32 %v5705_v30, %v306_v3  ;;  %v1599_v31 = vrot.slane %v5950_v47, 1  ;;  %v1810_v13 = vshrl.u32 %v5758_v28, 16  ;;  %v5173_v3 = vld [vmem:[#allocation2 + $0x44] ss:$0 sps:$4 sm:$0x11]  }
  0xa6   : > { %v1451_v21 = vsel %vm1307_vm0, %v1446_v5, %v1450_v54  ;;  %v1795_v54 = vrot.slane %v1793_v18, 1  ;;  %v1595_v45 = vrot.slane %v4284_v41, 1  ;;  %v1085_v5 = vld [vmem:[#allocation2 + $0x30] sm:$0xe]  ;;  %v2037_v53 = vsel %vm1564_vm9, %v2035_v49, %v2036_v4  ;;  %v6016_v18 = vld [vmem:[#allocation2 + $0xa0] sm:$0xf] }
  0xa7   : > { %3253 = vmatprep.mubr.bf16.mxu0 %v1451_v21  ;;  %v1805_v21 = vshll.u32 %v5162_v38, 16  ;;  %v4325_v61 = vcombine.low %v1085_v5, %v5742_v63  ;;  %v377_v0 = vmax.f32 %v345_v52, 0.0  ;;  %v1030_v38 = vld [vmem:[#allocation2 + $0x90] sm:$0xe]  ;;  %v5257_v49 = vld [vmem:[#allocation2 + $0x94] sm:$0xf] }
  0xa8   : > { %3254 = vmatmul.mubr.bf16.gmra.mrb[44].mxu0 %v4253_v35  ;;  %v1594_v35 = vsel %vm1564_vm9, %v1592_v36, %v1593_v23  ;;  %v1597_v17 = vsel %vm1564_vm9, %v1595_v45, %v1596_v2  ;;  %v5169_v36 = vld [vmem:[#allocation2 + $0x38] ss:$0 sps:$4 sm:$0x11]   ;;  %v4286_v4 = vcombine.low %v1030_v38, %v5257_v49  ;;  %v1060_v52 = vld [vmem:[#allocation2 + $0xa8] sm:$0xf]  ;;  %v1836_v49 = vshll.u32 %v5868_v1, 16 }
  0xa9   : > { %3487 = vmatprep.mubr.bf16.mxu0 %v2031_v62  ;;  %v268_v62 = vld [vmem:[%s5354_s20 + $0xf8] sm:$0xff]  ;;  %v1807_v25 = vrot.slane %v1805_v21, 1 }
  0xaa   : > { %3391 = vmatmul.mubr.bf16.gmra.mrb[48].mxu1 %v1591_v6  ;;  %v1791_v6 = vor.u32 %v1790_v9, %v1786_v37  ;;  %v307_v14 = vmul.f32 %v5689_v16, %v268_v62  ;;  %v1058_v16 = vld [vmem:[#allocation2 + $0x9c] sm:$0xf]  ;;  %v4492_v37 = vpack.c.bf16 %v377_v0, %v377_v0  ;;  %v5205_v62 = vld [vmem:[%s6956_s3 + $0x228] sm:$0xff]   ;;  %v5212_v0 = vld [vmem:[%s6956_s3 + $0x230] sm:$0xff]  }
  0xab   : > { %3398 = vmatprep.mubr.bf16.mxu1 %v5960_v43  ;;  %v1086_v9 = vld [vmem:[#allocation2 + $0x3c] sm:$0xe] }
  0xac   : > { %v1796_v23 = vsel %vm1307_vm0, %v1791_v6, %v1795_v54  ;;  %v346_v24 = vadd.f32 %v5705_v30, %v307_v14  ;;  %v2038_v30 = vrot.slane %v4325_v61, 1  ;;  %v788_v45 = vshrl.u32 %v4492_v37, 16  ;;  %v963_v14 = vld [vmem:[#allocation2 + $0xc0] sm:$0xf] }
  0xad   : > { %v791_v2 = vshll.u32 %v4492_v37, 16 }
  0xae   : > { %v378_v41 = vmax.f32 %v346_v24, 0.0  ;;  %v790_v21 = vrot.slane %v788_v45, 7  ;;  %v6037_v24 = vld [vmem:[#allocation2 + $0xac] sm:$0xf] }
  0xb0   : > { %3488 = vmatmul.mubr.bf16.vlgmr.msra.gmra.mrb[48].mxu0 %v1784_v44  ;;  %v2039_v44 = vrot.slane %v5169_v36, 1  ;;  %v4493_v47 = vpack.c.bf16 %v378_v41, %v378_v41 }
  0xb1   : > { %4967 = vmatpush3.bf16.msra.mxu0 %v5853_v51  ;;  %3495 = vmatprep.mubr.bf16.mxu0 %v2034_v60  ;;  %v4285_v51 = vcombine.low %v1029_v12, %v5946_v11  ;;  %v1803_v11 = vor.u32 %v1802_v20, %v1798_v57  ;;  %v1817_v60 = vshll.u32 %v5169_v36, 16  ;;  %v1824_v12 = vshll.u32 %v5818_v55, 16 }
  0xb2   : > { %3399 = vmatmul.mubr.bf16.gmra.mrb[52].mxu1 %v1594_v35  ;;  %4968 = vmatprep.subr.bf16.mxu0 %v5166_v27  ;;  %v1812_v35 = vshll.u32 %v5758_v28, 16  ;;  %v796_v6 = vshrl.u32 %v4493_v47, 16  ;;  %v799_v7 = vshll.u32 %v4493_v47, 16  ;;  %v4326_v57 = vcombine.low %v1086_v9, %v5795_v32  ;;  %v5258_v32 = vld [vmem:[#allocation2 + $0x98] ss:$0 sps:$4 sm:$0x11]  }
  0xb3   : > { %3406 = vmatprep.mubr.bf16.mxu1 %v5978_v39  ;;  %v1598_v63 = vrot.slane %v4285_v51, 1  ;;  %v1808_v58 = vsel %vm1307_vm0, %v1803_v11, %v1807_v25  ;;  %v2040_v20 = vsel %vm1564_vm9, %v2038_v30, %v2039_v44  ;;  %v1819_v51 = vrot.slane %v1817_v60, 1  ;;  %v1031_v11 = vld [vmem:[#allocation2 + $0x9c] sm:$0xe]  ;;  %v5259_v44 = vld [vmem:[#allocation2 + $0xa0] sm:$0xf] }
  0xb4   : > { %v1814_v5 = vrot.slane %v1812_v35, 1  ;;  %v6034_v28 = vrot.slane %v796_v6, 7  ;;  %v1602_v61 = vrot.slane %v5258_v32, 1  ;;  %v794_v36 = vrot.slane %v790_v21, 4  ;;  %v1062_v6 = vld [vmem:[#allocation2 + $0xb4] sm:$0xf] }
  0xb5   : > { %4969 = vmatpush3.bf16.msra.mxu0 %v5166_v27  ;;  %v6021_v27 = vcombine.low %v1058_v16, %v6016_v18  ;;  %v1600_v54 = vsel %vm1564_vm9, %v1598_v63, %v1599_v31  ;;  %v2041_v16 = vrot.slane %v4326_v57, 1  ;;  %v2042_v63 = vrot.slane %v5173_v3, 1  ;;  %v5180_v47 = vld [vmem:[#allocation2 + $0x50] ss:$0 sps:$4 sm:$0x11]  }
  0xb6   : > { %4970 = vmatprep.subr.bf16.mxu0 %v5177_v33  ;;  %v801_v25 = vor.u32 %v799_v7, %v6034_v28  ;;  %v6050_v30 = vcombine.low %v1060_v52, %v6037_v24  ;;  %v4287_v37 = vcombine.low %v1031_v11, %v5259_v44  ;;  %v1822_v9 = vshrl.u32 %v5818_v55, 16  ;;  %v5260_v55 = vld [vmem:[#allocation2 + $0xa4] ss:$0 sps:$4 sm:$0x11]   ;;  %v6060_v7 = vld [vmem:[#allocation2 + $0xb8] sm:$0xf] }
  0xb7   : > { %v1829_v60 = vshll.u32 %v5173_v3, 16  ;;  %v2043_v50 = vsel %vm1564_vm9, %v2041_v16, %v2042_v63  ;;  %v1605_v45 = vrot.slane %v5260_v55, 1  ;;  %v2045_v57 = vrot.slane %v5180_v47, 1  ;;  %v1099_v3 = vld [vmem:[#allocation2 + $0x18] sm:$0xf] }
  0xb8   : > { %3496 = vmatmul.mubr.bf16.gmra.mrb[52].mxu0 %v1796_v23  ;;  %v1601_v23 = vrot.slane %v4286_v4, 1  ;;  %v802_v35 = vsel %vm5413_vm6, %v794_v36, %v801_v25  ;;  %v1604_v4 = vrot.slane %v4287_v37, 1  ;;  %v6069_v32 = vcombine.low %v1062_v6, %v6060_v7  ;;  %v5262_v16 = vld [vmem:[#allocation2 + $0xb0] ss:$0 sps:$4 sm:$0x11]  }
  0xb9   : > { %3503 = vmatprep.mubr.bf16.mxu0 %v2037_v53  ;;  %4971 = vmatpush3.bf16.msra.mxu0 %v5177_v33  ;;  %v5198_v33 = vld [vmem:[%s6956_s3 + $0x220] sm:$0xff]   ;;  %v793_v53 = vor.u32 %v791_v2, %v790_v21  ;;  %966 = vst [vmem:[#allocation2 + $0xc4] sm:$0xf] %v802_v35  ;;  %v1032_v2 = vld [vmem:[#allocation2 + $0xa8] sm:$0xe]  ;;  %v1872_v6 = vshll.u32 %v5940_v8, 16 }
  0xba   : > { %3407 = vmatmul.mubr.bf16.gmra.mrb[56].mxu1 %v1597_v17  ;;  %4972 = vmatprep.subr.bf16.mxu0 %v5188_v15  ;;  %v1087_v17 = vld [vmem:[#allocation2 + $0x48] sm:$0xe]  ;;  %v1603_v41 = vsel %vm1564_vm9, %v1601_v23, %v1602_v61  ;;  %v6063_v21 = vld [vmem:[#allocation2 + $0x1c] sm:$0xf]  ;;  %v1606_v23 = vsel %vm1564_vm9, %v1604_v4, %v1605_v45  ;;  %v1101_v35 = vld [vmem:[#allocation2 + $0x24] sm:$0xf] }
  0xbb   : > { %3414 = vmatprep.mubr.bf16.mxu1 %v6002_v22  ;;  %v964_v31 = vsel %vm5421_vm7, %v793_v53, %v963_v14  ;;  %v4327_v38 = vcombine.low %v1087_v17, %v5841_v34  ;;  %v5219_v34 = vld [vmem:[%s6956_s3 + $0x238] sm:$0xff]   ;;  %v1834_v14 = vshrl.u32 %v5868_v1, 16  ;;  %v6073_v36 = vcombine.low %v1099_v3, %v6063_v21  ;;  %v1149_v8 = vld [vmem:[#allocation2 + $0x30] sm:$0xe] }
  0xbc   : > { %965 = vst [vmem:[#allocation2 + $0xc0] sm:$0xf] %v964_v31  ;;  %v5184_v53 = vld [vmem:[#allocation2 + $0x5c] ss:$0 sps:$4 sm:$0x11]   ;;  %v1608_v1 = vrot.slane %v5262_v16, 1 }
  0xbd   : > { %4973 = vmatpush3.bf16.msra.mxu0 %v5188_v15  ;;  %v1815_v15 = vor.u32 %v1814_v5, %v1810_v13  ;;  %v1831_v13 = vrot.slane %v1829_v60, 1  ;;  %v2044_v5 = vrot.slane %v4327_v38, 1  ;;  %v1033_v31 = vld [vmem:[#allocation2 + $0xb4] sm:$0xe]  ;;  %v6079_v38 = vld [vmem:[#allocation2 + $0x28] sm:$0xf] }
  0xbe   : > { %4974 = vmatprep.subr.bf16.mxu0 %v5198_v33  ;;  %v2048_v44 = vrot.slane %v5184_v53, 1  ;;  %v1860_v60 = vshll.u32 %v5914_v29, 16  ;;  %v5263_v55 = vld [vmem:[#allocation2 + $0xb8] sm:$0xf]  ;;  %v1858_v3 = vshrl.u32 %v5914_v29, 16 }
  0xbf   : > { %v1820_v56 = vsel %vm1307_vm0, %v1815_v15, %v1819_v51  ;;  %v1848_v51 = vshll.u32 %v5891_v19, 16  ;;  %v1089_v15 = vld [vmem:[#allocation2 + $0x60] sm:$0xe]  ;;  %v2046_v52 = vsel %vm1564_vm9, %v2044_v5, %v2045_v57  ;;  %v4289_v45 = vcombine.low %v1033_v31, %v5263_v55  ;;  %v1090_v5 = vld [vmem:[#allocation2 + $0x6c] sm:$0xe] }
  0xc0   : > { %3504 = vmatmul.mubr.bf16.gmra.mrb[56].mxu0 %v1808_v58  ;;  %v1826_v58 = vrot.slane %v1824_v12, 1  ;;  %v6105_v29 = vld [vmem:[#allocation2 + $0x34] sm:$0xf]  ;;  %v4330_v16 = vcombine.low %v1090_v5, %v5932_v46  ;;  %v5204_v55 = vld [vmem:[#allocation2 + $0x38] ss:$0 sps:$4 sm:$0x11]  }
  0xc1   : > { %3511 = vmatprep.mubr.bf16.mxu0 %v2040_v20  ;;  %4975 = vmatpush3.bf16.msra.mxu0 %v5198_v33  ;;  %v1841_v20 = vshll.u32 %v5180_v47, 16  ;;  %v1850_v47 = vrot.slane %v1848_v51, 1  ;;  %v1610_v51 = vrot.slane %v4289_v45, 1  ;;  %v1874_v5 = vrot.slane %v1872_v6, 1  ;;  %v1150_v6 = vld [vmem:[#allocation2 + $0x3c] sm:$0xe] }
  0xc2   : > { %3415 = vmatmul.mubr.bf16.gmra.mrb[60].mxu1 %v1600_v54  ;;  %4976 = vmatprep.subr.bf16.mxu0 %v5205_v62  ;;  %v1088_v54 = vld [vmem:[#allocation2 + $0x54] sm:$0xe]  ;;  %v1827_v33 = vor.u32 %v1826_v58, %v1822_v9  ;;  %v2240_v9 = vshll.u32 %v6073_v36, 16  ;;  %v4329_v58 = vcombine.low %v1089_v15, %v5907_v42  ;;  %v2238_v42 = vshrl.u32 %v6073_v36, 16 }
  0xc3   : > { %3422 = vmatprep.mubr.bf16.mxu1 %v6021_v27  ;;  %v4328_v12 = vcombine.low %v1088_v54, %v5877_v26  ;;  %v1838_v26 = vrot.slane %v1836_v49, 1  ;;  %v1843_v11 = vrot.slane %v1841_v20, 1  ;;  %v1064_v37 = vld [vmem:[#allocation2 + $0xc0] sm:$0xf]  ;;  %v803_v15 = vrot.slane %v6034_v28, 4 }
  0xc4   : > { %v1832_v61 = vsel %vm1307_vm0, %v1827_v33, %v1831_v13  ;;  %v5191_v49 = vld [vmem:[#allocation2 + $0x68] ss:$0 sps:$4 sm:$0x11]   ;;  %v2242_v13 = vrot.slane %v2240_v9, 1  ;;  %v2050_v20 = vrot.slane %v4329_v58, 1 }
  0xc5   : > { %4977 = vmatpush3.bf16.msra.mxu0 %v5205_v62  ;;  %v5261_v62 = vld [vmem:[#allocation2 + $0xac] sm:$0xf]  ;;  %v2047_v25 = vrot.slane %v4328_v12, 1 }
  0xc6   : > { %4978 = vmatprep.subr.bf16.mxu0 %v5212_v0  ;;  %v4288_v17 = vcombine.low %v1032_v2, %v5261_v62  ;;  %v6092_v2 = vcombine.low %v1101_v35, %v6079_v38  ;;  %v1862_v62 = vrot.slane %v1860_v60, 1  ;;  %v1091_v60 = vld [vmem:[#allocation2 + $0x78] sm:$0xe] }
  0xc7   : > { %v2049_v12 = vsel %vm1564_vm9, %v2047_v25, %v2048_v44  ;;  %v1103_v25 = vld [vmem:[#allocation2 + $0x30] sm:$0xf] }
  0xc8   : > { %3512 = vmatmul.mubr.bf16.gmra.mrb[60].mxu0 %v1820_v56  ;;  %v1607_v63 = vrot.slane %v4288_v17, 1  ;;  %v6081_v56 = vld [vmem:[#allocation2 + $0xc4] sm:$0xf]  ;;  %v2250_v35 = vshrl.u32 %v6092_v2, 16  ;;  %v6114_v58 = vcombine.low %v1103_v25, %v6105_v29 }
  0xc9   : > { %3519 = vmatprep.mubr.bf16.mxu0 %v2043_v50  ;;  %4979 = vmatpush3.bf16.msra.mxu0 %v5212_v0  ;;  %v6076_v0 = vld [vmem:[#allocation2 + $0x20] ss:$0 sps:$4 sm:$0x11]   ;;  %v1846_v50 = vshrl.u32 %v5891_v19, 16  ;;  %v6089_v4 = vcombine.low %v1064_v37, %v6081_v56  ;;  %v967_v37 = vld [vmem:[#allocation2 + $0xc8] sm:$0x1] }
  0xca   : > { %3423 = vmatmul.mubr.bf16.gmra.mrb[64].mxu1 %v1603_v41  ;;  %4980 = vmatprep.subr.bf16.mxu0 %v5219_v34  ;;  %v1839_v41 = vor.u32 %v1838_v26, %v1834_v14  ;;  %v1609_v54 = vsel %vm1564_vm9, %v1607_v63, %v1608_v1  ;;  %v2245_v19 = vshll.u32 %v6076_v0, 16  ;;  %v5264_v14 = vld [vmem:[#allocation2 + $0xbc] ss:$0 sps:$4 sm:$0x11]   ;;  %v2252_v26 = vshll.u32 %v6092_v2, 16 }
  0xcb   : > { %3430 = vmatprep.mubr.bf16.mxu1 %v6050_v30  ;;  %v1851_v17 = vor.u32 %v1850_v47, %v1846_v50  ;;  %v1865_v1 = vshll.u32 %v5191_v49, 16  ;;  %v5195_v63 = vld [vmem:[#allocation2 + $0x74] ss:$0 sps:$4 sm:$0x11]   ;;  %v968_v46 = vsel %vm5429_vm8, %v803_v15, %v967_v37  ;;  %v1863_v47 = vor.u32 %v1862_v62, %v1858_v3  ;;  %v1092_v37 = vld [vmem:[#allocation2 + $0x84] sm:$0xe] }
  0xcc   : > { %v1844_v33 = vsel %vm1307_vm0, %v1839_v41, %v1843_v11  ;;  %v2247_v11 = vrot.slane %v2245_v19, 1  ;;  %v2254_v41 = vrot.slane %v2252_v26, 1  ;;  %969 = vst [vmem:[#allocation2 + $0xc8] sm:$0x1] %v968_v46  ;;  %v4331_v19 = vcombine.low %v1091_v60, %v5953_v40 }
  0xcd   : > { %4981 = vmatpush3.bf16.msra.mxu0 %v5219_v34  ;;  %v1853_v34 = vshll.u32 %v5184_v53, 16  ;;  %v2051_v53 = vrot.slane %v5191_v49, 1  ;;  %v2054_v49 = vrot.slane %v5195_v63, 1  ;;  %v2494_v62 = vrot.slane %v6076_v0, 1 }
  0xce   : > { %v2255_v45 = vor.u32 %v2254_v41, %v2250_v35  ;;  %v2269_v26 = vshll.u32 %v5204_v55, 16  ;;  %v2262_v15 = vshrl.u32 %v6114_v58, 16  ;;  %v5199_v0 = vld [vmem:[#allocation2 + $0x80] ss:$0 sps:$4 sm:$0x11]   ;;  %v1884_v41 = vshll.u32 %v5960_v43, 16 }
  0xcf   : > { %v1855_v57 = vrot.slane %v1853_v34, 1  ;;  %v2052_v50 = vsel %vm1564_vm9, %v2050_v20, %v2051_v53  ;;  %v1867_v34 = vrot.slane %v1865_v1, 1  ;;  %v1106_v20 = vld [vmem:[#allocation2 + $0x40] sm:$0xf]  ;;  %v2057_v60 = vrot.slane %v5199_v0, 1 }
  0xd0   : > { %3520 = vmatmul.mubr.bf16.gmra.mrb[64].mxu0 %v1832_v61  ;;  %v6101_v61 = vld [vmem:[#allocation2 + $0x2c] ss:$0 sps:$4 sm:$0x11]  }
  0xd1   : > { %3527 = vmatprep.mubr.bf16.mxu0 %v2046_v52  ;;  %v2243_v52 = vor.u32 %v2242_v13, %v2238_v42  ;;  %v2257_v44 = vshll.u32 %v6101_v61, 16  ;;  %v1856_v9 = vsel %vm1307_vm0, %v1851_v17, %v1855_v57  ;;  %v1147_v42 = vld [vmem:[#allocation2 + $0x18] sm:$0xe]  ;;  %v1148_v13 = vld [vmem:[#allocation2 + $0x24] sm:$0xe] }
  0xd2   : > { %3431 = vmatmul.mubr.bf16.gmra.mrb[68].mxu1 %v1606_v23  ;;  %v1611_v23 = vrot.slane %v5264_v14, 1  ;;  %v1105_v57 = vld [vmem:[#allocation2 + $0x3c] sm:$0xf]  ;;  %v4370_v3 = vcombine.low %v1147_v42, %v6063_v21  ;;  %v4371_v17 = vcombine.low %v1148_v13, %v6079_v38  ;;  %v1868_v14 = vsel %vm1307_vm0, %v1863_v47, %v1867_v34 }
  0xd3   : > { %3438 = vmatprep.mubr.bf16.mxu1 %v6069_v32  ;;  %v2248_v28 = vsel %vm1307_vm0, %v2243_v52, %v2247_v11  ;;  %v5208_v52 = vld [vmem:[#allocation2 + $0x44] ss:$0 sps:$4 sm:$0x11]   ;;  %v6130_v38 = vcombine.low %v1105_v57, %v1106_v20  ;;  %v2271_v47 = vrot.slane %v2269_v26, 1  ;;  %v1886_v13 = vrot.slane %v1884_v41, 1 }
  0xd4   : > { %v1612_v31 = vsel %vm1564_vm9, %v1610_v51, %v1611_v23  ;;  %v2497_v51 = vrot.slane %v6101_v61, 1  ;;  %v1877_v23 = vshll.u32 %v5195_v63, 16  ;;  %v2493_v21 = vrot.slane %v4370_v3, 1 }
  0xd5   : > { %v2496_v11 = vrot.slane %v4371_v17, 1  ;;  %v4372_v61 = vcombine.low %v1149_v8, %v6105_v29  ;;  %v2503_v35 = vrot.slane %v5208_v52, 1  ;;  %v2276_v34 = vshll.u32 %v6130_v38, 16  ;;  %v1093_v17 = vld [vmem:[#allocation2 + $0x90] sm:$0xe] }
  0xd6   : > { %v6134_v1 = vsel %vm1564_vm9, %v2493_v21, %v2494_v62  ;;  %v2274_v57 = vshrl.u32 %v6130_v38, 16 }
  0xd7   : > { %v6137_v63 = vsel %vm1564_vm9, %v2496_v11, %v2497_v51  ;;  %v2499_v29 = vrot.slane %v4372_v61, 1 }
  0xd8   : > { %3528 = vmatmul.mubr.bf16.gmra.mrb[68].mxu0 %v1844_v33  ;;  %v2259_v33 = vrot.slane %v2257_v44, 1  ;;  %v1875_v44 = vor.u32 %v1874_v5, %v1870_v59  ;;  %v2281_v59 = vshll.u32 %v5208_v52, 16  ;;  %v5202_v5 = vld [vmem:[#allocation2 + $0x8c] ss:$0 sps:$4 sm:$0x11]   ;;  %v1894_v52 = vshrl.u32 %v5978_v39, 16 }
  0xd9   : > { %3535 = vmatprep.mubr.bf16.mxu0 %v2049_v12  ;;  %v2264_v12 = vshll.u32 %v6114_v58, 16 }
  0xda   : > { %3439 = vmatmul.mubr.bf16.gmra.mrb[72].mxu1 %v1609_v54  ;;  %v2053_v54 = vrot.slane %v4330_v16, 1  ;;  %v2260_v53 = vsel %vm1307_vm0, %v2255_v45, %v2259_v33  ;;  %v4373_v16 = vcombine.low %v1150_v6, %v1106_v20  ;;  %v4332_v45 = vcombine.low %v1092_v37, %v5970_v48 }
  0xdb   : > { %3446 = vmatprep.mubr.bf16.mxu1 %v6089_v4  ;;  %v2266_v25 = vrot.slane %v2264_v12, 1  ;;  %v1882_v33 = vshrl.u32 %v5960_v43, 16  ;;  %v2278_v20 = vrot.slane %v2276_v34, 1  ;;  %v1896_v43 = vshll.u32 %v5978_v39, 16 }
  0xdc   : > { %v2055_v40 = vsel %vm1564_vm9, %v2053_v54, %v2054_v49  ;;  %v2502_v46 = vrot.slane %v4373_v16, 1  ;;  %v1107_v54 = vld [vmem:[#allocation2 + $0x48] sm:$0xf]  ;;  %v6142_v49 = vld [vmem:[#allocation2 + $0x4c] sm:$0xf]  ;;  %v2283_v8 = vrot.slane %v2281_v59, 1 }
  0xdd   : > { %v6156_v3 = vcombine.low %v1107_v54, %v6142_v49  ;;  %v1887_v48 = vor.u32 %v1886_v13, %v1882_v33  ;;  %v2279_v26 = vor.u32 %v2278_v20, %v2274_v57  ;;  %v1898_v11 = vrot.slane %v1896_v43, 1  ;;  %v5206_v16 = vld [vmem:[#allocation2 + $0x98] ss:$0 sps:$4 sm:$0x11]   ;;  %v1111_v13 = vld [vmem:[#allocation2 + $0x60] sm:$0xf] }
  0xde   : > { %v2063_v34 = vrot.slane %v5206_v16, 1  ;;  %v6182_v33 = vld [vmem:[#allocation2 + $0x5c] ss:$0 sps:$4 sm:$0x11]   ;;  %v1906_v59 = vshrl.u32 %v6002_v22, 16  ;;  %v1913_v57 = vshll.u32 %v5206_v16, 16 }
  0xdf   : > { %v2288_v6 = vshll.u32 %v6156_v3, 16  ;;  %v2305_v43 = vshll.u32 %v6182_v33, 16 }
  0xe0   : > { %3536 = vmatmul.mubr.bf16.gmra.mrb[72].mxu0 %v1856_v9  ;;  %v1879_v9 = vrot.slane %v1877_v23, 1  ;;  %v2060_v23 = vrot.slane %v5202_v5, 1 }
  0xe1   : > { %3543 = vmatprep.mubr.bf16.mxu0 %v2052_v50  ;;  %v2267_v50 = vor.u32 %v2266_v25, %v2262_v15  ;;  %v6164_v15 = vld [vmem:[#allocation2 + $0x58] sm:$0xf]  ;;  %v2290_v41 = vrot.slane %v2288_v6, 1  ;;  %v1915_v6 = vrot.slane %v1913_v57, 1 }
  0xe2   : > { %3447 = vmatmul.mubr.bf16.gmra.mrb[76].mxu1 %v1612_v31  ;;  %v2500_v31 = vrot.slane %v5204_v55, 1  ;;  %v1880_v42 = vsel %vm1307_vm0, %v1875_v44, %v1879_v9  ;;  %v1115_v57 = vld [vmem:[#allocation2 + $0x78] sm:$0xf] }
  0xe3   : > { %3648 = vmatprep.mubr.bf16.mxu1 %v2248_v28  ;;  %v2056_v28 = vrot.slane %v4331_v19, 1  ;;  %v1889_v19 = vshll.u32 %v5199_v0, 16  ;;  %v2272_v12 = vsel %vm1307_vm0, %v2267_v50, %v2271_v47  ;;  %v1901_v0 = vshll.u32 %v5202_v5, 16 }
  0xe4   : > { %v6145_v55 = vsel %vm1564_vm9, %v2499_v29, %v2500_v31  ;;  %v2284_v31 = vsel %vm1307_vm0, %v2279_v26, %v2283_v8  ;;  %v1095_v26 = vld [vmem:[#allocation2 + $0xa8] sm:$0xe] }
  0xe5   : > { %v2058_v62 = vsel %vm1564_vm9, %v2056_v28, %v2057_v60  ;;  %v1891_v51 = vrot.slane %v1889_v19, 1  ;;  %v1908_v28 = vshll.u32 %v6002_v22, 16  ;;  %v1903_v60 = vrot.slane %v1901_v0, 1  ;;  %v6185_v19 = vld [vmem:[#allocation2 + $0x64] sm:$0xf] }
  0xe6   : > { %v1920_v22 = vshll.u32 %v6021_v27, 16  ;;  %v1113_v0 = vld [vmem:[#allocation2 + $0x6c] sm:$0xf] }
  0xe7   : > { %v1892_v21 = vsel %vm1307_vm0, %v1887_v48, %v1891_v51  ;;  %v6193_v48 = vcombine.low %v1111_v13, %v6185_v19 }
  0xe8   : > { %3544 = vmatmul.mubr.bf16.gmra.mrb[76].mxu0 %v1868_v14  ;;  %v2059_v14 = vrot.slane %v4332_v45, 1 }
  0xe9   : > { %3551 = vmatprep.mubr.bf16.mxu0 %v2055_v40  ;;  %v6161_v40 = vld [vmem:[#allocation2 + $0x50] ss:$0 sps:$4 sm:$0x11]  }
  0xea   : > { %3649 = vmatmul.mubr.bf16.vlgmr.msra.gmra.mrb[80].mxu1 %v6073_v36  ;;  %v6148_v36 = vsel %vm1564_vm9, %v2502_v46, %v2503_v35  ;;  %v2293_v25 = vshll.u32 %v6161_v40, 16  ;;  %v2286_v35 = vshrl.u32 %v6156_v3, 16  ;;  %v1899_v46 = vor.u32 %v1898_v11, %v1894_v52  ;;  %v6199_v52 = vld [vmem:[#allocation2 + $0x68] ss:$0 sps:$4 sm:$0x11]  }
  0xeb   : > { %3656 = vmatprep.mubr.bf16.mxu1 %v2260_v53  ;;  %v1109_v53 = vld [vmem:[#allocation2 + $0x54] sm:$0xf] }
  0xec   : > { %v6173_v44 = vcombine.low %v1109_v53, %v6164_v15  ;;  %v2291_v54 = vor.u32 %v2290_v41, %v2286_v35  ;;  %v2295_v45 = vrot.slane %v2293_v25, 1  ;;  %v1904_v5 = vsel %vm1307_vm0, %v1899_v46, %v1903_v60  ;;  %v6202_v25 = vld [vmem:[#allocation2 + $0x70] sm:$0xf] }
  0xed   : > { %v2310_v41 = vshrl.u32 %v6193_v48, 16  ;;  %v5213_v46 = vld [vmem:[#allocation2 + $0xb0] ss:$0 sps:$4 sm:$0x11]  }
  0xee   : > { %v2298_v20 = vshrl.u32 %v6173_v44, 16 }
  0xf0   : > { %3552 = vmatmul.mubr.bf16.gmra.mrb[80].mxu0 %v1880_v42  ;;  %v2300_v42 = vshll.u32 %v6173_v44, 16 }
  0xf1   : > { %3559 = vmatprep.mubr.bf16.mxu0 %v2058_v62  ;;  %v2296_v62 = vsel %vm1307_vm0, %v2291_v54, %v2295_v45 }
  0xf2   : > { %3657 = vmatmul.mubr.bf16.gmra.mrb[84].mxu1 %v6092_v2  ;;  %v4333_v2 = vcombine.low %v1093_v17, %v5995_v10  ;;  %v2061_v10 = vsel %vm1564_vm9, %v2059_v14, %v2060_v23  ;;  %v2302_v17 = vrot.slane %v2300_v42, 1  ;;  %v5209_v23 = vld [vmem:[#allocation2 + $0xa4] ss:$0 sps:$4 sm:$0x11]  }
  0xf3   : > { %3664 = vmatprep.mubr.bf16.mxu1 %v2272_v12  ;;  %v1910_v12 = vrot.slane %v1908_v28, 1  ;;  %v2066_v11 = vrot.slane %v5209_v23, 1  ;;  %v1925_v35 = vshll.u32 %v5209_v23, 16  ;;  %v6211_v28 = vcombine.low %v1113_v0, %v6202_v25 }
  0xf4   : > { %v2062_v50 = vrot.slane %v4333_v2, 1  ;;  %v2303_v53 = vor.u32 %v2302_v17, %v2298_v20  ;;  %v2307_v2 = vrot.slane %v2305_v43, 1  ;;  %v6221_v20 = vld [vmem:[#allocation2 + $0x7c] sm:$0xf]  ;;  %v1930_v17 = vshrl.u32 %v6050_v30, 16 }
  0xf5   : > { %v1911_v8 = vor.u32 %v1910_v12, %v1906_v59  ;;  %v6218_v59 = vld [vmem:[#allocation2 + $0x74] ss:$0 sps:$4 sm:$0x11]   ;;  %v1937_v23 = vshll.u32 %v5213_v46, 16  ;;  %v1944_v0 = vshll.u32 %v6069_v32, 16 }
  0xf6   : > { %v2064_v14 = vsel %vm1564_vm9, %v2062_v50, %v2063_v34  ;;  %v1927_v50 = vrot.slane %v1925_v35, 1 }
  0xf7   : > { %v1916_v16 = vsel %vm1307_vm0, %v1911_v8, %v1915_v6  ;;  %v2329_v6 = vshll.u32 %v6218_v59, 16 }
  0xf8   : > { %3560 = vmatmul.mubr.bf16.gmra.mrb[84].mxu0 %v1892_v21  ;;  %v2312_v21 = vshll.u32 %v6193_v48, 16 }
  0xf9   : > { %3567 = vmatprep.mubr.bf16.mxu0 %v2061_v10 }
  0xfa   : > { %3665 = vmatmul.mubr.bf16.gmra.mrb[88].mxu1 %v6114_v58  ;;  %v1094_v58 = vld [vmem:[#allocation2 + $0x9c] sm:$0xe]  ;;  %v2314_v10 = vrot.slane %v2312_v21, 1  ;;  %v5216_v21 = vld [vmem:[#allocation2 + $0xbc] ss:$0 sps:$4 sm:$0x11]  }
  0xfb   : > { %v4510_v61 = vpop.f32.mrb[0].mxu0  ;;  %3672 = vmatprep.mubr.bf16.mxu1 %v2284_v31  ;;  %v4334_v51 = vcombine.low %v1094_v58, %v6016_v18  ;;  %v1922_v31 = vrot.slane %v1920_v22, 1  ;;  %v2322_v22 = vshrl.u32 %v6211_v28, 16 }
  0xfc   : > { %v4511_v37 = vpop.f32.mrb[1].mxu0  ;;  %v2315_v45 = vor.u32 %v2314_v10, %v2310_v41  ;;  %v2331_v41 = vrot.slane %v2329_v6, 1  ;;  %v6260_v6 = vld [vmem:[#allocation2 + $0x8c] ss:$0 sps:$4 sm:$0x11]  }
  0xfd   : > { %v6176_v39 = vadd.f32 %v4511_v37, %v4510_v61  ;;  %v4513_v9 = vpop.f32.mrb[2].mxu0  ;;  %v2065_v18 = vrot.slane %v4334_v51, 1  ;;  %v1918_v61 = vshrl.u32 %v6021_v27, 16  ;;  %v2308_v37 = vsel %vm1307_vm0, %v2303_v53, %v2307_v2 }
  0xfe   : > { %v4514_v29 = vpop.f32.mrb[3].mxu0  ;;  %v6231_v53 = vcombine.low %v1115_v57, %v6221_v20 }
  0xff   : > { %v6180_v47 = vadd.f32 %v4514_v29, %v4513_v9  ;;  %v2317_v9 = vshll.u32 %v6199_v52, 16  ;;  %v2067_v29 = vsel %vm1564_vm9, %v2065_v18, %v2066_v11  ;;  %v1923_v60 = vor.u32 %v1922_v31, %v1918_v61 }
 0x100   : > { %3568 = vmatmul.mubr.bf16.gmra.mrb[88].mxu0 %v1904_v5  ;;  %v2324_v5 = vshll.u32 %v6211_v28, 16  ;;  %v1939_v61 = vrot.slane %v1937_v23, 1  ;;  %v2336_v10 = vshll.u32 %v6231_v53, 16  ;;  %v1956_v23 = vshll.u32 %v6089_v4, 16 }
 0x101   : > { %3575 = vmatprep.mubr.bf16.mxu0 %v2064_v14  ;;  %v2319_v42 = vrot.slane %v2317_v9, 1  ;;  %v1928_v51 = vsel %vm1307_vm0, %v1923_v60, %v1927_v50  ;;  %v1942_v60 = vshrl.u32 %v6069_v32, 16  ;;  %v5220_v32 = vld [vmem:[#allocation2 + $0xc8] ss:$0 sps:$4 sm:$0x11]  }
 0x102   : > { %3673 = vmatmul.mubr.bf16.gmra.mrb[92].mxu1 %v6130_v38  ;;  %v4335_v38 = vcombine.low %v1095_v26, %v6037_v24  ;;  %v1932_v24 = vshll.u32 %v6050_v30, 16  ;;  %v2326_v8 = vrot.slane %v2324_v5, 1  ;;  %v2338_v5 = vrot.slane %v2336_v10, 1 }
 0x103   : > { %3680 = vmatprep.mubr.bf16.mxu1 %v2296_v62  ;;  %v1096_v62 = vld [vmem:[#allocation2 + $0xb4] sm:$0xe]  ;;  %v2320_v26 = vsel %vm1307_vm0, %v2315_v45, %v2319_v42  ;;  %v2334_v45 = vshrl.u32 %v6231_v53, 16 }
 0x104   : > { %v2068_v34 = vrot.slane %v4335_v38, 1  ;;  %v1934_v14 = vrot.slane %v1932_v24, 1  ;;  %v4336_v2 = vcombine.low %v1096_v62, %v6060_v7  ;;  %v2327_v35 = vor.u32 %v2326_v8, %v2322_v22  ;;  %v1097_v24 = vld [vmem:[#allocation2 + $0xc0] sm:$0xe] }
 0x105   : > { %v4337_v57 = vcombine.low %v1097_v24, %v6081_v56 }
 0x106   : > { %v1935_v38 = vor.u32 %v1934_v14, %v1930_v17  ;;  %v2071_v9 = vrot.slane %v4336_v2, 1  ;;  %v2332_v42 = vsel %vm1307_vm0, %v2327_v35, %v2331_v41  ;;  %v2339_v2 = vor.u32 %v2338_v5, %v2334_v45 }
 0x107   : > { %v1961_v35 = vshll.u32 %v5220_v32, 16 }
 0x108   : > { %3576 = vmatmul.mubr.bf16.gmra.mrb[92].mxu0 %v1916_v16  ;;  %v1940_v50 = vsel %vm1307_vm0, %v1935_v38, %v1939_v61  ;;  %v1954_v38 = vshrl.u32 %v6089_v4, 16 }
 0x109   : > { %3583 = vmatprep.mubr.bf16.mxu0 %v2067_v29  ;;  %v1963_v45 = vrot.slane %v1961_v35, 1 }
 0x10a   : > { %3681 = vmatmul.mubr.bf16.gmra.mrb[96].mxu1 %v6156_v3  ;;  %v4582_v27 = vpop.f32.mrb[0].mxu1  ;;  %v2069_v3 = vrot.slane %v5213_v46, 1  ;;  %v1117_v46 = vld [vmem:[#allocation2 + $0x84] sm:$0xf] }
 0x10b   : > { %3688 = vmatprep.mubr.bf16.mxu1 %v2308_v37  ;;  %v4583_v54 = vpop.f32.mrb[1].mxu1  ;;  %v6239_v37 = vld [vmem:[#allocation2 + $0x80] ss:$0 sps:$4 sm:$0x11]  }
 0x10c   : > { %v6216_v13 = vadd.f32 %v4583_v54, %v4582_v27  ;;  %v4585_v58 = vpop.f32.mrb[2].mxu1  ;;  %v2070_v30 = vsel %vm1564_vm9, %v2068_v34, %v2069_v3  ;;  %v6244_v27 = vld [vmem:[#allocation2 + $0x88] sm:$0xf]  ;;  %v1946_v34 = vrot.slane %v1944_v0, 1  ;;  %v1949_v54 = vshll.u32 %v5216_v21, 16 }
 0x10d   : > { %v4586_v12 = vpop.f32.mrb[3].mxu1  ;;  %v2341_v3 = vshll.u32 %v6239_v37, 16  ;;  %v6265_v0 = vld [vmem:[#allocation2 + $0x94] sm:$0xf] }
 0x10e   : > { %v6224_v43 = vadd.f32 %v4586_v12, %v4585_v58  ;;  %v6252_v12 = vcombine.low %v1117_v46, %v6244_v27  ;;  %v1947_v22 = vor.u32 %v1946_v34, %v1942_v60 }
 0x110   : > { %3584 = vmatmul.mubr.bf16.gmra.mrb[96].mxu0 %v1928_v51 }
 0x111   : > { %3591 = vmatprep.mubr.bf16.mxu0 %v2070_v30  ;;  %v2343_v30 = vrot.slane %v2341_v3, 1 }
 0x112   : > { %v4516_v18 = vpop.f32.mrb[4].mxu0  ;;  %3689 = vmatmul.mubr.bf16.gmra.mrb[100].mxu1 %v6173_v44  ;;  %v2072_v44 = vrot.slane %v5216_v21, 1  ;;  %v2348_v21 = vshll.u32 %v6252_v12, 16 }
 0x113   : > { %v4517_v11 = vpop.f32.mrb[5].mxu0  ;;  %3696 = vmatprep.mubr.bf16.mxu1 %v2320_v26  ;;  %v1951_v26 = vrot.slane %v1949_v54, 1  ;;  %v2344_v10 = vsel %vm1307_vm0, %v2339_v2, %v2343_v30 }
 0x114   : > { %v6237_v16 = vadd.f32 %v4517_v11, %v4516_v18  ;;  %v4519_v31 = vpop.f32.mrb[6].mxu0  ;;  %v2073_v62 = vsel %vm1564_vm9, %v2071_v9, %v2072_v44  ;;  %v2075_v18 = vrot.slane %v5220_v32, 1  ;;  %v1119_v11 = vld [vmem:[#allocation2 + $0x90] sm:$0xf]  ;;  %v2346_v44 = vshrl.u32 %v6252_v12, 16 }
 0x115   : > { %v4520_v7 = vpop.f32.mrb[7].mxu0  ;;  %v1952_v61 = vsel %vm1307_vm0, %v1947_v22, %v1951_v26  ;;  %v2350_v46 = vrot.slane %v2348_v21, 1  ;;  %v6273_v24 = vcombine.low %v1119_v11, %v6265_v0  ;;  %v6284_v32 = vld [vmem:[#allocation2 + $0xa0] sm:$0xf] }
 0x116   : > { %v6242_v29 = vadd.f32 %v4520_v7, %v4519_v31  ;;  %v1958_v31 = vrot.slane %v1956_v23, 1  ;;  %v2353_v7 = vshll.u32 %v6260_v6, 16  ;;  %v6298_v11 = vld [vmem:[#allocation2 + $0xa4] ss:$0 sps:$4 sm:$0x11]  }
 0x117   : > { %v2351_v5 = vor.u32 %v2350_v46, %v2346_v44  ;;  %v2358_v23 = vshrl.u32 %v6273_v24, 16 }
 0x118   : > { %v4588_v58 = vpop.f32.mrb[4].mxu1  ;;  %3592 = vmatmul.mubr.bf16.gmra.mrb[100].mxu0 %v1940_v50  ;;  %v1959_v54 = vor.u32 %v1958_v31, %v1954_v38  ;;  %v2355_v3 = vrot.slane %v2353_v7, 1  ;;  %v1151_v38 = vld [vmem:[#allocation2 + $0x48] sm:$0xe] }
 0x119   : > { %v4589_v17 = vpop.f32.mrb[5].mxu1  ;;  %3599 = vmatprep.mubr.bf16.mxu0 %v2073_v62  ;;  %v1121_v62 = vld [vmem:[#allocation2 + $0x9c] sm:$0xf]  ;;  %v1123_v7 = vld [vmem:[#allocation2 + $0xa8] sm:$0xf]  ;;  %v4374_v46 = vcombine.low %v1151_v38, %v6142_v49 }
 0x11a   : > { %3697 = vmatmul.mubr.bf16.gmra.mrb[104].mxu1 %v6193_v48  ;;  %v6257_v51 = vadd.f32 %v4589_v17, %v4588_v58  ;;  %v4591_v14 = vpop.f32.mrb[6].mxu1  ;;  %v2074_v48 = vrot.slane %v4337_v57, 1  ;;  %v6281_v58 = vld [vmem:[#allocation2 + $0x98] ss:$0 sps:$4 sm:$0x11]   ;;  %v2360_v57 = vshll.u32 %v6273_v24, 16  ;;  %v2356_v2 = vsel %vm1307_vm0, %v2351_v5, %v2355_v3 }
 0x11b   : > { %3704 = vmatprep.mubr.bf16.mxu1 %v2332_v42  ;;  %v4592_v8 = vpop.f32.mrb[7].mxu1  ;;  %v2365_v22 = vshll.u32 %v6281_v58, 16  ;;  %v6293_v21 = vcombine.low %v1121_v62, %v6284_v32  ;;  %v1152_v3 = vld [vmem:[#allocation2 + $0x54] sm:$0xe]  ;;  %v1153_v62 = vld [vmem:[#allocation2 + $0x60] sm:$0xe] }
 0x11c   : > { %v6262_v56 = vadd.f32 %v4592_v8, %v4591_v14  ;;  %v2076_v60 = vsel %vm1564_vm9, %v2074_v48, %v2075_v18  ;;  %v2362_v30 = vrot.slane %v2360_v57, 1  ;;  %v6317_v49 = vld [vmem:[#allocation2 + $0xb0] ss:$0 sps:$4 sm:$0x11]   ;;  %v2505_v57 = vrot.slane %v4374_v46, 1 }
 0x11d   : > { %v2367_v31 = vrot.slane %v2365_v22, 1  ;;  %v2372_v35 = vshll.u32 %v6293_v21, 16  ;;  %v2389_v38 = vshll.u32 %v6317_v49, 16 }
 0x11e   : > { %v4522_v41 = vpop.f32.mrb[8].mxu0 }
 0x11f   : > { %v4523_v9 = vpop.f32.mrb[9].mxu0 }
 0x120   : > { %v6276_v50 = vadd.f32 %v4523_v9, %v4522_v41  ;;  %v4525_v4 = vpop.f32.mrb[10].mxu0  ;;  %3600 = vmatmul.mubr.bf16.gmra.mrb[104].mxu0 %v1952_v61  ;;  %v2363_v61 = vor.u32 %v2362_v30, %v2358_v23  ;;  %v2506_v23 = vrot.slane %v6161_v40, 1 }
 0x121   : > { %v4526_v34 = vpop.f32.mrb[11].mxu0  ;;  %3607 = vmatprep.mubr.bf16.mxu0 %v2076_v60  ;;  %v2377_v60 = vshll.u32 %v6298_v11, 16 }
 0x122   : > { %3705 = vmatmul.mubr.bf16.gmra.mrb[108].mxu1 %v6211_v28  ;;  %v6279_v42 = vadd.f32 %v4526_v34, %v4525_v4  ;;  %v1964_v28 = vsel %vm1307_vm0, %v1959_v54, %v1963_v45  ;;  %v2370_v34 = vshrl.u32 %v6293_v21, 16  ;;  %v2374_v54 = vrot.slane %v2372_v35, 1 }
 0x123   : > { %3712 = vmatprep.mubr.bf16.mxu1 %v2344_v10  ;;  %v6302_v10 = vld [vmem:[#allocation2 + $0xac] sm:$0xf] }
 0x124   : > { %v6311_v45 = vcombine.low %v1123_v7, %v6302_v10  ;;  %v2507_v7 = vsel %vm1564_vm9, %v2505_v57, %v2506_v23 }
 0x126   : > { %v4594_v17 = vpop.f32.mrb[8].mxu1  ;;  %v2382_v35 = vshrl.u32 %v6311_v45, 16 }
 0x127   : > { %v4595_v14 = vpop.f32.mrb[9].mxu1 }
 0x128   : > { %v6289_v26 = vadd.f32 %v4595_v14, %v4594_v17  ;;  %v4597_v8 = vpop.f32.mrb[10].mxu1  ;;  %3608 = vmatmul.mubr.bf16.gmra.mrb[108].mxu0 %v1964_v28  ;;  %v2375_v17 = vor.u32 %v2374_v54, %v2370_v34  ;;  %v2379_v28 = vrot.slane %v2377_v60, 1  ;;  %v2384_v14 = vshll.u32 %v6311_v45, 16 }
 0x129   : > { %v4598_v48 = vpop.f32.mrb[11].mxu1  ;;  %4982 = vmatprep.mubr.bf16.mxu0 %v6134_v1  ;;  %v2368_v1 = vsel %vm1307_vm0, %v2363_v61, %v2367_v31  ;;  %v2512_v60 = vrot.slane %v6199_v52, 1  ;;  %v2391_v34 = vrot.slane %v2389_v38, 1  ;;  %v1155_v52 = vld [vmem:[#allocation2 + $0x78] sm:$0xe] }
 0x12a   : > { %3713 = vmatmul.mubr.bf16.gmra.mrb[112].mxu1 %v6231_v53  ;;  %v6296_v18 = vadd.f32 %v4598_v48, %v4597_v8  ;;  %v1125_v8 = vld [vmem:[#allocation2 + $0xb4] sm:$0xf]  ;;  %v2380_v31 = vsel %vm1307_vm0, %v2375_v17, %v2379_v28  ;;  %v2386_v40 = vrot.slane %v2384_v14, 1 }
 0x12b   : > { %3720 = vmatprep.mubr.bf16.mxu1 %v2356_v2  ;;  %v6322_v2 = vld [vmem:[#allocation2 + $0xb8] sm:$0xf] }
 0x12d   : > { %v4528_v41 = vpop.f32.mrb[12].mxu0 }
 0x12e   : > { %v4529_v9 = vpop.f32.mrb[13].mxu0 }
 0x12f   : > { %v6304_v44 = vadd.f32 %v4529_v9, %v4528_v41  ;;  %v4531_v53 = vpop.f32.mrb[14].mxu0  ;;  %v6332_v41 = vcombine.low %v1125_v8, %v6322_v2 }
 0x130   : > { %v4532_v4 = vpop.f32.mrb[15].mxu0  ;;  %4983 = vmatmul.mubr.bf16.vlgmr.msra.gmra.mrb[112].mxu0 %v6137_v63  ;;  %v4375_v63 = vcombine.low %v1152_v3, %v6164_v15 }
 0x131   : > { %v6313_v5 = vadd.f32 %v4532_v4, %v4531_v53  ;;  %4986 = vmatprep.mubr.bf16.mxu0 %v6145_v55  ;;  %v4376_v55 = vcombine.low %v1153_v62, %v6185_v19  ;;  %v2509_v53 = vrot.slane %v6182_v33, 1  ;;  %v1154_v19 = vld [vmem:[#allocation2 + $0x6c] sm:$0xe]  ;;  %v6341_v4 = vld [vmem:[#allocation2 + $0xbc] ss:$0 sps:$4 sm:$0x11]  }
 0x132   : > { %3721 = vmatmul.mubr.bf16.gmra.mrb[116].mxu1 %v6252_v12  ;;  %v2508_v9 = vrot.slane %v4375_v63, 1  ;;  %v2396_v54 = vshll.u32 %v6332_v41, 16  ;;  %v1127_v62 = vld [vmem:[#allocation2 + $0xc0] sm:$0xf]  ;;  %v6344_v33 = vld [vmem:[#allocation2 + $0xc4] sm:$0xf] }
 0x133   : > { %3728 = vmatprep.mubr.bf16.mxu1 %v2368_v1  ;;  %v2511_v46 = vrot.slane %v4376_v55, 1  ;;  %v2387_v1 = vor.u32 %v2386_v40, %v2382_v35 }
 0x135   : > { %v4600_v22 = vpop.f32.mrb[12].mxu1  ;;  %v2392_v38 = vsel %vm1307_vm0, %v2387_v1, %v2391_v34  ;;  %v2518_v1 = vrot.slane %v6239_v37, 1 }
 0x136   : > { %v4601_v12 = vpop.f32.mrb[13].mxu1 }
 0x137   : > { %v6325_v30 = vadd.f32 %v4601_v12, %v4600_v22  ;;  %v4603_v48 = vpop.f32.mrb[14].mxu1  ;;  %v2513_v22 = vsel %vm1564_vm9, %v2511_v46, %v2512_v60  ;;  %v2401_v12 = vshll.u32 %v6341_v4, 16  ;;  %v6368_v60 = vld [vmem:[#allocation2 + $0xc8] ss:$0 sps:$4 sm:$0x11]  }
 0x138   : > { %v4604_v61 = vpop.f32.mrb[15].mxu1  ;;  %4987 = vmatmul.mubr.bf16.gmra.mrb[116].mxu0 %v6148_v36  ;;  %v4377_v36 = vcombine.low %v1154_v19, %v6202_v25  ;;  %v6355_v25 = vcombine.low %v1127_v62, %v6344_v33  ;;  %v2515_v19 = vrot.slane %v6218_v59, 1  ;;  %v6372_v62 = vld [vmem:[#allocation2 + $0xd0] sm:$0xf]  ;;  %v2413_v37 = vshll.u32 %v6368_v60, 16 }
 0x139   : > { %v6335_v15 = vadd.f32 %v4604_v61, %v4603_v48  ;;  %4990 = vmatprep.mubr.bf16.mxu0 %v2507_v7  ;;  %v2394_v61 = vshrl.u32 %v6332_v41, 16 }
 0x13a   : > { %3729 = vmatmul.mubr.bf16.gmra.mrb[120].mxu1 %v6273_v24  ;;  %v2510_v24 = vsel %vm1564_vm9, %v2508_v9, %v2509_v53  ;;  %v4378_v9 = vcombine.low %v1155_v52, %v6221_v20  ;;  %v2514_v53 = vrot.slane %v4377_v36, 1  ;;  %v2408_v20 = vshll.u32 %v6355_v25, 16 }
 0x13b   : > { %3736 = vmatprep.mubr.bf16.mxu1 %v2380_v31  ;;  %v2398_v31 = vrot.slane %v2396_v54, 1  ;;  %v2403_v54 = vrot.slane %v2401_v12, 1 }
 0x13c   : > { %v4534_v3 = vpop.f32.mrb[16].mxu0 }
 0x13d   : > { %v4622_v57 = vpop.f32.mrb[16].mxu1  ;;  %v4535_v17 = vpop.f32.mrb[17].mxu0  ;;  %v2399_v34 = vor.u32 %v2398_v31, %v2394_v61 }
 0x13e   : > { %v4623_v28 = vpop.f32.mrb[17].mxu1  ;;  %v6348_v14 = vadd.f32 %v4535_v17, %v4534_v3  ;;  %v4537_v23 = vpop.f32.mrb[18].mxu0  ;;  %v2517_v3 = vrot.slane %v4378_v9, 1 }
 0x13f   : > { %v4624_v8 = vadd.f32 %v4623_v28, %v4622_v57  ;;  %v4625_v63 = vpop.f32.mrb[18].mxu1  ;;  %v4538_v48 = vpop.f32.mrb[19].mxu0  ;;  %v1129_v57 = vld [vmem:[#allocation2 + $0xcc] sm:$0xf] }
 0x140   : > { %v4626_v55 = vpop.f32.mrb[19].mxu1  ;;  %v6357_v35 = vadd.f32 %v4538_v48, %v4537_v23  ;;  %4991 = vmatmul.mubr.bf16.gmra.mrb[120].mxu0 %v2510_v24  ;;  %v1157_v24 = vld [vmem:[#allocation2 + $0x90] sm:$0xe]  ;;  %v2404_v23 = vsel %vm1307_vm0, %v2399_v34, %v2403_v54  ;;  %v2519_v48 = vsel %vm1564_vm9, %v2517_v3, %v2518_v1  ;;  %v1158_v1 = vld [vmem:[#allocation2 + $0x9c] sm:$0xe]  ;;  %v2415_v34 = vrot.slane %v2413_v37, 1 }
 0x141   : > { %v6360_v40 = vadd.f32 %v4624_v8, %v6176_v39  ;;  %v4627_v7 = vadd.f32 %v4626_v55, %v4625_v63  ;;  %4994 = vmatprep.mubr.bf16.mxu0 %v2513_v22  ;;  %v1156_v39 = vld [vmem:[#allocation2 + $0x84] sm:$0xe]  ;;  %v2406_v22 = vshrl.u32 %v6355_v25, 16  ;;  %v2410_v8 = vrot.slane %v2408_v20, 1 }
 0x142   : > { %3737 = vmatmul.mubr.bf16.gmra.mrb[124].mxu1 %v6293_v21  ;;  %v4379_v17 = vcombine.low %v1156_v39, %v6244_v27  ;;  %v6380_v63 = vcombine.low %v1129_v57, %v6372_v62  ;;  %v2524_v3 = vrot.slane %v6281_v58, 1  ;;  %v1159_v57 = vld [vmem:[#allocation2 + $0xa8] sm:$0xe] }
 0x143   : > { %v6366_v46 = vadd.f32 %v4627_v7, %v6180_v47  ;;  %3744 = vmatprep.mubr.bf16.mxu1 %v2392_v38  ;;  %v2516_v47 = vsel %vm1564_vm9, %v2514_v53, %v2515_v19  ;;  %v4380_v38 = vcombine.low %v1157_v24, %v6265_v0  ;;  %v2521_v53 = vrot.slane %v6260_v6, 1  ;;  %v6394_v0 = vld [vmem:[#allocation2 + $0xd4] ss:$0 sps:$4 sm:$0x11]  }
 0x144   : > { %v2520_v9 = vrot.slane %v4379_v17, 1  ;;  %v2411_v39 = vor.u32 %v2410_v8, %v2406_v22 }
 0x145   : > { %v4628_v21 = vpop.f32.mrb[20].mxu1  ;;  %v2523_v20 = vrot.slane %v4380_v38, 1 }
 0x146   : > { %v4629_v59 = vpop.f32.mrb[21].mxu1 }
 0x147   : > { %v4630_v36 = vadd.f32 %v4629_v59, %v4628_v21  ;;  %v4631_v28 = vpop.f32.mrb[22].mxu1  ;;  %v4381_v59 = vcombine.low %v1158_v1, %v6284_v32  ;;  %v2525_v58 = vsel %vm1564_vm9, %v2523_v20, %v2524_v3 }
 0x148   : > { %v4632_v52 = vpop.f32.mrb[23].mxu1  ;;  %v4540_v12 = vpop.f32.mrb[20].mxu0  ;;  %4995 = vmatmul.mubr.bf16.gmra.mrb[124].mxu0 %v2516_v47 }
 0x149   : > { %v6384_v55 = vadd.f32 %v4630_v36, %v6237_v16  ;;  %v4633_v27 = vadd.f32 %v4632_v52, %v4631_v28  ;;  %v4541_v61 = vpop.f32.mrb[21].mxu0  ;;  %4998 = vmatprep.mubr.bf16.mxu0 %v2519_v48  ;;  %v2416_v36 = vsel %vm1307_vm0, %v2411_v39, %v2415_v34  ;;  %v2418_v28 = vshrl.u32 %v6380_v63, 16  ;;  %v1160_v39 = vld [vmem:[#allocation2 + $0xb4] sm:$0xe] }
 0x14a   : > { %3745 = vmatmul.mubr.bf16.gmra.mrb[128].mxu1 %v6311_v45  ;;  %v6388_v31 = vadd.f32 %v4541_v61, %v4540_v12  ;;  %v4543_v7 = vpop.f32.mrb[22].mxu0  ;;  %v2420_v45 = vshll.u32 %v6380_v63, 16  ;;  %v2425_v52 = vshll.u32 %v6394_v0, 16  ;;  %v4382_v12 = vcombine.low %v1159_v57, %v6302_v10 }
 0x14b   : > { %v6392_v19 = vadd.f32 %v4633_v27, %v6242_v29  ;;  %3752 = vmatprep.mubr.bf16.mxu1 %v2404_v23  ;;  %v4544_v16 = vpop.f32.mrb[23].mxu0  ;;  %v2522_v29 = vsel %vm1564_vm9, %v2520_v9, %v2521_v53 }
 0x14c   : > { %v6397_v54 = vadd.f32 %v4544_v16, %v4543_v7  ;;  %v2422_v37 = vrot.slane %v2420_v45, 1  ;;  %v2526_v7 = vrot.slane %v4381_v59, 1  ;;  %v2427_v53 = vrot.slane %v2425_v52, 1  ;;  %v1161_v45 = vld [vmem:[#allocation2 + $0xc0] sm:$0xe] }
 0x14d   : > { %v4634_v21 = vpop.f32.mrb[24].mxu1  ;;  %v2529_v10 = vrot.slane %v4382_v12, 1 }
 0x14e   : > { %v4635_v6 = vpop.f32.mrb[25].mxu1  ;;  %v2423_v9 = vor.u32 %v2422_v37, %v2418_v28 }
 0x14f   : > { %v4636_v24 = vadd.f32 %v4635_v6, %v4634_v21  ;;  %v4637_v47 = vpop.f32.mrb[26].mxu1  ;;  %v4383_v21 = vcombine.low %v1160_v39, %v6322_v2 }
 0x150   : > { %v4638_v17 = vpop.f32.mrb[27].mxu1  ;;  %v4546_v23 = vpop.f32.mrb[24].mxu0  ;;  %4999 = vmatmul.mubr.bf16.gmra.mrb[128].mxu0 %v2522_v29 }
 0x151   : > { %v6407_v22 = vadd.f32 %v4636_v24, %v6276_v50  ;;  %v4639_v8 = vadd.f32 %v4638_v17, %v4637_v47  ;;  %v4547_v32 = vpop.f32.mrb[25].mxu0  ;;  %5002 = vmatprep.mubr.bf16.mxu0 %v2525_v58  ;;  %v2527_v50 = vrot.slane %v6298_v11, 1  ;;  %v2428_v11 = vsel %vm1307_vm0, %v2423_v9, %v2427_v53 }
 0x152   : > { %3753 = vmatmul.mubr.bf16.gmra.mrb[132].mxu1 %v6332_v41  ;;  %v6411_v48 = vadd.f32 %v4547_v32, %v4546_v23  ;;  %v4549_v27 = vpop.f32.mrb[26].mxu0  ;;  %v2530_v41 = vrot.slane %v6317_v49, 1  ;;  %v4384_v49 = vcombine.low %v1161_v45, %v6344_v33  ;;  %v2532_v17 = vrot.slane %v4383_v21, 1  ;;  %v1162_v23 = vld [vmem:[#allocation2 + $0xcc] sm:$0xe] }
 0x153   : > { %v6414_v38 = vadd.f32 %v4639_v8, %v6279_v42  ;;  %3760 = vmatprep.mubr.bf16.mxu1 %v2416_v36  ;;  %v4550_v61 = vpop.f32.mrb[27].mxu0  ;;  %v2528_v3 = vsel %vm1564_vm9, %v2526_v7, %v2527_v50  ;;  %v2533_v36 = vrot.slane %v6341_v4, 1  ;;  %v2536_v33 = vrot.slane %v6368_v60, 1 }
 0x154   : > { %v6417_v1 = vadd.f32 %v4550_v61, %v4549_v27  ;;  %v2531_v57 = vsel %vm1564_vm9, %v2529_v10, %v2530_v41  ;;  %v2535_v52 = vrot.slane %v4384_v49, 1  ;;  %v4385_v27 = vcombine.low %v1162_v23, %v6372_v62 }
 0x155   : > { %v4640_v16 = vpop.f32.mrb[28].mxu1  ;;  %v2534_v32 = vsel %vm1564_vm9, %v2532_v17, %v2533_v36  ;;  %v2539_v41 = vrot.slane %v6394_v0, 1 }
 0x156   : > { %v4641_v34 = vpop.f32.mrb[29].mxu1  ;;  %v2537_v4 = vsel %vm1564_vm9, %v2535_v52, %v2536_v33  ;;  %v2538_v10 = vrot.slane %v4385_v27, 1 }
 0x157   : > { %v4642_v20 = vadd.f32 %v4641_v34, %v4640_v16  ;;  %v4643_v42 = vpop.f32.mrb[30].mxu1 }
 0x158   : > { %v4644_v6 = vpop.f32.mrb[31].mxu1  ;;  %5003 = vmatmul.mubr.bf16.gmra.mrb[132].mxu0 %v2528_v3  ;;  %v4552_v24 = vpop.f32.mrb[28].mxu0 }
 0x159   : > { %v6425_v29 = vadd.f32 %v4642_v20, %v6304_v44  ;;  %v4645_v59 = vadd.f32 %v4644_v6, %v4643_v42  ;;  %v4553_v2 = vpop.f32.mrb[29].mxu0  ;;  %5006 = vmatprep.mubr.bf16.mxu0 %v2531_v57 }
 0x15a   : > { %3761 = vmatmul.mubr.bf16.gmra.mrb[136].mxu1 %v6355_v25  ;;  %v6433_v28 = vadd.f32 %v4553_v2, %v4552_v24  ;;  %v4555_v44 = vpop.f32.mrb[30].mxu0 }
 0x15b   : > { %v6430_v47 = vadd.f32 %v4645_v59, %v6313_v5  ;;  %3768 = vmatprep.mubr.bf16.mxu1 %v2428_v11  ;;  %v4556_v25 = vpop.f32.mrb[31].mxu0 }
 0x15c   : > { %v4557_v8 = vadd.f32 %v4556_v25, %v4555_v44 }
 0x15d   : > { %v4646_v37 = vpop.f32.mrb[32].mxu1 }
 0x15e   : > { %v4647_v58 = vpop.f32.mrb[33].mxu1 }
 0x15f   : > { %v4648_v12 = vadd.f32 %v4647_v58, %v4646_v37  ;;  %v4649_v5 = vpop.f32.mrb[34].mxu1 }
 0x160   : > { %v4650_v61 = vpop.f32.mrb[35].mxu1  ;;  %5007 = vmatmul.mubr.bf16.gmra.mrb[136].mxu0 %v2534_v32  ;;  %v4558_v60 = vpop.f32.mrb[32].mxu0 }
 0x161   : > { %v6440_v7 = vadd.f32 %v4648_v12, %v6348_v14  ;;  %v4651_v50 = vadd.f32 %v4650_v61, %v4649_v5  ;;  %v4559_v53 = vpop.f32.mrb[33].mxu0  ;;  %5010 = vmatprep.mubr.bf16.mxu0 %v2537_v4 }
 0x162   : > { %3769 = vmatmul.mubr.bf16.gmra.mrb[140].mxu1 %v6380_v63  ;;  %v4560_v62 = vadd.f32 %v4559_v53, %v4558_v60  ;;  %v4561_v16 = vpop.f32.mrb[34].mxu0  ;;  %v2540_v63 = vsel %vm1564_vm9, %v2538_v10, %v2539_v41 }
 0x163   : > { %v6444_v9 = vadd.f32 %v4651_v50, %v6357_v35  ;;  %v4562_v34 = vpop.f32.mrb[35].mxu0 }
 0x164   : > { %v4563_v14 = vadd.f32 %v4562_v34, %v4561_v16 }
 0x165   : > { %v4652_v39 = vpop.f32.mrb[36].mxu1 }
 0x166   : > { %v4653_v45 = vpop.f32.mrb[37].mxu1 }
 0x167   : > { %v4654_v20 = vadd.f32 %v4653_v45, %v4652_v39  ;;  %v4655_v42 = vpop.f32.mrb[38].mxu1 }
 0x168   : > { %v4656_v3 = vpop.f32.mrb[39].mxu1  ;;  %5011 = vmatmul.mubr.bf16.gmra.mrb[140].mxu0 %v2540_v63  ;;  %v4564_v0 = vpop.f32.mrb[36].mxu0 }
 0x169   : > { %v6449_v21 = vadd.f32 %v4654_v20, %v6388_v31  ;;  %v4657_v35 = vadd.f32 %v4656_v3, %v4655_v42  ;;  %v4565_v11 = vpop.f32.mrb[37].mxu0 }
 0x16a   : > { %v4566_v59 = vadd.f32 %v4565_v11, %v4564_v0  ;;  %v4567_v49 = vpop.f32.mrb[38].mxu0 }
 0x16b   : > { %v6452_v6 = vadd.f32 %v4657_v35, %v6397_v54  ;;  %v4568_v2 = vpop.f32.mrb[39].mxu0 }
 0x16c   : > { %v4569_v44 = vadd.f32 %v4568_v2, %v4567_v49 }
 0x16d   : > { %v4658_v57 = vpop.f32.mrb[40].mxu1 }
 0x16e   : > { %v4659_v24 = vpop.f32.mrb[41].mxu1 }
 0x16f   : > { %v4660_v17 = vadd.f32 %v4659_v24, %v4658_v57  ;;  %v4661_v36 = vpop.f32.mrb[42].mxu1 }
 0x170   : > { %v4662_v37 = vpop.f32.mrb[43].mxu1 }
 0x171   : > { %v6455_v52 = vadd.f32 %v4660_v17, %v6411_v48  ;;  %v4663_v31 = vadd.f32 %v4662_v37, %v4661_v36 }
 0x172   : > { %v4570_v54 = vpop.f32.mrb[40].mxu0 }
 0x173   : > { %v6458_v33 = vadd.f32 %v4663_v31, %v6417_v1  ;;  %v4571_v25 = vpop.f32.mrb[41].mxu0 }
 0x174   : > { %v4572_v12 = vadd.f32 %v4571_v25, %v4570_v54  ;;  %v4573_v5 = vpop.f32.mrb[42].mxu0 }
 0x175   : > { %v4664_v23 = vpop.f32.mrb[44].mxu1  ;;  %v4574_v61 = vpop.f32.mrb[43].mxu0 }
 0x176   : > { %v4665_v58 = vpop.f32.mrb[45].mxu1  ;;  %v4575_v50 = vadd.f32 %v4574_v61, %v4573_v5 }
 0x177   : > { %v4666_v32 = vadd.f32 %v4665_v58, %v4664_v23  ;;  %v4667_v27 = vpop.f32.mrb[46].mxu1 }
 0x178   : > { %v4668_v4 = vpop.f32.mrb[47].mxu1 }
 0x179   : > { %v6461_v60 = vadd.f32 %v4666_v32, %v6433_v28  ;;  %v4669_v48 = vadd.f32 %v4668_v4, %v4667_v27 }
 0x17b   : > { %v6463_v53 = vadd.f32 %v4669_v48, %v4557_v8  ;;  %v4576_v1 = vpop.f32.mrb[44].mxu0 }
 0x17c   : > { %v4577_v16 = vpop.f32.mrb[45].mxu0 }
 0x17d   : > { %v4670_v10 = vpop.f32.mrb[48].mxu1  ;;  %v4578_v45 = vadd.f32 %v4577_v16, %v4576_v1  ;;  %v4579_v20 = vpop.f32.mrb[46].mxu0 }
 0x17e   : > { %v4671_v41 = vpop.f32.mrb[49].mxu1  ;;  %v4580_v63 = vpop.f32.mrb[47].mxu0 }
 0x17f   : > { %v4672_v39 = vadd.f32 %v4671_v41, %v4670_v10  ;;  %v4673_v34 = vpop.f32.mrb[50].mxu1  ;;  %v4581_v0 = vadd.f32 %v4580_v63, %v4579_v20 }
 0x180   : > { %v4674_v42 = vpop.f32.mrb[51].mxu1 }
 0x181   : > { %v6465_v3 = vadd.f32 %v4672_v39, %v4560_v62  ;;  %v4675_v35 = vadd.f32 %v4674_v42, %v4673_v34 }
 0x183   : > { %v6467_v11 = vadd.f32 %v4675_v35, %v4563_v14  ;;  %v4734_v57 = vpop.f32.mrb[48].mxu0 }
 0x184   : > { %v4735_v49 = vpop.f32.mrb[49].mxu0 }
 0x185   : > { %v4676_v28 = vpop.f32.mrb[52].mxu1  ;;  %v4736_v17 = vadd.f32 %v4735_v49, %v4734_v57  ;;  %v4737_v36 = vpop.f32.mrb[50].mxu0 }
 0x186   : > { %v4677_v8 = vpop.f32.mrb[53].mxu1  ;;  %v4738_v31 = vpop.f32.mrb[51].mxu0 }
 0x187   : > { %v4678_v24 = vadd.f32 %v4677_v8, %v4676_v28  ;;  %v4679_v2 = vpop.f32.mrb[54].mxu1  ;;  %v6472_v62 = vadd.f32 %v4736_v17, %v6360_v40  ;;  %v4739_v25 = vadd.f32 %v4738_v31, %v4737_v36 }
 0x188   : > { %v4680_v37 = vpop.f32.mrb[55].mxu1 }
 0x189   : > { %v6469_v54 = vadd.f32 %v4678_v24, %v4566_v59  ;;  %v4681_v23 = vadd.f32 %v4680_v37, %v4679_v2  ;;  %v6477_v14 = vadd.f32 %v4739_v25, %v6366_v46 }
 0x18b   : > { %v6474_v58 = vadd.f32 %v4681_v23, %v4569_v44  ;;  %v4740_v32 = vpop.f32.mrb[52].mxu0 }
 0x18c   : > { %v4741_v61 = vpop.f32.mrb[53].mxu0 }
 0x18d   : > { %v4682_v5 = vpop.f32.mrb[56].mxu1  ;;  %v4742_v10 = vadd.f32 %v4741_v61, %v4740_v32  ;;  %v4743_v1 = vpop.f32.mrb[54].mxu0 }
 0x18e   : > { %v4683_v27 = vpop.f32.mrb[57].mxu1  ;;  %v4744_v41 = vpop.f32.mrb[55].mxu0 }
 0x18f   : > { %v4684_v4 = vadd.f32 %v4683_v27, %v4682_v5  ;;  %v4685_v48 = vpop.f32.mrb[58].mxu1  ;;  %v6482_v39 = vadd.f32 %v4742_v10, %v6384_v55  ;;  %v4745_v44 = vadd.f32 %v4744_v41, %v4743_v1 }
 0x190   : > { %v4686_v59 = vpop.f32.mrb[59].mxu1 }
 0x191   : > { %v6479_v16 = vadd.f32 %v4684_v4, %v4572_v12  ;;  %v4687_v40 = vadd.f32 %v4686_v59, %v4685_v48  ;;  %v6487_v46 = vadd.f32 %v4745_v44, %v6392_v19 }
 0x193   : > { %v6484_v34 = vadd.f32 %v4687_v40, %v4575_v50  ;;  %v4746_v42 = vpop.f32.mrb[56].mxu0 }
 0x194   : > { %v4747_v35 = vpop.f32.mrb[57].mxu0 }
 0x195   : > { %v4688_v20 = vpop.f32.mrb[60].mxu1  ;;  %v4748_v8 = vadd.f32 %v4747_v35, %v4746_v42  ;;  %v4749_v49 = vpop.f32.mrb[58].mxu0 }
 0x196   : > { %v4689_v63 = vpop.f32.mrb[61].mxu1  ;;  %v4750_v24 = vpop.f32.mrb[59].mxu0 }
 0x197   : > { %v4690_v28 = vadd.f32 %v4689_v63, %v4688_v20  ;;  %v4691_v57 = vpop.f32.mrb[62].mxu1  ;;  %v6492_v17 = vadd.f32 %v4748_v8, %v6407_v22  ;;  %v4751_v50 = vadd.f32 %v4750_v24, %v4749_v49 }
 0x198   : > { %v4692_v12 = vpop.f32.mrb[63].mxu1 }
 0x199   : > { %v6489_v2 = vadd.f32 %v4690_v28, %v4578_v45  ;;  %v4693_v55 = vadd.f32 %v4692_v12, %v4691_v57  ;;  %v6497_v19 = vadd.f32 %v4751_v50, %v6414_v38 }
 0x19b   : > { %v6494_v36 = vadd.f32 %v4693_v55, %v4581_v0  ;;  %v4752_v31 = vpop.f32.mrb[60].mxu0 }
 0x19c   : > { %v4753_v25 = vpop.f32.mrb[61].mxu0 }
 0x19d   : > { %v4694_v37 = vpop.f32.mrb[64].mxu1  ;;  %v4754_v27 = vadd.f32 %v4753_v25, %v4752_v31  ;;  %v4755_v61 = vpop.f32.mrb[62].mxu0 }
 0x19e   : > { %v4695_v23 = vpop.f32.mrb[65].mxu1  ;;  %v4756_v4 = vpop.f32.mrb[63].mxu0 }
 0x19f   : > { %v4696_v5 = vadd.f32 %v4695_v23, %v4694_v37  ;;  %v4697_v32 = vpop.f32.mrb[66].mxu1  ;;  %v6503_v0 = vadd.f32 %v4754_v27, %v6425_v29  ;;  %v4757_v10 = vadd.f32 %v4756_v4, %v4755_v61 }
 0x1a0   : > { %v4698_v45 = vpop.f32.mrb[67].mxu1 }
 0x1a1   : > { %v6500_v48 = vadd.f32 %v4696_v5, %v6216_v13  ;;  %v4699_v22 = vadd.f32 %v4698_v45, %v4697_v32  ;;  %v6509_v1 = vadd.f32 %v4757_v10, %v6430_v47 }
 0x1a3   : > { %v6506_v38 = vadd.f32 %v4699_v22, %v6224_v43  ;;  %v4758_v41 = vpop.f32.mrb[64].mxu0 }
 0x1a4   : > { %v4759_v44 = vpop.f32.mrb[65].mxu0 }
 0x1a5   : > { %v4700_v59 = vpop.f32.mrb[68].mxu1  ;;  %v4760_v63 = vadd.f32 %v4759_v44, %v4758_v41  ;;  %v4761_v13 = vpop.f32.mrb[66].mxu0 }
 0x1a6   : > { %v4701_v40 = vpop.f32.mrb[69].mxu1  ;;  %v4762_v28 = vpop.f32.mrb[67].mxu0 }
 0x1a7   : > { %v4702_v20 = vadd.f32 %v4701_v40, %v4700_v59  ;;  %v4703_v42 = vpop.f32.mrb[70].mxu1  ;;  %v6515_v43 = vadd.f32 %v4760_v63, %v6440_v7  ;;  %v4763_v8 = vadd.f32 %v4762_v28, %v4761_v13 }
 0x1a8   : > { %v4704_v35 = vpop.f32.mrb[71].mxu1 }
 0x1a9   : > { %v6512_v29 = vadd.f32 %v4702_v20, %v6257_v51  ;;  %v4705_v57 = vadd.f32 %v4704_v35, %v4703_v42  ;;  %v6521_v49 = vadd.f32 %v4763_v8, %v6444_v9 }
 0x1ab   : > { %v6518_v47 = vadd.f32 %v4705_v57, %v6262_v56  ;;  %v4764_v24 = vpop.f32.mrb[68].mxu0 }
 0x1ac   : > { %v4765_v50 = vpop.f32.mrb[69].mxu0 }
 0x1ad   : > { %v4706_v12 = vpop.f32.mrb[72].mxu1  ;;  %v4766_v23 = vadd.f32 %v4765_v50, %v4764_v24  ;;  %v4767_v51 = vpop.f32.mrb[70].mxu0 }
 0x1ae   : > { %v4707_v55 = vpop.f32.mrb[73].mxu1  ;;  %v4768_v5 = vpop.f32.mrb[71].mxu0 }
 0x1af   : > { %v4708_v37 = vadd.f32 %v4707_v55, %v4706_v12  ;;  %v4709_v31 = vpop.f32.mrb[74].mxu1  ;;  %v6527_v56 = vadd.f32 %v4766_v23, %v6449_v21  ;;  %v4769_v27 = vadd.f32 %v4768_v5, %v4767_v51 }
 0x1b0   : > { %v4710_v25 = vpop.f32.mrb[75].mxu1 }
 0x1b1   : > { %v6524_v7 = vadd.f32 %v4708_v37, %v6289_v26  ;;  %v4711_v32 = vadd.f32 %v4710_v25, %v4709_v31  ;;  %v6533_v61 = vadd.f32 %v4769_v27, %v6452_v6 }
 0x1b3   : > { %v6530_v9 = vadd.f32 %v4711_v32, %v6296_v18  ;;  %v4770_v4 = vpop.f32.mrb[72].mxu0 }
 0x1b4   : > { %v4771_v10 = vpop.f32.mrb[73].mxu0 }
 0x1b5   : > { %v4712_v45 = vpop.f32.mrb[76].mxu1  ;;  %v4772_v40 = vadd.f32 %v4771_v10, %v4770_v4  ;;  %v4773_v26 = vpop.f32.mrb[74].mxu0 }
 0x1b6   : > { %v4713_v22 = vpop.f32.mrb[77].mxu1  ;;  %v4774_v20 = vpop.f32.mrb[75].mxu0 }
 0x1b7   : > { %v4714_v59 = vadd.f32 %v4713_v22, %v4712_v45  ;;  %v4715_v41 = vpop.f32.mrb[78].mxu1  ;;  %v6539_v18 = vadd.f32 %v4772_v40, %v6455_v52  ;;  %v4775_v63 = vadd.f32 %v4774_v20, %v4773_v26 }
 0x1b8   : > { %v4716_v44 = vpop.f32.mrb[79].mxu1 }
 0x1b9   : > { %v6536_v21 = vadd.f32 %v4714_v59, %v6325_v30  ;;  %v4717_v42 = vadd.f32 %v4716_v44, %v4715_v41  ;;  %v6545_v13 = vadd.f32 %v4775_v63, %v6458_v33 }
 0x1bb   : > { %v6542_v6 = vadd.f32 %v4717_v42, %v6335_v15  ;;  %v4776_v28 = vpop.f32.mrb[76].mxu0 }
 0x1bc   : > { %v4777_v8 = vpop.f32.mrb[77].mxu0 }
 0x1bd   : > { %v4846_v35 = vpop.f32.mrb[80].mxu1  ;;  %v4778_v55 = vadd.f32 %v4777_v8, %v4776_v28  ;;  %v4779_v30 = vpop.f32.mrb[78].mxu0 }
 0x1be   : > { %v4847_v57 = vpop.f32.mrb[81].mxu1  ;;  %v4780_v37 = vpop.f32.mrb[79].mxu0 }
 0x1bf   : > { %v4848_v12 = vadd.f32 %v4847_v57, %v4846_v35  ;;  %v4849_v24 = vpop.f32.mrb[82].mxu1  ;;  %v6551_v15 = vadd.f32 %v4778_v55, %v6461_v60  ;;  %v4781_v23 = vadd.f32 %v4780_v37, %v4779_v30 }
 0x1c0   : > { %v4850_v50 = vpop.f32.mrb[83].mxu1 }
 0x1c1   : > { %v4851_v31 = vadd.f32 %v4850_v50, %v4849_v24  ;;  %v6548_v52 = vadd.f32 %v4848_v12, %v6472_v62  ;;  %v6557_v51 = vadd.f32 %v4781_v23, %v6463_v53 }
 0x1c3   : > { %v6554_v33 = vadd.f32 %v4851_v31, %v6477_v14  ;;  %v4782_v5 = vpop.f32.mrb[80].mxu0 }
 0x1c4   : > { %v4783_v27 = vpop.f32.mrb[81].mxu0 }
 0x1c5   : > { %v4852_v25 = vpop.f32.mrb[84].mxu1  ;;  %v4784_v22 = vadd.f32 %v4783_v27, %v4782_v5  ;;  %v4785_v10 = vpop.f32.mrb[82].mxu0 }
 0x1c6   : > { %v4853_v32 = vpop.f32.mrb[85].mxu1  ;;  %v4786_v59 = vpop.f32.mrb[83].mxu0 }
 0x1c7   : > { %v4854_v45 = vadd.f32 %v4853_v32, %v4852_v25  ;;  %v4855_v4 = vpop.f32.mrb[86].mxu1  ;;  %v6563_v14 = vadd.f32 %v4784_v22, %v6465_v3  ;;  %v4787_v40 = vadd.f32 %v4786_v59, %v4785_v10 }
 0x1c8   : > { %v4856_v62 = vpop.f32.mrb[87].mxu1 }
 0x1c9   : > { %v4857_v41 = vadd.f32 %v4856_v62, %v4855_v4  ;;  %v6560_v60 = vadd.f32 %v4854_v45, %v6482_v39  ;;  %v6569_v26 = vadd.f32 %v4787_v40, %v6467_v11 }
 0x1cb   : > { %v6566_v53 = vadd.f32 %v4857_v41, %v6487_v46  ;;  %v4788_v20 = vpop.f32.mrb[84].mxu0 }
 0x1cc   : > { %v4789_v63 = vpop.f32.mrb[85].mxu0 }
 0x1cd   : > { %v4858_v44 = vpop.f32.mrb[88].mxu1  ;;  %v4790_v57 = vadd.f32 %v4789_v63, %v4788_v20  ;;  %v4791_v8 = vpop.f32.mrb[86].mxu0 }
 0x1ce   : > { %v4859_v42 = vpop.f32.mrb[89].mxu1  ;;  %v4792_v12 = vpop.f32.mrb[87].mxu0 }
 0x1cf   : > { %v4860_v35 = vadd.f32 %v4859_v42, %v4858_v44  ;;  %v4861_v28 = vpop.f32.mrb[90].mxu1  ;;  %v6575_v46 = vadd.f32 %v4790_v57, %v6469_v54  ;;  %v4793_v55 = vadd.f32 %v4792_v12, %v4791_v8 }
 0x1d0   : > { %v4862_v39 = vpop.f32.mrb[91].mxu1 }
 0x1d1   : > { %v4863_v24 = vadd.f32 %v4862_v39, %v4861_v28  ;;  %v6572_v3 = vadd.f32 %v4860_v35, %v6492_v17  ;;  %v6581_v30 = vadd.f32 %v4793_v55, %v6474_v58 }
 0x1d3   : > { %v6578_v11 = vadd.f32 %v4863_v24, %v6497_v19  ;;  %v4794_v37 = vpop.f32.mrb[88].mxu0 }
 0x1d4   : > { %v4795_v23 = vpop.f32.mrb[89].mxu0 }
 0x1d5   : > { %v4864_v50 = vpop.f32.mrb[92].mxu1  ;;  %v4796_v32 = vadd.f32 %v4795_v23, %v4794_v37  ;;  %v4797_v27 = vpop.f32.mrb[90].mxu0 }
 0x1d6   : > { %v4865_v31 = vpop.f32.mrb[93].mxu1  ;;  %v4798_v45 = vpop.f32.mrb[91].mxu0 }
 0x1d7   : > { %v4866_v25 = vadd.f32 %v4865_v31, %v4864_v50  ;;  %v4867_v5 = vpop.f32.mrb[94].mxu1  ;;  %v6587_v19 = vadd.f32 %v4796_v32, %v6479_v16  ;;  %v4799_v22 = vadd.f32 %v4798_v45, %v4797_v27 }
 0x1d8   : > { %v4868_v17 = vpop.f32.mrb[95].mxu1 }
 0x1d9   : > { %v4869_v4 = vadd.f32 %v4868_v17, %v4867_v5  ;;  %v6584_v54 = vadd.f32 %v4866_v25, %v6503_v0  ;;  %v6593_v10 = vadd.f32 %v4799_v22, %v6484_v34 }
 0x1db   : > { %v6590_v58 = vadd.f32 %v4869_v4, %v6509_v1  ;;  %v4800_v59 = vpop.f32.mrb[92].mxu0 }
 0x1dc   : > { %v4801_v40 = vpop.f32.mrb[93].mxu0 }
 0x1dd   : > { %v4870_v62 = vpop.f32.mrb[96].mxu1  ;;  %v4802_v42 = vadd.f32 %v4801_v40, %v4800_v59  ;;  %v4803_v63 = vpop.f32.mrb[94].mxu0 }
 0x1de   : > { %v4871_v41 = vpop.f32.mrb[97].mxu1  ;;  %v4804_v35 = vpop.f32.mrb[95].mxu0 }
 0x1df   : > { %v4872_v44 = vadd.f32 %v4871_v41, %v4870_v62  ;;  %v4873_v20 = vpop.f32.mrb[98].mxu1  ;;  %v6599_v1 = vadd.f32 %v4802_v42, %v6489_v2  ;;  %v4805_v57 = vadd.f32 %v4804_v35, %v4803_v63 }
 0x1e0   : > { %v4874_v0 = vpop.f32.mrb[99].mxu1 }
 0x1e1   : > { %v4875_v28 = vadd.f32 %v4874_v0, %v4873_v20  ;;  %v6596_v16 = vadd.f32 %v4872_v44, %v6515_v43  ;;  %v6605_v8 = vadd.f32 %v4805_v57, %v6494_v36 }
 0x1e3   : > { %v6602_v34 = vadd.f32 %v4875_v28, %v6521_v49  ;;  %v4806_v12 = vpop.f32.mrb[96].mxu0 }
 0x1e4   : > { %v4807_v55 = vpop.f32.mrb[97].mxu0 }
 0x1e5   : > { %v4876_v39 = vpop.f32.mrb[100].mxu1  ;;  %v4808_v31 = vadd.f32 %v4807_v55, %v4806_v12  ;;  %v4809_v23 = vpop.f32.mrb[98].mxu0 }
 0x1e6   : > { %v4877_v24 = vpop.f32.mrb[101].mxu1  ;;  %v4810_v25 = vpop.f32.mrb[99].mxu0 }
 0x1e7   : > { %v4878_v50 = vadd.f32 %v4877_v24, %v4876_v39  ;;  %v4879_v37 = vpop.f32.mrb[102].mxu1  ;;  %v6611_v49 = vadd.f32 %v4808_v31, %v6500_v48  ;;  %v4811_v32 = vadd.f32 %v4810_v25, %v4809_v23 }
 0x1e8   : > { %v4880_v43 = vpop.f32.mrb[103].mxu1 }
 0x1e9   : > { %v4881_v5 = vadd.f32 %v4880_v43, %v4879_v37  ;;  %v6608_v2 = vadd.f32 %v4878_v50, %v6527_v56  ;;  %v6617_v27 = vadd.f32 %v4811_v32, %v6506_v38 }
 0x1eb   : > { %v6614_v36 = vadd.f32 %v4881_v5, %v6533_v61  ;;  %v4812_v45 = vpop.f32.mrb[100].mxu0 }
 0x1ec   : > { %v4813_v22 = vpop.f32.mrb[101].mxu0 }
 0x1ed   : > { %v4882_v17 = vpop.f32.mrb[104].mxu1  ;;  %v4814_v41 = vadd.f32 %v4813_v22, %v4812_v45  ;;  %v4815_v40 = vpop.f32.mrb[102].mxu0 }
 0x1ee   : > { %v4883_v4 = vpop.f32.mrb[105].mxu1  ;;  %v4816_v44 = vpop.f32.mrb[103].mxu0 }
 0x1ef   : > { %v4884_v62 = vadd.f32 %v4883_v4, %v4882_v17  ;;  %v4885_v59 = vpop.f32.mrb[106].mxu1  ;;  %v6623_v61 = vadd.f32 %v4814_v41, %v6512_v29  ;;  %v4817_v42 = vadd.f32 %v4816_v44, %v4815_v40 }
 0x1f0   : > { %v4886_v56 = vpop.f32.mrb[107].mxu1 }
 0x1f1   : > { %v4887_v20 = vadd.f32 %v4886_v56, %v4885_v59  ;;  %v6620_v48 = vadd.f32 %v4884_v62, %v6539_v18  ;;  %v6629_v63 = vadd.f32 %v4817_v42, %v6518_v47 }
 0x1f3   : > { %v6626_v38 = vadd.f32 %v4887_v20, %v6545_v13  ;;  %v4818_v35 = vpop.f32.mrb[104].mxu0 }
 0x1f4   : > { %v4819_v57 = vpop.f32.mrb[105].mxu0 }
 0x1f5   : > { %v4888_v0 = vpop.f32.mrb[108].mxu1  ;;  %v4820_v24 = vadd.f32 %v4819_v57, %v4818_v35  ;;  %v4821_v55 = vpop.f32.mrb[106].mxu0 }
 0x1f6   : > { %v4889_v28 = vpop.f32.mrb[109].mxu1  ;;  %v4822_v50 = vpop.f32.mrb[107].mxu0 }
 0x1f7   : > { %v4890_v39 = vadd.f32 %v4889_v28, %v4888_v0  ;;  %v4891_v12 = vpop.f32.mrb[110].mxu1  ;;  %v6635_v13 = vadd.f32 %v4820_v24, %v6524_v7  ;;  %v4823_v31 = vadd.f32 %v4822_v50, %v4821_v55 }
 0x1f8   : > { %v4892_v18 = vpop.f32.mrb[111].mxu1 }
 0x1f9   : > { %v4893_v37 = vadd.f32 %v4892_v18, %v4891_v12  ;;  %v6632_v29 = vadd.f32 %v4890_v39, %v6551_v15  ;;  %v6641_v23 = vadd.f32 %v4823_v31, %v6530_v9 }
 0x1fb   : > { %v6638_v47 = vadd.f32 %v4893_v37, %v6557_v51  ;;  %v4824_v25 = vpop.f32.mrb[108].mxu0 }
 0x1fc   : > { %v4825_v32 = vpop.f32.mrb[109].mxu0 }
 0x1fd   : > { %v4894_v43 = vpop.f32.mrb[112].mxu1  ;;  %v4826_v4 = vadd.f32 %v4825_v32, %v4824_v25  ;;  %v4827_v15 = vpop.f32.mrb[110].mxu0 }
 0x1fe   : > { %v4895_v5 = vpop.f32.mrb[113].mxu1  ;;  %v4828_v62 = vpop.f32.mrb[111].mxu0 }
 0x1ff   : > { %v4896_v17 = vadd.f32 %v4895_v5, %v4894_v43  ;;  %v4897_v45 = vpop.f32.mrb[114].mxu1  ;;  %v6647_v51 = vadd.f32 %v4826_v4, %v6536_v21  ;;  %v4829_v9 = vadd.f32 %v4828_v62, %v4827_v15 }
 0x200   : > { %v4898_v22 = vpop.f32.mrb[115].mxu1 }
 0x201   : > { %v4899_v7 = vadd.f32 %v4898_v22, %v4897_v45  ;;  %v6644_v59 = vadd.f32 %v4896_v17, %v6563_v14  ;;  %v6653_v40 = vadd.f32 %v4829_v9, %v6542_v6 }
 0x203   : > { %v6650_v41 = vadd.f32 %v4899_v7, %v6569_v26  ;;  %v4984_v14 = vpop.f32.mrb[112].mxu0 }
 0x204   : > { %v6663_v44 = vadd.f32 %v4984_v14, %v6560_v60  ;;  %v3811_v26 = vpop.f32.mrb[113].mxu0 }
 0x205   : > { %v4900_v56 = vpop.f32.mrb[116].mxu1  ;;  %v6666_v42 = vadd.f32 %v3811_v26, %v6548_v52  ;;  %v4985_v0 = vpop.f32.mrb[114].mxu0 }
 0x206   : > { %v4901_v21 = vpop.f32.mrb[117].mxu1  ;;  %4079 = vst [vmem:[%s6660_s28 + $0x10] sm:$0xff] %v6663_v44  ;;  %v6671_v28 = vadd.f32 %v4985_v0, %v6566_v53  ;;  %v3814_v57 = vpop.f32.mrb[115].mxu0 }
 0x207   : > { %v4902_v20 = vadd.f32 %v4901_v21, %v4900_v56  ;;  %v4903_v6 = vpop.f32.mrb[118].mxu1  ;;  %4077 = vst [vmem:[%s6660_s28] sm:$0xff] %v6666_v42  ;;  %v6679_v60 = vadd.f32 %v3814_v57, %v6554_v33 }
 0x208   : > { %v4904_v35 = vpop.f32.mrb[119].mxu1  ;;  %4080 = vst [vmem:[%s6660_s28 + $0x18] sm:$0xff] %v6671_v28 }
 0x209   : > { %v4905_v39 = vadd.f32 %v4904_v35, %v4903_v6  ;;  %v6674_v12 = vadd.f32 %v4902_v20, %v6575_v46  ;;  %v3938_v53 = vadd.f32 %v6679_v60, %v6666_v42  ;;  %4078 = vst [vmem:[%s6660_s28 + $0x8] sm:$0xff] %v6679_v60 }
 0x20b   : > { %v6684_v52 = vadd.f32 %v4905_v39, %v6581_v30  ;;  %v3939_v46 = vadd.f32 %v3938_v53, %v6663_v44  ;;  %v4988_v55 = vpop.f32.mrb[116].mxu0 }
 0x20c   : > { %v6692_v33 = vadd.f32 %v4988_v55, %v6584_v54  ;;  %v3827_v50 = vpop.f32.mrb[117].mxu0 }
 0x20d   : > { %v4906_v24 = vpop.f32.mrb[120].mxu1  ;;  %v6695_v30 = vadd.f32 %v3827_v50, %v6572_v3  ;;  %v3940_v43 = vadd.f32 %v3939_v46, %v6671_v28  ;;  %v4989_v25 = vpop.f32.mrb[118].mxu0 }
 0x20e   : > { %v4907_v18 = vpop.f32.mrb[121].mxu1  ;;  %4083 = vst [vmem:[%s6660_s28 + $0x30] sm:$0xff] %v6692_v33  ;;  %v6701_v32 = vadd.f32 %v4989_v25, %v6590_v58  ;;  %v3830_v17 = vpop.f32.mrb[119].mxu0 }
 0x20f   : > { %v4908_v37 = vadd.f32 %v4907_v18, %v4906_v24  ;;  %v4909_v31 = vpop.f32.mrb[122].mxu1  ;;  %v3941_v4 = vadd.f32 %v3940_v43, %v6695_v30  ;;  %4081 = vst [vmem:[%s6660_s28 + $0x20] sm:$0xff] %v6695_v30  ;;  %v6710_v3 = vadd.f32 %v3830_v17, %v6578_v11 }
 0x210   : > { %v4910_v5 = vpop.f32.mrb[123].mxu1  ;;  %4084 = vst [vmem:[%s6660_s28 + $0x38] sm:$0xff] %v6701_v32 }
 0x211   : > { %v4911_v54 = vadd.f32 %v4910_v5, %v4909_v31  ;;  %v6704_v45 = vadd.f32 %v4908_v37, %v6587_v19  ;;  %v3942_v58 = vadd.f32 %v3941_v4, %v6710_v3  ;;  %4082 = vst [vmem:[%s6660_s28 + $0x28] sm:$0xff] %v6710_v3 }
 0x213   : > { %v6715_v15 = vadd.f32 %v4911_v54, %v6593_v10  ;;  %v3943_v19 = vadd.f32 %v3942_v58, %v6692_v33  ;;  %v4992_v62 = vpop.f32.mrb[120].mxu0 }
 0x214   : > { %v6722_v9 = vadd.f32 %v4992_v62, %v6608_v2  ;;  %v3843_v11 = vpop.f32.mrb[121].mxu0 }
 0x215   : > { %v4912_v22 = vpop.f32.mrb[124].mxu1  ;;  %v6725_v10 = vadd.f32 %v3843_v11, %v6596_v16  ;;  %v3944_v21 = vadd.f32 %v3943_v19, %v6701_v32  ;;  %v4993_v26 = vpop.f32.mrb[122].mxu0 }
 0x216   : > { %v4913_v7 = vpop.f32.mrb[125].mxu1  ;;  %4087 = vst [vmem:[%s6660_s28 + $0x50] sm:$0xff] %v6722_v9  ;;  %v6731_v6 = vadd.f32 %v4993_v26, %v6614_v36  ;;  %v3846_v0 = vpop.f32.mrb[123].mxu0 }
 0x217   : > { %v4914_v56 = vadd.f32 %v4913_v7, %v4912_v22  ;;  %v4915_v14 = vpop.f32.mrb[126].mxu1  ;;  %v3945_v57 = vadd.f32 %v3944_v21, %v6725_v10  ;;  %4085 = vst [vmem:[%s6660_s28 + $0x40] sm:$0xff] %v6725_v10  ;;  %v6738_v16 = vadd.f32 %v3846_v0, %v6602_v34 }
 0x218   : > { %v4916_v20 = vpop.f32.mrb[127].mxu1  ;;  %4088 = vst [vmem:[%s6660_s28 + $0x58] sm:$0xff] %v6731_v6 }
 0x219   : > { %v4917_v2 = vadd.f32 %v4916_v20, %v4915_v14  ;;  %v3739_v35 = vadd.f32 %v4914_v56, %v6599_v1  ;;  %v3946_v36 = vadd.f32 %v3945_v57, %v6738_v16  ;;  %4086 = vst [vmem:[%s6660_s28 + $0x48] sm:$0xff] %v6738_v16 }
 0x21b   : > { %v6743_v39 = vadd.f32 %v4917_v2, %v6605_v8  ;;  %v3947_v1 = vadd.f32 %v3946_v36, %v6722_v9  ;;  %v4996_v24 = vpop.f32.mrb[124].mxu0 }
 0x21c   : > { %v6750_v55 = vadd.f32 %v4996_v24, %v6632_v29  ;;  %v3859_v34 = vpop.f32.mrb[125].mxu0 }
 0x21d   : > { %v4918_v53 = vpop.f32.mrb[128].mxu1  ;;  %v6753_v8 = vadd.f32 %v3859_v34, %v6620_v48  ;;  %v3948_v37 = vadd.f32 %v3947_v1, %v6731_v6  ;;  %v4997_v31 = vpop.f32.mrb[126].mxu0 }
 0x21e   : > { %v4919_v46 = vpop.f32.mrb[129].mxu1  ;;  %4091 = vst [vmem:[%s6660_s28 + $0x70] sm:$0xff] %v6750_v55  ;;  %v6759_v25 = vadd.f32 %v4997_v31, %v6638_v47  ;;  %v3862_v5 = vpop.f32.mrb[127].mxu0 }
 0x21f   : > { %v4920_v18 = vadd.f32 %v4919_v46, %v4918_v53  ;;  %v4921_v50 = vpop.f32.mrb[130].mxu1  ;;  %v3949_v54 = vadd.f32 %v3948_v37, %v6753_v8  ;;  %4089 = vst [vmem:[%s6660_s28 + $0x60] sm:$0xff] %v6753_v8  ;;  %v6768_v48 = vadd.f32 %v3862_v5, %v6626_v38 }
 0x220   : > { %v4922_v43 = vpop.f32.mrb[131].mxu1  ;;  %4092 = vst [vmem:[%s6660_s28 + $0x78] sm:$0xff] %v6759_v25 }
 0x221   : > { %v4923_v29 = vadd.f32 %v4922_v43, %v4921_v50  ;;  %v6762_v17 = vadd.f32 %v4920_v18, %v6611_v49  ;;  %v3950_v47 = vadd.f32 %v3949_v54, %v6768_v48  ;;  %4090 = vst [vmem:[%s6660_s28 + $0x68] sm:$0xff] %v6768_v48 }
 0x223   : > { %v6773_v4 = vadd.f32 %v4923_v29, %v6617_v27  ;;  %v3951_v49 = vadd.f32 %v3950_v47, %v6750_v55  ;;  %v5000_v22 = vpop.f32.mrb[128].mxu0 }
 0x224   : > { %v6780_v62 = vadd.f32 %v5000_v22, %v6674_v12  ;;  %v3875_v38 = vpop.f32.mrb[129].mxu0 }
 0x225   : > { %v4924_v58 = vpop.f32.mrb[132].mxu1  ;;  %v6783_v27 = vadd.f32 %v3875_v38, %v6644_v59  ;;  %v3952_v56 = vadd.f32 %v3951_v49, %v6759_v25  ;;  %v5001_v14 = vpop.f32.mrb[130].mxu0 }
 0x226   : > { %v4925_v19 = vpop.f32.mrb[133].mxu1  ;;  %4095 = vst [vmem:[%s6660_s28 + $0x90] sm:$0xff] %v6780_v62  ;;  %v6789_v26 = vadd.f32 %v5001_v14, %v6684_v52  ;;  %v3878_v20 = vpop.f32.mrb[131].mxu0 }
 0x227   : > { %v4926_v7 = vadd.f32 %v4925_v19, %v4924_v58  ;;  %v4927_v11 = vpop.f32.mrb[134].mxu1  ;;  %v3953_v2 = vadd.f32 %v3952_v56, %v6783_v27  ;;  %4093 = vst [vmem:[%s6660_s28 + $0x80] sm:$0xff] %v6783_v27  ;;  %v6796_v59 = vadd.f32 %v3878_v20, %v6650_v41 }
 0x228   : > { %v4928_v21 = vpop.f32.mrb[135].mxu1  ;;  %4096 = vst [vmem:[%s6660_s28 + $0x98] sm:$0xff] %v6789_v26 }
 0x229   : > { %v4929_v12 = vadd.f32 %v4928_v21, %v4927_v11  ;;  %v3755_v0 = vadd.f32 %v4926_v7, %v6623_v61  ;;  %v3954_v36 = vadd.f32 %v3953_v2, %v6796_v59  ;;  %4094 = vst [vmem:[%s6660_s28 + $0x88] sm:$0xff] %v6796_v59 }
 0x22b   : > { %v3758_v57 = vadd.f32 %v4929_v12, %v6629_v63  ;;  %v3955_v53 = vadd.f32 %v3954_v36, %v6780_v62  ;;  %v5004_v61 = vpop.f32.mrb[132].mxu0 }
 0x22c   : > { %v6805_v24 = vadd.f32 %v5004_v61, %v3739_v35  ;;  %v3891_v41 = vpop.f32.mrb[133].mxu0 }
 0x22d   : > { %v4930_v52 = vpop.f32.mrb[136].mxu1  ;;  %v6808_v18 = vadd.f32 %v3891_v41, %v6704_v45  ;;  %v3956_v63 = vadd.f32 %v3955_v53, %v6789_v26  ;;  %v5005_v50 = vpop.f32.mrb[134].mxu0 }
 0x22e   : > { %v4931_v1 = vpop.f32.mrb[137].mxu1  ;;  %4099 = vst [vmem:[%s6660_s28 + $0xb0] sm:$0xff] %v6805_v24  ;;  %v6814_v31 = vadd.f32 %v5005_v50, %v6743_v39  ;;  %v3894_v43 = vpop.f32.mrb[135].mxu0 }
 0x22f   : > { %v4932_v46 = vadd.f32 %v4931_v1, %v4930_v52  ;;  %v4933_v34 = vpop.f32.mrb[138].mxu1  ;;  %v3957_v29 = vadd.f32 %v3956_v63, %v6808_v18  ;;  %4097 = vst [vmem:[%s6660_s28 + $0xa0] sm:$0xff] %v6808_v18  ;;  %v6821_v45 = vadd.f32 %v3894_v43, %v6715_v15 }
 0x230   : > { %v4934_v37 = vpop.f32.mrb[139].mxu1  ;;  %4100 = vst [vmem:[%s6660_s28 + $0xb8] sm:$0xff] %v6814_v31 }
 0x231   : > { %v4935_v35 = vadd.f32 %v4934_v37, %v4933_v34  ;;  %v3763_v5 = vadd.f32 %v4932_v46, %v6635_v13  ;;  %v3958_v47 = vadd.f32 %v3957_v29, %v6821_v45  ;;  %4098 = vst [vmem:[%s6660_s28 + $0xa8] sm:$0xff] %v6821_v45 }
 0x233   : > { %v3766_v54 = vadd.f32 %v4935_v35, %v6641_v23  ;;  %v3959_v58 = vadd.f32 %v3958_v47, %v6805_v24  ;;  %v5008_v13 = vpop.f32.mrb[136].mxu0 }
 0x234   : > { %v6830_v22 = vadd.f32 %v5008_v13, %v3755_v0  ;;  %v3907_v15 = vpop.f32.mrb[137].mxu0 }
 0x235   : > { %v4936_v39 = vpop.f32.mrb[140].mxu1  ;;  %v6833_v7 = vadd.f32 %v3907_v15, %v6762_v17  ;;  %v3960_v23 = vadd.f32 %v3959_v58, %v6814_v31  ;;  %v5009_v11 = vpop.f32.mrb[138].mxu0 }
 0x236   : > { %v4937_v49 = vpop.f32.mrb[141].mxu1  ;;  %4103 = vst [vmem:[%s6660_s28 + $0xd0] sm:$0xff] %v6830_v22  ;;  %v6838_v14 = vadd.f32 %v5009_v11, %v3758_v57  ;;  %v3910_v21 = vpop.f32.mrb[139].mxu0 }
 0x237   : > { %v4938_v19 = vadd.f32 %v4937_v49, %v4936_v39  ;;  %v4939_v38 = vpop.f32.mrb[142].mxu1  ;;  %v3961_v0 = vadd.f32 %v3960_v23, %v6833_v7  ;;  %4101 = vst [vmem:[%s6660_s28 + $0xc0] sm:$0xff] %v6833_v7  ;;  %v6845_v17 = vadd.f32 %v3910_v21, %v6773_v4 }
 0x238   : > { %v4940_v56 = vpop.f32.mrb[143].mxu1  ;;  %4104 = vst [vmem:[%s6660_s28 + $0xd8] sm:$0xff] %v6838_v14 }
 0x239   : > { %v3771_v20 = vadd.f32 %v4938_v19, %v6647_v51  ;;  %v4941_v12 = vadd.f32 %v4940_v56, %v4939_v38  ;;  %v3962_v57 = vadd.f32 %v3961_v0, %v6845_v17  ;;  %4102 = vst [vmem:[%s6660_s28 + $0xc8] sm:$0xff] %v6845_v17 }
 0x23b   : > { %v3774_v2 = vadd.f32 %v4941_v12, %v6653_v40  ;;  %v3963_v51 = vadd.f32 %v3962_v57, %v6830_v22  ;;  %v5012_v36 = vpop.f32.mrb[140].mxu0 }
 0x23c   : > { %v3923_v52 = vpop.f32.mrb[141].mxu0  ;;  %v6854_v53 = vadd.f32 %v5012_v36, %v3771_v20 }
 0x23d   : > { %v6856_v61 = vadd.f32 %v3923_v52, %v3763_v5  ;;  %v3964_v4 = vadd.f32 %v3963_v51, %v6838_v14  ;;  %v5013_v1 = vpop.f32.mrb[142].mxu0 }
 0x23e   : > { %v3926_v41 = vpop.f32.mrb[143].mxu0  ;;  %4107 = vst [vmem:[%s6660_s28 + $0xf0] sm:$0xff] %v6854_v53  ;;  %v6861_v40 = vadd.f32 %v5013_v1, %v3774_v2 }
 0x23f   : > { %v3965_v46 = vadd.f32 %v3964_v4, %v6856_v61  ;;  %4105 = vst [vmem:[%s6660_s28 + $0xe0] sm:$0xff] %v6856_v61  ;;  %v6866_v34 = vadd.f32 %v3926_v41, %v3766_v54 }
 0x240   : > { %4108 = vst [vmem:[%s6660_s28 + $0xf8] sm:$0xff] %v6861_v40 }
 0x241   : > { %v3966_v63 = vadd.f32 %v3965_v46, %v6866_v34  ;;  %4106 = vst [vmem:[%s6660_s28 + $0xe8] sm:$0xff] %v6866_v34 }
 0x243   : > { %v3967_v50 = vadd.f32 %v3966_v63, %v6854_v53 }
 0x245   : > { %v3968_v37 = vadd.f32 %v3967_v50, %v6861_v40 }
 0x247   : > { %v3969_v43 = vrot.slane %v3968_v37, 4 }
 0x249   : > { %v3970_v35 = vadd.f32 %v3969_v43, %v3968_v37 }
 0x24b   : > { %v3971_v5 = vrot.slane %v3970_v35, 2 }
 0x24d   : > { %v3972_v29 = vadd.f32 %v3971_v5, %v3970_v35 }
 0x24f   : > { %v3973_v47 = vrot.slane %v3972_v29, 1 }
 0x251   : > { %v6875_v39 = vadd.f32 %v3973_v47, %v3972_v29 }
 0x253   : > { %v6878_v54 = vmul.f32 0.00390625, %v6875_v39 }
 0x255   : > { %v3976_v58 = vsub.f32 %v6666_v42, %v6878_v54  ;;  %v3977_v13 = vsub.f32 %v6679_v60, %v6878_v54  ;;  %v3978_v49 = vsub.f32 %v6663_v44, %v6878_v54  ;;  %v3979_v38 = vsub.f32 %v6671_v28, %v6878_v54 }
 0x256   : > { %v3980_v23 = vsub.f32 %v6695_v30, %v6878_v54  ;;  %v3981_v21 = vsub.f32 %v6710_v3, %v6878_v54  ;;  %v3982_v60 = vsub.f32 %v6692_v33, %v6878_v54  ;;  %v3983_v0 = vsub.f32 %v6701_v32, %v6878_v54 }
 0x257   : > { %v4008_v15 = vmul.f32 %v3976_v58, %v3976_v58  ;;  %v4009_v19 = vmul.f32 %v3977_v13, %v3977_v13  ;;  %v4010_v11 = vmul.f32 %v3978_v49, %v3978_v49  ;;  %v4011_v42 = vmul.f32 %v3979_v38, %v3979_v38 }
 0x258   : > { %v4012_v12 = vmul.f32 %v3980_v23, %v3980_v23  ;;  %v4013_v2 = vmul.f32 %v3981_v21, %v3981_v21  ;;  %v3984_v30 = vsub.f32 %v6725_v10, %v6878_v54  ;;  %v4014_v57 = vmul.f32 %v3982_v60, %v3982_v60 }
 0x259   : > { %v4040_v56 = vadd.f32 %v4009_v19, %v4008_v15  ;;  %v3985_v3 = vsub.f32 %v6738_v16, %v6878_v54  ;;  %v4015_v36 = vmul.f32 %v3983_v0, %v3983_v0  ;;  %v3986_v33 = vsub.f32 %v6722_v9, %v6878_v54 }
 0x25a   : > { %v4016_v4 = vmul.f32 %v3984_v30, %v3984_v30  ;;  %v3987_v32 = vsub.f32 %v6731_v6, %v6878_v54  ;;  %v3988_v10 = vsub.f32 %v6753_v8, %v6878_v54  ;;  %v3989_v16 = vsub.f32 %v6768_v48, %v6878_v54 }
 0x25b   : > { %v4041_v20 = vadd.f32 %v4040_v56, %v4010_v11  ;;  %v4017_v41 = vmul.f32 %v3985_v3, %v3985_v3  ;;  %v4018_v63 = vmul.f32 %v3986_v33, %v3986_v33  ;;  %v3990_v9 = vsub.f32 %v6750_v55, %v6878_v54 }
 0x25c   : > { %v4019_v37 = vmul.f32 %v3987_v32, %v3987_v32  ;;  %v4020_v35 = vmul.f32 %v3988_v10, %v3988_v10  ;;  %v3991_v6 = vsub.f32 %v6759_v25, %v6878_v54  ;;  %v4021_v29 = vmul.f32 %v3989_v16, %v3989_v16 }
 0x25d   : > { %v4042_v44 = vadd.f32 %v4041_v20, %v4011_v42  ;;  %v3992_v8 = vsub.f32 %v6783_v27, %v6878_v54  ;;  %v4022_v58 = vmul.f32 %v3990_v9, %v3990_v9  ;;  %v3993_v48 = vsub.f32 %v6796_v59, %v6878_v54 }
 0x25e   : > { %v4023_v49 = vmul.f32 %v3991_v6, %v3991_v6  ;;  %v3994_v55 = vsub.f32 %v6780_v62, %v6878_v54  ;;  %v3995_v25 = vsub.f32 %v6789_v26, %v6878_v54  ;;  %v3996_v27 = vsub.f32 %v6808_v18, %v6878_v54 }
 0x25f   : > { %v4043_v28 = vadd.f32 %v4042_v44, %v4012_v12  ;;  %v4024_v19 = vmul.f32 %v3992_v8, %v3992_v8  ;;  %v4025_v23 = vmul.f32 %v3993_v48, %v3993_v48  ;;  %v3997_v59 = vsub.f32 %v6821_v45, %v6878_v54 }
 0x260   : > { %v4026_v56 = vmul.f32 %v3994_v55, %v3994_v55  ;;  %v4027_v42 = vmul.f32 %v3995_v25, %v3995_v25  ;;  %v3998_v62 = vsub.f32 %v6805_v24, %v6878_v54  ;;  %v4028_v60 = vmul.f32 %v3996_v27, %v3996_v27 }
 0x261   : > { %v4044_v51 = vadd.f32 %v4043_v28, %v4013_v2  ;;  %v3999_v26 = vsub.f32 %v6814_v31, %v6878_v54  ;;  %v4029_v44 = vmul.f32 %v3997_v59, %v3997_v59  ;;  %v4000_v18 = vsub.f32 %v6833_v7, %v6878_v54 }
 0x262   : > { %v4030_v2 = vmul.f32 %v3998_v62, %v3998_v62  ;;  %v4001_v45 = vsub.f32 %v6845_v17, %v6878_v54  ;;  %v4002_v24 = vsub.f32 %v6830_v22, %v6878_v54  ;;  %v4003_v31 = vsub.f32 %v6838_v14, %v6878_v54 }
 0x263   : > { %v4045_v52 = vadd.f32 %v4044_v51, %v4014_v57  ;;  %v4031_v30 = vmul.f32 %v3999_v26, %v3999_v26  ;;  %v4032_v51 = vmul.f32 %v4000_v18, %v4000_v18  ;;  %v4004_v7 = vsub.f32 %v6856_v61, %v6878_v54 }
 0x264   : > { %v4034_v33 = vmul.f32 %v4002_v24, %v4002_v24  ;;  %v4005_v17 = vsub.f32 %v6866_v34, %v6878_v54  ;;  %v4006_v22 = vsub.f32 %v6854_v53, %v6878_v54  ;;  %v4007_v14 = vsub.f32 %v6861_v40, %v6878_v54 }
 0x265   : > { %v4046_v1 = vadd.f32 %v4045_v52, %v4015_v36  ;;  %v4033_v36 = vmul.f32 %v4001_v45, %v4001_v45 }
 0x266   : > { %v4037_v10 = vmul.f32 %v4005_v17, %v4005_v17  ;;  %v4039_v16 = vmul.f32 %v4007_v14, %v4007_v14 }
 0x267   : > { %v4047_v46 = vadd.f32 %v4046_v1, %v4016_v4  ;;  %v4035_v1 = vmul.f32 %v4003_v31, %v4003_v31 }
 0x269   : > { %v4048_v50 = vadd.f32 %v4047_v46, %v4017_v41  ;;  %v4036_v41 = vmul.f32 %v4004_v7, %v4004_v7 }
 0x26b   : > { %v4049_v43 = vadd.f32 %v4048_v50, %v4018_v63  ;;  %v4038_v50 = vmul.f32 %v4006_v22, %v4006_v22 }
 0x26d   : > { %v4050_v5 = vadd.f32 %v4049_v43, %v4019_v37 }
 0x26f   : > { %v4051_v47 = vadd.f32 %v4050_v5, %v4020_v35 }
 0x271   : > { %v4052_v13 = vadd.f32 %v4051_v47, %v4021_v29 }
 0x273   : > { %v4053_v15 = vadd.f32 %v4052_v13, %v4022_v58 }
 0x275   : > { %v4054_v38 = vadd.f32 %v4053_v15, %v4023_v49 }
 0x277   : > { %v4055_v11 = vadd.f32 %v4054_v38, %v4024_v19 }
 0x279   : > { %v4056_v21 = vadd.f32 %v4055_v11, %v4025_v23 }
 0x27b   : > { %v4057_v20 = vadd.f32 %v4056_v21, %v4026_v56 }
 0x27d   : > { %v4058_v12 = vadd.f32 %v4057_v20, %v4027_v42 }
 0x27f   : > { %v4059_v0 = vadd.f32 %v4058_v12, %v4028_v60 }
 0x281   : > { %v4060_v28 = vadd.f32 %v4059_v0, %v4029_v44 }
 0x283   : > { %v4061_v57 = vadd.f32 %v4060_v28, %v4030_v2 }
 0x285   : > { %v4062_v3 = vadd.f32 %v4061_v57, %v4031_v30 }
 0x287   : > { %v4063_v52 = vadd.f32 %v4062_v3, %v4032_v51 }
 0x289   : > { %v4064_v4 = vadd.f32 %v4063_v52, %v4033_v36 }
 0x28b   : > { %v4065_v32 = vadd.f32 %v4064_v4, %v4034_v33 }
 0x28d   : > { %v4066_v46 = vadd.f32 %v4065_v32, %v4035_v1 }
 0x28f   : > { %v4067_v63 = vadd.f32 %v4066_v46, %v4036_v41 }
 0x291   : > { %v4068_v61 = vadd.f32 %v4067_v63, %v4037_v10 }
 0x293   : > { %v4069_v37 = vadd.f32 %v4068_v61, %v4038_v50 }
 0x295   : > { %v4070_v43 = vadd.f32 %v4069_v37, %v4039_v16 }
 0x297   : > { %v4071_v9 = vrot.slane %v4070_v43, 4 }
 0x299   : > { %v4072_v34 = vadd.f32 %v4071_v9, %v4070_v43 }
 0x29b   : > { %v4073_v35 = vrot.slane %v4072_v34, 2 }
 0x29d   : > { %v4074_v5 = vadd.f32 %v4073_v35, %v4072_v34 }
 0x29f   : > { %v4075_v6 = vrot.slane %v4074_v5, 1 }
 0x2a1   : > { %v4076_v53 = vadd.f32 %v4075_v6, %v4074_v5 }
 0x2a3   : > { %v4110_v40 = vsel %vm860_vm2, %v6875_v39, %v4076_v53 }
 0x2a4   : > { %4111 = vst [vmem:[%s235_s6] sm:$0x3] %v4110_v40 }
 0x2a5 PF: > { %s16_s18 = sadd.s32 1, %s5271_s18  }
 0x2a6   : > { %p13_p4 = scmp.ge.s32.totalorder %s16_s18, 4  }
 0x2a8   :  { %15 = sbr.rel (!%p13_p4) target bundleno = 1 (0x1), region = 80 }

</bundles_post_ra>
